<compile_context>
chip_gen: v7x
topology: tpu7x:2x2x1
jax: 0.10.0
libtpu: 0.0.40
codegen_flags: <defaults>
</compile_context>

<pallas_src>
import functools
import math

import jax
import jax.numpy as jnp
from jax.experimental import pallas as pl
from jax.experimental.pallas import tpu as pltpu


def _vmem_limit_bytes():
    # Generation-aware scoped-VMEM budget: ~3/4 of physical, capped at 96 MiB.
    try:
        cap = pltpu.get_tpu_info().vmem_capacity_bytes
        return int(min(cap * 3 // 4, 96 * 1024 * 1024))
    except Exception:
        return 48 * 1024 * 1024


VMEM_LIMIT = _vmem_limit_bytes()


def _round_up(x, m):
    return ((x + m - 1) // m) * m


def _pick_tile(dim, target, align):
    """Largest tile <= target (halving) that divides `dim` and is `align`-aligned.
    Falls back to the full dimension (always a legal block shape); with the token
    axis padded to a multiple of 128 this fallback only triggers for small dims."""
    t = target
    while t >= align:
        if dim % t == 0 and t % align == 0:
            return t
        t //= 2
    return dim


# ------------- fused LayerNorm + Linear (+bias) (+QuickGELU) kernel -------------
# grid = (M//tm, N//tn); the inner N axis is "arbitrary" so the LayerNorm'd x tile
# computed at j==0 into a (tm, K) bf16 scratch can be reused for every N tile.

def _ln_linear_kernel(x_ref, g_ref, b_ref, w_ref, *rest, activation, has_bias):
    if has_bias:
        bias_ref, o_ref, xn_ref = rest
    else:
        o_ref, xn_ref = rest
        bias_ref = None

    @pl.when(pl.program_id(1) == 0)
    def _():
        x = x_ref[...].astype(jnp.float32)
        mu = jnp.mean(x, axis=-1, keepdims=True)
        var = jnp.mean(jnp.square(x - mu), axis=-1, keepdims=True)
        h = (x - mu) * jax.lax.rsqrt(var + 1e-5)            # torch LayerNorm eps
        h = h * g_ref[...] + b_ref[...]
        xn_ref[...] = h.astype(xn_ref.dtype)                # bf16 MXU operand, cached

    y = jnp.dot(xn_ref[...], w_ref[...], preferred_element_type=jnp.float32)
    if has_bias:
        y = y + bias_ref[...]
    if activation == "quick_gelu":
        y = y * jax.nn.sigmoid(1.702 * y)
    o_ref[...] = y.astype(o_ref.dtype)


def ln_linear(x, g, b, w, bias=None, activation=None, out_dtype=jnp.float32,
              tm=256, tn=512):
    """y = act(LayerNorm(x) @ w + bias).  x:(M,K) f32, w:(K,N) bf16."""
    M, K = x.shape
    N = w.shape[1]
    tm = _pick_tile(M, tm, 128)
    tn = _pick_tile(N, tn, 128)
    in_specs = [
        pl.BlockSpec((tm, K), lambda i, j: (i, 0)),
        pl.BlockSpec((1, K), lambda i, j: (0, 0)),
        pl.BlockSpec((1, K), lambda i, j: (0, 0)),
        pl.BlockSpec((K, tn), lambda i, j: (0, j)),
    ]
    args = [x, g.reshape(1, K), b.reshape(1, K), w]
    if bias is not None:
        in_specs.append(pl.BlockSpec((1, tn), lambda i, j: (0, j)))
        args.append(bias.reshape(1, N))
    kern = functools.partial(_ln_linear_kernel, activation=activation,
                             has_bias=bias is not None)
    return pl.pallas_call(
        kern,
        grid=(M // tm, N // tn),
        in_specs=in_specs,
        out_specs=pl.BlockSpec((tm, tn), lambda i, j: (i, j)),
        out_shape=jax.ShapeDtypeStruct((M, N), out_dtype),
        scratch_shapes=[pltpu.VMEM((tm, K), jnp.bfloat16)],
        compiler_params=pltpu.CompilerParams(
            dimension_semantics=("parallel", "arbitrary"),
            vmem_limit_bytes=VMEM_LIMIT),
    )(*args)


# --------- tiled Linear (+bias) (+residual) with K-axis accumulation ---------

def _linear_kernel(x_ref, w_ref, *rest, activation, has_bias, has_residual):
    o_ref, acc_ref = rest[-2], rest[-1]
    opt = rest[:-2]
    pos = 0
    bias_ref = res_ref = None
    if has_bias:
        bias_ref = opt[pos]; pos += 1
    if has_residual:
        res_ref = opt[pos]; pos += 1

    k = pl.program_id(2)

    @pl.when(k == 0)
    def _():
        acc_ref[...] = jnp.zeros_like(acc_ref)

    acc_ref[...] += jnp.dot(x_ref[...].astype(w_ref.dtype), w_ref[...],
                            preferred_element_type=jnp.float32)

    @pl.when(k == pl.num_programs(2) - 1)
    def _():
        y = acc_ref[...]
        if has_bias:
            y = y + bias_ref[...]
        if activation == "quick_gelu":
            y = y * jax.nn.sigmoid(1.702 * y)
        if has_residual:
            y = y + res_ref[...].astype(jnp.float32)
        o_ref[...] = y.astype(o_ref.dtype)


def linear(x, w, bias=None, residual=None, activation=None, out_dtype=jnp.float32,
           tm=256, tn=512, tk=512):
    """y = act(x @ w + bias) [+ residual].  x:(M,K) f32/bf16, w:(K,N) bf16."""
    M, K = x.shape
    N = w.shape[1]
    tm = _pick_tile(M, tm, 128)
    tn = _pick_tile(N, tn, 128)
    tk = _pick_tile(K, tk, 128)
    in_specs = [
        pl.BlockSpec((tm, tk), lambda i, j, k: (i, k)),
        pl.BlockSpec((tk, tn), lambda i, j, k: (k, j)),
    ]
    args = [x, w]
    if bias is not None:
        in_specs.append(pl.BlockSpec((1, tn), lambda i, j, k: (0, j)))
        args.append(bias.reshape(1, N))
    if residual is not None:
        in_specs.append(pl.BlockSpec((tm, tn), lambda i, j, k: (i, j)))
        args.append(residual)
    kern = functools.partial(_linear_kernel, activation=activation,
                             has_bias=bias is not None,
                             has_residual=residual is not None)
    return pl.pallas_call(
        kern,
        grid=(M // tm, N // tn, K // tk),
        in_specs=in_specs,
        out_specs=pl.BlockSpec((tm, tn), lambda i, j, k: (i, j)),
        out_shape=jax.ShapeDtypeStruct((M, N), out_dtype),
        scratch_shapes=[pltpu.VMEM((tm, tn), jnp.float32)],
        compiler_params=pltpu.CompilerParams(
            dimension_semantics=("parallel", "parallel", "arbitrary"),
            vmem_limit_bytes=VMEM_LIMIT),
    )(*args)


# ------------------------------ standalone LayerNorm ------------------------------

def _layernorm_kernel(x_ref, g_ref, b_ref, o_ref):
    x = x_ref[...].astype(jnp.float32)
    mu = jnp.mean(x, axis=-1, keepdims=True)
    var = jnp.mean(jnp.square(x - mu), axis=-1, keepdims=True)
    y = (x - mu) * jax.lax.rsqrt(var + 1e-5)
    o_ref[...] = (y * g_ref[...] + b_ref[...]).astype(o_ref.dtype)


def layernorm(x, g, b, tm=512):
    M, D = x.shape
    tm = _pick_tile(M, tm, 8)
    return pl.pallas_call(
        _layernorm_kernel,
        grid=(M // tm,),
        in_specs=[pl.BlockSpec((tm, D), lambda i: (i, 0)),
                  pl.BlockSpec((1, D), lambda i: (0, 0)),
                  pl.BlockSpec((1, D), lambda i: (0, 0))],
        out_specs=pl.BlockSpec((tm, D), lambda i: (i, 0)),
        out_shape=jax.ShapeDtypeStruct((M, D), jnp.float32),
        compiler_params=pltpu.CompilerParams(
            dimension_semantics=("parallel",),
            vmem_limit_bytes=VMEM_LIMIT),
    )(x, g.reshape(1, D), b.reshape(1, D))


# ------------------------- multi-head attention kernel -------------------------
# Lane-dense I/O: qkv slab (B, Lp, 3D) bf16 in, (B, Lp, D) bf16 out. Heads are
# static lane slices inside the kernel; padded keys (>= l_real) are masked.
# grid = (B, n_q_tiles): K/V block index is constant per batch (no re-DMA across
# q tiles), scores live as (tq, Lp) per head.

def _attn_kernel(q_ref, kv_ref, o_ref, *, n_head, scale, l_real):
    lk = kv_ref.shape[1]
    d = o_ref.shape[2]
    dh = d // n_head
    q_all = q_ref[0]                      # (tq, 3D) bf16
    kv_all = kv_ref[0]                    # (Lp, 3D) bf16
    kmask = None
    if l_real < lk:
        kmask = jax.lax.broadcasted_iota(jnp.int32, (1, lk), 1) < l_real

    outs = []
    # TODO(synk): when dh is a multiple of 128, the head loop could instead be a
    # (B, H) grid with per-head lane blocks for extra megacore parallelism.
    for h in range(n_head):
        q = q_all[:, h * dh:(h + 1) * dh]
        k = kv_all[:, d + h * dh:d + (h + 1) * dh]
        v = kv_all[:, 2 * d + h * dh:2 * d + (h + 1) * dh]
        s = jax.lax.dot_general(q, k, (((1,), (1,)), ((), ())),
                                preferred_element_type=jnp.float32) * scale
        if kmask is not None:
            s = jnp.where(kmask, s, -1e30)
        m = jnp.max(s, axis=-1, keepdims=True)
        p = jnp.exp(s - m)
        p = p * pl.reciprocal(jnp.sum(p, axis=-1, keepdims=True), approx=True)
        outs.append(jnp.dot(p.astype(v.dtype), v, preferred_element_type=jnp.float32))
    o_ref[...] = jnp.concatenate(outs, axis=-1)[None].astype(o_ref.dtype)


def attention(qkv, n_head, scale, l_real, out_dtype=jnp.bfloat16, tq=256):
    """qkv: (B, Lp, 3D) bf16 slab [q|k|v].  Returns (B, Lp, D) in out_dtype."""
    B, Lp, threeD = qkv.shape
    D = threeD // 3
    tq = _pick_tile(Lp, tq, 128)
    kern = functools.partial(_attn_kernel, n_head=n_head, scale=scale, l_real=l_real)
    return pl.pallas_call(
        kern,
        grid=(B, Lp // tq),
        in_specs=[pl.BlockSpec((1, tq, threeD), lambda b, qi: (b, qi, 0)),
                  pl.BlockSpec((1, Lp, threeD), lambda b, qi: (b, 0, 0))],
        out_specs=pl.BlockSpec((1, tq, D), lambda b, qi: (b, qi, 0)),
        out_shape=jax.ShapeDtypeStruct((B, Lp, D), out_dtype),
        compiler_params=pltpu.CompilerParams(
            dimension_semantics=("parallel", "parallel"),
            vmem_limit_bytes=VMEM_LIMIT),
    )(qkv, qkv)


# ----------------------------------- model glue -----------------------------------

def residual_block(x2d, prm, B, Lp, L_real, n_head):
    """x2d: (B*Lp, D) f32 residual stream."""
    D = x2d.shape[-1]
    dh = D // n_head

    # ln_1 fused into the qkv in_proj; qkv stored bf16 for the attention kernel
    qkv = ln_linear(x2d, prm["ln1_g"], prm["ln1_b"],
                    prm["in_proj_w"], prm["in_proj_b"],
                    out_dtype=jnp.bfloat16)                        # (B*Lp, 3D)
    qkv = qkv.reshape(B, Lp, 3 * D)                                # free reshape

    o = attention(qkv, n_head, 1.0 / math.sqrt(dh), L_real)        # (B, Lp, D) bf16
    o = o.reshape(B * Lp, D)

    # out_proj + residual add fused; residual stream stays f32
    x2d = linear(o, prm["out_proj_w"], prm["out_proj_b"], residual=x2d)

    # ln_2 fused into c_fc + QuickGELU; MLP hidden stored bf16
    h = ln_linear(x2d, prm["ln2_g"], prm["ln2_b"],
                  prm["c_fc_w"], prm["c_fc_b"], activation="quick_gelu",
                  out_dtype=jnp.bfloat16)
    # c_proj + residual add fused
    x2d = linear(h, prm["c_proj_w"], prm["c_proj_b"], residual=x2d)
    return x2d


def vision_transformer_forward(params, image, cfg):
    B = image.shape[0]
    p = cfg["patch_size"]
    W = cfg["width"]
    H = cfg["heads"]
    g = cfg["input_resolution"] // p
    n_patch = g * g

    # conv1 (kernel=stride=patch, no bias) == per-patch linear, (c, kh, kw) flatten order
    patches = (image.reshape(B, 3, g, p, g, p)
                    .transpose(0, 2, 4, 1, 3, 5)
                    .reshape(B * n_patch, 3 * p * p))
    Mp = _round_up(patches.shape[0], 128)
    if Mp != patches.shape[0]:
        patches = jnp.pad(patches, ((0, Mp - patches.shape[0]), (0, 0)))
    x = linear(patches, params["conv1_w"])[:B * n_patch].reshape(B, n_patch, W)

    cls = jnp.broadcast_to(
        params["class_embedding"].astype(jnp.float32)[None, None, :], (B, 1, W))
    x = jnp.concatenate([cls, x], axis=1) + params["positional_embedding"][None]
    L = x.shape[1]                                   # g*g + 1 (e.g. 257)

    # Pad token axis to a multiple of 128 so all (B*L, ...) GEMMs tile cleanly and
    # attention gets unmasked 8x128 tiles; padded keys are masked in the kernel.
    Lp = _round_up(L, 128)
    if Lp != L:
        x = jnp.pad(x, ((0, 0), (0, Lp - L), (0, 0)))

    x2d = layernorm(x.reshape(B * Lp, W), params["ln_pre_g"], params["ln_pre_b"])

    def body(carry, blk):
        return residual_block(carry, blk, B, Lp, L, H), None

    x2d, _ = jax.lax.scan(body, x2d, params["blocks"])

    cls_tok = x2d.reshape(B, Lp, W)[:, 0, :]
    # ln_post fused with the output projection (CLIP visual proj has no bias)
    return ln_linear(cls_tok, params["ln_post_g"], params["ln_post_b"], params["proj"])


# --------------------------------- parameter init ---------------------------------

def init_params(key, cfg):
    f32, bf16 = jnp.float32, jnp.bfloat16
    W = cfg["width"]
    p = cfg["patch_size"]
    g = cfg["input_resolution"] // p
    od = cfg["output_dim"]
    nl = cfg["layers"]
    scale = W ** -0.5
    attn_std = W ** -0.5
    proj_std = (W ** -0.5) * ((2 * nl) ** -0.5)
    fc_std = (2 * W) ** -0.5
    ks = jax.random.split(key, 6)

    def block(k):
        kk = jax.random.split(k, 4)
        # weights generated directly in (in, out) layout and stored bf16
        return dict(
            ln1_g=jnp.ones((W,), f32), ln1_b=jnp.zeros((W,), f32),
            in_proj_w=(attn_std * jax.random.normal(kk[0], (W, 3 * W), f32)).astype(bf16),
            in_proj_b=jnp.zeros((3 * W,), f32),
            out_proj_w=(proj_std * jax.random.normal(kk[1], (W, W), f32)).astype(bf16),
            out_proj_b=jnp.zeros((W,), f32),
            ln2_g=jnp.ones((W,), f32), ln2_b=jnp.zeros((W,), f32),
            c_fc_w=(fc_std * jax.random.normal(kk[2], (W, 4 * W), f32)).astype(bf16),
            c_fc_b=jnp.zeros((4 * W,), f32),
            c_proj_w=(proj_std * jax.random.normal(kk[3], (4 * W, W), f32)).astype(bf16),
            c_proj_b=jnp.zeros((W,), f32),
        )

    blocks = [block(k) for k in jax.random.split(ks[0], nl)]
    blocks = jax.tree_util.tree_map(lambda *xs: jnp.stack(xs), *blocks)  # stacked for scan

    return dict(
        conv1_w=(0.02 * jax.random.normal(ks[1], (3 * p * p, W), f32)).astype(bf16),
        class_embedding=scale * jax.random.normal(ks[2], (W,), f32),
        positional_embedding=scale * jax.random.normal(ks[3], (g * g + 1, W), f32),
        ln_pre_g=jnp.ones((W,), f32), ln_pre_b=jnp.zeros((W,), f32),
        ln_post_g=jnp.ones((W,), f32), ln_post_b=jnp.zeros((W,), f32),
        proj=(scale * jax.random.normal(ks[4], (W, od), f32)).astype(bf16),
        blocks=blocks,
    )


# -------------------------------------- main --------------------------------------

if __name__ == "__main__":
    cfg = dict(
        input_resolution=16,
        patch_size=4,
        width=64,
        layers=2,
        heads=2,        # dh = 32
        output_dim=32,
    )

    key = jax.random.PRNGKey(0)
    kp, ki = jax.random.split(key)
    params = init_params(kp, cfg)
    image = jax.random.normal(
        ki, (2, 3, cfg["input_resolution"], cfg["input_resolution"]), jnp.float32)

    fwd = jax.jit(functools.partial(vision_transformer_forward, cfg=cfg))
    out = fwd(params, image)
    jax.block_until_ready(out)

    assert out.shape == (2, cfg["output_dim"])
    assert bool(jnp.all(jnp.isfinite(out)))
    print("KERNEL_OK")
</pallas_src>

<mosaic_0001>
module attributes {stable_mosaic.version = 11 : i64} {
  func.func @_layernorm_kernel(%arg0: i32, %arg1: memref<256x64xf32, #tpu.memory_space<vmem>>, %arg2: memref<1x64xf32, #tpu.memory_space<vmem>>, %arg3: memref<1x64xf32, #tpu.memory_space<vmem>>, %arg4: memref<256x64xf32, #tpu.memory_space<vmem>>) attributes {dimension_semantics = [#tpu.dimension_semantics<parallel>], iteration_bounds = array<i64: 1>, scalar_prefetch = 0 : i64, scratch_operands = 0 : i64, tpu.core_type = #tpu.core_type<tc>, window_params = [{transform_indices = @transform_0, window_bounds = array<i64: 256, 64>}, {pipeline_mode = #tpu.pipeline_mode<synchronous>, transform_indices = @transform_1, window_bounds = array<i64: 1, 64>}, {pipeline_mode = #tpu.pipeline_mode<synchronous>, transform_indices = @transform_2, window_bounds = array<i64: 1, 64>}, {transform_indices = @transform_3, window_bounds = array<i64: 256, 64>}]} {
    %c0 = arith.constant 0 : index
    %c0_0 = arith.constant 0 : index
    %0 = vector.load %arg1[%c0, %c0_0] : memref<256x64xf32, #tpu.memory_space<vmem>>, vector<256x64xf32>
    %cst = arith.constant dense<0.000000e+00> : vector<256xf32>
    %1 = vector.multi_reduction <add>, %0, %cst [1] : vector<256x64xf32> to vector<256xf32>
    %2 = vector.shape_cast %1 : vector<256xf32> to vector<256x1xf32>
    %cst_1 = arith.constant 6.400000e+01 : f32
    %3 = vector.broadcast %cst_1 : f32 to vector<256x1xf32>
    %4 = arith.divf %2, %3 : vector<256x1xf32>
    %5 = vector.broadcast %4 : vector<256x1xf32> to vector<256x64xf32>
    %6 = arith.subf %0, %5 : vector<256x64xf32>
    %7 = arith.mulf %6, %6 : vector<256x64xf32>
    %cst_2 = arith.constant dense<0.000000e+00> : vector<256xf32>
    %8 = vector.multi_reduction <add>, %7, %cst_2 [1] : vector<256x64xf32> to vector<256xf32>
    %9 = vector.shape_cast %8 : vector<256xf32> to vector<256x1xf32>
    %cst_3 = arith.constant 6.400000e+01 : f32
    %10 = vector.broadcast %cst_3 : f32 to vector<256x1xf32>
    %11 = arith.divf %9, %10 : vector<256x1xf32>
    %12 = vector.broadcast %4 : vector<256x1xf32> to vector<256x64xf32>
    %13 = arith.subf %0, %12 : vector<256x64xf32>
    %cst_4 = arith.constant 9.99999974E-6 : f32
    %14 = vector.broadcast %cst_4 : f32 to vector<256x1xf32>
    %15 = arith.addf %11, %14 : vector<256x1xf32>
    %16 = math.rsqrt %15 : vector<256x1xf32>
    %17 = vector.broadcast %16 : vector<256x1xf32> to vector<256x64xf32>
    %18 = arith.mulf %13, %17 : vector<256x64xf32>
    %c0_5 = arith.constant 0 : index
    %c0_6 = arith.constant 0 : index
    %19 = vector.load %arg2[%c0_5, %c0_6] : memref<1x64xf32, #tpu.memory_space<vmem>>, vector<1x64xf32>
    %20 = vector.broadcast %19 : vector<1x64xf32> to vector<256x64xf32>
    %21 = arith.mulf %18, %20 : vector<256x64xf32>
    %c0_7 = arith.constant 0 : index
    %c0_8 = arith.constant 0 : index
    %22 = vector.load %arg3[%c0_7, %c0_8] : memref<1x64xf32, #tpu.memory_space<vmem>>, vector<1x64xf32>
    %23 = vector.broadcast %22 : vector<1x64xf32> to vector<256x64xf32>
    %24 = arith.addf %21, %23 : vector<256x64xf32>
    %c0_9 = arith.constant 0 : index
    %c0_10 = arith.constant 0 : index
    %25 = vector.load %arg4[%c0_9, %c0_10] : memref<256x64xf32, #tpu.memory_space<vmem>>, vector<256x64xf32>
    tpu.vector_store %arg4[%c0_9, %c0_10], %24 {strides = array<i32>} : memref<256x64xf32, #tpu.memory_space<vmem>>, vector<256x64xf32>,
    return
  }
  func.func @transform_0(%arg0: i32) -> (i32, i32) {
    %c0_i32 = arith.constant 0 : i32
    %c0_i32_0 = arith.constant 0 : i32
    return %arg0, %c0_i32 : i32, i32
  }
  func.func @transform_1(%arg0: i32) -> (i32, i32) {
    %c0_i32 = arith.constant 0 : i32
    %c0_i32_0 = arith.constant 0 : i32
    %c0_i32_1 = arith.constant 0 : i32
    return %c0_i32, %c0_i32_0 : i32, i32
  }
  func.func @transform_2(%arg0: i32) -> (i32, i32) {
    %c0_i32 = arith.constant 0 : i32
    %c0_i32_0 = arith.constant 0 : i32
    %c0_i32_1 = arith.constant 0 : i32
    return %c0_i32, %c0_i32_0 : i32, i32
  }
  func.func @transform_3(%arg0: i32) -> (i32, i32) {
    %c0_i32 = arith.constant 0 : i32
    %c0_i32_0 = arith.constant 0 : i32
    return %arg0, %c0_i32 : i32, i32
  }
}

module attributes {stable_mosaic.version = 11 : i64} {
  func.func @_linear_kernel(%arg0: i32, %arg1: i32, %arg2: i32, %arg3: memref<128x48xf32, #tpu.memory_space<vmem>>, %arg4: memref<48x64xbf16, #tpu.memory_space<vmem>>, %arg5: memref<128x64xf32, #tpu.memory_space<vmem>>, %arg6: memref<128x64xf32, #tpu.memory_space<vmem>>) attributes {dimension_semantics = [#tpu.dimension_semantics<parallel>, #tpu.dimension_semantics<parallel>, #tpu.dimension_semantics<arbitrary>], iteration_bounds = array<i64: 1, 1, 1>, scalar_prefetch = 0 : i64, scratch_operands = 1 : i64, tpu.core_type = #tpu.core_type<tc>, window_params = [{transform_indices = @transform_0, window_bounds = array<i64: 128, 48>}, {transform_indices = @transform_1, window_bounds = array<i64: 48, 64>}, {transform_indices = @transform_2, window_bounds = array<i64: 128, 64>}]} {
    %c0_i32 = arith.constant 0 : i32
    %0 = arith.cmpi eq, %arg2, %c0_i32 : i32
    %1 = arith.extui %0 : i1 to i32
    %c0_i32_0 = arith.constant 0 : i32
    %2 = arith.cmpi ne, %1, %c0_i32_0 : i32
    scf.if %2 {
      %cst_10 = arith.constant 0.000000e+00 : f32
      %13 = vector.broadcast %cst_10 : f32 to vector<128x64xf32>
      %c0_11 = arith.constant 0 : index
      %c0_12 = arith.constant 0 : index
      %14 = vector.load %arg6[%c0_11, %c0_12] : memref<128x64xf32, #tpu.memory_space<vmem>>, vector<128x64xf32>
      tpu.vector_store %arg6[%c0_11, %c0_12], %13 {strides = array<i32>} : memref<128x64xf32, #tpu.memory_space<vmem>>, vector<128x64xf32>,
    } else {
    }
    %c0 = arith.constant 0 : index
    %c0_1 = arith.constant 0 : index
    %3 = vector.load %arg6[%c0, %c0_1] : memref<128x64xf32, #tpu.memory_space<vmem>>, vector<128x64xf32>
    %c0_2 = arith.constant 0 : index
    %c0_3 = arith.constant 0 : index
    %4 = vector.load %arg3[%c0_2, %c0_3] : memref<128x48xf32, #tpu.memory_space<vmem>>, vector<128x48xf32>
    %5 = arith.truncf %4 : vector<128x48xf32> to vector<128x48xbf16>
    %c0_4 = arith.constant 0 : index
    %c0_5 = arith.constant 0 : index
    %6 = vector.load %arg4[%c0_4, %c0_5] : memref<48x64xbf16, #tpu.memory_space<vmem>>, vector<48x64xbf16>
    %cst = arith.constant dense<0.000000e+00> : vector<128x64xf32>
    %7 = tpu.matmul %5, %6, %cst {dimension_numbers = #tpu.dot_dimension_numbers<[1], [0], [0], [1], [0, 0, 1, 1], [], []>} : vector<128x48xbf16>, vector<48x64xbf16>, vector<128x64xf32> -> vector<128x64xf32>
    %8 = arith.addf %3, %7 : vector<128x64xf32>
    %c0_6 = arith.constant 0 : index
    %c0_7 = arith.constant 0 : index
    %9 = vector.load %arg6[%c0_6, %c0_7] : memref<128x64xf32, #tpu.memory_space<vmem>>, vector<128x64xf32>
    tpu.vector_store %arg6[%c0_6, %c0_7], %8 {strides = array<i32>} : memref<128x64xf32, #tpu.memory_space<vmem>>, vector<128x64xf32>,
    %c0_i32_8 = arith.constant 0 : i32
    %10 = arith.cmpi eq, %arg2, %c0_i32_8 : i32
    %11 = arith.extui %10 : i1 to i32
    %c0_i32_9 = arith.constant 0 : i32
    %12 = arith.cmpi ne, %11, %c0_i32_9 : i32
    scf.if %12 {
      %c0_10 = arith.constant 0 : index
      %c0_11 = arith.constant 0 : index
      %13 = vector.load %arg6[%c0_10, %c0_11] : memref<128x64xf32, #tpu.memory_space<vmem>>, vector<128x64xf32>
      %c0_12 = arith.constant 0 : index
      %c0_13 = arith.constant 0 : index
      %14 = vector.load %arg5[%c0_12, %c0_13] : memref<128x64xf32, #tpu.memory_space<vmem>>, vector<128x64xf32>
      tpu.vector_store %arg5[%c0_12, %c0_13], %13 {strides = array<i32>} : memref<128x64xf32, #tpu.memory_space<vmem>>, vector<128x64xf32>,
    } else {
    }
    return
  }
  func.func @transform_0(%arg0: i32, %arg1: i32, %arg2: i32) -> (i32, i32) {
    %c0_i32 = arith.constant 0 : i32
    return %arg0, %arg2 : i32, i32
  }
  func.func @transform_1(%arg0: i32, %arg1: i32, %arg2: i32) -> (i32, i32) {
    %c0_i32 = arith.constant 0 : i32
    return %arg2, %arg1 : i32, i32
  }
  func.func @transform_2(%arg0: i32, %arg1: i32, %arg2: i32) -> (i32, i32) {
    %c0_i32 = arith.constant 0 : i32
    return %arg0, %arg1 : i32, i32
  }
}

module attributes {stable_mosaic.version = 11 : i64} {
  func.func @_ln_linear_kernel(%arg0: i32, %arg1: i32, %arg2: memref<256x64xf32, #tpu.memory_space<vmem>>, %arg3: memref<1x64xf32, #tpu.memory_space<vmem>>, %arg4: memref<1x64xf32, #tpu.memory_space<vmem>>, %arg5: memref<64x192xbf16, #tpu.memory_space<vmem>>, %arg6: memref<1x192xf32, #tpu.memory_space<vmem>>, %arg7: memref<256x192xbf16, #tpu.memory_space<vmem>>, %arg8: memref<256x64xbf16, #tpu.memory_space<vmem>>) attributes {dimension_semantics = [#tpu.dimension_semantics<parallel>, #tpu.dimension_semantics<arbitrary>], iteration_bounds = array<i64: 1, 1>, scalar_prefetch = 0 : i64, scratch_operands = 1 : i64, tpu.core_type = #tpu.core_type<tc>, window_params = [{transform_indices = @transform_0, window_bounds = array<i64: 256, 64>}, {pipeline_mode = #tpu.pipeline_mode<synchronous>, transform_indices = @transform_1, window_bounds = array<i64: 1, 64>}, {pipeline_mode = #tpu.pipeline_mode<synchronous>, transform_indices = @transform_2, window_bounds = array<i64: 1, 64>}, {transform_indices = @transform_3, window_bounds = array<i64: 64, 192>}, {transform_indices = @transform_4, window_bounds = array<i64: 1, 192>}, {transform_indices = @transform_5, window_bounds = array<i64: 256, 192>}]} {
    %c0_i32 = arith.constant 0 : i32
    %0 = arith.cmpi eq, %arg1, %c0_i32 : i32
    %1 = arith.extui %0 : i1 to i32
    %c0_i32_0 = arith.constant 0 : i32
    %2 = arith.cmpi ne, %1, %c0_i32_0 : i32
    scf.if %2 {
      %c0_8 = arith.constant 0 : index
      %c0_9 = arith.constant 0 : index
      %11 = vector.load %arg2[%c0_8, %c0_9] : memref<256x64xf32, #tpu.memory_space<vmem>>, vector<256x64xf32>
      %cst_10 = arith.constant dense<0.000000e+00> : vector<256xf32>
      %12 = vector.multi_reduction <add>, %11, %cst_10 [1] : vector<256x64xf32> to vector<256xf32>
      %13 = vector.shape_cast %12 : vector<256xf32> to vector<256x1xf32>
      %cst_11 = arith.constant 6.400000e+01 : f32
      %14 = vector.broadcast %cst_11 : f32 to vector<256x1xf32>
      %15 = arith.divf %13, %14 : vector<256x1xf32>
      %16 = vector.broadcast %15 : vector<256x1xf32> to vector<256x64xf32>
      %17 = arith.subf %11, %16 : vector<256x64xf32>
      %18 = arith.mulf %17, %17 : vector<256x64xf32>
      %cst_12 = arith.constant dense<0.000000e+00> : vector<256xf32>
      %19 = vector.multi_reduction <add>, %18, %cst_12 [1] : vector<256x64xf32> to vector<256xf32>
      %20 = vector.shape_cast %19 : vector<256xf32> to vector<256x1xf32>
      %cst_13 = arith.constant 6.400000e+01 : f32
      %21 = vector.broadcast %cst_13 : f32 to vector<256x1xf32>
      %22 = arith.divf %20, %21 : vector<256x1xf32>
      %23 = vector.broadcast %15 : vector<256x1xf32> to vector<256x64xf32>
      %24 = arith.subf %11, %23 : vector<256x64xf32>
      %cst_14 = arith.constant 9.99999974E-6 : f32
      %25 = vector.broadcast %cst_14 : f32 to vector<256x1xf32>
      %26 = arith.addf %22, %25 : vector<256x1xf32>
      %27 = math.rsqrt %26 : vector<256x1xf32>
      %28 = vector.broadcast %27 : vector<256x1xf32> to vector<256x64xf32>
      %29 = arith.mulf %24, %28 : vector<256x64xf32>
      %c0_15 = arith.constant 0 : index
      %c0_16 = arith.constant 0 : index
      %30 = vector.load %arg3[%c0_15, %c0_16] : memref<1x64xf32, #tpu.memory_space<vmem>>, vector<1x64xf32>
      %31 = vector.broadcast %30 : vector<1x64xf32> to vector<256x64xf32>
      %32 = arith.mulf %29, %31 : vector<256x64xf32>
      %c0_17 = arith.constant 0 : index
      %c0_18 = arith.constant 0 : index
      %33 = vector.load %arg4[%c0_17, %c0_18] : memref<1x64xf32, #tpu.memory_space<vmem>>, vector<1x64xf32>
      %34 = vector.broadcast %33 : vector<1x64xf32> to vector<256x64xf32>
      %35 = arith.addf %32, %34 : vector<256x64xf32>
      %36 = arith.truncf %35 : vector<256x64xf32> to vector<256x64xbf16>
      %c0_19 = arith.constant 0 : index
      %c0_20 = arith.constant 0 : index
      %37 = vector.load %arg8[%c0_19, %c0_20] : memref<256x64xbf16, #tpu.memory_space<vmem>>, vector<256x64xbf16>
      tpu.vector_store %arg8[%c0_19, %c0_20], %36 {strides = array<i32>} : memref<256x64xbf16, #tpu.memory_space<vmem>>, vector<256x64xbf16>,
    } else {
    }
    %c0 = arith.constant 0 : index
    %c0_1 = arith.constant 0 : index
    %3 = vector.load %arg8[%c0, %c0_1] : memref<256x64xbf16, #tpu.memory_space<vmem>>, vector<256x64xbf16>
    %c0_2 = arith.constant 0 : index
    %c0_3 = arith.constant 0 : index
    %4 = vector.load %arg5[%c0_2, %c0_3] : memref<64x192xbf16, #tpu.memory_space<vmem>>, vector<64x192xbf16>
    %cst = arith.constant dense<0.000000e+00> : vector<256x192xf32>
    %5 = tpu.matmul %3, %4, %cst {dimension_numbers = #tpu.dot_dimension_numbers<[1], [0], [0], [1], [0, 0, 1, 1], [], []>} : vector<256x64xbf16>, vector<64x192xbf16>, vector<256x192xf32> -> vector<256x192xf32>
    %c0_4 = arith.constant 0 : index
    %c0_5 = arith.constant 0 : index
    %6 = vector.load %arg6[%c0_4, %c0_5] : memref<1x192xf32, #tpu.memory_space<vmem>>, vector<1x192xf32>
    %7 = vector.broadcast %6 : vector<1x192xf32> to vector<256x192xf32>
    %8 = arith.addf %5, %7 : vector<256x192xf32>
    %9 = arith.truncf %8 : vector<256x192xf32> to vector<256x192xbf16>
    %c0_6 = arith.constant 0 : index
    %c0_7 = arith.constant 0 : index
    %10 = vector.load %arg7[%c0_6, %c0_7] : memref<256x192xbf16, #tpu.memory_space<vmem>>, vector<256x192xbf16>
    tpu.vector_store %arg7[%c0_6, %c0_7], %9 {strides = array<i32>} : memref<256x192xbf16, #tpu.memory_space<vmem>>, vector<256x192xbf16>,
    return
  }
  func.func @transform_0(%arg0: i32, %arg1: i32) -> (i32, i32) {
    %c0_i32 = arith.constant 0 : i32
    %c0_i32_0 = arith.constant 0 : i32
    return %arg0, %c0_i32 : i32, i32
  }
  func.func @transform_1(%arg0: i32, %arg1: i32) -> (i32, i32) {
    %c0_i32 = arith.constant 0 : i32
    %c0_i32_0 = arith.constant 0 : i32
    %c0_i32_1 = arith.constant 0 : i32
    return %c0_i32, %c0_i32_0 : i32, i32
  }
  func.func @transform_2(%arg0: i32, %arg1: i32) -> (i32, i32) {
    %c0_i32 = arith.constant 0 : i32
    %c0_i32_0 = arith.constant 0 : i32
    %c0_i32_1 = arith.constant 0 : i32
    return %c0_i32, %c0_i32_0 : i32, i32
  }
  func.func @transform_3(%arg0: i32, %arg1: i32) -> (i32, i32) {
    %c0_i32 = arith.constant 0 : i32
    %c0_i32_0 = arith.constant 0 : i32
    return %c0_i32, %arg1 : i32, i32
  }
  func.func @transform_4(%arg0: i32, %arg1: i32) -> (i32, i32) {
    %c0_i32 = arith.constant 0 : i32
    %c0_i32_0 = arith.constant 0 : i32
    return %c0_i32, %arg1 : i32, i32
  }
  func.func @transform_5(%arg0: i32, %arg1: i32) -> (i32, i32) {
    %c0_i32 = arith.constant 0 : i32
    return %arg0, %arg1 : i32, i32
  }
}

module attributes {stable_mosaic.version = 11 : i64} {
  func.func @_attn_kernel(%arg0: i32, %arg1: i32, %arg2: memref<1x128x192xbf16, #tpu.memory_space<vmem>>, %arg3: memref<1x128x192xbf16, #tpu.memory_space<vmem>>, %arg4: memref<1x128x64xbf16, #tpu.memory_space<vmem>>) attributes {dimension_semantics = [#tpu.dimension_semantics<parallel>, #tpu.dimension_semantics<parallel>], iteration_bounds = array<i64: 2, 1>, scalar_prefetch = 0 : i64, scratch_operands = 0 : i64, tpu.core_type = #tpu.core_type<tc>, window_params = [{transform_indices = @transform_0, window_bounds = array<i64: 1, 128, 192>}, {transform_indices = @transform_1, window_bounds = array<i64: 1, 128, 192>}, {transform_indices = @transform_2, window_bounds = array<i64: 1, 128, 64>}]} {
    %c0 = arith.constant 0 : index
    %c0_0 = arith.constant 0 : index
    %c0_1 = arith.constant 0 : index
    %0 = vector.load %arg2[%c0, %c0_0, %c0_1] : memref<1x128x192xbf16, #tpu.memory_space<vmem>>, vector<1x128x192xbf16>
    %1 = vector.shape_cast %0 : vector<1x128x192xbf16> to vector<128x192xbf16>
    %c0_2 = arith.constant 0 : index
    %c0_3 = arith.constant 0 : index
    %c0_4 = arith.constant 0 : index
    %2 = vector.load %arg3[%c0_2, %c0_3, %c0_4] : memref<1x128x192xbf16, #tpu.memory_space<vmem>>, vector<1x128x192xbf16>
    %3 = vector.shape_cast %2 : vector<1x128x192xbf16> to vector<128x192xbf16>
    %4 = tpu.iota {dimensions = array<i32: 1>} : vector<1x128xi32>
    %c17_i32 = arith.constant 17 : i32
    %5 = vector.broadcast %c17_i32 : i32 to vector<1x128xi32>
    %6 = arith.cmpi slt, %4, %5 : vector<1x128xi32>
    %7 = vector.extract_strided_slice %1 {offsets = [0, 0], sizes = [128, 32], strides = [1, 1]} : vector<128x192xbf16> to vector<128x32xbf16>
    %8 = vector.extract_strided_slice %3 {offsets = [0, 64], sizes = [128, 32], strides = [1, 1]} : vector<128x192xbf16> to vector<128x32xbf16>
    %9 = vector.extract_strided_slice %3 {offsets = [0, 128], sizes = [128, 32], strides = [1, 1]} : vector<128x192xbf16> to vector<128x32xbf16>
    %cst = arith.constant dense<0.000000e+00> : vector<128x128xf32>
    %10 = tpu.matmul %7, %8, %cst {dimension_numbers = #tpu.dot_dimension_numbers<[1], [1], [0], [0], [0, 0, 1, 0], [], []>} : vector<128x32xbf16>, vector<128x32xbf16>, vector<128x128xf32> -> vector<128x128xf32>
    %cst_5 = arith.constant 0.176776692 : f32
    %11 = vector.broadcast %cst_5 : f32 to vector<128x128xf32>
    %12 = arith.mulf %10, %11 : vector<128x128xf32>
    %cst_6 = arith.constant -1.000000e+30 : f32
    %13 = vector.shape_cast %6 : vector<1x128xi1> to vector<1x128xi1>
    %14 = vector.broadcast %13 : vector<1x128xi1> to vector<128x128xi1>
    %15 = vector.broadcast %cst_6 : f32 to vector<128x128xf32>
    %16 = arith.select %14, %12, %15 : vector<128x128xi1>, vector<128x128xf32>
    %cst_7 = arith.constant dense<0xFF800000> : vector<128xf32>
    %17 = vector.multi_reduction <maximumf>, %16, %cst_7 [1] : vector<128x128xf32> to vector<128xf32>
    %18 = vector.shape_cast %17 : vector<128xf32> to vector<128x1xf32>
    %19 = vector.broadcast %18 : vector<128x1xf32> to vector<128x128xf32>
    %20 = arith.subf %16, %19 : vector<128x128xf32>
    %21 = math.exp %20 : vector<128x128xf32>
    %cst_8 = arith.constant dense<0.000000e+00> : vector<128xf32>
    %22 = vector.multi_reduction <add>, %21, %cst_8 [1] : vector<128x128xf32> to vector<128xf32>
    %23 = vector.shape_cast %22 : vector<128xf32> to vector<128x1xf32>
    %24 = tpu.reciprocal %23 {approx = true} : vector<128x1xf32> -> vector<128x1xf32>
    %25 = vector.broadcast %24 : vector<128x1xf32> to vector<128x128xf32>
    %26 = arith.mulf %21, %25 : vector<128x128xf32>
    %27 = arith.truncf %26 : vector<128x128xf32> to vector<128x128xbf16>
    %cst_9 = arith.constant dense<0.000000e+00> : vector<128x32xf32>
    %28 = tpu.matmul %27, %9, %cst_9 {dimension_numbers = #tpu.dot_dimension_numbers<[1], [0], [0], [1], [0, 0, 1, 1], [], []>} : vector<128x128xbf16>, vector<128x32xbf16>, vector<128x32xf32> -> vector<128x32xf32>
    %29 = vector.extract_strided_slice %1 {offsets = [0, 32], sizes = [128, 32], strides = [1, 1]} : vector<128x192xbf16> to vector<128x32xbf16>
    %30 = vector.extract_strided_slice %3 {offsets = [0, 96], sizes = [128, 32], strides = [1, 1]} : vector<128x192xbf16> to vector<128x32xbf16>
    %31 = vector.extract_strided_slice %3 {offsets = [0, 160], sizes = [128, 32], strides = [1, 1]} : vector<128x192xbf16> to vector<128x32xbf16>
    %cst_10 = arith.constant dense<0.000000e+00> : vector<128x128xf32>
    %32 = tpu.matmul %29, %30, %cst_10 {dimension_numbers = #tpu.dot_dimension_numbers<[1], [1], [0], [0], [0, 0, 1, 0], [], []>} : vector<128x32xbf16>, vector<128x32xbf16>, vector<128x128xf32> -> vector<128x128xf32>
    %cst_11 = arith.constant 0.176776692 : f32
    %33 = vector.broadcast %cst_11 : f32 to vector<128x128xf32>
    %34 = arith.mulf %32, %33 : vector<128x128xf32>
    %cst_12 = arith.constant -1.000000e+30 : f32
    %35 = vector.shape_cast %6 : vector<1x128xi1> to vector<1x128xi1>
    %36 = vector.broadcast %35 : vector<1x128xi1> to vector<128x128xi1>
    %37 = vector.broadcast %cst_12 : f32 to vector<128x128xf32>
    %38 = arith.select %36, %34, %37 : vector<128x128xi1>, vector<128x128xf32>
    %cst_13 = arith.constant dense<0xFF800000> : vector<128xf32>
    %39 = vector.multi_reduction <maximumf>, %38, %cst_13 [1] : vector<128x128xf32> to vector<128xf32>
    %40 = vector.shape_cast %39 : vector<128xf32> to vector<128x1xf32>
    %41 = vector.broadcast %40 : vector<128x1xf32> to vector<128x128xf32>
    %42 = arith.subf %38, %41 : vector<128x128xf32>
    %43 = math.exp %42 : vector<128x128xf32>
    %cst_14 = arith.constant dense<0.000000e+00> : vector<128xf32>
    %44 = vector.multi_reduction <add>, %43, %cst_14 [1] : vector<128x128xf32> to vector<128xf32>
    %45 = vector.shape_cast %44 : vector<128xf32> to vector<128x1xf32>
    %46 = tpu.reciprocal %45 {approx = true} : vector<128x1xf32> -> vector<128x1xf32>
    %47 = vector.broadcast %46 : vector<128x1xf32> to vector<128x128xf32>
    %48 = arith.mulf %43, %47 : vector<128x128xf32>
    %49 = arith.truncf %48 : vector<128x128xf32> to vector<128x128xbf16>
    %cst_15 = arith.constant dense<0.000000e+00> : vector<128x32xf32>
    %50 = tpu.matmul %49, %31, %cst_15 {dimension_numbers = #tpu.dot_dimension_numbers<[1], [0], [0], [1], [0, 0, 1, 1], [], []>} : vector<128x128xbf16>, vector<128x32xbf16>, vector<128x32xf32> -> vector<128x32xf32>
    %51 = tpu.concatenate %28, %50 in 1 : vector<128x32xf32>, vector<128x32xf32> -> vector<128x64xf32>
    %52 = vector.shape_cast %51 : vector<128x64xf32> to vector<1x128x64xf32>
    %53 = arith.truncf %52 : vector<1x128x64xf32> to vector<1x128x64xbf16>
    %c0_16 = arith.constant 0 : index
    %c0_17 = arith.constant 0 : index
    %c0_18 = arith.constant 0 : index
    %54 = vector.load %arg4[%c0_16, %c0_17, %c0_18] : memref<1x128x64xbf16, #tpu.memory_space<vmem>>, vector<1x128x64xbf16>
    tpu.vector_store %arg4[%c0_16, %c0_17, %c0_18], %53 {strides = array<i32>} : memref<1x128x64xbf16, #tpu.memory_space<vmem>>, vector<1x128x64xbf16>,
    return
  }
  func.func @transform_0(%arg0: i32, %arg1: i32) -> (i32, i32, i32) {
    %c0_i32 = arith.constant 0 : i32
    %c0_i32_0 = arith.constant 0 : i32
    return %arg0, %arg1, %c0_i32 : i32, i32, i32
  }
  func.func @transform_1(%arg0: i32, %arg1: i32) -> (i32, i32, i32) {
    %c0_i32 = arith.constant 0 : i32
    %c0_i32_0 = arith.constant 0 : i32
    %c0_i32_1 = arith.constant 0 : i32
    return %arg0, %c0_i32, %c0_i32_0 : i32, i32, i32
  }
  func.func @transform_2(%arg0: i32, %arg1: i32) -> (i32, i32, i32) {
    %c0_i32 = arith.constant 0 : i32
    %c0_i32_0 = arith.constant 0 : i32
    return %arg0, %arg1, %c0_i32 : i32, i32, i32
  }
}

module attributes {stable_mosaic.version = 11 : i64} {
  func.func @_linear_kernel(%arg0: i32, %arg1: i32, %arg2: i32, %arg3: memref<256x64xbf16, #tpu.memory_space<vmem>>, %arg4: memref<64x64xbf16, #tpu.memory_space<vmem>>, %arg5: memref<1x64xf32, #tpu.memory_space<vmem>>, %arg6: memref<256x64xf32, #tpu.memory_space<vmem>>, %arg7: memref<256x64xf32, #tpu.memory_space<vmem>>, %arg8: memref<256x64xf32, #tpu.memory_space<vmem>>) attributes {dimension_semantics = [#tpu.dimension_semantics<parallel>, #tpu.dimension_semantics<parallel>, #tpu.dimension_semantics<arbitrary>], iteration_bounds = array<i64: 1, 1, 1>, scalar_prefetch = 0 : i64, scratch_operands = 1 : i64, tpu.core_type = #tpu.core_type<tc>, window_params = [{transform_indices = @transform_0, window_bounds = array<i64: 256, 64>}, {transform_indices = @transform_1, window_bounds = array<i64: 64, 64>}, {transform_indices = @transform_2, window_bounds = array<i64: 1, 64>}, {transform_indices = @transform_3, window_bounds = array<i64: 256, 64>}, {transform_indices = @transform_4, window_bounds = array<i64: 256, 64>}]} {
    %c0_i32 = arith.constant 0 : i32
    %0 = arith.cmpi eq, %arg2, %c0_i32 : i32
    %1 = arith.extui %0 : i1 to i32
    %c0_i32_0 = arith.constant 0 : i32
    %2 = arith.cmpi ne, %1, %c0_i32_0 : i32
    scf.if %2 {
      %cst_10 = arith.constant 0.000000e+00 : f32
      %12 = vector.broadcast %cst_10 : f32 to vector<256x64xf32>
      %c0_11 = arith.constant 0 : index
      %c0_12 = arith.constant 0 : index
      %13 = vector.load %arg8[%c0_11, %c0_12] : memref<256x64xf32, #tpu.memory_space<vmem>>, vector<256x64xf32>
      tpu.vector_store %arg8[%c0_11, %c0_12], %12 {strides = array<i32>} : memref<256x64xf32, #tpu.memory_space<vmem>>, vector<256x64xf32>,
    } else {
    }
    %c0 = arith.constant 0 : index
    %c0_1 = arith.constant 0 : index
    %3 = vector.load %arg8[%c0, %c0_1] : memref<256x64xf32, #tpu.memory_space<vmem>>, vector<256x64xf32>
    %c0_2 = arith.constant 0 : index
    %c0_3 = arith.constant 0 : index
    %4 = vector.load %arg3[%c0_2, %c0_3] : memref<256x64xbf16, #tpu.memory_space<vmem>>, vector<256x64xbf16>
    %c0_4 = arith.constant 0 : index
    %c0_5 = arith.constant 0 : index
    %5 = vector.load %arg4[%c0_4, %c0_5] : memref<64x64xbf16, #tpu.memory_space<vmem>>, vector<64x64xbf16>
    %cst = arith.constant dense<0.000000e+00> : vector<256x64xf32>
    %6 = tpu.matmul %4, %5, %cst {dimension_numbers = #tpu.dot_dimension_numbers<[1], [0], [0], [1], [0, 0, 1, 1], [], []>} : vector<256x64xbf16>, vector<64x64xbf16>, vector<256x64xf32> -> vector<256x64xf32>
    %7 = arith.addf %3, %6 : vector<256x64xf32>
    %c0_6 = arith.constant 0 : index
    %c0_7 = arith.constant 0 : index
    %8 = vector.load %arg8[%c0_6, %c0_7] : memref<256x64xf32, #tpu.memory_space<vmem>>, vector<256x64xf32>
    tpu.vector_store %arg8[%c0_6, %c0_7], %7 {strides = array<i32>} : memref<256x64xf32, #tpu.memory_space<vmem>>, vector<256x64xf32>,
    %c0_i32_8 = arith.constant 0 : i32
    %9 = arith.cmpi eq, %arg2, %c0_i32_8 : i32
    %10 = arith.extui %9 : i1 to i32
    %c0_i32_9 = arith.constant 0 : i32
    %11 = arith.cmpi ne, %10, %c0_i32_9 : i32
    scf.if %11 {
      %c0_10 = arith.constant 0 : index
      %c0_11 = arith.constant 0 : index
      %12 = vector.load %arg8[%c0_10, %c0_11] : memref<256x64xf32, #tpu.memory_space<vmem>>, vector<256x64xf32>
      %c0_12 = arith.constant 0 : index
      %c0_13 = arith.constant 0 : index
      %13 = vector.load %arg5[%c0_12, %c0_13] : memref<1x64xf32, #tpu.memory_space<vmem>>, vector<1x64xf32>
      %14 = vector.broadcast %13 : vector<1x64xf32> to vector<256x64xf32>
      %15 = arith.addf %12, %14 : vector<256x64xf32>
      %c0_14 = arith.constant 0 : index
      %c0_15 = arith.constant 0 : index
      %16 = vector.load %arg6[%c0_14, %c0_15] : memref<256x64xf32, #tpu.memory_space<vmem>>, vector<256x64xf32>
      %17 = arith.addf %15, %16 : vector<256x64xf32>
      %c0_16 = arith.constant 0 : index
      %c0_17 = arith.constant 0 : index
      %18 = vector.load %arg7[%c0_16, %c0_17] : memref<256x64xf32, #tpu.memory_space<vmem>>, vector<256x64xf32>
      tpu.vector_store %arg7[%c0_16, %c0_17], %17 {strides = array<i32>} : memref<256x64xf32, #tpu.memory_space<vmem>>, vector<256x64xf32>,
    } else {
    }
    return
  }
  func.func @transform_0(%arg0: i32, %arg1: i32, %arg2: i32) -> (i32, i32) {
    %c0_i32 = arith.constant 0 : i32
    return %arg0, %arg2 : i32, i32
  }
  func.func @transform_1(%arg0: i32, %arg1: i32, %arg2: i32) -> (i32, i32) {
    %c0_i32 = arith.constant 0 : i32
    return %arg2, %arg1 : i32, i32
  }
  func.func @transform_2(%arg0: i32, %arg1: i32, %arg2: i32) -> (i32, i32) {
    %c0_i32 = arith.constant 0 : i32
    %c0_i32_0 = arith.constant 0 : i32
    return %c0_i32, %arg1 : i32, i32
  }
  func.func @transform_3(%arg0: i32, %arg1: i32, %arg2: i32) -> (i32, i32) {
    %c0_i32 = arith.constant 0 : i32
    return %arg0, %arg1 : i32, i32
  }
  func.func @transform_4(%arg0: i32, %arg1: i32, %arg2: i32) -> (i32, i32) {
    %c0_i32 = arith.constant 0 : i32
    return %arg0, %arg1 : i32, i32
  }
}

module attributes {stable_mosaic.version = 11 : i64} {
  func.func @_linear_kernel(%arg0: i32, %arg1: i32, %arg2: i32, %arg3: memref<256x256xbf16, #tpu.memory_space<vmem>>, %arg4: memref<256x64xbf16, #tpu.memory_space<vmem>>, %arg5: memref<1x64xf32, #tpu.memory_space<vmem>>, %arg6: memref<256x64xf32, #tpu.memory_space<vmem>>, %arg7: memref<256x64xf32, #tpu.memory_space<vmem>>, %arg8: memref<256x64xf32, #tpu.memory_space<vmem>>) attributes {dimension_semantics = [#tpu.dimension_semantics<parallel>, #tpu.dimension_semantics<parallel>, #tpu.dimension_semantics<arbitrary>], iteration_bounds = array<i64: 1, 1, 1>, scalar_prefetch = 0 : i64, scratch_operands = 1 : i64, tpu.core_type = #tpu.core_type<tc>, window_params = [{transform_indices = @transform_0, window_bounds = array<i64: 256, 256>}, {transform_indices = @transform_1, window_bounds = array<i64: 256, 64>}, {transform_indices = @transform_2, window_bounds = array<i64: 1, 64>}, {transform_indices = @transform_3, window_bounds = array<i64: 256, 64>}, {transform_indices = @transform_4, window_bounds = array<i64: 256, 64>}]} {
    %c0_i32 = arith.constant 0 : i32
    %0 = arith.cmpi eq, %arg2, %c0_i32 : i32
    %1 = arith.extui %0 : i1 to i32
    %c0_i32_0 = arith.constant 0 : i32
    %2 = arith.cmpi ne, %1, %c0_i32_0 : i32
    scf.if %2 {
      %cst_10 = arith.constant 0.000000e+00 : f32
      %12 = vector.broadcast %cst_10 : f32 to vector<256x64xf32>
      %c0_11 = arith.constant 0 : index
      %c0_12 = arith.constant 0 : index
      %13 = vector.load %arg8[%c0_11, %c0_12] : memref<256x64xf32, #tpu.memory_space<vmem>>, vector<256x64xf32>
      tpu.vector_store %arg8[%c0_11, %c0_12], %12 {strides = array<i32>} : memref<256x64xf32, #tpu.memory_space<vmem>>, vector<256x64xf32>,
    } else {
    }
    %c0 = arith.constant 0 : index
    %c0_1 = arith.constant 0 : index
    %3 = vector.load %arg8[%c0, %c0_1] : memref<256x64xf32, #tpu.memory_space<vmem>>, vector<256x64xf32>
    %c0_2 = arith.constant 0 : index
    %c0_3 = arith.constant 0 : index
    %4 = vector.load %arg3[%c0_2, %c0_3] : memref<256x256xbf16, #tpu.memory_space<vmem>>, vector<256x256xbf16>
    %c0_4 = arith.constant 0 : index
    %c0_5 = arith.constant 0 : index
    %5 = vector.load %arg4[%c0_4, %c0_5] : memref<256x64xbf16, #tpu.memory_space<vmem>>, vector<256x64xbf16>
    %cst = arith.constant dense<0.000000e+00> : vector<256x64xf32>
    %6 = tpu.matmul %4, %5, %cst {dimension_numbers = #tpu.dot_dimension_numbers<[1], [0], [0], [1], [0, 0, 1, 1], [], []>} : vector<256x256xbf16>, vector<256x64xbf16>, vector<256x64xf32> -> vector<256x64xf32>
    %7 = arith.addf %3, %6 : vector<256x64xf32>
    %c0_6 = arith.constant 0 : index
    %c0_7 = arith.constant 0 : index
    %8 = vector.load %arg8[%c0_6, %c0_7] : memref<256x64xf32, #tpu.memory_space<vmem>>, vector<256x64xf32>
    tpu.vector_store %arg8[%c0_6, %c0_7], %7 {strides = array<i32>} : memref<256x64xf32, #tpu.memory_space<vmem>>, vector<256x64xf32>,
    %c0_i32_8 = arith.constant 0 : i32
    %9 = arith.cmpi eq, %arg2, %c0_i32_8 : i32
    %10 = arith.extui %9 : i1 to i32
    %c0_i32_9 = arith.constant 0 : i32
    %11 = arith.cmpi ne, %10, %c0_i32_9 : i32
    scf.if %11 {
      %c0_10 = arith.constant 0 : index
      %c0_11 = arith.constant 0 : index
      %12 = vector.load %arg8[%c0_10, %c0_11] : memref<256x64xf32, #tpu.memory_space<vmem>>, vector<256x64xf32>
      %c0_12 = arith.constant 0 : index
      %c0_13 = arith.constant 0 : index
      %13 = vector.load %arg5[%c0_12, %c0_13] : memref<1x64xf32, #tpu.memory_space<vmem>>, vector<1x64xf32>
      %14 = vector.broadcast %13 : vector<1x64xf32> to vector<256x64xf32>
      %15 = arith.addf %12, %14 : vector<256x64xf32>
      %c0_14 = arith.constant 0 : index
      %c0_15 = arith.constant 0 : index
      %16 = vector.load %arg6[%c0_14, %c0_15] : memref<256x64xf32, #tpu.memory_space<vmem>>, vector<256x64xf32>
      %17 = arith.addf %15, %16 : vector<256x64xf32>
      %c0_16 = arith.constant 0 : index
      %c0_17 = arith.constant 0 : index
      %18 = vector.load %arg7[%c0_16, %c0_17] : memref<256x64xf32, #tpu.memory_space<vmem>>, vector<256x64xf32>
      tpu.vector_store %arg7[%c0_16, %c0_17], %17 {strides = array<i32>} : memref<256x64xf32, #tpu.memory_space<vmem>>, vector<256x64xf32>,
    } else {
    }
    return
  }
  func.func @transform_0(%arg0: i32, %arg1: i32, %arg2: i32) -> (i32, i32) {
    %c0_i32 = arith.constant 0 : i32
    return %arg0, %arg2 : i32, i32
  }
  func.func @transform_1(%arg0: i32, %arg1: i32, %arg2: i32) -> (i32, i32) {
    %c0_i32 = arith.constant 0 : i32
    return %arg2, %arg1 : i32, i32
  }
  func.func @transform_2(%arg0: i32, %arg1: i32, %arg2: i32) -> (i32, i32) {
    %c0_i32 = arith.constant 0 : i32
    %c0_i32_0 = arith.constant 0 : i32
    return %c0_i32, %arg1 : i32, i32
  }
  func.func @transform_3(%arg0: i32, %arg1: i32, %arg2: i32) -> (i32, i32) {
    %c0_i32 = arith.constant 0 : i32
    return %arg0, %arg1 : i32, i32
  }
  func.func @transform_4(%arg0: i32, %arg1: i32, %arg2: i32) -> (i32, i32) {
    %c0_i32 = arith.constant 0 : i32
    return %arg0, %arg1 : i32, i32
  }
}

module attributes {stable_mosaic.version = 11 : i64} {
  func.func @_ln_linear_kernel(%arg0: i32, %arg1: i32, %arg2: memref<2x64xf32, #tpu.memory_space<vmem>>, %arg3: memref<1x64xf32, #tpu.memory_space<vmem>>, %arg4: memref<1x64xf32, #tpu.memory_space<vmem>>, %arg5: memref<64x32xbf16, #tpu.memory_space<vmem>>, %arg6: memref<2x32xf32, #tpu.memory_space<vmem>>, %arg7: memref<2x64xbf16, #tpu.memory_space<vmem>>) attributes {dimension_semantics = [#tpu.dimension_semantics<parallel>, #tpu.dimension_semantics<arbitrary>], iteration_bounds = array<i64: 1, 1>, scalar_prefetch = 0 : i64, scratch_operands = 1 : i64, tpu.core_type = #tpu.core_type<tc>, window_params = [{transform_indices = @transform_0, window_bounds = array<i64: 2, 64>}, {pipeline_mode = #tpu.pipeline_mode<synchronous>, transform_indices = @transform_1, window_bounds = array<i64: 1, 64>}, {pipeline_mode = #tpu.pipeline_mode<synchronous>, transform_indices = @transform_2, window_bounds = array<i64: 1, 64>}, {transform_indices = @transform_3, window_bounds = array<i64: 64, 32>}, {transform_indices = @transform_4, window_bounds = array<i64: 2, 32>}]} {
    %c0_i32 = arith.constant 0 : i32
    %0 = arith.cmpi eq, %arg1, %c0_i32 : i32
    %1 = arith.extui %0 : i1 to i32
    %c0_i32_0 = arith.constant 0 : i32
    %2 = arith.cmpi ne, %1, %c0_i32_0 : i32
    scf.if %2 {
      %c0_6 = arith.constant 0 : index
      %c0_7 = arith.constant 0 : index
      %7 = vector.load %arg2[%c0_6, %c0_7] : memref<2x64xf32, #tpu.memory_space<vmem>>, vector<2x64xf32>
      %cst_8 = arith.constant dense<0.000000e+00> : vector<2xf32>
      %8 = vector.multi_reduction <add>, %7, %cst_8 [1] : vector<2x64xf32> to vector<2xf32>
      %9 = vector.shape_cast %8 : vector<2xf32> to vector<2x1xf32>
      %cst_9 = arith.constant 6.400000e+01 : f32
      %10 = vector.broadcast %cst_9 : f32 to vector<2x1xf32>
      %11 = arith.divf %9, %10 : vector<2x1xf32>
      %12 = vector.broadcast %11 : vector<2x1xf32> to vector<2x64xf32>
      %13 = arith.subf %7, %12 : vector<2x64xf32>
      %14 = arith.mulf %13, %13 : vector<2x64xf32>
      %cst_10 = arith.constant dense<0.000000e+00> : vector<2xf32>
      %15 = vector.multi_reduction <add>, %14, %cst_10 [1] : vector<2x64xf32> to vector<2xf32>
      %16 = vector.shape_cast %15 : vector<2xf32> to vector<2x1xf32>
      %cst_11 = arith.constant 6.400000e+01 : f32
      %17 = vector.broadcast %cst_11 : f32 to vector<2x1xf32>
      %18 = arith.divf %16, %17 : vector<2x1xf32>
      %19 = vector.broadcast %11 : vector<2x1xf32> to vector<2x64xf32>
      %20 = arith.subf %7, %19 : vector<2x64xf32>
      %cst_12 = arith.constant 9.99999974E-6 : f32
      %21 = vector.broadcast %cst_12 : f32 to vector<2x1xf32>
      %22 = arith.addf %18, %21 : vector<2x1xf32>
      %23 = math.rsqrt %22 : vector<2x1xf32>
      %24 = vector.broadcast %23 : vector<2x1xf32> to vector<2x64xf32>
      %25 = arith.mulf %20, %24 : vector<2x64xf32>
      %c0_13 = arith.constant 0 : index
      %c0_14 = arith.constant 0 : index
      %26 = vector.load %arg3[%c0_13, %c0_14] : memref<1x64xf32, #tpu.memory_space<vmem>>, vector<1x64xf32>
      %27 = vector.broadcast %26 : vector<1x64xf32> to vector<2x64xf32>
      %28 = arith.mulf %25, %27 : vector<2x64xf32>
      %c0_15 = arith.constant 0 : index
      %c0_16 = arith.constant 0 : index
      %29 = vector.load %arg4[%c0_15, %c0_16] : memref<1x64xf32, #tpu.memory_space<vmem>>, vector<1x64xf32>
      %30 = vector.broadcast %29 : vector<1x64xf32> to vector<2x64xf32>
      %31 = arith.addf %28, %30 : vector<2x64xf32>
      %32 = arith.truncf %31 : vector<2x64xf32> to vector<2x64xbf16>
      %c0_17 = arith.constant 0 : index
      %c0_18 = arith.constant 0 : index
      %33 = vector.load %arg7[%c0_17, %c0_18] : memref<2x64xbf16, #tpu.memory_space<vmem>>, vector<2x64xbf16>
      tpu.vector_store %arg7[%c0_17, %c0_18], %32 {strides = array<i32>} : memref<2x64xbf16, #tpu.memory_space<vmem>>, vector<2x64xbf16>,
    } else {
    }
    %c0 = arith.constant 0 : index
    %c0_1 = arith.constant 0 : index
    %3 = vector.load %arg7[%c0, %c0_1] : memref<2x64xbf16, #tpu.memory_space<vmem>>, vector<2x64xbf16>
    %c0_2 = arith.constant 0 : index
    %c0_3 = arith.constant 0 : index
    %4 = vector.load %arg5[%c0_2, %c0_3] : memref<64x32xbf16, #tpu.memory_space<vmem>>, vector<64x32xbf16>
    %cst = arith.constant dense<0.000000e+00> : vector<2x32xf32>
    %5 = tpu.matmul %3, %4, %cst {dimension_numbers = #tpu.dot_dimension_numbers<[1], [0], [0], [1], [0, 0, 1, 1], [], []>} : vector<2x64xbf16>, vector<64x32xbf16>, vector<2x32xf32> -> vector<2x32xf32>
    %c0_4 = arith.constant 0 : index
    %c0_5 = arith.constant 0 : index
    %6 = vector.load %arg6[%c0_4, %c0_5] : memref<2x32xf32, #tpu.memory_space<vmem>>, vector<2x32xf32>
    tpu.vector_store %arg6[%c0_4, %c0_5], %5 {strides = array<i32>} : memref<2x32xf32, #tpu.memory_space<vmem>>, vector<2x32xf32>,
    return
  }
  func.func @transform_0(%arg0: i32, %arg1: i32) -> (i32, i32) {
    %c0_i32 = arith.constant 0 : i32
    %c0_i32_0 = arith.constant 0 : i32
    return %arg0, %c0_i32 : i32, i32
  }
  func.func @transform_1(%arg0: i32, %arg1: i32) -> (i32, i32) {
    %c0_i32 = arith.constant 0 : i32
    %c0_i32_0 = arith.constant 0 : i32
    %c0_i32_1 = arith.constant 0 : i32
    return %c0_i32, %c0_i32_0 : i32, i32
  }
  func.func @transform_2(%arg0: i32, %arg1: i32) -> (i32, i32) {
    %c0_i32 = arith.constant 0 : i32
    %c0_i32_0 = arith.constant 0 : i32
    %c0_i32_1 = arith.constant 0 : i32
    return %c0_i32, %c0_i32_0 : i32, i32
  }
  func.func @transform_3(%arg0: i32, %arg1: i32) -> (i32, i32) {
    %c0_i32 = arith.constant 0 : i32
    %c0_i32_0 = arith.constant 0 : i32
    return %c0_i32, %arg1 : i32, i32
  }
  func.func @transform_4(%arg0: i32, %arg1: i32) -> (i32, i32) {
    %c0_i32 = arith.constant 0 : i32
    return %arg0, %arg1 : i32, i32
  }
}

module attributes {stable_mosaic.version = 11 : i64} {
  func.func @_ln_linear_kernel(%arg0: i32, %arg1: i32, %arg2: memref<256x64xf32, #tpu.memory_space<vmem>>, %arg3: memref<1x64xf32, #tpu.memory_space<vmem>>, %arg4: memref<1x64xf32, #tpu.memory_space<vmem>>, %arg5: memref<64x256xbf16, #tpu.memory_space<vmem>>, %arg6: memref<1x256xf32, #tpu.memory_space<vmem>>, %arg7: memref<256x256xbf16, #tpu.memory_space<vmem>>, %arg8: memref<256x64xbf16, #tpu.memory_space<vmem>>) attributes {dimension_semantics = [#tpu.dimension_semantics<parallel>, #tpu.dimension_semantics<arbitrary>], iteration_bounds = array<i64: 1, 1>, scalar_prefetch = 0 : i64, scratch_operands = 1 : i64, tpu.core_type = #tpu.core_type<tc>, window_params = [{transform_indices = @transform_0, window_bounds = array<i64: 256, 64>}, {pipeline_mode = #tpu.pipeline_mode<synchronous>, transform_indices = @transform_1, window_bounds = array<i64: 1, 64>}, {pipeline_mode = #tpu.pipeline_mode<synchronous>, transform_indices = @transform_2, window_bounds = array<i64: 1, 64>}, {transform_indices = @transform_3, window_bounds = array<i64: 64, 256>}, {transform_indices = @transform_4, window_bounds = array<i64: 1, 256>}, {transform_indices = @transform_5, window_bounds = array<i64: 256, 256>}]} {
    %c0_i32 = arith.constant 0 : i32
    %0 = arith.cmpi eq, %arg1, %c0_i32 : i32
    %1 = arith.extui %0 : i1 to i32
    %c0_i32_0 = arith.constant 0 : i32
    %2 = arith.cmpi ne, %1, %c0_i32_0 : i32
    scf.if %2 {
      %c0_10 = arith.constant 0 : index
      %c0_11 = arith.constant 0 : index
      %19 = vector.load %arg2[%c0_10, %c0_11] : memref<256x64xf32, #tpu.memory_space<vmem>>, vector<256x64xf32>
      %cst_12 = arith.constant dense<0.000000e+00> : vector<256xf32>
      %20 = vector.multi_reduction <add>, %19, %cst_12 [1] : vector<256x64xf32> to vector<256xf32>
      %21 = vector.shape_cast %20 : vector<256xf32> to vector<256x1xf32>
      %cst_13 = arith.constant 6.400000e+01 : f32
      %22 = vector.broadcast %cst_13 : f32 to vector<256x1xf32>
      %23 = arith.divf %21, %22 : vector<256x1xf32>
      %24 = vector.broadcast %23 : vector<256x1xf32> to vector<256x64xf32>
      %25 = arith.subf %19, %24 : vector<256x64xf32>
      %26 = arith.mulf %25, %25 : vector<256x64xf32>
      %cst_14 = arith.constant dense<0.000000e+00> : vector<256xf32>
      %27 = vector.multi_reduction <add>, %26, %cst_14 [1] : vector<256x64xf32> to vector<256xf32>
      %28 = vector.shape_cast %27 : vector<256xf32> to vector<256x1xf32>
      %cst_15 = arith.constant 6.400000e+01 : f32
      %29 = vector.broadcast %cst_15 : f32 to vector<256x1xf32>
      %30 = arith.divf %28, %29 : vector<256x1xf32>
      %31 = vector.broadcast %23 : vector<256x1xf32> to vector<256x64xf32>
      %32 = arith.subf %19, %31 : vector<256x64xf32>
      %cst_16 = arith.constant 9.99999974E-6 : f32
      %33 = vector.broadcast %cst_16 : f32 to vector<256x1xf32>
      %34 = arith.addf %30, %33 : vector<256x1xf32>
      %35 = math.rsqrt %34 : vector<256x1xf32>
      %36 = vector.broadcast %35 : vector<256x1xf32> to vector<256x64xf32>
      %37 = arith.mulf %32, %36 : vector<256x64xf32>
      %c0_17 = arith.constant 0 : index
      %c0_18 = arith.constant 0 : index
      %38 = vector.load %arg3[%c0_17, %c0_18] : memref<1x64xf32, #tpu.memory_space<vmem>>, vector<1x64xf32>
      %39 = vector.broadcast %38 : vector<1x64xf32> to vector<256x64xf32>
      %40 = arith.mulf %37, %39 : vector<256x64xf32>
      %c0_19 = arith.constant 0 : index
      %c0_20 = arith.constant 0 : index
      %41 = vector.load %arg4[%c0_19, %c0_20] : memref<1x64xf32, #tpu.memory_space<vmem>>, vector<1x64xf32>
      %42 = vector.broadcast %41 : vector<1x64xf32> to vector<256x64xf32>
      %43 = arith.addf %40, %42 : vector<256x64xf32>
      %44 = arith.truncf %43 : vector<256x64xf32> to vector<256x64xbf16>
      %c0_21 = arith.constant 0 : index
      %c0_22 = arith.constant 0 : index
      %45 = vector.load %arg8[%c0_21, %c0_22] : memref<256x64xbf16, #tpu.memory_space<vmem>>, vector<256x64xbf16>
      tpu.vector_store %arg8[%c0_21, %c0_22], %44 {strides = array<i32>} : memref<256x64xbf16, #tpu.memory_space<vmem>>, vector<256x64xbf16>,
    } else {
    }
    %c0 = arith.constant 0 : index
    %c0_1 = arith.constant 0 : index
    %3 = vector.load %arg8[%c0, %c0_1] : memref<256x64xbf16, #tpu.memory_space<vmem>>, vector<256x64xbf16>
    %c0_2 = arith.constant 0 : index
    %c0_3 = arith.constant 0 : index
    %4 = vector.load %arg5[%c0_2, %c0_3] : memref<64x256xbf16, #tpu.memory_space<vmem>>, vector<64x256xbf16>
    %cst = arith.constant dense<0.000000e+00> : vector<256x256xf32>
    %5 = tpu.matmul %3, %4, %cst {dimension_numbers = #tpu.dot_dimension_numbers<[1], [0], [0], [1], [0, 0, 1, 1], [], []>} : vector<256x64xbf16>, vector<64x256xbf16>, vector<256x256xf32> -> vector<256x256xf32>
    %c0_4 = arith.constant 0 : index
    %c0_5 = arith.constant 0 : index
    %6 = vector.load %arg6[%c0_4, %c0_5] : memref<1x256xf32, #tpu.memory_space<vmem>>, vector<1x256xf32>
    %7 = vector.broadcast %6 : vector<1x256xf32> to vector<256x256xf32>
    %8 = arith.addf %5, %7 : vector<256x256xf32>
    %cst_6 = arith.constant 1.702000e+00 : f32
    %9 = vector.broadcast %cst_6 : f32 to vector<256x256xf32>
    %10 = arith.mulf %9, %8 : vector<256x256xf32>
    %11 = arith.negf %10 : vector<256x256xf32>
    %12 = math.exp %11 : vector<256x256xf32>
    %cst_7 = arith.constant 1.000000e+00 : f32
    %13 = vector.broadcast %cst_7 : f32 to vector<256x256xf32>
    %14 = arith.addf %13, %12 : vector<256x256xf32>
    %15 = arith.divf %13, %14 : vector<256x256xf32>
    %16 = arith.mulf %8, %15 : vector<256x256xf32>
    %17 = arith.truncf %16 : vector<256x256xf32> to vector<256x256xbf16>
    %c0_8 = arith.constant 0 : index
    %c0_9 = arith.constant 0 : index
    %18 = vector.load %arg7[%c0_8, %c0_9] : memref<256x256xbf16, #tpu.memory_space<vmem>>, vector<256x256xbf16>
    tpu.vector_store %arg7[%c0_8, %c0_9], %17 {strides = array<i32>} : memref<256x256xbf16, #tpu.memory_space<vmem>>, vector<256x256xbf16>,
    return
  }
  func.func @transform_0(%arg0: i32, %arg1: i32) -> (i32, i32) {
    %c0_i32 = arith.constant 0 : i32
    %c0_i32_0 = arith.constant 0 : i32
    return %arg0, %c0_i32 : i32, i32
  }
  func.func @transform_1(%arg0: i32, %arg1: i32) -> (i32, i32) {
    %c0_i32 = arith.constant 0 : i32
    %c0_i32_0 = arith.constant 0 : i32
    %c0_i32_1 = arith.constant 0 : i32
    return %c0_i32, %c0_i32_0 : i32, i32
  }
  func.func @transform_2(%arg0: i32, %arg1: i32) -> (i32, i32) {
    %c0_i32 = arith.constant 0 : i32
    %c0_i32_0 = arith.constant 0 : i32
    %c0_i32_1 = arith.constant 0 : i32
    return %c0_i32, %c0_i32_0 : i32, i32
  }
  func.func @transform_3(%arg0: i32, %arg1: i32) -> (i32, i32) {
    %c0_i32 = arith.constant 0 : i32
    %c0_i32_0 = arith.constant 0 : i32
    return %c0_i32, %arg1 : i32, i32
  }
  func.func @transform_4(%arg0: i32, %arg1: i32) -> (i32, i32) {
    %c0_i32 = arith.constant 0 : i32
    %c0_i32_0 = arith.constant 0 : i32
    return %c0_i32, %arg1 : i32, i32
  }
  func.func @transform_5(%arg0: i32, %arg1: i32) -> (i32, i32) {
    %c0_i32 = arith.constant 0 : i32
    return %arg0, %arg1 : i32, i32
  }
}

</mosaic_0001>

<bundles_post_ra>
// kernel: vision_transformer_forward.4
= control target key start
LH: loop header
LB: loop body
LE: loop exit
PB: predicated region body
PF: predicated region fallthrough
CT: control target
= control target key end

     0   :  { %vm46_vm0 = vcmask 523264   ;;  %s1314_s0 = inlined_call_operand.vmem [shape: f32[256,64], index: 0, kind: input, shape index: {}]   ;;  %s1315_s1 = inlined_call_operand.vmem [shape: f32[1,64], index: 1, kind: input, shape index: {}]   ;;  %s1316_s2 = inlined_call_operand.vmem [shape: f32[1,64], index: 2, kind: input, shape index: {}]   ;;  %s1317_s3 = inlined_call_operand.vmem [shape: f32[256,64], index: 3, kind: output, shape index: {}]  }
   0x1   :  { %v667_v0 = vld [vmem:[%s1314_s0] sm:$0xff]  ;;  %v672_v1 = vld [vmem:[%s1314_s0 + $0x10] sm:$0xff]  ;;  %v677_v2 = vld [vmem:[%s1314_s0 + $0x8] sm:$0xff] }
   0x2   :  { %v47_v3 = vsel %vm46_vm0, %v667_v0, 0.0  ;;  %v53_v4 = vsel %vm46_vm0, %v672_v1, 0.0  ;;  %v686_v5 = vld [vmem:[%s1314_s0 + $0x18] sm:$0xff]  ;;  %v50_v6 = vsel %vm46_vm0, %v677_v2, 0.0  ;;  %v695_v8 = vld [vmem:[%s1314_s0 + $0x20] sm:$0xff]  ;;  %v700_v9 = vld [vmem:[%s1314_s0 + $0x28] sm:$0xff] }
   0x3   :  { %48 = vadd.xlane.f32.xlu0 %v47_v3  ;;  %54 = vadd.xlane.f32.xlu1 %v53_v4  ;;  %v56_v7 = vsel %vm46_vm0, %v686_v5, 0.0  ;;  %v59_v10 = vsel %vm46_vm0, %v695_v8, 0.0  ;;  %v62_v11 = vsel %vm46_vm0, %v700_v9, 0.0  ;;  %v709_v12 = vld [vmem:[%s1314_s0 + $0x30] sm:$0xff]  ;;  %v714_v13 = vld [vmem:[%s1314_s0 + $0x38] sm:$0xff]  ;;  %v723_v16 = vld [vmem:[%s1314_s0 + $0x40] sm:$0xff] }
   0x4   :  { %v65_v14 = vsel %vm46_vm0, %v709_v12, 0.0  ;;  %v68_v15 = vsel %vm46_vm0, %v714_v13, 0.0  ;;  %v728_v17 = vld [vmem:[%s1314_s0 + $0x48] sm:$0xff]  ;;  %v71_v18 = vsel %vm46_vm0, %v723_v16, 0.0  ;;  %v737_v20 = vld [vmem:[%s1314_s0 + $0x50] sm:$0xff]  ;;  %v742_v21 = vld [vmem:[%s1314_s0 + $0x58] sm:$0xff] }
   0x5   :  { %v74_v19 = vsel %vm46_vm0, %v728_v17, 0.0  ;;  %v77_v22 = vsel %vm46_vm0, %v737_v20, 0.0  ;;  %v80_v23 = vsel %vm46_vm0, %v742_v21, 0.0  ;;  %v751_v24 = vld [vmem:[%s1314_s0 + $0x60] sm:$0xff]  ;;  %v756_v25 = vld [vmem:[%s1314_s0 + $0x68] sm:$0xff]  ;;  %v765_v28 = vld [vmem:[%s1314_s0 + $0x70] sm:$0xff] }
   0x6   :  { %v83_v26 = vsel %vm46_vm0, %v751_v24, 0.0  ;;  %v86_v27 = vsel %vm46_vm0, %v756_v25, 0.0  ;;  %v770_v29 = vld [vmem:[%s1314_s0 + $0x78] sm:$0xff]  ;;  %v89_v30 = vsel %vm46_vm0, %v765_v28, 0.0  ;;  %v779_v32 = vld [vmem:[%s1314_s0 + $0x80] sm:$0xff]  ;;  %v784_v33 = vld [vmem:[%s1314_s0 + $0x88] sm:$0xff] }
   0x7   :  { %51 = vadd.xlane.f32.xlu0 %v50_v6  ;;  %57 = vadd.xlane.f32.xlu1 %v56_v7  ;;  %v92_v31 = vsel %vm46_vm0, %v770_v29, 0.0  ;;  %v95_v34 = vsel %vm46_vm0, %v779_v32, 0.0  ;;  %v98_v35 = vsel %vm46_vm0, %v784_v33, 0.0  ;;  %v793_v36 = vld [vmem:[%s1314_s0 + $0x90] sm:$0xff]  ;;  %v798_v37 = vld [vmem:[%s1314_s0 + $0x98] sm:$0xff]  ;;  %v807_v40 = vld [vmem:[%s1314_s0 + $0xa0] sm:$0xff] }
   0x8   :  { %v101_v38 = vsel %vm46_vm0, %v793_v36, 0.0  ;;  %v104_v39 = vsel %vm46_vm0, %v798_v37, 0.0  ;;  %v812_v41 = vld [vmem:[%s1314_s0 + $0xa8] sm:$0xff]  ;;  %v107_v42 = vsel %vm46_vm0, %v807_v40, 0.0  ;;  %v821_v44 = vld [vmem:[%s1314_s0 + $0xb0] sm:$0xff]  ;;  %v826_v45 = vld [vmem:[%s1314_s0 + $0xb8] sm:$0xff] }
   0x9   :  { %v110_v43 = vsel %vm46_vm0, %v812_v41, 0.0  ;;  %v113_v46 = vsel %vm46_vm0, %v821_v44, 0.0  ;;  %v116_v47 = vsel %vm46_vm0, %v826_v45, 0.0  ;;  %v835_v48 = vld [vmem:[%s1314_s0 + $0xc0] sm:$0xff]  ;;  %v840_v49 = vld [vmem:[%s1314_s0 + $0xc8] sm:$0xff]  ;;  %v849_v52 = vld [vmem:[%s1314_s0 + $0xd0] sm:$0xff] }
   0xa   :  { %v119_v50 = vsel %vm46_vm0, %v835_v48, 0.0  ;;  %v122_v51 = vsel %vm46_vm0, %v840_v49, 0.0  ;;  %v854_v53 = vld [vmem:[%s1314_s0 + $0xd8] sm:$0xff]  ;;  %v125_v54 = vsel %vm46_vm0, %v849_v52, 0.0  ;;  %v863_v56 = vld [vmem:[%s1314_s0 + $0xe0] sm:$0xff]  ;;  %v868_v57 = vld [vmem:[%s1314_s0 + $0xe8] sm:$0xff] }
   0xb   :  { %60 = vadd.xlane.f32.xlu0 %v59_v10  ;;  %63 = vadd.xlane.f32.xlu1 %v62_v11  ;;  %v128_v55 = vsel %vm46_vm0, %v854_v53, 0.0  ;;  %v131_v58 = vsel %vm46_vm0, %v863_v56, 0.0  ;;  %v134_v59 = vsel %vm46_vm0, %v868_v57, 0.0  ;;  %v877_v60 = vld [vmem:[%s1314_s0 + $0xf0] sm:$0xff]  ;;  %v882_v61 = vld [vmem:[%s1314_s0 + $0xf8] sm:$0xff] }
   0xc   :  { %v137_v62 = vsel %vm46_vm0, %v877_v60, 0.0  ;;  %v140_v63 = vsel %vm46_vm0, %v882_v61, 0.0 }
   0xf   :  { %66 = vadd.xlane.f32.xlu0 %v65_v14  ;;  %69 = vadd.xlane.f32.xlu1 %v68_v15 }
  0x13   :  { %72 = vadd.xlane.f32.xlu0 %v71_v18  ;;  %75 = vadd.xlane.f32.xlu1 %v74_v19 }
  0x17   :  { %78 = vadd.xlane.f32.xlu0 %v77_v22  ;;  %81 = vadd.xlane.f32.xlu1 %v80_v23 }
  0x1b   :  { %84 = vadd.xlane.f32.xlu0 %v83_v26  ;;  %87 = vadd.xlane.f32.xlu1 %v86_v27 }
  0x1f   :  { %90 = vadd.xlane.f32.xlu0 %v89_v30  ;;  %93 = vadd.xlane.f32.xlu1 %v92_v31 }
  0x23   :  { %96 = vadd.xlane.f32.xlu0 %v95_v34  ;;  %99 = vadd.xlane.f32.xlu1 %v98_v35 }
  0x27   :  { %102 = vadd.xlane.f32.xlu0 %v101_v38  ;;  %105 = vadd.xlane.f32.xlu1 %v104_v39 }
  0x2b   :  { %108 = vadd.xlane.f32.xlu0 %v107_v42  ;;  %111 = vadd.xlane.f32.xlu1 %v110_v43 }
  0x2f   :  { %114 = vadd.xlane.f32.xlu0 %v113_v46  ;;  %117 = vadd.xlane.f32.xlu1 %v116_v47 }
  0x33   :  { %120 = vadd.xlane.f32.xlu0 %v119_v50  ;;  %123 = vadd.xlane.f32.xlu1 %v122_v51 }
  0x37   :  { %126 = vadd.xlane.f32.xlu0 %v125_v54  ;;  %129 = vadd.xlane.f32.xlu1 %v128_v55 }
  0x3b   :  { %132 = vadd.xlane.f32.xlu0 %v131_v58  ;;  %135 = vadd.xlane.f32.xlu1 %v134_v59 }
  0x3f   :  { %138 = vadd.xlane.f32.xlu0 %v137_v62  ;;  %141 = vadd.xlane.f32.xlu1 %v140_v63 }
  0x90   :  { %v49_v3 = vpop.xlane.xlu0 %48  ;;  %v55_v4 = vpop.xlane.xlu1 %54 }
  0x91   :  { %v144_v6 = vmul.f32 0.015625, %v49_v3  ;;  %v146_v7 = vmul.f32 0.015625, %v55_v4 }
  0x93   :  { %v889_v10 = vsub.f32 %v667_v0, %v144_v6  ;;  %v892_v11 = vsub.f32 %v672_v1, %v146_v7 }
  0x94   :  { %v52_v14 = vpop.xlane.xlu0 %51  ;;  %v58_v15 = vpop.xlane.xlu1 %57 }
  0x95   :  { %v145_v18 = vmul.f32 0.015625, %v52_v14  ;;  %v147_v19 = vmul.f32 0.015625, %v58_v15  ;;  %v208_v22 = vmul.f32 %v889_v10, %v889_v10  ;;  %v210_v23 = vmul.f32 %v892_v11, %v892_v11 }
  0x97   :  { %v899_v26 = vsub.f32 %v677_v2, %v145_v18  ;;  %v902_v27 = vsub.f32 %v686_v5, %v147_v19  ;;  %v240_v0 = vsel %vm46_vm0, %v208_v22, 0.0  ;;  %v246_v31 = vsel %vm46_vm0, %v210_v23, 0.0 }
  0x98   :  { %241 = vadd.xlane.f32.xlu0 %v240_v0  ;;  %v61_v1 = vpop.xlane.xlu0 %60  ;;  %v64_v30 = vpop.xlane.xlu1 %63 }
  0x99   :  { %v148_v34 = vmul.f32 0.015625, %v61_v1  ;;  %v149_v35 = vmul.f32 0.015625, %v64_v30  ;;  %v209_v38 = vmul.f32 %v899_v26, %v899_v26  ;;  %v211_v39 = vmul.f32 %v902_v27, %v902_v27 }
  0x9b   :  { %v911_v2 = vsub.f32 %v695_v8, %v148_v34  ;;  %v914_v5 = vsub.f32 %v700_v9, %v149_v35  ;;  %v243_v42 = vsel %vm46_vm0, %v209_v38, 0.0  ;;  %v249_v47 = vsel %vm46_vm0, %v211_v39, 0.0 }
  0x9c   :  { %247 = vadd.xlane.f32.xlu0 %v246_v31  ;;  %244 = vadd.xlane.f32.xlu1 %v243_v42  ;;  %v67_v43 = vpop.xlane.xlu0 %66  ;;  %v70_v46 = vpop.xlane.xlu1 %69 }
  0x9d   :  { %v150_v50 = vmul.f32 0.015625, %v67_v43  ;;  %v151_v51 = vmul.f32 0.015625, %v70_v46  ;;  %v212_v54 = vmul.f32 %v911_v2, %v911_v2  ;;  %v213_v8 = vmul.f32 %v914_v5, %v914_v5 }
  0x9f   :  { %v923_v55 = vsub.f32 %v709_v12, %v150_v50  ;;  %v926_v9 = vsub.f32 %v714_v13, %v151_v51  ;;  %v252_v58 = vsel %vm46_vm0, %v212_v54, 0.0  ;;  %v255_v63 = vsel %vm46_vm0, %v213_v8, 0.0 }
  0xa0   :  { %250 = vadd.xlane.f32.xlu1 %v249_v47  ;;  %253 = vadd.xlane.f32.xlu0 %v252_v58  ;;  %v73_v59 = vpop.xlane.xlu0 %72  ;;  %v76_v62 = vpop.xlane.xlu1 %75 }
  0xa1   :  { %v152_v3 = vmul.f32 0.015625, %v73_v59  ;;  %v153_v4 = vmul.f32 0.015625, %v76_v62  ;;  %v214_v6 = vmul.f32 %v923_v55, %v923_v55  ;;  %v215_v12 = vmul.f32 %v926_v9, %v926_v9 }
  0xa3   :  { %v935_v7 = vsub.f32 %v723_v16, %v152_v3  ;;  %v938_v13 = vsub.f32 %v728_v17, %v153_v4  ;;  %v258_v14 = vsel %vm46_vm0, %v214_v6, 0.0  ;;  %v261_v19 = vsel %vm46_vm0, %v215_v12, 0.0 }
  0xa4   :  { %256 = vadd.xlane.f32.xlu1 %v255_v63  ;;  %259 = vadd.xlane.f32.xlu0 %v258_v14  ;;  %v79_v15 = vpop.xlane.xlu0 %78  ;;  %v82_v18 = vpop.xlane.xlu1 %81 }
  0xa5   :  { %v154_v22 = vmul.f32 0.015625, %v79_v15  ;;  %v155_v23 = vmul.f32 0.015625, %v82_v18  ;;  %v216_v0 = vmul.f32 %v935_v7, %v935_v7  ;;  %v217_v16 = vmul.f32 %v938_v13, %v938_v13 }
  0xa7   :  { %v947_v1 = vsub.f32 %v737_v20, %v154_v22  ;;  %v950_v17 = vsub.f32 %v742_v21, %v155_v23  ;;  %v264_v30 = vsel %vm46_vm0, %v216_v0, 0.0  ;;  %v267_v35 = vsel %vm46_vm0, %v217_v16, 0.0 }
  0xa8   :  { %262 = vadd.xlane.f32.xlu1 %v261_v19  ;;  %265 = vadd.xlane.f32.xlu0 %v264_v30  ;;  %v85_v31 = vpop.xlane.xlu0 %84  ;;  %v88_v34 = vpop.xlane.xlu1 %87 }
  0xa9   :  { %v156_v38 = vmul.f32 0.015625, %v85_v31  ;;  %v157_v39 = vmul.f32 0.015625, %v88_v34  ;;  %v218_v42 = vmul.f32 %v947_v1, %v947_v1  ;;  %v219_v20 = vmul.f32 %v950_v17, %v950_v17 }
  0xab   :  { %v959_v43 = vsub.f32 %v751_v24, %v156_v38  ;;  %v962_v21 = vsub.f32 %v756_v25, %v157_v39  ;;  %v270_v46 = vsel %vm46_vm0, %v218_v42, 0.0  ;;  %v273_v51 = vsel %vm46_vm0, %v219_v20, 0.0 }
  0xac   :  { %268 = vadd.xlane.f32.xlu1 %v267_v35  ;;  %271 = vadd.xlane.f32.xlu0 %v270_v46  ;;  %v91_v47 = vpop.xlane.xlu0 %90  ;;  %v94_v50 = vpop.xlane.xlu1 %93 }
  0xad   :  { %v158_v54 = vmul.f32 0.015625, %v91_v47  ;;  %v159_v8 = vmul.f32 0.015625, %v94_v50  ;;  %v220_v58 = vmul.f32 %v959_v43, %v959_v43  ;;  %v221_v24 = vmul.f32 %v962_v21, %v962_v21 }
  0xaf   :  { %v971_v59 = vsub.f32 %v765_v28, %v158_v54  ;;  %v974_v25 = vsub.f32 %v770_v29, %v159_v8  ;;  %v276_v62 = vsel %vm46_vm0, %v220_v58, 0.0  ;;  %v279_v4 = vsel %vm46_vm0, %v221_v24, 0.0 }
  0xb0   :  { %274 = vadd.xlane.f32.xlu1 %v273_v51  ;;  %277 = vadd.xlane.f32.xlu0 %v276_v62  ;;  %v97_v63 = vpop.xlane.xlu0 %96  ;;  %v100_v3 = vpop.xlane.xlu1 %99 }
  0xb1   :  { %v160_v6 = vmul.f32 0.015625, %v97_v63  ;;  %v161_v12 = vmul.f32 0.015625, %v100_v3  ;;  %v222_v14 = vmul.f32 %v971_v59, %v971_v59  ;;  %v223_v28 = vmul.f32 %v974_v25, %v974_v25 }
  0xb3   :  { %v983_v15 = vsub.f32 %v779_v32, %v160_v6  ;;  %v986_v29 = vsub.f32 %v784_v33, %v161_v12  ;;  %v282_v18 = vsel %vm46_vm0, %v222_v14, 0.0  ;;  %v285_v23 = vsel %vm46_vm0, %v223_v28, 0.0 }
  0xb4   :  { %280 = vadd.xlane.f32.xlu1 %v279_v4  ;;  %283 = vadd.xlane.f32.xlu0 %v282_v18  ;;  %v103_v19 = vpop.xlane.xlu0 %102  ;;  %v106_v22 = vpop.xlane.xlu1 %105 }
  0xb5   :  { %v162_v0 = vmul.f32 0.015625, %v103_v19  ;;  %v163_v16 = vmul.f32 0.015625, %v106_v22  ;;  %v224_v30 = vmul.f32 %v983_v15, %v983_v15  ;;  %v225_v32 = vmul.f32 %v986_v29, %v986_v29 }
  0xb7   :  { %v995_v31 = vsub.f32 %v793_v36, %v162_v0  ;;  %v998_v33 = vsub.f32 %v798_v37, %v163_v16  ;;  %v288_v34 = vsel %vm46_vm0, %v224_v30, 0.0  ;;  %v291_v39 = vsel %vm46_vm0, %v225_v32, 0.0 }
  0xb8   :  { %286 = vadd.xlane.f32.xlu1 %v285_v23  ;;  %289 = vadd.xlane.f32.xlu0 %v288_v34  ;;  %v109_v35 = vpop.xlane.xlu0 %108  ;;  %v112_v38 = vpop.xlane.xlu1 %111 }
  0xb9   :  { %v164_v42 = vmul.f32 0.015625, %v109_v35  ;;  %v165_v20 = vmul.f32 0.015625, %v112_v38  ;;  %v226_v46 = vmul.f32 %v995_v31, %v995_v31  ;;  %v227_v36 = vmul.f32 %v998_v33, %v998_v33 }
  0xbb   :  { %v1007_v47 = vsub.f32 %v807_v40, %v164_v42  ;;  %v1010_v37 = vsub.f32 %v812_v41, %v165_v20  ;;  %v294_v50 = vsel %vm46_vm0, %v226_v46, 0.0  ;;  %v297_v8 = vsel %vm46_vm0, %v227_v36, 0.0 }
  0xbc   :  { %292 = vadd.xlane.f32.xlu1 %v291_v39  ;;  %295 = vadd.xlane.f32.xlu0 %v294_v50  ;;  %v115_v51 = vpop.xlane.xlu0 %114  ;;  %v118_v54 = vpop.xlane.xlu1 %117 }
  0xbd   :  { %v166_v58 = vmul.f32 0.015625, %v115_v51  ;;  %v167_v24 = vmul.f32 0.015625, %v118_v54  ;;  %v228_v62 = vmul.f32 %v1007_v47, %v1007_v47  ;;  %v229_v40 = vmul.f32 %v1010_v37, %v1010_v37 }
  0xbf   :  { %v1019_v63 = vsub.f32 %v821_v44, %v166_v58  ;;  %v1022_v41 = vsub.f32 %v826_v45, %v167_v24  ;;  %v300_v3 = vsel %vm46_vm0, %v228_v62, 0.0  ;;  %v303_v12 = vsel %vm46_vm0, %v229_v40, 0.0 }
  0xc0   :  { %298 = vadd.xlane.f32.xlu1 %v297_v8  ;;  %301 = vadd.xlane.f32.xlu0 %v300_v3  ;;  %v121_v4 = vpop.xlane.xlu0 %120  ;;  %v124_v6 = vpop.xlane.xlu1 %123 }
  0xc1   :  { %v168_v14 = vmul.f32 0.015625, %v121_v4  ;;  %v169_v28 = vmul.f32 0.015625, %v124_v6  ;;  %v230_v18 = vmul.f32 %v1019_v63, %v1019_v63  ;;  %v231_v44 = vmul.f32 %v1022_v41, %v1022_v41 }
  0xc3   :  { %v1031_v19 = vsub.f32 %v835_v48, %v168_v14  ;;  %v1034_v45 = vsub.f32 %v840_v49, %v169_v28  ;;  %v306_v22 = vsel %vm46_vm0, %v230_v18, 0.0  ;;  %v309_v16 = vsel %vm46_vm0, %v231_v44, 0.0 }
  0xc4   :  { %304 = vadd.xlane.f32.xlu1 %v303_v12  ;;  %307 = vadd.xlane.f32.xlu0 %v306_v22  ;;  %v127_v23 = vpop.xlane.xlu0 %126  ;;  %v130_v0 = vpop.xlane.xlu1 %129 }
  0xc5   :  { %v170_v30 = vmul.f32 0.015625, %v127_v23  ;;  %v171_v32 = vmul.f32 0.015625, %v130_v0  ;;  %v232_v34 = vmul.f32 %v1031_v19, %v1031_v19  ;;  %v233_v48 = vmul.f32 %v1034_v45, %v1034_v45 }
  0xc7   :  { %v1043_v35 = vsub.f32 %v849_v52, %v170_v30  ;;  %v1046_v49 = vsub.f32 %v854_v53, %v171_v32  ;;  %v312_v38 = vsel %vm46_vm0, %v232_v34, 0.0  ;;  %v315_v20 = vsel %vm46_vm0, %v233_v48, 0.0 }
  0xc8   :  { %310 = vadd.xlane.f32.xlu1 %v309_v16  ;;  %313 = vadd.xlane.f32.xlu0 %v312_v38  ;;  %v133_v39 = vpop.xlane.xlu0 %132  ;;  %v136_v42 = vpop.xlane.xlu1 %135 }
  0xc9   :  { %v172_v46 = vmul.f32 0.015625, %v133_v39  ;;  %v173_v36 = vmul.f32 0.015625, %v136_v42  ;;  %v234_v50 = vmul.f32 %v1043_v35, %v1043_v35  ;;  %v235_v52 = vmul.f32 %v1046_v49, %v1046_v49 }
  0xcb   :  { %v1055_v51 = vsub.f32 %v863_v56, %v172_v46  ;;  %v1058_v53 = vsub.f32 %v868_v57, %v173_v36  ;;  %v318_v54 = vsel %vm46_vm0, %v234_v50, 0.0  ;;  %v321_v24 = vsel %vm46_vm0, %v235_v52, 0.0 }
  0xcc   :  { %316 = vadd.xlane.f32.xlu1 %v315_v20  ;;  %319 = vadd.xlane.f32.xlu0 %v318_v54  ;;  %v139_v8 = vpop.xlane.xlu0 %138  ;;  %v142_v58 = vpop.xlane.xlu1 %141 }
  0xcd   :  { %v174_v62 = vmul.f32 0.015625, %v139_v8  ;;  %v175_v40 = vmul.f32 0.015625, %v142_v58  ;;  %v236_v3 = vmul.f32 %v1055_v51, %v1055_v51  ;;  %v237_v56 = vmul.f32 %v1058_v53, %v1058_v53  ;;  %v1083_v58 = vld [vmem:[%s1315_s1] ss:$0 sm:$0xff] }
  0xcf   :  { %v1067_v4 = vsub.f32 %v877_v60, %v174_v62  ;;  %v1070_v57 = vsub.f32 %v882_v61, %v175_v40  ;;  %v324_v6 = vsel %vm46_vm0, %v236_v3, 0.0  ;;  %v327_v12 = vsel %vm46_vm0, %v237_v56, 0.0 }
  0xd0   :  { %322 = vadd.xlane.f32.xlu1 %v321_v24  ;;  %325 = vadd.xlane.f32.xlu0 %v324_v6  ;;  %v1089_v6 = vld [vmem:[%s1316_s2] ss:$0 sm:$0xff] }
  0xd1   :  { %v238_v14 = vmul.f32 %v1067_v4, %v1067_v4  ;;  %v239_v28 = vmul.f32 %v1070_v57, %v1070_v57 }
  0xd3   :  { %v330_v18 = vsel %vm46_vm0, %v238_v14, 0.0  ;;  %v333_v60 = vsel %vm46_vm0, %v239_v28, 0.0 }
  0xd4   :  { %328 = vadd.xlane.f32.xlu1 %v327_v12  ;;  %331 = vadd.xlane.f32.xlu0 %v330_v18 }
  0xd8   :  { %334 = vadd.xlane.f32.xlu1 %v333_v60 }
 0x125   :  { %v242_v61 = vpop.xlane.xlu0 %241 }
 0x126   :  { %v336_v44 = vmul.f32 0.015625, %v242_v61 }
 0x128   :  { %v368_v22 = vadd.f32 1e-05, %v336_v44 }
 0x129   :  { %v245_v23 = vpop.xlane.xlu1 %244  ;;  %v248_v0 = vpop.xlane.xlu0 %247 }
 0x12a   :  { %580 = vrsqrt.f32 %v368_v22  ;;  %v337_v16 = vmul.f32 0.015625, %v245_v23  ;;  %v338_v30 = vmul.f32 0.015625, %v248_v0 }
 0x12c   :  { %v369_v32 = vadd.f32 1e-05, %v337_v16  ;;  %v370_v34 = vadd.f32 1e-05, %v338_v30 }
 0x12d   :  { %v251_v48 = vpop.xlane.xlu1 %250  ;;  %v254_v38 = vpop.xlane.xlu0 %253 }
 0x12e   :  { %582 = vrsqrt.f32 %v369_v32  ;;  %v339_v39 = vmul.f32 0.015625, %v251_v48  ;;  %v340_v42 = vmul.f32 0.015625, %v254_v38 }
 0x12f   :  { %584 = vrsqrt.f32 %v370_v34 }
 0x130   :  { %v371_v20 = vadd.f32 1e-05, %v339_v39  ;;  %v372_v46 = vadd.f32 1e-05, %v340_v42 }
 0x131   :  { %v257_v36 = vpop.xlane.xlu1 %256  ;;  %v260_v50 = vpop.xlane.xlu0 %259 }
 0x132   :  { %586 = vrsqrt.f32 %v371_v20  ;;  %v341_v52 = vmul.f32 0.015625, %v257_v36  ;;  %v342_v54 = vmul.f32 0.015625, %v260_v50 }
 0x133   :  { %588 = vrsqrt.f32 %v372_v46 }
 0x134   :  { %v581_v8 = vpop.eup %580  ;;  %v373_v24 = vadd.f32 1e-05, %v341_v52  ;;  %v374_v62 = vadd.f32 1e-05, %v342_v54 }
 0x135   :  { %v432_v40 = vmul.f32 %v581_v8, %v889_v10  ;;  %v263_v3 = vpop.xlane.xlu1 %262  ;;  %v266_v56 = vpop.xlane.xlu0 %265 }
 0x136   :  { %590 = vrsqrt.f32 %v373_v24  ;;  %v343_v12 = vmul.f32 0.015625, %v263_v3  ;;  %v344_v14 = vmul.f32 0.015625, %v266_v56 }
 0x137   :  { %v471_v28 = vmul.f32 %v1083_v58, %v432_v40  ;;  %592 = vrsqrt.f32 %v374_v62 }
 0x138   :  { %v583_v18 = vpop.eup %582  ;;  %v375_v60 = vadd.f32 1e-05, %v343_v12  ;;  %v376_v61 = vadd.f32 1e-05, %v344_v14 }
 0x139   :  { %v585_v44 = vpop.eup %584  ;;  %v510_v22 = vadd.f32 %v1089_v6, %v471_v28  ;;  %v433_v10 = vmul.f32 %v583_v18, %v899_v26  ;;  %v269_v23 = vpop.xlane.xlu1 %268 }
 0x13a   :  { %v272_v0 = vpop.xlane.xlu0 %271  ;;  %v434_v16 = vmul.f32 %v585_v44, %v892_v11  ;;  %594 = vrsqrt.f32 %v375_v60  ;;  %v345_v30 = vmul.f32 0.015625, %v269_v23 }
 0x13b   :  { %v346_v32 = vmul.f32 0.015625, %v272_v0  ;;  %542 = vst.msk [vmem:[%s1317_s3] sm:$0xff] %vm46_vm0, %v510_v22  ;;  %v472_v34 = vmul.f32 %v1083_v58, %v433_v10  ;;  %596 = vrsqrt.f32 %v376_v61 }
 0x13c   :  { %v587_v48 = vpop.eup %586  ;;  %v473_v38 = vmul.f32 %v1083_v58, %v434_v16  ;;  %v377_v39 = vadd.f32 1e-05, %v345_v30 }
 0x13d   :  { %v378_v26 = vadd.f32 1e-05, %v346_v32  ;;  %v589_v42 = vpop.eup %588  ;;  %v511_v20 = vadd.f32 %v1089_v6, %v472_v34  ;;  %v435_v11 = vmul.f32 %v587_v48, %v902_v27  ;;  %v275_v46 = vpop.xlane.xlu1 %274 }
 0x13e   :  { %v278_v36 = vpop.xlane.xlu0 %277  ;;  %v512_v50 = vadd.f32 %v1089_v6, %v473_v38  ;;  %v436_v52 = vmul.f32 %v589_v42, %v911_v2  ;;  %598 = vrsqrt.f32 %v377_v39  ;;  %v347_v54 = vmul.f32 0.015625, %v275_v46 }
 0x13f   :  { %543 = vst.msk [vmem:[%s1317_s3 + $0x8] sm:$0xff] %vm46_vm0, %v511_v20  ;;  %v474_v8 = vmul.f32 %v1083_v58, %v435_v11  ;;  %600 = vrsqrt.f32 %v378_v26  ;;  %v348_v24 = vmul.f32 0.015625, %v278_v36 }
 0x140   :  { %v591_v62 = vpop.eup %590  ;;  %544 = vst.msk [vmem:[%s1317_s3 + $0x10] sm:$0xff] %vm46_vm0, %v512_v50  ;;  %v475_v27 = vmul.f32 %v1083_v58, %v436_v52  ;;  %v379_v2 = vadd.f32 1e-05, %v347_v54 }
 0x141   :  { %v593_v40 = vpop.eup %592  ;;  %v513_v3 = vadd.f32 %v1089_v6, %v474_v8  ;;  %v437_v56 = vmul.f32 %v591_v62, %v914_v5  ;;  %v380_v12 = vadd.f32 1e-05, %v348_v24  ;;  %v281_v14 = vpop.xlane.xlu1 %280 }
 0x142   :  { %v284_v28 = vpop.xlane.xlu0 %283  ;;  %v514_v18 = vadd.f32 %v1089_v6, %v475_v27  ;;  %v438_v60 = vmul.f32 %v593_v40, %v923_v55  ;;  %602 = vrsqrt.f32 %v379_v2  ;;  %v349_v61 = vmul.f32 0.015625, %v281_v14 }
 0x143   :  { %545 = vst.msk [vmem:[%s1317_s3 + $0x18] sm:$0xff] %vm46_vm0, %v513_v3  ;;  %v476_v44 = vmul.f32 %v1083_v58, %v437_v56  ;;  %604 = vrsqrt.f32 %v380_v12  ;;  %v350_v22 = vmul.f32 0.015625, %v284_v28 }
 0x144   :  { %v595_v10 = vpop.eup %594  ;;  %546 = vst.msk [vmem:[%s1317_s3 + $0x20] sm:$0xff] %vm46_vm0, %v514_v18  ;;  %v477_v5 = vmul.f32 %v1083_v58, %v438_v60  ;;  %v381_v55 = vadd.f32 1e-05, %v349_v61 }
 0x145   :  { %v597_v23 = vpop.eup %596  ;;  %v515_v0 = vadd.f32 %v1089_v6, %v476_v44  ;;  %v439_v16 = vmul.f32 %v595_v10, %v926_v9  ;;  %v382_v30 = vadd.f32 1e-05, %v350_v22  ;;  %v287_v32 = vpop.xlane.xlu1 %286 }
 0x146   :  { %v290_v34 = vpop.xlane.xlu0 %289  ;;  %v516_v48 = vadd.f32 %v1089_v6, %v477_v5  ;;  %v440_v38 = vmul.f32 %v597_v23, %v935_v7  ;;  %606 = vrsqrt.f32 %v381_v55  ;;  %v351_v39 = vmul.f32 0.015625, %v287_v32 }
 0x147   :  { %547 = vst.msk [vmem:[%s1317_s3 + $0x28] sm:$0xff] %vm46_vm0, %v515_v0  ;;  %v478_v26 = vmul.f32 %v1083_v58, %v439_v16  ;;  %608 = vrsqrt.f32 %v382_v30  ;;  %v352_v42 = vmul.f32 0.015625, %v290_v34 }
 0x148   :  { %v599_v20 = vpop.eup %598  ;;  %548 = vst.msk [vmem:[%s1317_s3 + $0x30] sm:$0xff] %vm46_vm0, %v516_v48  ;;  %v479_v9 = vmul.f32 %v1083_v58, %v440_v38  ;;  %v383_v7 = vadd.f32 1e-05, %v351_v39 }
 0x149   :  { %v601_v11 = vpop.eup %600  ;;  %v517_v46 = vadd.f32 %v1089_v6, %v478_v26  ;;  %v441_v36 = vmul.f32 %v599_v20, %v938_v13  ;;  %v384_v50 = vadd.f32 1e-05, %v352_v42  ;;  %v293_v52 = vpop.xlane.xlu1 %292 }
 0x14a   :  { %v296_v54 = vpop.xlane.xlu0 %295  ;;  %v518_v8 = vadd.f32 %v1089_v6, %v479_v9  ;;  %v442_v24 = vmul.f32 %v601_v11, %v947_v1  ;;  %610 = vrsqrt.f32 %v383_v7  ;;  %v353_v62 = vmul.f32 0.015625, %v293_v52 }
 0x14b   :  { %549 = vst.msk [vmem:[%s1317_s3 + $0x38] sm:$0xff] %vm46_vm0, %v517_v46  ;;  %v480_v27 = vmul.f32 %v1083_v58, %v441_v36  ;;  %612 = vrsqrt.f32 %v384_v50  ;;  %v354_v2 = vmul.f32 0.015625, %v296_v54 }
 0x14c   :  { %v603_v40 = vpop.eup %602  ;;  %550 = vst.msk [vmem:[%s1317_s3 + $0x40] sm:$0xff] %vm46_vm0, %v518_v8  ;;  %v481_v13 = vmul.f32 %v1083_v58, %v442_v24  ;;  %v385_v1 = vadd.f32 1e-05, %v353_v62 }
 0x14d   :  { %v605_v3 = vpop.eup %604  ;;  %v519_v56 = vadd.f32 %v1089_v6, %v480_v27  ;;  %v443_v12 = vmul.f32 %v603_v40, %v950_v17  ;;  %v386_v14 = vadd.f32 1e-05, %v354_v2  ;;  %v299_v28 = vpop.xlane.xlu1 %298 }
 0x14e   :  { %v302_v18 = vpop.xlane.xlu0 %301  ;;  %v520_v60 = vadd.f32 %v1089_v6, %v481_v13  ;;  %v444_v61 = vmul.f32 %v605_v3, %v959_v43  ;;  %614 = vrsqrt.f32 %v385_v1  ;;  %v355_v44 = vmul.f32 0.015625, %v299_v28 }
 0x14f   :  { %551 = vst.msk [vmem:[%s1317_s3 + $0x48] sm:$0xff] %vm46_vm0, %v519_v56  ;;  %v482_v22 = vmul.f32 %v1083_v58, %v443_v12  ;;  %616 = vrsqrt.f32 %v386_v14  ;;  %v356_v10 = vmul.f32 0.015625, %v302_v18 }
 0x150   :  { %v607_v5 = vpop.eup %606  ;;  %552 = vst.msk [vmem:[%s1317_s3 + $0x50] sm:$0xff] %vm46_vm0, %v520_v60  ;;  %v483_v17 = vmul.f32 %v1083_v58, %v444_v61  ;;  %v387_v43 = vadd.f32 1e-05, %v355_v44 }
 0x151   :  { %v609_v55 = vpop.eup %608  ;;  %v521_v23 = vadd.f32 %v1089_v6, %v482_v22  ;;  %v445_v0 = vmul.f32 %v607_v5, %v962_v21  ;;  %v388_v16 = vadd.f32 1e-05, %v356_v10  ;;  %v305_v30 = vpop.xlane.xlu1 %304 }
 0x152   :  { %v308_v32 = vpop.xlane.xlu0 %307  ;;  %v522_v34 = vadd.f32 %v1089_v6, %v483_v17  ;;  %v446_v48 = vmul.f32 %v609_v55, %v971_v59  ;;  %618 = vrsqrt.f32 %v387_v43  ;;  %v357_v38 = vmul.f32 0.015625, %v305_v30 }
 0x153   :  { %553 = vst.msk [vmem:[%s1317_s3 + $0x58] sm:$0xff] %vm46_vm0, %v521_v23  ;;  %v484_v39 = vmul.f32 %v1083_v58, %v445_v0  ;;  %620 = vrsqrt.f32 %v388_v16  ;;  %v358_v26 = vmul.f32 0.015625, %v308_v32 }
 0x154   :  { %v611_v42 = vpop.eup %610  ;;  %554 = vst.msk [vmem:[%s1317_s3 + $0x60] sm:$0xff] %vm46_vm0, %v522_v34  ;;  %v485_v21 = vmul.f32 %v1083_v58, %v446_v48  ;;  %v389_v59 = vadd.f32 1e-05, %v357_v38 }
 0x155   :  { %v613_v20 = vpop.eup %612  ;;  %v523_v9 = vadd.f32 %v1089_v6, %v484_v39  ;;  %v447_v7 = vmul.f32 %v611_v42, %v974_v25  ;;  %v390_v11 = vadd.f32 1e-05, %v358_v26  ;;  %v311_v46 = vpop.xlane.xlu1 %310 }
 0x156   :  { %v314_v36 = vpop.xlane.xlu0 %313  ;;  %v524_v50 = vadd.f32 %v1089_v6, %v485_v21  ;;  %v448_v52 = vmul.f32 %v613_v20, %v983_v15  ;;  %622 = vrsqrt.f32 %v389_v59  ;;  %v359_v54 = vmul.f32 0.015625, %v311_v46 }
 0x157   :  { %555 = vst.msk [vmem:[%s1317_s3 + $0x68] sm:$0xff] %vm46_vm0, %v523_v9  ;;  %v486_v8 = vmul.f32 %v1083_v58, %v447_v7  ;;  %624 = vrsqrt.f32 %v390_v11  ;;  %v360_v24 = vmul.f32 0.015625, %v314_v36 }
 0x158   :  { %v615_v62 = vpop.eup %614  ;;  %556 = vst.msk [vmem:[%s1317_s3 + $0x70] sm:$0xff] %vm46_vm0, %v524_v50  ;;  %v487_v25 = vmul.f32 %v1083_v58, %v448_v52  ;;  %v391_v15 = vadd.f32 1e-05, %v359_v54 }
 0x159   :  { %v617_v27 = vpop.eup %616  ;;  %v525_v2 = vadd.f32 %v1089_v6, %v486_v8  ;;  %v449_v40 = vmul.f32 %v615_v62, %v986_v29  ;;  %v392_v13 = vadd.f32 1e-05, %v360_v24  ;;  %v317_v1 = vpop.xlane.xlu1 %316 }
 0x15a   :  { %v320_v3 = vpop.xlane.xlu0 %319  ;;  %v526_v56 = vadd.f32 %v1089_v6, %v487_v25  ;;  %v450_v12 = vmul.f32 %v617_v27, %v995_v31  ;;  %626 = vrsqrt.f32 %v391_v15  ;;  %v361_v14 = vmul.f32 0.015625, %v317_v1 }
 0x15b   :  { %557 = vst.msk [vmem:[%s1317_s3 + $0x78] sm:$0xff] %vm46_vm0, %v525_v2  ;;  %v488_v28 = vmul.f32 %v1083_v58, %v449_v40  ;;  %628 = vrsqrt.f32 %v392_v13  ;;  %v362_v18 = vmul.f32 0.015625, %v320_v3 }
 0x15c   :  { %v619_v60 = vpop.eup %618  ;;  %558 = vst.msk [vmem:[%s1317_s3 + $0x80] sm:$0xff] %vm46_vm0, %v526_v56  ;;  %v489_v29 = vmul.f32 %v1083_v58, %v450_v12  ;;  %v393_v31 = vadd.f32 1e-05, %v361_v14 }
 0x15d   :  { %v621_v61 = vpop.eup %620  ;;  %v527_v44 = vadd.f32 %v1089_v6, %v488_v28  ;;  %v451_v22 = vmul.f32 %v619_v60, %v998_v33  ;;  %v394_v10 = vadd.f32 1e-05, %v362_v18  ;;  %v323_v5 = vpop.xlane.xlu1 %322 }
 0x15e   :  { %v326_v17 = vpop.xlane.xlu0 %325  ;;  %v528_v43 = vadd.f32 %v1089_v6, %v489_v29  ;;  %v452_v55 = vmul.f32 %v621_v61, %v1007_v47  ;;  %630 = vrsqrt.f32 %v393_v31  ;;  %v363_v23 = vmul.f32 0.015625, %v323_v5 }
 0x15f   :  { %559 = vst.msk [vmem:[%s1317_s3 + $0x88] sm:$0xff] %vm46_vm0, %v527_v44  ;;  %v490_v0 = vmul.f32 %v1083_v58, %v451_v22  ;;  %632 = vrsqrt.f32 %v394_v10  ;;  %v364_v16 = vmul.f32 0.015625, %v326_v17 }
 0x160   :  { %v623_v30 = vpop.eup %622  ;;  %560 = vst.msk [vmem:[%s1317_s3 + $0x90] sm:$0xff] %vm46_vm0, %v528_v43  ;;  %v491_v33 = vmul.f32 %v1083_v58, %v452_v55  ;;  %v395_v47 = vadd.f32 1e-05, %v363_v23 }
 0x161   :  { %v625_v32 = vpop.eup %624  ;;  %v529_v34 = vadd.f32 %v1089_v6, %v490_v0  ;;  %v453_v48 = vmul.f32 %v623_v30, %v1010_v37  ;;  %v396_v38 = vadd.f32 1e-05, %v364_v16  ;;  %v329_v39 = vpop.xlane.xlu1 %328 }
 0x162   :  { %v332_v26 = vpop.xlane.xlu0 %331  ;;  %v530_v42 = vadd.f32 %v1089_v6, %v491_v33  ;;  %v454_v21 = vmul.f32 %v625_v32, %v1019_v63  ;;  %634 = vrsqrt.f32 %v395_v47  ;;  %v365_v59 = vmul.f32 0.015625, %v329_v39 }
 0x163   :  { %561 = vst.msk [vmem:[%s1317_s3 + $0x98] sm:$0xff] %vm46_vm0, %v529_v34  ;;  %v492_v20 = vmul.f32 %v1083_v58, %v453_v48  ;;  %636 = vrsqrt.f32 %v396_v38  ;;  %v366_v9 = vmul.f32 0.015625, %v332_v26 }
 0x164   :  { %v627_v7 = vpop.eup %626  ;;  %562 = vst.msk [vmem:[%s1317_s3 + $0xa0] sm:$0xff] %vm46_vm0, %v530_v42  ;;  %v493_v37 = vmul.f32 %v1083_v58, %v454_v21  ;;  %v397_v63 = vadd.f32 1e-05, %v365_v59 }
 0x165   :  { %v629_v11 = vpop.eup %628  ;;  %v531_v46 = vadd.f32 %v1089_v6, %v492_v20  ;;  %v455_v36 = vmul.f32 %v627_v7, %v1022_v41  ;;  %v398_v50 = vadd.f32 1e-05, %v366_v9  ;;  %v335_v52 = vpop.xlane.xlu1 %334 }
 0x166   :  { %v532_v54 = vadd.f32 %v1089_v6, %v493_v37  ;;  %v456_v8 = vmul.f32 %v629_v11, %v1031_v19  ;;  %638 = vrsqrt.f32 %v397_v63  ;;  %v367_v24 = vmul.f32 0.015625, %v335_v52 }
 0x167   :  { %563 = vst.msk [vmem:[%s1317_s3 + $0xa8] sm:$0xff] %vm46_vm0, %v531_v46  ;;  %v494_v62 = vmul.f32 %v1083_v58, %v455_v36  ;;  %640 = vrsqrt.f32 %v398_v50 }
 0x168   :  { %v631_v25 = vpop.eup %630  ;;  %564 = vst.msk [vmem:[%s1317_s3 + $0xb0] sm:$0xff] %vm46_vm0, %v532_v54  ;;  %v495_v41 = vmul.f32 %v1083_v58, %v456_v8  ;;  %v399_v15 = vadd.f32 1e-05, %v367_v24 }
 0x169   :  { %v633_v19 = vpop.eup %632  ;;  %v533_v27 = vadd.f32 %v1089_v6, %v494_v62  ;;  %v457_v2 = vmul.f32 %v631_v25, %v1034_v45 }
 0x16a   :  { %v534_v40 = vadd.f32 %v1089_v6, %v495_v41  ;;  %v458_v13 = vmul.f32 %v633_v19, %v1043_v35  ;;  %642 = vrsqrt.f32 %v399_v15 }
 0x16b   :  { %565 = vst.msk [vmem:[%s1317_s3 + $0xb8] sm:$0xff] %vm46_vm0, %v533_v27  ;;  %v496_v1 = vmul.f32 %v1083_v58, %v457_v2 }
 0x16c   :  { %v635_v3 = vpop.eup %634  ;;  %566 = vst.msk [vmem:[%s1317_s3 + $0xc0] sm:$0xff] %vm46_vm0, %v534_v40  ;;  %v497_v45 = vmul.f32 %v1083_v58, %v458_v13 }
 0x16d   :  { %v637_v56 = vpop.eup %636  ;;  %v535_v12 = vadd.f32 %v1089_v6, %v496_v1  ;;  %v459_v35 = vmul.f32 %v635_v3, %v1046_v49 }
 0x16e   :  { %v536_v14 = vadd.f32 %v1089_v6, %v497_v45  ;;  %v460_v28 = vmul.f32 %v637_v56, %v1055_v51 }
 0x16f   :  { %567 = vst.msk [vmem:[%s1317_s3 + $0xc8] sm:$0xff] %vm46_vm0, %v535_v12  ;;  %v498_v18 = vmul.f32 %v1083_v58, %v459_v35 }
 0x170   :  { %v639_v60 = vpop.eup %638  ;;  %568 = vst.msk [vmem:[%s1317_s3 + $0xd0] sm:$0xff] %vm46_vm0, %v536_v14  ;;  %v499_v29 = vmul.f32 %v1083_v58, %v460_v28 }
 0x171   :  { %v641_v49 = vpop.eup %640  ;;  %v537_v31 = vadd.f32 %v1089_v6, %v498_v18  ;;  %v461_v51 = vmul.f32 %v639_v60, %v1058_v53 }
 0x172   :  { %v538_v61 = vadd.f32 %v1089_v6, %v499_v29  ;;  %v462_v44 = vmul.f32 %v641_v49, %v1067_v4 }
 0x173   :  { %569 = vst.msk [vmem:[%s1317_s3 + $0xd8] sm:$0xff] %vm46_vm0, %v537_v31  ;;  %v500_v22 = vmul.f32 %v1083_v58, %v461_v51 }
 0x174   :  { %v643_v10 = vpop.eup %642  ;;  %570 = vst.msk [vmem:[%s1317_s3 + $0xe0] sm:$0xff] %vm46_vm0, %v538_v61  ;;  %v501_v5 = vmul.f32 %v1083_v58, %v462_v44 }
 0x175   :  { %v539_v53 = vadd.f32 %v1089_v6, %v500_v22  ;;  %v463_v17 = vmul.f32 %v643_v10, %v1070_v57 }
 0x176   :  { %v540_v4 = vadd.f32 %v1089_v6, %v501_v5 }
 0x177   :  { %571 = vst.msk [vmem:[%s1317_s3 + $0xe8] sm:$0xff] %vm46_vm0, %v539_v53  ;;  %v502_v43 = vmul.f32 %v1083_v58, %v463_v17 }
 0x178   :  { %572 = vst.msk [vmem:[%s1317_s3 + $0xf0] sm:$0xff] %vm46_vm0, %v540_v4 }
 0x179   :  { %v541_v55 = vadd.f32 %v1089_v6, %v502_v43 }
 0x17b   :  { %573 = vst.msk [vmem:[%s1317_s3 + $0xf8] sm:$0xff] %vm46_vm0, %v541_v55 }

// kernel: vision_transformer_forward.3
= control target key start
LH: loop header
LB: loop body
LE: loop exit
PB: predicated region body
PF: predicated region fallthrough
CT: control target
= control target key end

     0   :  { %vm16_vm0 = vcmask 523264   ;;  %v345_v1 = vmov 0.0   ;;  %vm97_vm1 = vcmask 392192   ;;  %s522_s1 = inlined_call_operand.vmem [shape: bf16[48,64], index: 1, kind: input, shape index: {}]   ;;  %s523_s0 = inlined_call_operand.vmem [shape: f32[128,48], index: 0, kind: input, shape index: {}]   ;;  %s524_s2 = inlined_call_operand.vmem [shape: f32[128,64], index: 2, kind: output, shape index: {}]  }
   0x1   :  { %v342_v0 = vld [vmem:[%s522_s1] sm:$0xff]   ;;  %19 = vst.msk [vmem:[#allocation2 + $0x10] sm:$0xff] %vm16_vm0, %v345_v1  ;;  %17 = vst.msk [vmem:[#allocation2] sm:$0xff] %vm16_vm0, %v345_v1  ;;  %v343_v2 = vld [vmem:[%s522_s1 + $0x8] sm:$0xff]  }
   0x2   :  { %18 = vst.msk [vmem:[#allocation2 + $0x8] sm:$0xff] %vm16_vm0, %v345_v1  ;;  %20 = vst.msk [vmem:[#allocation2 + $0x18] sm:$0xff] %vm16_vm0, %v345_v1  ;;  %313 = vmatprep.subr.bf16.mxu0 %v342_v0  ;;  %335 = vmatprep.subr.bf16.mxu1 %v342_v0  ;;  %v49_v3 = vld [vmem:[%s523_s0] sm:$0xff]  ;;  %v50_v4 = vld [vmem:[%s523_s0 + $0x8] sm:$0xff] }
   0x3   :  { %21 = vst.msk [vmem:[#allocation2 + $0x20] sm:$0xff] %vm16_vm0, %v345_v1  ;;  %22 = vst.msk [vmem:[#allocation2 + $0x28] sm:$0xff] %vm16_vm0, %v345_v1  ;;  %314 = vmatpush3.bf16.msra.mxu0 %v342_v0  ;;  %338 = vmatpush3.bf16.msra.mxu1 %v342_v0  ;;  %v57_v5 = vld [vmem:[%s523_s0 + $0x40] sm:$0xff]  ;;  %v344_v6 = vld [vmem:[%s522_s1 + $0x10] sm:$0xff]   ;;  %v65_v7 = vpack.c.bf16 %v50_v4, %v49_v3 }
   0x4   :  { %23 = vst.msk [vmem:[#allocation2 + $0x30] sm:$0xff] %vm16_vm0, %v345_v1  ;;  %24 = vst.msk [vmem:[#allocation2 + $0x38] sm:$0xff] %vm16_vm0, %v345_v1  ;;  %315 = vmatprep.subr.bf16.mxu0 %v343_v2  ;;  %336 = vmatprep.subr.bf16.mxu1 %v343_v2  ;;  %v58_v8 = vld [vmem:[%s523_s0 + $0x48] sm:$0xff]  ;;  %v51_v10 = vld [vmem:[%s523_s0 + $0x10] sm:$0xff] }
   0x5   :  { %25 = vst.msk [vmem:[#allocation2 + $0x40] sm:$0xff] %vm16_vm0, %v345_v1  ;;  %26 = vst.msk [vmem:[#allocation2 + $0x48] sm:$0xff] %vm16_vm0, %v345_v1  ;;  %v69_v9 = vpack.c.bf16 %v58_v8, %v57_v5  ;;  %319 = vmatprep.mubr.msk.bf16.mxu0 %vm97_vm1, %v65_v7  ;;  %v52_v11 = vld [vmem:[%s523_s0 + $0x18] sm:$0xff]  ;;  %v59_v12 = vld [vmem:[%s523_s0 + $0x50] sm:$0xff] }
   0x6   :  { %27 = vst.msk [vmem:[#allocation2 + $0x50] sm:$0xff] %vm16_vm0, %v345_v1  ;;  %28 = vst.msk [vmem:[#allocation2 + $0x58] sm:$0xff] %vm16_vm0, %v345_v1  ;;  %v60_v13 = vld [vmem:[%s523_s0 + $0x58] sm:$0xff]  ;;  %v53_v14 = vld [vmem:[%s523_s0 + $0x20] sm:$0xff]  ;;  %v66_v18 = vpack.c.bf16 %v52_v11, %v51_v10 }
   0x7   :  { %29 = vst.msk [vmem:[#allocation2 + $0x60] sm:$0xff] %vm16_vm0, %v345_v1  ;;  %30 = vst.msk [vmem:[#allocation2 + $0x68] sm:$0xff] %vm16_vm0, %v345_v1  ;;  %316 = vmatpush3.bf16.msra.mxu0 %v343_v2  ;;  %339 = vmatpush3.bf16.msra.mxu1 %v343_v2  ;;  %v54_v15 = vld [vmem:[%s523_s0 + $0x28] sm:$0xff]  ;;  %v61_v16 = vld [vmem:[%s523_s0 + $0x60] sm:$0xff]  ;;  %v70_v19 = vpack.c.bf16 %v60_v13, %v59_v12 }
   0x8   :  { %31 = vst.msk [vmem:[#allocation2 + $0x70] sm:$0xff] %vm16_vm0, %v345_v1  ;;  %32 = vst.msk [vmem:[#allocation2 + $0x78] sm:$0xff] %vm16_vm0, %v345_v1  ;;  %317 = vmatprep.subr.bf16.mxu0 %v344_v6  ;;  %337 = vmatprep.subr.bf16.mxu1 %v344_v6  ;;  %v62_v17 = vld [vmem:[%s523_s0 + $0x68] sm:$0xff]  ;;  %v67_v20 = vpack.c.bf16 %v54_v15, %v53_v14  ;;  %v55_v22 = vld [vmem:[%s523_s0 + $0x30] sm:$0xff] }
   0x9   :  { %327 = vmatprep.mubr.msk.bf16.mxu1 %vm97_vm1, %v69_v9  ;;  %v71_v21 = vpack.c.bf16 %v62_v17, %v61_v16  ;;  %v56_v23 = vld [vmem:[%s523_s0 + $0x38] sm:$0xff]  ;;  %v63_v24 = vld [vmem:[%s523_s0 + $0x70] sm:$0xff]  ;;  %v33_v30 = vld [vmem:[#allocation2] sm:$0xff] }
   0xa   :  { %v64_v25 = vld [vmem:[%s523_s0 + $0x78] sm:$0xff]  ;;  %v68_v26 = vpack.c.bf16 %v56_v23, %v55_v22  ;;  %v35_v28 = vld [vmem:[#allocation2 + $0x10] sm:$0xff]  ;;  %v34_v40 = vld [vmem:[#allocation2 + $0x8] sm:$0xff] }
   0xb   :  { %318 = vmatpush3.bf16.msra.mxu0 %v344_v6  ;;  %340 = vmatpush3.bf16.msra.mxu1 %v344_v6  ;;  %v72_v27 = vpack.c.bf16 %v64_v25, %v63_v24  ;;  %v36_v34 = vld [vmem:[#allocation2 + $0x18] sm:$0xff]  ;;  %v39_v52 = vld [vmem:[#allocation2 + $0x30] sm:$0xff]  ;;  %v37_v54 = vld [vmem:[#allocation2 + $0x20] sm:$0xff] }
   0xc   :  { %v41_v31 = vld [vmem:[#allocation2 + $0x40] sm:$0xff]  ;;  %v42_v41 = vld [vmem:[#allocation2 + $0x48] sm:$0xff]  ;;  %v40_v58 = vld [vmem:[#allocation2 + $0x38] sm:$0xff] }
   0xd   :  { %v43_v29 = vld [vmem:[#allocation2 + $0x50] sm:$0xff]  ;;  %v44_v35 = vld [vmem:[#allocation2 + $0x58] sm:$0xff]  ;;  %v38_v0 = vld [vmem:[#allocation2 + $0x28] sm:$0xff] }
   0xe   :  { %320 = vmatmul.mubr.msk.bf16.vlgmr.msra.gmra.mrb[0].mxu0 %vm97_vm1, %v66_v18  ;;  %328 = vmatmul.mubr.msk.bf16.vlgmr.msra.gmra.mrb[0].mxu1 %vm97_vm1, %v70_v19  ;;  %v45_v55 = vld [vmem:[#allocation2 + $0x60] sm:$0xff]  ;;  %v46_v1 = vld [vmem:[#allocation2 + $0x68] sm:$0xff] }
   0xf   :  { %323 = vmatprep.mubr.msk.bf16.mxu0 %vm97_vm1, %v67_v20  ;;  %331 = vmatprep.mubr.msk.bf16.mxu1 %vm97_vm1, %v71_v21  ;;  %v47_v53 = vld [vmem:[#allocation2 + $0x70] sm:$0xff]  ;;  %v48_v59 = vld [vmem:[#allocation2 + $0x78] sm:$0xff] }
  0x16   :  { %324 = vmatmul.mubr.msk.bf16.gmra.mrb[4].mxu0 %vm97_vm1, %v68_v26  ;;  %332 = vmatmul.mubr.msk.bf16.gmra.mrb[4].mxu1 %vm97_vm1, %v72_v27 }
  0xe1   :  { %v321_v32 = vpop.f32.mrb[0].mxu0  ;;  %v329_v33 = vpop.f32.mrb[0].mxu1 }
  0xe2   :  { %v221_v36 = vadd.f32 %v321_v32, %v35_v28  ;;  %v229_v37 = vadd.f32 %v329_v33, %v43_v29  ;;  %v156_v38 = vpop.f32.mrb[1].mxu0  ;;  %v188_v39 = vpop.f32.mrb[1].mxu1 }
  0xe3   :  { %v219_v42 = vadd.f32 %v156_v38, %v33_v30  ;;  %v227_v43 = vadd.f32 %v188_v39, %v41_v31  ;;  %v322_v44 = vpop.f32.mrb[2].mxu0  ;;  %v330_v45 = vpop.f32.mrb[2].mxu1 }
  0xe4   :  { %238 = vst.msk [vmem:[#allocation2 + $0x10] sm:$0xff] %vm16_vm0, %v221_v36  ;;  %246 = vst.msk [vmem:[#allocation2 + $0x50] sm:$0xff] %vm16_vm0, %v229_v37  ;;  %v222_v46 = vadd.f32 %v322_v44, %v36_v34  ;;  %v230_v47 = vadd.f32 %v330_v45, %v44_v35  ;;  %v159_v48 = vpop.f32.mrb[3].mxu0  ;;  %v191_v49 = vpop.f32.mrb[3].mxu1 }
  0xe5   :  { %236 = vst.msk [vmem:[#allocation2] sm:$0xff] %vm16_vm0, %v219_v42  ;;  %244 = vst.msk [vmem:[#allocation2 + $0x40] sm:$0xff] %vm16_vm0, %v227_v43  ;;  %v220_v50 = vadd.f32 %v159_v48, %v34_v40  ;;  %v228_v51 = vadd.f32 %v191_v49, %v42_v41 }
  0xe6   :  { %239 = vst.msk [vmem:[#allocation2 + $0x18] sm:$0xff] %vm16_vm0, %v222_v46  ;;  %247 = vst.msk [vmem:[#allocation2 + $0x58] sm:$0xff] %vm16_vm0, %v230_v47 }
  0xe7   :  { %237 = vst.msk [vmem:[#allocation2 + $0x8] sm:$0xff] %vm16_vm0, %v220_v50  ;;  %245 = vst.msk [vmem:[#allocation2 + $0x48] sm:$0xff] %vm16_vm0, %v228_v51 }
  0xe9   :  { %v325_v56 = vpop.f32.mrb[4].mxu0  ;;  %v333_v57 = vpop.f32.mrb[4].mxu1 }
  0xea   :  { %v225_v60 = vadd.f32 %v325_v56, %v39_v52  ;;  %v233_v61 = vadd.f32 %v333_v57, %v47_v53  ;;  %v172_v62 = vpop.f32.mrb[5].mxu0  ;;  %v204_v63 = vpop.f32.mrb[5].mxu1 }
  0xeb   :  { %v257_v2 = vld [vmem:[#allocation2 + $0x10] sm:$0xff]  ;;  %v223_v4 = vadd.f32 %v172_v62, %v37_v54  ;;  %v231_v5 = vadd.f32 %v204_v63, %v45_v55  ;;  %v326_v6 = vpop.f32.mrb[6].mxu0  ;;  %v334_v7 = vpop.f32.mrb[6].mxu1 }
  0xec   :  { %v265_v3 = vld [vmem:[#allocation2 + $0x50] sm:$0xff]  ;;  %273 = vst.msk [vmem:[%s524_s2 + $0x10] sm:$0xff] %vm16_vm0, %v257_v2  ;;  %v255_v8 = vld [vmem:[#allocation2] sm:$0xff]  ;;  %242 = vst.msk [vmem:[#allocation2 + $0x30] sm:$0xff] %vm16_vm0, %v225_v60  ;;  %v226_v10 = vadd.f32 %v326_v6, %v40_v58  ;;  %v234_v11 = vadd.f32 %v334_v7, %v48_v59  ;;  %v175_v12 = vpop.f32.mrb[7].mxu0  ;;  %v207_v13 = vpop.f32.mrb[7].mxu1 }
  0xed   :  { %281 = vst.msk [vmem:[%s524_s2 + $0x50] sm:$0xff] %vm16_vm0, %v265_v3  ;;  %v263_v9 = vld [vmem:[#allocation2 + $0x40] sm:$0xff]  ;;  %250 = vst.msk [vmem:[#allocation2 + $0x70] sm:$0xff] %vm16_vm0, %v233_v61  ;;  %v258_v14 = vld [vmem:[#allocation2 + $0x18] sm:$0xff]  ;;  %v224_v16 = vadd.f32 %v175_v12, %v38_v0  ;;  %v232_v17 = vadd.f32 %v207_v13, %v46_v1 }
  0xee   :  { %271 = vst.msk [vmem:[%s524_s2] sm:$0xff] %vm16_vm0, %v255_v8  ;;  %279 = vst.msk [vmem:[%s524_s2 + $0x40] sm:$0xff] %vm16_vm0, %v263_v9  ;;  %v266_v15 = vld [vmem:[#allocation2 + $0x58] sm:$0xff]  ;;  %v256_v18 = vld [vmem:[#allocation2 + $0x8] sm:$0xff] }
  0xef   :  { %240 = vst.msk [vmem:[#allocation2 + $0x20] sm:$0xff] %vm16_vm0, %v223_v4  ;;  %248 = vst.msk [vmem:[#allocation2 + $0x60] sm:$0xff] %vm16_vm0, %v231_v5  ;;  %v264_v19 = vld [vmem:[#allocation2 + $0x48] sm:$0xff] }
  0xf0   :  { %274 = vst.msk [vmem:[%s524_s2 + $0x18] sm:$0xff] %vm16_vm0, %v258_v14  ;;  %282 = vst.msk [vmem:[%s524_s2 + $0x58] sm:$0xff] %vm16_vm0, %v266_v15 }
  0xf1   :  { %243 = vst.msk [vmem:[#allocation2 + $0x38] sm:$0xff] %vm16_vm0, %v226_v10  ;;  %251 = vst.msk [vmem:[#allocation2 + $0x78] sm:$0xff] %vm16_vm0, %v234_v11 }
  0xf2   :  { %272 = vst.msk [vmem:[%s524_s2 + $0x8] sm:$0xff] %vm16_vm0, %v256_v18  ;;  %280 = vst.msk [vmem:[%s524_s2 + $0x48] sm:$0xff] %vm16_vm0, %v264_v19 }
  0xf3   :  { %241 = vst.msk [vmem:[#allocation2 + $0x28] sm:$0xff] %vm16_vm0, %v224_v16  ;;  %249 = vst.msk [vmem:[#allocation2 + $0x68] sm:$0xff] %vm16_vm0, %v232_v17  ;;  %v261_v20 = vld [vmem:[#allocation2 + $0x30] sm:$0xff] }
  0xf4   :  { %v269_v21 = vld [vmem:[#allocation2 + $0x70] sm:$0xff]  ;;  %277 = vst.msk [vmem:[%s524_s2 + $0x30] sm:$0xff] %vm16_vm0, %v261_v20 }
  0xf5   :  { %285 = vst.msk [vmem:[%s524_s2 + $0x70] sm:$0xff] %vm16_vm0, %v269_v21 }
  0xf6   :  { %v259_v22 = vld [vmem:[#allocation2 + $0x20] sm:$0xff] }
  0xf7   :  { %v267_v23 = vld [vmem:[#allocation2 + $0x60] sm:$0xff]  ;;  %275 = vst.msk [vmem:[%s524_s2 + $0x20] sm:$0xff] %vm16_vm0, %v259_v22 }
  0xf8   :  { %283 = vst.msk [vmem:[%s524_s2 + $0x60] sm:$0xff] %vm16_vm0, %v267_v23  ;;  %v262_v24 = vld [vmem:[#allocation2 + $0x38] sm:$0xff] }
  0xf9   :  { %v270_v25 = vld [vmem:[#allocation2 + $0x78] sm:$0xff]  ;;  %278 = vst.msk [vmem:[%s524_s2 + $0x38] sm:$0xff] %vm16_vm0, %v262_v24 }
  0xfa   :  { %286 = vst.msk [vmem:[%s524_s2 + $0x78] sm:$0xff] %vm16_vm0, %v270_v25  ;;  %v260_v26 = vld [vmem:[#allocation2 + $0x28] sm:$0xff] }
  0xfb   :  { %v268_v27 = vld [vmem:[#allocation2 + $0x68] sm:$0xff]  ;;  %276 = vst.msk [vmem:[%s524_s2 + $0x28] sm:$0xff] %vm16_vm0, %v260_v26 }
  0xfc   :  { %284 = vst.msk [vmem:[%s524_s2 + $0x68] sm:$0xff] %vm16_vm0, %v268_v27 }

// kernel: closed_call.16
= control target key start
LH: loop header
LB: loop body
LE: loop exit
PB: predicated region body
PF: predicated region fallthrough
CT: control target
= control target key end

     0   :  { %vm57_vm0 = vcmask 523264   ;;  %vm1095_vm1 = vcmask 1043456   ;;  %vm1096_vm2 = vcmask 523268   ;;  %s2177_s0 = inlined_call_operand.vmem [shape: f32[256,64], index: 0, kind: input, shape index: {}]   ;;  %s2178_s3 = inlined_call_operand.vmem [shape: bf16[64,192], index: 3, kind: input, shape index: {}]   ;;  %s2179_s1 = inlined_call_operand.vmem [shape: f32[1,64], index: 1, kind: input, shape index: {}]   ;;  %s2180_s2 = inlined_call_operand.vmem [shape: f32[1,64], index: 2, kind: input, shape index: {}]   ;;  %s2181_s4 = inlined_call_operand.vmem [shape: f32[1,192], index: 4, kind: input, shape index: {}]   ;;  %s2182_s5 = inlined_call_operand.vmem [shape: bf16[256,192], index: 5, kind: output, shape index: {}]  }
   0x1   :  { %v1339_v0 = vld [vmem:[%s2177_s0] sm:$0xff]  ;;  %v1349_v2 = vld [vmem:[%s2177_s0 + $0x8] sm:$0xff]  ;;  %v1367_v8 = vld [vmem:[%s2177_s0 + $0x10] sm:$0xff] }
   0x2   :  { %v1344_v1 = vld [vmem:[%s2177_s0 + $0x80] sm:$0xff]  ;;  %v58_v3 = vsel %vm57_vm0, %v1339_v0, 0.0  ;;  %v1358_v5 = vld [vmem:[%s2177_s0 + $0x88] sm:$0xff]  ;;  %v61_v6 = vsel %vm57_vm0, %v1349_v2, 0.0  ;;  %v1372_v9 = vld [vmem:[%s2177_s0 + $0x18] sm:$0xff]  ;;  %v64_v10 = vsel %vm57_vm0, %v1367_v8, 0.0 }
   0x3   :  { %v106_v4 = vsel %vm57_vm0, %v1344_v1, 0.0  ;;  %59 = vadd.xlane.f32.xlu0 %v58_v3  ;;  %v109_v7 = vsel %vm57_vm0, %v1358_v5, 0.0  ;;  %v67_v11 = vsel %vm57_vm0, %v1372_v9, 0.0  ;;  %v1381_v12 = vld [vmem:[%s2177_s0 + $0x90] sm:$0xff]  ;;  %v1386_v13 = vld [vmem:[%s2177_s0 + $0x98] sm:$0xff]  ;;  %v1395_v16 = vld [vmem:[%s2177_s0 + $0x20] sm:$0xff] }
   0x4   :  { %107 = vadd.xlane.f32.xlu1 %v106_v4  ;;  %v112_v14 = vsel %vm57_vm0, %v1381_v12, 0.0  ;;  %v115_v15 = vsel %vm57_vm0, %v1386_v13, 0.0  ;;  %v1400_v17 = vld [vmem:[%s2177_s0 + $0x28] sm:$0xff]  ;;  %v70_v18 = vsel %vm57_vm0, %v1395_v16, 0.0  ;;  %v1409_v20 = vld [vmem:[%s2177_s0 + $0xa0] sm:$0xff]  ;;  %v1423_v24 = vld [vmem:[%s2177_s0 + $0x30] sm:$0xff] }
   0x5   :  { %v73_v19 = vsel %vm57_vm0, %v1400_v17, 0.0  ;;  %v1414_v21 = vld [vmem:[%s2177_s0 + $0xa8] sm:$0xff]  ;;  %v118_v22 = vsel %vm57_vm0, %v1409_v20, 0.0  ;;  %v1428_v25 = vld [vmem:[%s2177_s0 + $0x38] sm:$0xff]  ;;  %v76_v26 = vsel %vm57_vm0, %v1423_v24, 0.0  ;;  %v1437_v28 = vld [vmem:[%s2177_s0 + $0xb0] sm:$0xff] }
   0x6   :  { %v121_v23 = vsel %vm57_vm0, %v1414_v21, 0.0  ;;  %v79_v27 = vsel %vm57_vm0, %v1428_v25, 0.0  ;;  %v1442_v29 = vld [vmem:[%s2177_s0 + $0xb8] sm:$0xff]  ;;  %v124_v30 = vsel %vm57_vm0, %v1437_v28, 0.0  ;;  %v1451_v32 = vld [vmem:[%s2177_s0 + $0x40] sm:$0xff]  ;;  %v1456_v33 = vld [vmem:[%s2177_s0 + $0x48] sm:$0xff] }
   0x7   :  { %62 = vadd.xlane.f32.xlu0 %v61_v6  ;;  %v127_v31 = vsel %vm57_vm0, %v1442_v29, 0.0  ;;  %v82_v34 = vsel %vm57_vm0, %v1451_v32, 0.0  ;;  %v85_v35 = vsel %vm57_vm0, %v1456_v33, 0.0  ;;  %v1465_v36 = vld [vmem:[%s2177_s0 + $0xc0] sm:$0xff]  ;;  %v1470_v37 = vld [vmem:[%s2177_s0 + $0xc8] sm:$0xff]  ;;  %v1479_v40 = vld [vmem:[%s2177_s0 + $0x50] sm:$0xff] }
   0x8   :  { %110 = vadd.xlane.f32.xlu1 %v109_v7  ;;  %v130_v38 = vsel %vm57_vm0, %v1465_v36, 0.0  ;;  %v133_v39 = vsel %vm57_vm0, %v1470_v37, 0.0  ;;  %v1484_v41 = vld [vmem:[%s2177_s0 + $0x58] sm:$0xff]  ;;  %v88_v42 = vsel %vm57_vm0, %v1479_v40, 0.0  ;;  %v1493_v44 = vld [vmem:[%s2177_s0 + $0xd0] sm:$0xff]  ;;  %v1507_v48 = vld [vmem:[%s2177_s0 + $0x60] sm:$0xff] }
   0x9   :  { %v91_v43 = vsel %vm57_vm0, %v1484_v41, 0.0  ;;  %v1498_v45 = vld [vmem:[%s2177_s0 + $0xd8] sm:$0xff]  ;;  %v136_v46 = vsel %vm57_vm0, %v1493_v44, 0.0  ;;  %v1512_v49 = vld [vmem:[%s2177_s0 + $0x68] sm:$0xff]  ;;  %v94_v50 = vsel %vm57_vm0, %v1507_v48, 0.0  ;;  %v1521_v52 = vld [vmem:[%s2177_s0 + $0xe0] sm:$0xff] }
   0xa   :  { %v139_v47 = vsel %vm57_vm0, %v1498_v45, 0.0  ;;  %v97_v51 = vsel %vm57_vm0, %v1512_v49, 0.0  ;;  %v1526_v53 = vld [vmem:[%s2177_s0 + $0xe8] sm:$0xff]  ;;  %v142_v54 = vsel %vm57_vm0, %v1521_v52, 0.0  ;;  %v1535_v56 = vld [vmem:[%s2177_s0 + $0x70] sm:$0xff]  ;;  %v1540_v57 = vld [vmem:[%s2177_s0 + $0x78] sm:$0xff] }
   0xb   :  { %65 = vadd.xlane.f32.xlu0 %v64_v10  ;;  %v145_v55 = vsel %vm57_vm0, %v1526_v53, 0.0  ;;  %v100_v58 = vsel %vm57_vm0, %v1535_v56, 0.0  ;;  %v103_v59 = vsel %vm57_vm0, %v1540_v57, 0.0  ;;  %v1549_v60 = vld [vmem:[%s2177_s0 + $0xf0] sm:$0xff]  ;;  %v1554_v61 = vld [vmem:[%s2177_s0 + $0xf8] sm:$0xff]  ;;  %vm1951_vm3 = vmor %vm1096_vm2, %vm1095_vm1 }
   0xc   :  { %68 = vadd.xlane.f32.xlu1 %v67_v11  ;;  %v148_v62 = vsel %vm57_vm0, %v1549_v60, 0.0  ;;  %v151_v63 = vsel %vm57_vm0, %v1554_v61, 0.0 }
   0xf   :  { %113 = vadd.xlane.f32.xlu0 %v112_v14 }
  0x10   :  { %116 = vadd.xlane.f32.xlu1 %v115_v15 }
  0x13   :  { %71 = vadd.xlane.f32.xlu0 %v70_v18 }
  0x14   :  { %74 = vadd.xlane.f32.xlu1 %v73_v19 }
  0x17   :  { %119 = vadd.xlane.f32.xlu0 %v118_v22 }
  0x18   :  { %122 = vadd.xlane.f32.xlu1 %v121_v23 }
  0x1b   :  { %77 = vadd.xlane.f32.xlu0 %v76_v26 }
  0x1c   :  { %80 = vadd.xlane.f32.xlu1 %v79_v27 }
  0x1f   :  { %125 = vadd.xlane.f32.xlu0 %v124_v30 }
  0x20   :  { %128 = vadd.xlane.f32.xlu1 %v127_v31 }
  0x23   :  { %83 = vadd.xlane.f32.xlu0 %v82_v34 }
  0x24   :  { %86 = vadd.xlane.f32.xlu1 %v85_v35 }
  0x27   :  { %131 = vadd.xlane.f32.xlu0 %v130_v38 }
  0x28   :  { %134 = vadd.xlane.f32.xlu1 %v133_v39 }
  0x2b   :  { %89 = vadd.xlane.f32.xlu0 %v88_v42 }
  0x2c   :  { %92 = vadd.xlane.f32.xlu1 %v91_v43 }
  0x2f   :  { %137 = vadd.xlane.f32.xlu0 %v136_v46 }
  0x30   :  { %140 = vadd.xlane.f32.xlu1 %v139_v47 }
  0x33   :  { %95 = vadd.xlane.f32.xlu0 %v94_v50 }
  0x34   :  { %98 = vadd.xlane.f32.xlu1 %v97_v51 }
  0x37   :  { %143 = vadd.xlane.f32.xlu0 %v142_v54 }
  0x38   :  { %146 = vadd.xlane.f32.xlu1 %v145_v55 }
  0x3b   :  { %101 = vadd.xlane.f32.xlu0 %v100_v58 }
  0x3c   :  { %104 = vadd.xlane.f32.xlu1 %v103_v59 }
  0x3f   :  { %149 = vadd.xlane.f32.xlu0 %v148_v62 }
  0x40   :  { %152 = vadd.xlane.f32.xlu1 %v151_v63 }
  0x90   :  { %v60_v3 = vpop.xlane.xlu0 %59 }
  0x91   :  { %v108_v4 = vpop.xlane.xlu1 %107  ;;  %v155_v6 = vmul.f32 0.015625, %v60_v3 }
  0x92   :  { %v171_v7 = vmul.f32 0.015625, %v108_v4 }
  0x93   :  { %v1561_v10 = vsub.f32 %v1339_v0, %v155_v6 }
  0x94   :  { %v1564_v11 = vsub.f32 %v1344_v1, %v171_v7  ;;  %v63_v14 = vpop.xlane.xlu0 %62 }
  0x95   :  { %v111_v15 = vpop.xlane.xlu1 %110  ;;  %v156_v18 = vmul.f32 0.015625, %v63_v14  ;;  %v219_v22 = vmul.f32 %v1561_v10, %v1561_v10 }
  0x96   :  { %v172_v19 = vmul.f32 0.015625, %v111_v15  ;;  %v235_v23 = vmul.f32 %v1564_v11, %v1564_v11 }
  0x97   :  { %v1571_v26 = vsub.f32 %v1349_v2, %v156_v18  ;;  %v251_v0 = vsel %vm57_vm0, %v219_v22, 0.0 }
  0x98   :  { %v1574_v27 = vsub.f32 %v1358_v5, %v172_v19  ;;  %252 = vadd.xlane.f32.xlu0 %v251_v0  ;;  %v66_v1 = vpop.xlane.xlu0 %65  ;;  %v299_v31 = vsel %vm57_vm0, %v235_v23, 0.0 }
  0x99   :  { %v69_v30 = vpop.xlane.xlu1 %68  ;;  %v157_v34 = vmul.f32 0.015625, %v66_v1  ;;  %v220_v38 = vmul.f32 %v1571_v26, %v1571_v26 }
  0x9a   :  { %v158_v35 = vmul.f32 0.015625, %v69_v30  ;;  %v236_v39 = vmul.f32 %v1574_v27, %v1574_v27 }
  0x9b   :  { %v1583_v2 = vsub.f32 %v1367_v8, %v157_v34  ;;  %v254_v42 = vsel %vm57_vm0, %v220_v38, 0.0 }
  0x9c   :  { %v1586_v5 = vsub.f32 %v1372_v9, %v158_v35  ;;  %300 = vadd.xlane.f32.xlu0 %v299_v31  ;;  %255 = vadd.xlane.f32.xlu1 %v254_v42  ;;  %v114_v43 = vpop.xlane.xlu0 %113  ;;  %v302_v47 = vsel %vm57_vm0, %v236_v39, 0.0 }
  0x9d   :  { %v117_v46 = vpop.xlane.xlu1 %116  ;;  %v173_v50 = vmul.f32 0.015625, %v114_v43  ;;  %v221_v54 = vmul.f32 %v1583_v2, %v1583_v2 }
  0x9e   :  { %v174_v51 = vmul.f32 0.015625, %v117_v46  ;;  %v222_v8 = vmul.f32 %v1586_v5, %v1586_v5 }
  0x9f   :  { %v1595_v55 = vsub.f32 %v1381_v12, %v173_v50  ;;  %v257_v58 = vsel %vm57_vm0, %v221_v54, 0.0 }
  0xa0   :  { %v1598_v9 = vsub.f32 %v1386_v13, %v174_v51  ;;  %303 = vadd.xlane.f32.xlu1 %v302_v47  ;;  %258 = vadd.xlane.f32.xlu0 %v257_v58  ;;  %v72_v59 = vpop.xlane.xlu0 %71  ;;  %v260_v63 = vsel %vm57_vm0, %v222_v8, 0.0 }
  0xa1   :  { %v75_v62 = vpop.xlane.xlu1 %74  ;;  %v159_v3 = vmul.f32 0.015625, %v72_v59  ;;  %v237_v6 = vmul.f32 %v1595_v55, %v1595_v55 }
  0xa2   :  { %v160_v4 = vmul.f32 0.015625, %v75_v62  ;;  %v238_v12 = vmul.f32 %v1598_v9, %v1598_v9 }
  0xa3   :  { %v1607_v7 = vsub.f32 %v1395_v16, %v159_v3  ;;  %v305_v14 = vsel %vm57_vm0, %v237_v6, 0.0 }
  0xa4   :  { %v1610_v13 = vsub.f32 %v1400_v17, %v160_v4  ;;  %261 = vadd.xlane.f32.xlu1 %v260_v63  ;;  %306 = vadd.xlane.f32.xlu0 %v305_v14  ;;  %v120_v15 = vpop.xlane.xlu0 %119  ;;  %v308_v19 = vsel %vm57_vm0, %v238_v12, 0.0 }
  0xa5   :  { %v123_v18 = vpop.xlane.xlu1 %122  ;;  %v175_v22 = vmul.f32 0.015625, %v120_v15  ;;  %v223_v0 = vmul.f32 %v1607_v7, %v1607_v7 }
  0xa6   :  { %v176_v23 = vmul.f32 0.015625, %v123_v18  ;;  %v224_v16 = vmul.f32 %v1610_v13, %v1610_v13 }
  0xa7   :  { %v1619_v1 = vsub.f32 %v1409_v20, %v175_v22  ;;  %v263_v30 = vsel %vm57_vm0, %v223_v0, 0.0 }
  0xa8   :  { %v1622_v17 = vsub.f32 %v1414_v21, %v176_v23  ;;  %309 = vadd.xlane.f32.xlu1 %v308_v19  ;;  %264 = vadd.xlane.f32.xlu0 %v263_v30  ;;  %v78_v31 = vpop.xlane.xlu0 %77  ;;  %v266_v35 = vsel %vm57_vm0, %v224_v16, 0.0 }
  0xa9   :  { %v81_v34 = vpop.xlane.xlu1 %80  ;;  %v161_v38 = vmul.f32 0.015625, %v78_v31  ;;  %v239_v42 = vmul.f32 %v1619_v1, %v1619_v1 }
  0xaa   :  { %v162_v39 = vmul.f32 0.015625, %v81_v34  ;;  %v240_v20 = vmul.f32 %v1622_v17, %v1622_v17 }
  0xab   :  { %v1631_v43 = vsub.f32 %v1423_v24, %v161_v38  ;;  %v311_v46 = vsel %vm57_vm0, %v239_v42, 0.0  ;;  %v601_v42 = vld [vmem:[%s2178_s3] sm:$0xff] }
  0xac   :  { %v1634_v21 = vsub.f32 %v1428_v25, %v162_v39  ;;  %267 = vadd.xlane.f32.xlu1 %v266_v35  ;;  %312 = vadd.xlane.f32.xlu0 %v311_v46  ;;  %v126_v47 = vpop.xlane.xlu0 %125  ;;  %v314_v51 = vsel %vm57_vm0, %v240_v20, 0.0 }
  0xad   :  { %v129_v50 = vpop.xlane.xlu1 %128  ;;  %v177_v54 = vmul.f32 0.015625, %v126_v47  ;;  %v225_v58 = vmul.f32 %v1631_v43, %v1631_v43 }
  0xae   :  { %v178_v8 = vmul.f32 0.015625, %v129_v50  ;;  %v226_v24 = vmul.f32 %v1634_v21, %v1634_v21 }
  0xaf   :  { %v1643_v59 = vsub.f32 %v1437_v28, %v177_v54  ;;  %v269_v62 = vsel %vm57_vm0, %v225_v58, 0.0 }
  0xb0   :  { %v1646_v25 = vsub.f32 %v1442_v29, %v178_v8  ;;  %315 = vadd.xlane.f32.xlu1 %v314_v51  ;;  %270 = vadd.xlane.f32.xlu0 %v269_v62  ;;  %v84_v63 = vpop.xlane.xlu0 %83  ;;  %v272_v4 = vsel %vm57_vm0, %v226_v24, 0.0 }
  0xb1   :  { %v87_v3 = vpop.xlane.xlu1 %86  ;;  %v163_v6 = vmul.f32 0.015625, %v84_v63  ;;  %v241_v14 = vmul.f32 %v1643_v59, %v1643_v59 }
  0xb2   :  { %v164_v12 = vmul.f32 0.015625, %v87_v3  ;;  %v242_v28 = vmul.f32 %v1646_v25, %v1646_v25  ;;  %v603_v3 = vld [vmem:[%s2178_s3 + $0x10] sm:$0xff] }
  0xb3   :  { %v1655_v15 = vsub.f32 %v1451_v32, %v163_v6  ;;  %v317_v18 = vsel %vm57_vm0, %v241_v14, 0.0 }
  0xb4   :  { %v1658_v29 = vsub.f32 %v1456_v33, %v164_v12  ;;  %273 = vadd.xlane.f32.xlu1 %v272_v4  ;;  %318 = vadd.xlane.f32.xlu0 %v317_v18  ;;  %v132_v19 = vpop.xlane.xlu0 %131  ;;  %v320_v23 = vsel %vm57_vm0, %v242_v28, 0.0 }
  0xb5   :  { %v135_v22 = vpop.xlane.xlu1 %134  ;;  %v179_v0 = vmul.f32 0.015625, %v132_v19  ;;  %v227_v30 = vmul.f32 %v1655_v15, %v1655_v15 }
  0xb6   :  { %v180_v16 = vmul.f32 0.015625, %v135_v22  ;;  %v228_v32 = vmul.f32 %v1658_v29, %v1658_v29 }
  0xb7   :  { %v1667_v31 = vsub.f32 %v1465_v36, %v179_v0  ;;  %v275_v34 = vsel %vm57_vm0, %v227_v30, 0.0  ;;  %v602_v36 = vld [vmem:[%s2178_s3 + $0x8] sm:$0xff]  ;;  %v605_v30 = vld [vmem:[%s2178_s3 + $0x20] sm:$0xff] }
  0xb8   :  { %v1670_v33 = vsub.f32 %v1470_v37, %v180_v16  ;;  %321 = vadd.xlane.f32.xlu1 %v320_v23  ;;  %276 = vadd.xlane.f32.xlu0 %v275_v34  ;;  %v90_v35 = vpop.xlane.xlu0 %89  ;;  %v278_v39 = vsel %vm57_vm0, %v228_v32, 0.0  ;;  %v1233_v37 = vld [vmem:[%s2178_s3 + $0x4] ss:$8 sps:$4 sm:$0xff]   ;;  %v1136_v51 = vcombine.low %v601_v42, %v602_v36 }
  0xb9   :  { %v93_v38 = vpop.xlane.xlu1 %92  ;;  %v165_v20 = vmul.f32 0.015625, %v90_v35  ;;  %v243_v47 = vmul.f32 %v1667_v31, %v1667_v31  ;;  %710 = vmatprep.subr.bf16.mxu0 %v1233_v37  ;;  %1224 = vmatprep.subr.bf16.mxu1 %v1233_v37 }
  0xba   :  { %v166_v46 = vmul.f32 0.015625, %v93_v38  ;;  %v244_v50 = vmul.f32 %v1670_v33, %v1670_v33  ;;  %711 = vmatpush1.bf16.msra.mxu0 %v1136_v51  ;;  %1228 = vmatpush1.bf16.msra.mxu1 %v1136_v51 }
  0xbb   :  { %v1688_v54 = vsub.f32 %v1479_v40, %v165_v20  ;;  %v323_v58 = vsel %vm57_vm0, %v243_v47, 0.0  ;;  %v604_v40 = vld [vmem:[%s2178_s3 + $0x18] sm:$0xff] }
  0xbc   :  { %v1691_v8 = vsub.f32 %v1484_v41, %v166_v46  ;;  %279 = vadd.xlane.f32.xlu1 %v278_v39  ;;  %324 = vadd.xlane.f32.xlu0 %v323_v58  ;;  %v138_v24 = vpop.xlane.xlu0 %137  ;;  %v326_v63 = vsel %vm57_vm0, %v244_v50, 0.0  ;;  %v1235_v41 = vld [vmem:[%s2178_s3 + $0x14] ss:$8 sps:$4 sm:$0xff]   ;;  %v1138_v28 = vcombine.low %v603_v3, %v604_v40 }
  0xbd   :  { %v141_v62 = vpop.xlane.xlu1 %140  ;;  %v181_v4 = vmul.f32 0.015625, %v138_v24  ;;  %v229_v12 = vmul.f32 %v1688_v54, %v1688_v54  ;;  %712 = vmatprep.subr.bf16.mxu0 %v1235_v41  ;;  %1225 = vmatprep.subr.bf16.mxu1 %v1235_v41  ;;  %v607_v50 = vld [vmem:[%s2178_s3 + $0x30] sm:$0xff] }
  0xbe   :  { %v182_v6 = vmul.f32 0.015625, %v141_v62  ;;  %v230_v14 = vmul.f32 %v1691_v8, %v1691_v8  ;;  %713 = vmatpush1.bf16.msra.mxu0 %v1138_v28  ;;  %1229 = vmatpush1.bf16.msra.mxu1 %v1138_v28 }
  0xbf   :  { %v1709_v18 = vsub.f32 %v1493_v44, %v181_v4  ;;  %v281_v22 = vsel %vm57_vm0, %v229_v12, 0.0  ;;  %v606_v44 = vld [vmem:[%s2178_s3 + $0x28] sm:$0xff] }
  0xc0   :  { %v1712_v19 = vsub.f32 %v1498_v45, %v182_v6  ;;  %327 = vadd.xlane.f32.xlu1 %v326_v63  ;;  %282 = vadd.xlane.f32.xlu0 %v281_v22  ;;  %v96_v23 = vpop.xlane.xlu0 %95  ;;  %v284_v16 = vsel %vm57_vm0, %v230_v14, 0.0  ;;  %v1237_v45 = vld [vmem:[%s2178_s3 + $0x24] ss:$8 sps:$4 sm:$0xff]   ;;  %v1140_v39 = vcombine.low %v605_v30, %v606_v44 }
  0xc1   :  { %v99_v0 = vpop.xlane.xlu1 %98  ;;  %v167_v32 = vmul.f32 0.015625, %v96_v23  ;;  %v245_v35 = vmul.f32 %v1709_v18, %v1709_v18  ;;  %714 = vmatprep.subr.bf16.mxu0 %v1237_v45  ;;  %1226 = vmatprep.subr.bf16.mxu1 %v1237_v45  ;;  %v1305_v23 = vmov 0  }
  0xc2   :  { %v168_v34 = vmul.f32 0.015625, %v99_v0  ;;  %v246_v38 = vmul.f32 %v1712_v19, %v1712_v19  ;;  %715 = vmatpush1.bf16.msra.mxu0 %v1140_v39  ;;  %1230 = vmatpush1.bf16.msra.mxu1 %v1140_v39 }
  0xc3   :  { %v1730_v42 = vsub.f32 %v1507_v48, %v167_v32  ;;  %v329_v37 = vsel %vm57_vm0, %v245_v35, 0.0  ;;  %v608_v48 = vld [vmem:[%s2178_s3 + $0x38] sm:$0xff]  ;;  %742 = vmatprep.mubr.bf16.mxu0 %v1305_v23  ;;  %822 = vmatprep.mubr.bf16.mxu1 %v1305_v23 }
  0xc4   :  { %v1733_v36 = vsub.f32 %v1512_v49, %v168_v34  ;;  %285 = vadd.xlane.f32.xlu1 %v284_v16  ;;  %330 = vadd.xlane.f32.xlu0 %v329_v37  ;;  %v144_v20 = vpop.xlane.xlu0 %143  ;;  %v332_v47 = vsel %vm57_vm0, %v246_v38, 0.0  ;;  %v1239_v49 = vld [vmem:[%s2178_s3 + $0x34] ss:$8 sps:$4 sm:$0xff]   ;;  %v1142_v63 = vcombine.low %v607_v50, %v608_v48 }
  0xc5   :  { %v147_v46 = vpop.xlane.xlu1 %146  ;;  %v183_v51 = vmul.f32 0.015625, %v144_v20  ;;  %v231_v24 = vmul.f32 %v1730_v42, %v1730_v42  ;;  %716 = vmatprep.subr.bf16.mxu0 %v1239_v49  ;;  %1227 = vmatprep.subr.bf16.mxu1 %v1239_v49 }
  0xc6   :  { %v184_v58 = vmul.f32 0.015625, %v147_v46  ;;  %v232_v62 = vmul.f32 %v1733_v36, %v1733_v36  ;;  %717 = vmatpush1.bf16.msra.mxu0 %v1142_v63  ;;  %1231 = vmatpush1.bf16.msra.mxu1 %v1142_v63 }
  0xc7   :  { %v1751_v3 = vsub.f32 %v1521_v52, %v183_v51  ;;  %v287_v41 = vsel %vm57_vm0, %v231_v24, 0.0 }
  0xc8   :  { %v1754_v40 = vsub.f32 %v1526_v53, %v184_v58  ;;  %333 = vadd.xlane.f32.xlu1 %v332_v47  ;;  %288 = vadd.xlane.f32.xlu0 %v287_v41  ;;  %v102_v4 = vpop.xlane.xlu0 %101  ;;  %v290_v12 = vsel %vm57_vm0, %v232_v62, 0.0 }
  0xc9   :  { %v105_v6 = vpop.xlane.xlu1 %104  ;;  %v169_v14 = vmul.f32 0.015625, %v102_v4  ;;  %v247_v22 = vmul.f32 %v1751_v3, %v1751_v3 }
  0xca   :  { %v170_v28 = vmul.f32 0.015625, %v105_v6  ;;  %v248_v52 = vmul.f32 %v1754_v40, %v1754_v40 }
  0xcb   :  { %v1765_v53 = vsub.f32 %v1535_v56, %v169_v14  ;;  %v335_v16 = vsel %vm57_vm0, %v247_v22, 0.0 }
  0xcc   :  { %v1768_v0 = vsub.f32 %v1540_v57, %v170_v28  ;;  %291 = vadd.xlane.f32.xlu1 %v290_v12  ;;  %336 = vadd.xlane.f32.xlu0 %v335_v16  ;;  %v150_v30 = vpop.xlane.xlu0 %149  ;;  %v338_v45 = vsel %vm57_vm0, %v248_v52, 0.0 }
  0xcd   :  { %v153_v44 = vpop.xlane.xlu1 %152  ;;  %v185_v32 = vmul.f32 0.015625, %v150_v30  ;;  %v233_v35 = vmul.f32 %v1765_v53, %v1765_v53 }
  0xce   :  { %v186_v34 = vmul.f32 0.015625, %v153_v44  ;;  %v234_v56 = vmul.f32 %v1768_v0, %v1768_v0 }
  0xcf   :  { %v1777_v38 = vsub.f32 %v1549_v60, %v185_v32  ;;  %v293_v39 = vsel %vm57_vm0, %v233_v35, 0.0 }
  0xd0   :  { %v1780_v57 = vsub.f32 %v1554_v61, %v186_v34  ;;  %339 = vadd.xlane.f32.xlu1 %v338_v45  ;;  %294 = vadd.xlane.f32.xlu0 %v293_v39  ;;  %v296_v37 = vsel %vm57_vm0, %v234_v56, 0.0  ;;  %v1794_v39 = vld [vmem:[%s2179_s1] ss:$0 sm:$0xff] }
  0xd1   :  { %v249_v20 = vmul.f32 %v1777_v38, %v1777_v38 }
  0xd2   :  { %v250_v46 = vmul.f32 %v1780_v57, %v1780_v57 }
  0xd3   :  { %v341_v47 = vsel %vm57_vm0, %v249_v20, 0.0 }
  0xd4   :  { %297 = vadd.xlane.f32.xlu1 %v296_v37  ;;  %342 = vadd.xlane.f32.xlu0 %v341_v47  ;;  %v344_v60 = vsel %vm57_vm0, %v250_v46, 0.0 }
  0xd8   :  { %345 = vadd.xlane.f32.xlu1 %v344_v60 }
 0x125   :  { %v253_v61 = vpop.xlane.xlu0 %252 }
 0x126   :  { %v347_v50 = vmul.f32 0.015625, %v253_v61 }
 0x128   :  { %v379_v48 = vadd.f32 1e-05, %v347_v50 }
 0x129   :  { %v256_v49 = vpop.xlane.xlu1 %255  ;;  %v301_v51 = vpop.xlane.xlu0 %300 }
 0x12a   :  { %1241 = vrsqrt.f32 %v379_v48  ;;  %v348_v58 = vmul.f32 0.015625, %v256_v49  ;;  %v363_v24 = vmul.f32 0.015625, %v301_v51  ;;  %v1801_v51 = vld [vmem:[%s2180_s2] ss:$0 sm:$0xff] }
 0x12c   :  { %v380_v62 = vadd.f32 1e-05, %v348_v58  ;;  %v395_v63 = vadd.f32 1e-05, %v363_v24 }
 0x12d   :  { %v304_v41 = vpop.xlane.xlu1 %303  ;;  %v259_v4 = vpop.xlane.xlu0 %258 }
 0x12e   :  { %1243 = vrsqrt.f32 %v380_v62  ;;  %v364_v6 = vmul.f32 0.015625, %v304_v41  ;;  %v349_v12 = vmul.f32 0.015625, %v259_v4 }
 0x12f   :  { %1245 = vrsqrt.f32 %v395_v63 }
 0x130   :  { %v396_v14 = vadd.f32 1e-05, %v364_v6  ;;  %v381_v28 = vadd.f32 1e-05, %v349_v12 }
 0x131   :  { %v262_v22 = vpop.xlane.xlu1 %261  ;;  %v307_v52 = vpop.xlane.xlu0 %306 }
 0x132   :  { %1247 = vrsqrt.f32 %v396_v14  ;;  %v350_v16 = vmul.f32 0.015625, %v262_v22  ;;  %v365_v30 = vmul.f32 0.015625, %v307_v52 }
 0x133   :  { %1249 = vrsqrt.f32 %v381_v28 }
 0x134   :  { %v1242_v44 = vpop.eup %1241  ;;  %v382_v45 = vadd.f32 1e-05, %v350_v16  ;;  %v397_v32 = vadd.f32 1e-05, %v365_v30 }
 0x135   :  { %v443_v34 = vmul.f32 %v1242_v44, %v1561_v10  ;;  %v310_v35 = vpop.xlane.xlu1 %309  ;;  %v265_v56 = vpop.xlane.xlu0 %264 }
 0x136   :  { %1251 = vrsqrt.f32 %v382_v45  ;;  %v366_v37 = vmul.f32 0.015625, %v310_v35  ;;  %v351_v20 = vmul.f32 0.015625, %v265_v56 }
 0x137   :  { %1253 = vrsqrt.f32 %v397_v32  ;;  %v482_v50 = vmul.f32 %v1794_v39, %v443_v34 }
 0x138   :  { %v1244_v46 = vpop.eup %1243  ;;  %v398_v47 = vadd.f32 1e-05, %v366_v37  ;;  %v383_v60 = vadd.f32 1e-05, %v351_v20 }
 0x139   :  { %v1246_v61 = vpop.eup %1245  ;;  %v444_v48 = vmul.f32 %v1244_v46, %v1571_v26  ;;  %v268_v10 = vpop.xlane.xlu1 %267  ;;  %v521_v26 = vadd.f32 %v1801_v51, %v482_v50 }
 0x13a   :  { %v313_v49 = vpop.xlane.xlu0 %312  ;;  %v459_v58 = vmul.f32 %v1246_v61, %v1564_v11  ;;  %1255 = vrsqrt.f32 %v398_v47  ;;  %v352_v24 = vmul.f32 0.015625, %v268_v10 }
 0x13b   :  { %v367_v62 = vmul.f32 0.015625, %v313_v49  ;;  %v483_v63 = vmul.f32 %v1794_v39, %v444_v48  ;;  %1257 = vrsqrt.f32 %v383_v60 }
 0x13c   :  { %v1248_v41 = vpop.eup %1247  ;;  %v384_v4 = vadd.f32 1e-05, %v352_v24  ;;  %v498_v28 = vmul.f32 %v1794_v39, %v459_v58 }
 0x13d   :  { %v399_v6 = vadd.f32 1e-05, %v367_v62  ;;  %v1250_v12 = vpop.eup %1249  ;;  %v522_v14 = vadd.f32 %v1801_v51, %v483_v63  ;;  %v460_v22 = vmul.f32 %v1248_v41, %v1574_v27  ;;  %v316_v52 = vpop.xlane.xlu1 %315 }
 0x13e   :  { %v271_v11 = vpop.xlane.xlu0 %270  ;;  %v445_v16 = vmul.f32 %v1250_v12, %v1583_v2  ;;  %1259 = vrsqrt.f32 %v384_v4  ;;  %v368_v30 = vmul.f32 0.015625, %v316_v52  ;;  %v537_v27 = vadd.f32 %v1801_v51, %v498_v28 }
 0x13f   :  { %v553_v44 = vpack.c.bf16 %v522_v14, %v521_v26  ;;  %v499_v45 = vmul.f32 %v1794_v39, %v460_v22  ;;  %1261 = vrsqrt.f32 %v399_v6  ;;  %v353_v32 = vmul.f32 0.015625, %v271_v11 }
 0x140   :  { %v1252_v34 = vpop.eup %1251  ;;  %v484_v35 = vmul.f32 %v1794_v39, %v445_v16  ;;  %v400_v56 = vadd.f32 1e-05, %v368_v30 }
 0x141   :  { %v1254_v37 = vpop.eup %1253  ;;  %569 = vst.msk [vmem:[#allocation2] sm:$0xff] %vm57_vm0, %v553_v44  ;;  %v538_v20 = vadd.f32 %v1801_v51, %v499_v45  ;;  %v446_v2 = vmul.f32 %v1252_v34, %v1586_v5  ;;  %v385_v46 = vadd.f32 1e-05, %v353_v32  ;;  %v274_v47 = vpop.xlane.xlu1 %273 }
 0x142   :  { %v319_v60 = vpop.xlane.xlu0 %318  ;;  %v461_v61 = vmul.f32 %v1254_v37, %v1595_v55  ;;  %1263 = vrsqrt.f32 %v400_v56  ;;  %v354_v50 = vmul.f32 0.015625, %v274_v47  ;;  %v523_v24 = vadd.f32 %v1801_v51, %v484_v35 }
 0x143   :  { %v561_v48 = vpack.c.bf16 %v538_v20, %v537_v27  ;;  %v485_v10 = vmul.f32 %v1794_v39, %v446_v2  ;;  %1265 = vrsqrt.f32 %v385_v46  ;;  %v369_v49 = vmul.f32 0.015625, %v319_v60 }
 0x144   :  { %v1256_v58 = vpop.eup %1255  ;;  %v386_v62 = vadd.f32 1e-05, %v354_v50  ;;  %v500_v41 = vmul.f32 %v1794_v39, %v461_v61 }
 0x145   :  { %v1258_v63 = vpop.eup %1257  ;;  %577 = vst.msk [vmem:[#allocation2 + $0x40] sm:$0xff] %vm57_vm0, %v561_v48  ;;  %v524_v5 = vadd.f32 %v1801_v51, %v485_v10  ;;  %v462_v55 = vmul.f32 %v1256_v58, %v1598_v9  ;;  %v401_v4 = vadd.f32 1e-05, %v369_v49  ;;  %v322_v6 = vpop.xlane.xlu1 %321 }
 0x146   :  { %v277_v12 = vpop.xlane.xlu0 %276  ;;  %v447_v26 = vmul.f32 %v1258_v63, %v1607_v7  ;;  %1267 = vrsqrt.f32 %v386_v62  ;;  %v370_v14 = vmul.f32 0.015625, %v322_v6  ;;  %v539_v9 = vadd.f32 %v1801_v51, %v500_v41 }
 0x147   :  { %v554_v28 = vpack.c.bf16 %v524_v5, %v523_v24  ;;  %v501_v22 = vmul.f32 %v1794_v39, %v462_v55  ;;  %1269 = vrsqrt.f32 %v401_v4  ;;  %v355_v52 = vmul.f32 0.015625, %v277_v12 }
 0x148   :  { %v1260_v11 = vpop.eup %1259  ;;  %v486_v16 = vmul.f32 %v1794_v39, %v447_v26  ;;  %v402_v30 = vadd.f32 1e-05, %v370_v14  ;;  %v585_v44 = vld [vmem:[#allocation2] sm:$0xff] }
 0x149   :  { %v1262_v45 = vpop.eup %1261  ;;  %570 = vst.msk [vmem:[#allocation2 + $0x8] sm:$0xff] %vm57_vm0, %v554_v28  ;;  %v540_v32 = vadd.f32 %v1801_v51, %v501_v22  ;;  %v448_v7 = vmul.f32 %v1260_v11, %v1610_v13  ;;  %v387_v34 = vadd.f32 1e-05, %v355_v52  ;;  %v280_v35 = vpop.xlane.xlu1 %279  ;;  %1144 = vmatmul.mubr.msk.bf16.vlgmr.msra.gmra.mrb[0].mxu0 %vm57_vm0, %v585_v44 }
 0x14a   :  { %v325_v56 = vpop.xlane.xlu0 %324  ;;  %v463_v37 = vmul.f32 %v1262_v45, %v1619_v1  ;;  %1271 = vrsqrt.f32 %v402_v30  ;;  %v356_v27 = vmul.f32 0.015625, %v280_v35  ;;  %752 = vmatprep.mubr.bf16.mxu0 %v1305_v23  ;;  %v525_v60 = vadd.f32 %v1801_v51, %v486_v16 }
 0x14b   :  { %v562_v20 = vpack.c.bf16 %v540_v32, %v539_v9  ;;  %v487_v2 = vmul.f32 %v1794_v39, %v448_v7  ;;  %1273 = vrsqrt.f32 %v387_v34  ;;  %v371_v46 = vmul.f32 0.015625, %v325_v56 }
 0x14c   :  { %v1264_v47 = vpop.eup %1263  ;;  %v388_v13 = vadd.f32 1e-05, %v356_v27  ;;  %v593_v61 = vld [vmem:[#allocation2 + $0x40] sm:$0xff]  ;;  %v502_v1 = vmul.f32 %v1794_v39, %v463_v37 }
 0x14d   :  { %v1266_v50 = vpop.eup %1265  ;;  %578 = vst.msk [vmem:[#allocation2 + $0x48] sm:$0xff] %vm57_vm0, %v562_v20  ;;  %v526_v48 = vadd.f32 %v1801_v51, %v487_v2  ;;  %v464_v10 = vmul.f32 %v1264_v47, %v1622_v17  ;;  %v403_v49 = vadd.f32 1e-05, %v371_v46  ;;  %v328_v58 = vpop.xlane.xlu1 %327  ;;  %1152 = vmatmul.mubr.msk.bf16.vlgmr.msra.gmra.mrb[0].mxu1 %vm57_vm0, %v593_v61 }
 0x14e   :  { %v283_v24 = vpop.xlane.xlu0 %282  ;;  %v449_v62 = vmul.f32 %v1266_v50, %v1631_v43  ;;  %1275 = vrsqrt.f32 %v388_v13  ;;  %v372_v63 = vmul.f32 0.015625, %v328_v58  ;;  %832 = vmatprep.mubr.bf16.mxu1 %v1305_v23  ;;  %v541_v14 = vadd.f32 %v1801_v51, %v502_v1 }
 0x14f   :  { %v555_v5 = vpack.c.bf16 %v526_v48, %v525_v60  ;;  %v503_v41 = vmul.f32 %v1794_v39, %v464_v10  ;;  %1277 = vrsqrt.f32 %v403_v49  ;;  %v357_v55 = vmul.f32 0.015625, %v283_v24 }
 0x150   :  { %v1268_v4 = vpop.eup %1267  ;;  %v488_v6 = vmul.f32 %v1794_v39, %v449_v62  ;;  %v404_v17 = vadd.f32 1e-05, %v372_v63  ;;  %v586_v12 = vld [vmem:[#allocation2 + $0x8] sm:$0xff] }
 0x151   :  { %v1270_v26 = vpop.eup %1269  ;;  %571 = vst.msk [vmem:[#allocation2 + $0x10] sm:$0xff] %vm57_vm0, %v555_v5  ;;  %v542_v43 = vadd.f32 %v1801_v51, %v503_v41  ;;  %v450_v28 = vmul.f32 %v1268_v4, %v1634_v21  ;;  %v389_v22 = vadd.f32 1e-05, %v357_v55  ;;  %v286_v52 = vpop.xlane.xlu1 %285  ;;  %1145 = vmatmul.mubr.msk.bf16.gmra.mrb[4].mxu0 %vm57_vm0, %v586_v12 }
 0x152   :  { %v331_v11 = vpop.xlane.xlu0 %330  ;;  %v465_v16 = vmul.f32 %v1270_v26, %v1643_v59  ;;  %1279 = vrsqrt.f32 %v404_v17  ;;  %v358_v30 = vmul.f32 0.015625, %v286_v52  ;;  %762 = vmatprep.mubr.bf16.mxu0 %v1305_v23  ;;  %v527_v7 = vadd.f32 %v1801_v51, %v488_v6 }
 0x153   :  { %v563_v44 = vpack.c.bf16 %v542_v43, %v541_v14  ;;  %v489_v45 = vmul.f32 %v1794_v39, %v450_v28  ;;  %1281 = vrsqrt.f32 %v389_v22  ;;  %v373_v9 = vmul.f32 0.015625, %v331_v11 }
 0x154   :  { %v1272_v32 = vpop.eup %1271  ;;  %v390_v21 = vadd.f32 1e-05, %v358_v30  ;;  %v594_v34 = vld [vmem:[#allocation2 + $0x48] sm:$0xff]  ;;  %v504_v59 = vmul.f32 %v1794_v39, %v465_v16 }
 0x155   :  { %v1274_v35 = vpop.eup %1273  ;;  %579 = vst.msk [vmem:[#allocation2 + $0x50] sm:$0xff] %vm57_vm0, %v563_v44  ;;  %v528_v56 = vadd.f32 %v1801_v51, %v489_v45  ;;  %v466_v37 = vmul.f32 %v1272_v32, %v1646_v25  ;;  %v405_v27 = vadd.f32 1e-05, %v373_v9  ;;  %v334_v20 = vpop.xlane.xlu1 %333  ;;  %1153 = vmatmul.mubr.msk.bf16.gmra.mrb[4].mxu1 %vm57_vm0, %v594_v34 }
 0x156   :  { %v289_v2 = vpop.xlane.xlu0 %288  ;;  %v451_v46 = vmul.f32 %v1274_v35, %v1655_v15  ;;  %1283 = vrsqrt.f32 %v390_v21  ;;  %v374_v47 = vmul.f32 0.015625, %v334_v20  ;;  %842 = vmatprep.mubr.bf16.mxu1 %v1305_v23  ;;  %v543_v49 = vadd.f32 %v1801_v51, %v504_v59 }
 0x157   :  { %v556_v60 = vpack.c.bf16 %v528_v56, %v527_v7  ;;  %v505_v13 = vmul.f32 %v1794_v39, %v466_v37  ;;  %1285 = vrsqrt.f32 %v405_v27  ;;  %v359_v61 = vmul.f32 0.015625, %v289_v2 }
 0x158   :  { %v1276_v50 = vpop.eup %1275  ;;  %v490_v48 = vmul.f32 %v1794_v39, %v451_v46  ;;  %v406_v25 = vadd.f32 1e-05, %v374_v47  ;;  %v587_v1 = vld [vmem:[#allocation2 + $0x10] sm:$0xff] }
 0x159   :  { %v1278_v10 = vpop.eup %1277  ;;  %572 = vst.msk [vmem:[#allocation2 + $0x18] sm:$0xff] %vm57_vm0, %v556_v60  ;;  %v544_v15 = vadd.f32 %v1801_v51, %v505_v13  ;;  %v452_v58 = vmul.f32 %v1276_v50, %v1658_v29  ;;  %v391_v24 = vadd.f32 1e-05, %v359_v61  ;;  %v292_v62 = vpop.xlane.xlu1 %291  ;;  %1146 = vmatmul.mubr.msk.bf16.gmra.mrb[8].mxu0 %vm57_vm0, %v587_v1 }
 0x15a   :  { %v337_v63 = vpop.xlane.xlu0 %336  ;;  %v467_v5 = vmul.f32 %v1278_v10, %v1667_v31  ;;  %1287 = vrsqrt.f32 %v406_v25  ;;  %v360_v41 = vmul.f32 0.015625, %v292_v62  ;;  %772 = vmatprep.mubr.bf16.mxu0 %v1305_v23  ;;  %v529_v12 = vadd.f32 %v1801_v51, %v490_v48 }
 0x15b   :  { %v564_v55 = vpack.c.bf16 %v544_v15, %v543_v49  ;;  %v491_v4 = vmul.f32 %v1794_v39, %v452_v58  ;;  %1289 = vrsqrt.f32 %v391_v24  ;;  %v375_v6 = vmul.f32 0.015625, %v337_v63 }
 0x15c   :  { %v1280_v17 = vpop.eup %1279  ;;  %v392_v29 = vadd.f32 1e-05, %v360_v41  ;;  %v595_v26 = vld [vmem:[#allocation2 + $0x50] sm:$0xff]  ;;  %v506_v31 = vmul.f32 %v1794_v39, %v467_v5 }
 0x15d   :  { %v1282_v14 = vpop.eup %1281  ;;  %580 = vst.msk [vmem:[#allocation2 + $0x58] sm:$0xff] %vm57_vm0, %v564_v55  ;;  %v530_v43 = vadd.f32 %v1801_v51, %v491_v4  ;;  %v468_v28 = vmul.f32 %v1280_v17, %v1670_v33  ;;  %v407_v22 = vadd.f32 1e-05, %v375_v6  ;;  %v340_v52 = vpop.xlane.xlu1 %339  ;;  %1154 = vmatmul.mubr.msk.bf16.gmra.mrb[8].mxu1 %vm57_vm0, %v595_v26 }
 0x15e   :  { %v295_v11 = vpop.xlane.xlu0 %294  ;;  %v453_v16 = vmul.f32 %v1282_v14, %v1688_v54  ;;  %1291 = vrsqrt.f32 %v392_v29  ;;  %v376_v30 = vmul.f32 0.015625, %v340_v52  ;;  %852 = vmatprep.mubr.bf16.mxu1 %v1305_v23  ;;  %v545_v35 = vadd.f32 %v1801_v51, %v506_v31 }
 0x15f   :  { %v557_v44 = vpack.c.bf16 %v530_v43, %v529_v12  ;;  %v507_v45 = vmul.f32 %v1794_v39, %v468_v28  ;;  %1293 = vrsqrt.f32 %v407_v22  ;;  %v361_v9 = vmul.f32 0.015625, %v295_v11 }
 0x160   :  { %v1284_v32 = vpop.eup %1283  ;;  %v492_v7 = vmul.f32 %v1794_v39, %v453_v16  ;;  %v408_v33 = vadd.f32 1e-05, %v376_v30  ;;  %v588_v21 = vld [vmem:[#allocation2 + $0x18] sm:$0xff] }
 0x161   :  { %v1286_v34 = vpop.eup %1285  ;;  %573 = vst.msk [vmem:[#allocation2 + $0x20] sm:$0xff] %vm57_vm0, %v557_v44  ;;  %v546_v54 = vadd.f32 %v1801_v51, %v507_v45  ;;  %v454_v56 = vmul.f32 %v1284_v32, %v1691_v8  ;;  %v393_v59 = vadd.f32 1e-05, %v361_v9  ;;  %v298_v37 = vpop.xlane.xlu1 %297  ;;  %1147 = vmatmul.mubr.msk.bf16.gmra.mrb[12].mxu0 %vm57_vm0, %v588_v21 }
 0x162   :  { %v343_v27 = vpop.xlane.xlu0 %342  ;;  %v469_v20 = vmul.f32 %v1286_v34, %v1709_v18  ;;  %1295 = vrsqrt.f32 %v408_v33  ;;  %v362_v2 = vmul.f32 0.015625, %v298_v37  ;;  %782 = vmatprep.mubr.bf16.mxu0 %v1305_v23  ;;  %v531_v61 = vadd.f32 %v1801_v51, %v492_v7 }
 0x163   :  { %v565_v46 = vpack.c.bf16 %v546_v54, %v545_v35  ;;  %v493_v47 = vmul.f32 %v1794_v39, %v454_v56  ;;  %1297 = vrsqrt.f32 %v393_v59  ;;  %v377_v60 = vmul.f32 0.015625, %v343_v27 }
 0x164   :  { %v1288_v13 = vpop.eup %1287  ;;  %v394_v8 = vadd.f32 1e-05, %v362_v2  ;;  %v596_v50 = vld [vmem:[#allocation2 + $0x58] sm:$0xff]  ;;  %v508_v18 = vmul.f32 %v1794_v39, %v469_v20 }
 0x165   :  { %v1290_v48 = vpop.eup %1289  ;;  %581 = vst.msk [vmem:[#allocation2 + $0x60] sm:$0xff] %vm57_vm0, %v565_v46  ;;  %v532_v25 = vadd.f32 %v1801_v51, %v493_v47  ;;  %v470_v1 = vmul.f32 %v1288_v13, %v1712_v19  ;;  %v409_v10 = vadd.f32 1e-05, %v377_v60  ;;  %v346_v49 = vpop.xlane.xlu1 %345  ;;  %1155 = vmatmul.mubr.msk.bf16.gmra.mrb[12].mxu1 %vm57_vm0, %v596_v50  ;;  %v611_v47 = vlaneseq  ;;  %v609_v13 = vld [vmem:[%s2181_s4] sm:$0x3] }
 0x166   :  { %v455_v15 = vmul.f32 %v1290_v48, %v1730_v42  ;;  %1299 = vrsqrt.f32 %v394_v8  ;;  %v378_v58 = vmul.f32 0.015625, %v346_v49  ;;  %862 = vmatprep.mubr.bf16.mxu1 %v1305_v23  ;;  %v547_v19 = vadd.f32 %v1801_v51, %v508_v18 }
 0x167   :  { %v558_v24 = vpack.c.bf16 %v532_v25, %v531_v61  ;;  %v509_v62 = vmul.f32 %v1794_v39, %v470_v1  ;;  %1301 = vrsqrt.f32 %v409_v10 }
 0x168   :  { %v1292_v63 = vpop.eup %1291  ;;  %v410_v5 = vadd.f32 1e-05, %v378_v58  ;;  %v589_v41 = vld [vmem:[#allocation2 + $0x20] sm:$0xff]  ;;  %v494_v42 = vmul.f32 %v1794_v39, %v455_v15 }
 0x169   :  { %v1294_v55 = vpop.eup %1293  ;;  %574 = vst.msk [vmem:[#allocation2 + $0x28] sm:$0xff] %vm57_vm0, %v558_v24  ;;  %v548_v4 = vadd.f32 %v1801_v51, %v509_v62  ;;  %v456_v6 = vmul.f32 %v1292_v63, %v1733_v36  ;;  %1148 = vmatmul.mubr.msk.bf16.gmra.mrb[16].mxu0 %vm57_vm0, %v589_v41 }
 0x16a   :  { %v471_v17 = vmul.f32 %v1294_v55, %v1751_v3  ;;  %1303 = vrsqrt.f32 %v410_v5  ;;  %792 = vmatprep.mubr.bf16.mxu0 %v1305_v23  ;;  %v533_v31 = vadd.f32 %v1801_v51, %v494_v42 }
 0x16b   :  { %v566_v12 = vpack.c.bf16 %v548_v4, %v547_v19  ;;  %v495_v29 = vmul.f32 %v1794_v39, %v456_v6 }
 0x16c   :  { %v1296_v26 = vpop.eup %1295  ;;  %v597_v14 = vld [vmem:[#allocation2 + $0x60] sm:$0xff]  ;;  %v510_v36 = vmul.f32 %v1794_v39, %v471_v17 }
 0x16d   :  { %v1298_v43 = vpop.eup %1297  ;;  %582 = vst.msk [vmem:[#allocation2 + $0x68] sm:$0xff] %vm57_vm0, %v566_v12  ;;  %v534_v28 = vadd.f32 %v1801_v51, %v495_v29  ;;  %v472_v22 = vmul.f32 %v1296_v26, %v1754_v40  ;;  %1156 = vmatmul.mubr.msk.bf16.gmra.mrb[16].mxu1 %vm57_vm0, %v597_v14 }
 0x16e   :  { %v457_v3 = vmul.f32 %v1298_v43, %v1765_v53  ;;  %872 = vmatprep.mubr.bf16.mxu1 %v1305_v23  ;;  %v549_v45 = vadd.f32 %v1801_v51, %v510_v36 }
 0x16f   :  { %v559_v52 = vpack.c.bf16 %v534_v28, %v533_v31  ;;  %v511_v11 = vmul.f32 %v1794_v39, %v472_v22 }
 0x170   :  { %v1300_v16 = vpop.eup %1299  ;;  %v590_v30 = vld [vmem:[#allocation2 + $0x28] sm:$0xff]  ;;  %v496_v40 = vmul.f32 %v1794_v39, %v457_v3 }
 0x171   :  { %v1302_v44 = vpop.eup %1301  ;;  %575 = vst.msk [vmem:[#allocation2 + $0x30] sm:$0xff] %vm57_vm0, %v559_v52  ;;  %v550_v9 = vadd.f32 %v1801_v51, %v511_v11  ;;  %v458_v32 = vmul.f32 %v1300_v16, %v1768_v0  ;;  %1149 = vmatmul.mubr.msk.bf16.gmra.mrb[20].mxu0 %vm57_vm0, %v590_v30 }
 0x172   :  { %v473_v53 = vmul.f32 %v1302_v44, %v1777_v38  ;;  %802 = vmatprep.mubr.bf16.mxu0 %v1305_v23  ;;  %v535_v35 = vadd.f32 %v1801_v51, %v496_v40 }
 0x173   :  { %v567_v7 = vpack.c.bf16 %v550_v9, %v549_v45  ;;  %v497_v33 = vmul.f32 %v1794_v39, %v458_v32 }
 0x174   :  { %v1304_v21 = vpop.eup %1303  ;;  %v598_v34 = vld [vmem:[#allocation2 + $0x68] sm:$0xff]  ;;  %v512_v56 = vmul.f32 %v1794_v39, %v473_v53 }
 0x175   :  { %583 = vst.msk [vmem:[#allocation2 + $0x70] sm:$0xff] %vm57_vm0, %v567_v7  ;;  %v536_v54 = vadd.f32 %v1801_v51, %v497_v33  ;;  %v474_v0 = vmul.f32 %v1304_v21, %v1780_v57  ;;  %1157 = vmatmul.mubr.msk.bf16.gmra.mrb[20].mxu1 %vm57_vm0, %v598_v34 }
 0x176   :  { %882 = vmatprep.mubr.bf16.mxu1 %v1305_v23  ;;  %v551_v27 = vadd.f32 %v1801_v51, %v512_v56 }
 0x177   :  { %v560_v38 = vpack.c.bf16 %v536_v54, %v535_v35  ;;  %v513_v59 = vmul.f32 %v1794_v39, %v474_v0 }
 0x178   :  { %v591_v37 = vld [vmem:[#allocation2 + $0x30] sm:$0xff] }
 0x179   :  { %576 = vst.msk [vmem:[#allocation2 + $0x38] sm:$0xff] %vm57_vm0, %v560_v38  ;;  %v552_v20 = vadd.f32 %v1801_v51, %v513_v59  ;;  %1150 = vmatmul.mubr.msk.bf16.gmra.mrb[24].mxu0 %vm57_vm0, %v591_v37  ;;  %v612_v51 = vshrl.u32 %v611_v47, 7 }
 0x17a   :  { %812 = vmatprep.mubr.bf16.mxu0 %v1305_v23 }
 0x17b   :  { %v568_v2 = vpack.c.bf16 %v552_v20, %v551_v27  ;;  %v613_v60 = vsub.s32 0, %v612_v51  ;;  %v617_v61 = vsub.s32 1, %v612_v51 }
 0x17c   :  { %v599_v57 = vld [vmem:[#allocation2 + $0x70] sm:$0xff] }
 0x17d   :  { %584 = vst.msk [vmem:[#allocation2 + $0x78] sm:$0xff] %vm57_vm0, %v568_v2  ;;  %1158 = vmatmul.mubr.msk.bf16.gmra.mrb[24].mxu1 %vm57_vm0, %v599_v57  ;;  %v1945_v8 = vrot.slane %v609_v13, %v613_v60  ;;  %v1947_v50 = vrot.slane %v609_v13, %v617_v61 }
 0x17e   :  { %892 = vmatprep.mubr.bf16.mxu1 %v1305_v23 }
 0x180   :  { %v592_v39 = vld [vmem:[#allocation2 + $0x38] sm:$0xff] }
 0x181   :  { %1151 = vmatmul.mubr.msk.bf16.gmra.mrb[28].mxu0 %vm57_vm0, %v592_v39 }
 0x184   :  { %v600_v46 = vld [vmem:[#allocation2 + $0x78] sm:$0xff] }
 0x185   :  { %1159 = vmatmul.mubr.msk.bf16.gmra.mrb[28].mxu1 %vm57_vm0, %v600_v46 }
 0x21c   :  { %v744_v48 = vpop.f32.mrb[0].mxu0 }
 0x21d   :  { %v745_v23 = vadd.f32 %v744_v48, %v1945_v8  ;;  %v746_v25 = vpop.f32.mrb[1].mxu0 }
 0x21e   :  { %v747_v18 = vadd.f32 %v746_v25, %v1947_v50  ;;  %v748_v1 = vpop.f32.mrb[2].mxu0 }
 0x21f   :  { %v749_v49 = vadd.f32 %v748_v1, %v1945_v8  ;;  %v750_v15 = vpop.f32.mrb[3].mxu0 }
 0x220   :  { %v1192_v58 = vpack.c.bf16 %v747_v18, %v745_v23  ;;  %v751_v24 = vadd.f32 %v750_v15, %v1947_v50  ;;  %v824_v62 = vpop.f32.mrb[0].mxu1 }
 0x221   :  { %v825_v63 = vadd.f32 %v824_v62, %v1945_v8  ;;  %v826_v5 = vpop.f32.mrb[1].mxu1 }
 0x222   :  { %1098 = vst.msk [vmem:[%s2182_s5] sm:$0xff] %vm1951_vm3, %v1192_v58  ;;  %v1193_v41 = vpack.c.bf16 %v751_v24, %v749_v49  ;;  %v827_v55 = vadd.f32 %v826_v5, %v1947_v50  ;;  %v828_v19 = vpop.f32.mrb[2].mxu1 }
 0x223   :  { %v829_v4 = vadd.f32 %v828_v19, %v1945_v8  ;;  %v830_v42 = vpop.f32.mrb[3].mxu1 }
 0x224   :  { %1099 = vst.msk [vmem:[%s2182_s5 + $0x8] sm:$0xff] %vm1951_vm3, %v1193_v41  ;;  %v1208_v6 = vpack.c.bf16 %v827_v55, %v825_v63  ;;  %v831_v17 = vadd.f32 %v830_v42, %v1947_v50  ;;  %v754_v12 = vpop.f32.mrb[4].mxu0 }
 0x225   :  { %v755_v29 = vadd.f32 %v754_v12, %v1945_v8  ;;  %v756_v26 = vpop.f32.mrb[5].mxu0 }
 0x226   :  { %1114 = vst.msk [vmem:[%s2182_s5 + $0x80] sm:$0xff] %vm1951_vm3, %v1208_v6  ;;  %v1209_v14 = vpack.c.bf16 %v831_v17, %v829_v4  ;;  %v757_v43 = vadd.f32 %v756_v26, %v1947_v50  ;;  %v758_v31 = vpop.f32.mrb[6].mxu0 }
 0x227   :  { %v759_v28 = vadd.f32 %v758_v31, %v1945_v8  ;;  %v760_v36 = vpop.f32.mrb[7].mxu0 }
 0x228   :  { %1115 = vst.msk [vmem:[%s2182_s5 + $0x88] sm:$0xff] %vm1951_vm3, %v1209_v14  ;;  %v1194_v22 = vpack.c.bf16 %v757_v43, %v755_v29  ;;  %v761_v3 = vadd.f32 %v760_v36, %v1947_v50  ;;  %v834_v52 = vpop.f32.mrb[4].mxu1 }
 0x229   :  { %v835_v11 = vadd.f32 %v834_v52, %v1945_v8  ;;  %v836_v16 = vpop.f32.mrb[5].mxu1 }
 0x22a   :  { %1100 = vst.msk [vmem:[%s2182_s5 + $0x10] sm:$0xff] %vm1951_vm3, %v1194_v22  ;;  %v1195_v30 = vpack.c.bf16 %v761_v3, %v759_v28  ;;  %v837_v44 = vadd.f32 %v836_v16, %v1947_v50  ;;  %v838_v45 = vpop.f32.mrb[6].mxu1 }
 0x22b   :  { %v839_v9 = vadd.f32 %v838_v45, %v1945_v8  ;;  %v840_v40 = vpop.f32.mrb[7].mxu1 }
 0x22c   :  { %1101 = vst.msk [vmem:[%s2182_s5 + $0x18] sm:$0xff] %vm1951_vm3, %v1195_v30  ;;  %v1210_v32 = vpack.c.bf16 %v837_v44, %v835_v11  ;;  %v841_v53 = vadd.f32 %v840_v40, %v1947_v50  ;;  %v764_v7 = vpop.f32.mrb[8].mxu0 }
 0x22d   :  { %v765_v33 = vadd.f32 %v764_v7, %v1945_v8  ;;  %v766_v21 = vpop.f32.mrb[9].mxu0 }
 0x22e   :  { %1116 = vst.msk [vmem:[%s2182_s5 + $0x90] sm:$0xff] %vm1951_vm3, %v1210_v32  ;;  %v1211_v34 = vpack.c.bf16 %v841_v53, %v839_v9  ;;  %v767_v35 = vadd.f32 %v766_v21, %v1947_v50  ;;  %v768_v54 = vpop.f32.mrb[10].mxu0 }
 0x22f   :  { %v769_v56 = vadd.f32 %v768_v54, %v1945_v8  ;;  %v770_v0 = vpop.f32.mrb[11].mxu0 }
 0x230   :  { %1117 = vst.msk [vmem:[%s2182_s5 + $0x98] sm:$0xff] %vm1951_vm3, %v1211_v34  ;;  %v1196_v38 = vpack.c.bf16 %v767_v35, %v765_v33  ;;  %v771_v59 = vadd.f32 %v770_v0, %v1947_v50  ;;  %v844_v37 = vpop.f32.mrb[8].mxu1 }
 0x231   :  { %v845_v27 = vadd.f32 %v844_v37, %v1945_v8  ;;  %v846_v20 = vpop.f32.mrb[9].mxu1 }
 0x232   :  { %1102 = vst.msk [vmem:[%s2182_s5 + $0x20] sm:$0xff] %vm1951_vm3, %v1196_v38  ;;  %v1197_v2 = vpack.c.bf16 %v771_v59, %v769_v56  ;;  %v847_v57 = vadd.f32 %v846_v20, %v1947_v50  ;;  %v848_v39 = vpop.f32.mrb[10].mxu1 }
 0x233   :  { %v849_v46 = vadd.f32 %v848_v39, %v1945_v8  ;;  %v850_v47 = vpop.f32.mrb[11].mxu1 }
 0x234   :  { %1103 = vst.msk [vmem:[%s2182_s5 + $0x28] sm:$0xff] %vm1951_vm3, %v1197_v2  ;;  %v1212_v51 = vpack.c.bf16 %v847_v57, %v845_v27  ;;  %v851_v60 = vadd.f32 %v850_v47, %v1947_v50  ;;  %v774_v13 = vpop.f32.mrb[12].mxu0 }
 0x235   :  { %v775_v61 = vadd.f32 %v774_v13, %v1945_v8  ;;  %v776_v48 = vpop.f32.mrb[13].mxu0 }
 0x236   :  { %1118 = vst.msk [vmem:[%s2182_s5 + $0xa0] sm:$0xff] %vm1951_vm3, %v1212_v51  ;;  %v1213_v23 = vpack.c.bf16 %v851_v60, %v849_v46  ;;  %v777_v25 = vadd.f32 %v776_v48, %v1947_v50  ;;  %v778_v18 = vpop.f32.mrb[14].mxu0 }
 0x237   :  { %v779_v1 = vadd.f32 %v778_v18, %v1945_v8  ;;  %v780_v49 = vpop.f32.mrb[15].mxu0 }
 0x238   :  { %1119 = vst.msk [vmem:[%s2182_s5 + $0xa8] sm:$0xff] %vm1951_vm3, %v1213_v23  ;;  %v1198_v15 = vpack.c.bf16 %v777_v25, %v775_v61  ;;  %v781_v58 = vadd.f32 %v780_v49, %v1947_v50  ;;  %v854_v24 = vpop.f32.mrb[12].mxu1 }
 0x239   :  { %v855_v62 = vadd.f32 %v854_v24, %v1945_v8  ;;  %v856_v63 = vpop.f32.mrb[13].mxu1 }
 0x23a   :  { %1104 = vst.msk [vmem:[%s2182_s5 + $0x30] sm:$0xff] %vm1951_vm3, %v1198_v15  ;;  %v1199_v5 = vpack.c.bf16 %v781_v58, %v779_v1  ;;  %v857_v41 = vadd.f32 %v856_v63, %v1947_v50  ;;  %v858_v55 = vpop.f32.mrb[14].mxu1 }
 0x23b   :  { %v859_v19 = vadd.f32 %v858_v55, %v1945_v8  ;;  %v860_v4 = vpop.f32.mrb[15].mxu1 }
 0x23c   :  { %1105 = vst.msk [vmem:[%s2182_s5 + $0x38] sm:$0xff] %vm1951_vm3, %v1199_v5  ;;  %v1214_v42 = vpack.c.bf16 %v857_v41, %v855_v62  ;;  %v861_v6 = vadd.f32 %v860_v4, %v1947_v50  ;;  %v784_v17 = vpop.f32.mrb[16].mxu0 }
 0x23d   :  { %v785_v12 = vadd.f32 %v784_v17, %v1945_v8  ;;  %v786_v29 = vpop.f32.mrb[17].mxu0 }
 0x23e   :  { %1120 = vst.msk [vmem:[%s2182_s5 + $0xb0] sm:$0xff] %vm1951_vm3, %v1214_v42  ;;  %v1215_v26 = vpack.c.bf16 %v861_v6, %v859_v19  ;;  %v787_v14 = vadd.f32 %v786_v29, %v1947_v50  ;;  %v788_v43 = vpop.f32.mrb[18].mxu0 }
 0x23f   :  { %v789_v31 = vadd.f32 %v788_v43, %v1945_v8  ;;  %v790_v28 = vpop.f32.mrb[19].mxu0 }
 0x240   :  { %1121 = vst.msk [vmem:[%s2182_s5 + $0xb8] sm:$0xff] %vm1951_vm3, %v1215_v26  ;;  %v1200_v36 = vpack.c.bf16 %v787_v14, %v785_v12  ;;  %v791_v22 = vadd.f32 %v790_v28, %v1947_v50  ;;  %v864_v3 = vpop.f32.mrb[16].mxu1 }
 0x241   :  { %v865_v52 = vadd.f32 %v864_v3, %v1945_v8  ;;  %v866_v11 = vpop.f32.mrb[17].mxu1 }
 0x242   :  { %1106 = vst.msk [vmem:[%s2182_s5 + $0x40] sm:$0xff] %vm1951_vm3, %v1200_v36  ;;  %v1201_v16 = vpack.c.bf16 %v791_v22, %v789_v31  ;;  %v867_v30 = vadd.f32 %v866_v11, %v1947_v50  ;;  %v868_v44 = vpop.f32.mrb[18].mxu1 }
 0x243   :  { %v869_v45 = vadd.f32 %v868_v44, %v1945_v8  ;;  %v870_v9 = vpop.f32.mrb[19].mxu1 }
 0x244   :  { %1107 = vst.msk [vmem:[%s2182_s5 + $0x48] sm:$0xff] %vm1951_vm3, %v1201_v16  ;;  %v1216_v40 = vpack.c.bf16 %v867_v30, %v865_v52  ;;  %v871_v32 = vadd.f32 %v870_v9, %v1947_v50  ;;  %v794_v53 = vpop.f32.mrb[20].mxu0 }
 0x245   :  { %v795_v7 = vadd.f32 %v794_v53, %v1945_v8  ;;  %v796_v33 = vpop.f32.mrb[21].mxu0 }
 0x246   :  { %1122 = vst.msk [vmem:[%s2182_s5 + $0xc0] sm:$0xff] %vm1951_vm3, %v1216_v40  ;;  %v1217_v21 = vpack.c.bf16 %v871_v32, %v869_v45  ;;  %v797_v34 = vadd.f32 %v796_v33, %v1947_v50  ;;  %v798_v35 = vpop.f32.mrb[22].mxu0 }
 0x247   :  { %v799_v54 = vadd.f32 %v798_v35, %v1945_v8  ;;  %v800_v56 = vpop.f32.mrb[23].mxu0 }
 0x248   :  { %1123 = vst.msk [vmem:[%s2182_s5 + $0xc8] sm:$0xff] %vm1951_vm3, %v1217_v21  ;;  %v1202_v0 = vpack.c.bf16 %v797_v34, %v795_v7  ;;  %v801_v38 = vadd.f32 %v800_v56, %v1947_v50  ;;  %v874_v59 = vpop.f32.mrb[20].mxu1 }
 0x249   :  { %v875_v37 = vadd.f32 %v874_v59, %v1945_v8  ;;  %v876_v27 = vpop.f32.mrb[21].mxu1 }
 0x24a   :  { %1108 = vst.msk [vmem:[%s2182_s5 + $0x50] sm:$0xff] %vm1951_vm3, %v1202_v0  ;;  %v1203_v20 = vpack.c.bf16 %v801_v38, %v799_v54  ;;  %v877_v2 = vadd.f32 %v876_v27, %v1947_v50  ;;  %v878_v57 = vpop.f32.mrb[22].mxu1 }
 0x24b   :  { %v879_v39 = vadd.f32 %v878_v57, %v1945_v8  ;;  %v880_v46 = vpop.f32.mrb[23].mxu1 }
 0x24c   :  { %1109 = vst.msk [vmem:[%s2182_s5 + $0x58] sm:$0xff] %vm1951_vm3, %v1203_v20  ;;  %v1218_v47 = vpack.c.bf16 %v877_v2, %v875_v37  ;;  %v881_v51 = vadd.f32 %v880_v46, %v1947_v50  ;;  %v804_v60 = vpop.f32.mrb[24].mxu0 }
 0x24d   :  { %v805_v13 = vadd.f32 %v804_v60, %v1945_v8  ;;  %v806_v61 = vpop.f32.mrb[25].mxu0 }
 0x24e   :  { %1124 = vst.msk [vmem:[%s2182_s5 + $0xd0] sm:$0xff] %vm1951_vm3, %v1218_v47  ;;  %v1219_v48 = vpack.c.bf16 %v881_v51, %v879_v39  ;;  %v807_v23 = vadd.f32 %v806_v61, %v1947_v50  ;;  %v808_v25 = vpop.f32.mrb[26].mxu0 }
 0x24f   :  { %v809_v18 = vadd.f32 %v808_v25, %v1945_v8  ;;  %v810_v1 = vpop.f32.mrb[27].mxu0 }
 0x250   :  { %1125 = vst.msk [vmem:[%s2182_s5 + $0xd8] sm:$0xff] %vm1951_vm3, %v1219_v48  ;;  %v1204_v49 = vpack.c.bf16 %v807_v23, %v805_v13  ;;  %v811_v15 = vadd.f32 %v810_v1, %v1947_v50  ;;  %v884_v58 = vpop.f32.mrb[24].mxu1 }
 0x251   :  { %v885_v24 = vadd.f32 %v884_v58, %v1945_v8  ;;  %v886_v62 = vpop.f32.mrb[25].mxu1 }
 0x252   :  { %1110 = vst.msk [vmem:[%s2182_s5 + $0x60] sm:$0xff] %vm1951_vm3, %v1204_v49  ;;  %v1205_v63 = vpack.c.bf16 %v811_v15, %v809_v18  ;;  %v887_v5 = vadd.f32 %v886_v62, %v1947_v50  ;;  %v888_v41 = vpop.f32.mrb[26].mxu1 }
 0x253   :  { %v889_v55 = vadd.f32 %v888_v41, %v1945_v8  ;;  %v890_v19 = vpop.f32.mrb[27].mxu1 }
 0x254   :  { %1111 = vst.msk [vmem:[%s2182_s5 + $0x68] sm:$0xff] %vm1951_vm3, %v1205_v63  ;;  %v1220_v4 = vpack.c.bf16 %v887_v5, %v885_v24  ;;  %v891_v42 = vadd.f32 %v890_v19, %v1947_v50  ;;  %v814_v6 = vpop.f32.mrb[28].mxu0 }
 0x255   :  { %v815_v17 = vadd.f32 %v814_v6, %v1945_v8  ;;  %v816_v12 = vpop.f32.mrb[29].mxu0 }
 0x256   :  { %1126 = vst.msk [vmem:[%s2182_s5 + $0xe0] sm:$0xff] %vm1951_vm3, %v1220_v4  ;;  %v1221_v29 = vpack.c.bf16 %v891_v42, %v889_v55  ;;  %v817_v26 = vadd.f32 %v816_v12, %v1947_v50  ;;  %v818_v14 = vpop.f32.mrb[30].mxu0 }
 0x257   :  { %v819_v43 = vadd.f32 %v818_v14, %v1945_v8  ;;  %v820_v31 = vpop.f32.mrb[31].mxu0 }
 0x258   :  { %1127 = vst.msk [vmem:[%s2182_s5 + $0xe8] sm:$0xff] %vm1951_vm3, %v1221_v29  ;;  %v1206_v28 = vpack.c.bf16 %v817_v26, %v815_v17  ;;  %v821_v36 = vadd.f32 %v820_v31, %v1947_v50  ;;  %v894_v22 = vpop.f32.mrb[28].mxu1 }
 0x259   :  { %v895_v3 = vadd.f32 %v894_v22, %v1945_v8  ;;  %v896_v52 = vpop.f32.mrb[29].mxu1 }
 0x25a   :  { %1112 = vst.msk [vmem:[%s2182_s5 + $0x70] sm:$0xff] %vm1951_vm3, %v1206_v28  ;;  %v1207_v11 = vpack.c.bf16 %v821_v36, %v819_v43  ;;  %v897_v16 = vadd.f32 %v896_v52, %v1947_v50  ;;  %v898_v30 = vpop.f32.mrb[30].mxu1 }
 0x25b   :  { %v899_v44 = vadd.f32 %v898_v30, %v1945_v8  ;;  %v900_v45 = vpop.f32.mrb[31].mxu1 }
 0x25c   :  { %1113 = vst.msk [vmem:[%s2182_s5 + $0x78] sm:$0xff] %vm1951_vm3, %v1207_v11  ;;  %v1222_v9 = vpack.c.bf16 %v897_v16, %v895_v3  ;;  %v901_v40 = vadd.f32 %v900_v45, %v1947_v50 }
 0x25e   :  { %1128 = vst.msk [vmem:[%s2182_s5 + $0xf0] sm:$0xff] %vm1951_vm3, %v1222_v9  ;;  %v1223_v32 = vpack.c.bf16 %v901_v40, %v899_v44 }
 0x260   :  { %1129 = vst.msk [vmem:[%s2182_s5 + $0xf8] sm:$0xff] %vm1951_vm3, %v1223_v32 }

// kernel: closed_call.17
= control target key start
LH: loop header
LB: loop body
LE: loop exit
PB: predicated region body
PF: predicated region fallthrough
CT: control target
= control target key end

     0   :  { %s2109_s9 = smov 0   ;;  %s2111_s10 = smov 0   ;;  %s2762_s0 = inlined_call_operand.vmem [shape: bf16[2,128,192], index: 0, kind: input, shape index: {}, may-alias: {0,1}]   ;;  %s2763_s1 = inlined_call_operand.vmem [shape: bf16[2,128,192], index: 1, kind: input, shape index: {}, may-alias: {0,1}]   ;;  %s2764_s2 = inlined_call_operand.vmem [shape: bf16[2,128,64], index: 2, kind: output, shape index: {}]  }
   0x1   :  { %s2113_s11 = smov 0  }
   0x2 LB: > { %s24_s12 = sadd.s32 1, %s2085_s10  ;;  %p1548_p0 = scmp.ge.s32.totalorder %s2089_s11, 1  ;;  %s2089_s11 = sphi %s2113_s11, %s12_s11   ;;  %s2085_s10 = sphi %s2111_s10, %s2766_s10   ;;  %s2081_s9 = sphi %s2109_s9, %s2765_s9  }
   0x3   : > { %p26_p1 = scmp.ge.s32.totalorder %s24_s12, 2  ;;  %p144_p2 = scmp.lt.s32.totalorder %s2089_s11, 3 }
   0x5   : > { %s2768_s12 = smov (%p26_p1, %s24_s12), 0  ;;  %p145_p3 = pnand %p1548_p0, %p144_p2 }
   0x6   : > { %p181_p4 = scmp.lt.s32.totalorder (!%p145_p3), %s2081_s9, 1  ;;  %s2091_s17 = smov (!%p145_p3), 64   ;;  %vm338_vm0 = vcmask (!%p145_p3), 261120   ;;  %v239_v41 = vlaneseq (!%p145_p3)  ;;  %vm1425_vm2 = vcmask (!%p145_p3), 519168  }
   0x7   : > { %148 = sbr.rel (%p145_p3) target bundleno = 1785 (0x6f9), region = 28  ;;  %s2092_s21 = smov (!%p145_p3), 32  }
   0x8   : > { %v2270_v42 = vand.u32 (!%p145_p3), 127, %v239_v41  ;;  %s2093_s22 = smov (!%p145_p3), 96  }
   0xa   : > { %vm241_vm1 = vcmp.lt.s32.totalorder (!%p145_p3), %v2270_v42, 17 }
   0xe   : > { %s2770_s9 = smov (!%p181_p4, %s2081_s9), 1 }
   0xf   : > { %s1613_s13 = sshll.u32 %s2770_s9, 7  ;;  %s1615_s23 = sshll.u32 %s2770_s9, 6 }
  0x10   : > { %s2133_s16 = scalar_lea.vmem %s2763_s1, %s1613_s13  ;;  %s2172_s20 = scalar_lea.vmem %s2762_s0, %s1613_s13 }
  0x11   : > { %v1907_v0 = vld [vmem:[%s2133_s16] ss:$8 sps:$4 sm:$0xff]   ;;  %v2137_v1 = vld [vmem:[%s2133_s16 + $0x4] ss:$8 sps:$4 sm:$0xff]   ;;  %v2140_v2 = vld [vmem:[%s2133_s16 + $0x10] ss:$8 sps:$4 sm:$0xff]   ;;  %s2687_s26 = scalar_lea.vmem %s2764_s2, %s1615_s23 }
  0x12   : > { %322 = vrot.lane.b32.xlu0 %v1907_v0, %s2091_s17  ;;  %v2143_v3 = vld [vmem:[%s2133_s16 + $0x20] ss:$8 sps:$4 sm:$0xff]   ;;  %1728 = vmatprep.subr.bf16.mxu1 %v2137_v1  ;;  %v2149_v4 = vld [vmem:[%s2133_s16 + $0x30] ss:$8 sps:$4 sm:$0xff]   ;;  %v2232_v33 = vld [vmem:[%s2133_s16 + $0x24] ss:$8 sps:$4 sm:$0xff]  }
  0x13   : > { %1729 = vmatpush3.bf16.msra.mxu1 %v2137_v1  ;;  %326 = vrot.lane.b32.xlu1 %v2143_v3, %s2091_s17  ;;  %v2153_v5 = vld [vmem:[%s2133_s16 + $0x40] ss:$8 sps:$4 sm:$0xff]   ;;  %v2157_v6 = vld [vmem:[%s2133_s16 + $0x50] ss:$8 sps:$4 sm:$0xff]   ;;  %v2235_v34 = vld [vmem:[%s2133_s16 + $0x14] ss:$8 sps:$4 sm:$0xff]  }
  0x14   : > { %v2161_v7 = vld [vmem:[%s2133_s16 + $0x60] ss:$8 sps:$4 sm:$0xff]   ;;  %v2165_v8 = vld [vmem:[%s2133_s16 + $0x70] ss:$8 sps:$4 sm:$0xff]   ;;  %1730 = vmatprep.subr.bf16.mxu1 %v2235_v34  ;;  %v2242_v35 = vld [vmem:[%s2133_s16 + $0x34] ss:$8 sps:$4 sm:$0xff]  }
  0x15   : > { %v2175_v9 = vld [vmem:[%s2172_s20] ss:$8 sps:$4 sm:$0xff]   ;;  %v2197_v26 = vld [vmem:[%s2172_s20 + $0x10] ss:$8 sps:$4 sm:$0xff]   ;;  %v2247_v36 = vld [vmem:[%s2133_s16 + $0x44] ss:$8 sps:$4 sm:$0xff]  }
  0x16   : > { %324 = vrot.lane.b32.xlu0 %v2140_v2, %s2091_s17  ;;  %1712 = vmatprep.mubr.msk.bf16.mxu0 %vm338_vm0, %v2175_v9  ;;  %v2200_v27 = vld [vmem:[%s2172_s20 + $0x20] ss:$8 sps:$4 sm:$0xff]   ;;  %v2207_v28 = vld [vmem:[%s2172_s20 + $0x30] ss:$8 sps:$4 sm:$0xff]   ;;  %v2252_v37 = vld [vmem:[%s2133_s16 + $0x54] ss:$8 sps:$4 sm:$0xff]  }
  0x17   : > { %328 = vrot.lane.b32.xlu1 %v2149_v4, %s2091_s17  ;;  %v2210_v29 = vld [vmem:[%s2172_s20 + $0x40] ss:$8 sps:$4 sm:$0xff]   ;;  %v2217_v30 = vld [vmem:[%s2172_s20 + $0x50] ss:$8 sps:$4 sm:$0xff]   ;;  %1731 = vmatpush3.bf16.msra.mxu1 %v2235_v34  ;;  %v2257_v38 = vld [vmem:[%s2133_s16 + $0x64] ss:$8 sps:$4 sm:$0xff]  }
  0x18   : > { %v2220_v31 = vld [vmem:[%s2172_s20 + $0x60] ss:$8 sps:$4 sm:$0xff]   ;;  %v2227_v32 = vld [vmem:[%s2172_s20 + $0x70] ss:$8 sps:$4 sm:$0xff]   ;;  %1732 = vmatprep.subr.bf16.mxu1 %v2232_v33  ;;  %v2260_v39 = vld [vmem:[%s2133_s16 + $0x74] ss:$8 sps:$4 sm:$0xff]  }
  0x1a   : > { %330 = vrot.lane.b32.xlu0 %v2153_v5, %s2091_s17 }
  0x1b   : > { %332 = vrot.lane.b32.xlu1 %v2157_v6, %s2091_s17  ;;  %1733 = vmatpush3.bf16.msra.mxu1 %v2232_v33 }
  0x1c   : > { %1734 = vmatprep.subr.bf16.mxu1 %v2242_v35 }
  0x1e   : > { %334 = vrot.lane.b32.xlu0 %v2161_v7, %s2091_s17 }
  0x1f   : > { %336 = vrot.lane.b32.xlu1 %v2165_v8, %s2091_s17  ;;  %1735 = vmatpush3.bf16.msra.mxu1 %v2242_v35 }
  0x20   : > { %1736 = vmatprep.subr.bf16.mxu1 %v2247_v36 }
  0x23   : > { %815 = vrot.lane.b32.xlu1 %v1907_v0, %s2092_s21  ;;  %1737 = vmatpush3.bf16.msra.mxu1 %v2247_v36 }
  0x24   : > { %1738 = vmatprep.subr.bf16.mxu1 %v2252_v37 }
  0x27   : > { %1739 = vmatpush3.bf16.msra.mxu1 %v2252_v37 }
  0x28   : > { %1740 = vmatprep.subr.bf16.mxu1 %v2257_v38 }
  0x2b   : > { %1741 = vmatpush3.bf16.msra.mxu1 %v2257_v38 }
  0x2c   : > { %1742 = vmatprep.subr.bf16.mxu1 %v2260_v39 }
  0x2f   : > { %1743 = vmatpush3.bf16.msra.mxu1 %v2260_v39 }
  0x84   : > { %v323_v10 = vpop.permute.xlu0 %322 }
  0x85   : > { %1824 = vmatprep.subr.msk.bf16.mxu0 %vm338_vm0, %v323_v10  ;;  %v364_v11 = vsel %vm338_vm0, %v323_v10, 0  ;;  %v327_v14 = vpop.permute.xlu1 %326 }
  0x86   : > { %1697 = vmatpush3.bf16.xpose.msra.mxu0 %v364_v11  ;;  %v370_v15 = vsel %vm338_vm0, %v327_v14, 0 }
  0x88   : > { %v325_v12 = vpop.permute.xlu0 %324 }
  0x89   : > { %1825 = vmatprep.subr.msk.bf16.mxu0 %vm338_vm0, %v325_v12  ;;  %v367_v13 = vsel %vm338_vm0, %v325_v12, 0  ;;  %v329_v16 = vpop.permute.xlu1 %328 }
  0x8a   : > { %v373_v17 = vsel %vm338_vm0, %v329_v16, 0 }
  0x8c   : > { %v331_v18 = vpop.permute.xlu0 %330 }
  0x8d   : > { %v376_v19 = vsel %vm338_vm0, %v331_v18, 0  ;;  %v333_v20 = vpop.permute.xlu1 %332 }
  0x8e   : > { %1699 = vmatpush3.bf16.xpose.msra.mxu0 %v367_v13  ;;  %v379_v21 = vsel %vm338_vm0, %v333_v20, 0 }
  0x8f   : > { %1826 = vmatprep.subr.msk.bf16.mxu0 %vm338_vm0, %v327_v14 }
  0x90   : > { %v335_v22 = vpop.permute.xlu0 %334 }
  0x91   : > { %v382_v23 = vsel %vm338_vm0, %v335_v22, 0  ;;  %v337_v24 = vpop.permute.xlu1 %336 }
  0x92   : > { %v385_v25 = vsel %vm338_vm0, %v337_v24, 0 }
  0x95   : > { %v2265_v40 = vpop.permute.xlu1 %815 }
  0x96   : > { %1701 = vmatpush3.bf16.xpose.msra.mxu0 %v370_v15  ;;  %1832 = vmatprep.subr.msk.bf16.mxu1 %vm338_vm0, %v2265_v40 }
  0x97   : > { %1827 = vmatprep.subr.msk.bf16.mxu0 %vm338_vm0, %v329_v16 }
  0x9e   : > { %1703 = vmatpush3.bf16.xpose.msra.mxu0 %v373_v17 }
  0x9f   : > { %1828 = vmatprep.subr.msk.bf16.mxu0 %vm338_vm0, %v331_v18 }
  0xa6   : > { %1705 = vmatpush3.bf16.xpose.msra.mxu0 %v376_v19 }
  0xa7   : > { %1829 = vmatprep.subr.msk.bf16.mxu0 %vm338_vm0, %v333_v20 }
  0xae   : > { %1707 = vmatpush3.bf16.xpose.msra.mxu0 %v379_v21 }
  0xaf   : > { %1830 = vmatprep.subr.msk.bf16.mxu0 %vm338_vm0, %v335_v22 }
  0xb6   : > { %1709 = vmatpush3.bf16.xpose.msra.mxu0 %v382_v23 }
  0xb7   : > { %1831 = vmatprep.subr.msk.bf16.mxu0 %vm338_vm0, %v337_v24 }
  0xbe   : > { %1711 = vmatpush3.bf16.xpose.msra.mxu0 %v385_v25 }
  0xc5   : > { %1713 = vmatmul.mubr.msk.bf16.vlgmr.msra.gmra.mrb[0].mxu0 %vm338_vm0, %v2197_v26 }
  0xc6   : > { %1716 = vmatprep.mubr.msk.bf16.mxu0 %vm338_vm0, %v2200_v27 }
  0xcd   : > { %1717 = vmatmul.mubr.msk.bf16.gmra.mrb[4].mxu0 %vm338_vm0, %v2207_v28 }
  0xce   : > { %1720 = vmatprep.mubr.msk.bf16.mxu0 %vm338_vm0, %v2210_v29 }
  0xd5   : > { %1721 = vmatmul.mubr.msk.bf16.gmra.mrb[8].mxu0 %vm338_vm0, %v2217_v30 }
  0xd6   : > { %1724 = vmatprep.mubr.msk.bf16.mxu0 %vm338_vm0, %v2220_v31 }
  0xdd   : > { %1725 = vmatmul.mubr.msk.bf16.gmra.mrb[12].mxu0 %vm338_vm0, %v2227_v32 }
 0x198   : > { %v1714_v43 = vpop.f32.mrb[0].mxu0 }
 0x199   : > { %v486_v44 = vmul.f32 0.17677669, %v1714_v43  ;;  %v421_v45 = vpop.f32.mrb[1].mxu0 }
 0x19a   : > { %v1715_v46 = vpop.f32.mrb[2].mxu0  ;;  %v484_v47 = vmul.f32 0.17677669, %v421_v45 }
 0x19b   : > { %v424_v48 = vpop.f32.mrb[3].mxu0  ;;  %v504_v49 = vsel %vm241_vm1, %v486_v44, -1e+30  ;;  %v487_v52 = vmul.f32 0.17677669, %v1715_v46 }
 0x19c   : > { %v485_v50 = vmul.f32 0.17677669, %v424_v48  ;;  %522 = vmax.xlane.f32.xlu0 %v504_v49  ;;  %v502_v53 = vsel %vm241_vm1, %v484_v47, -1e+30 }
 0x19d   : > { %v505_v59 = vsel %vm241_vm1, %v487_v52, -1e+30 }
 0x19e   : > { %v2277_v51 = vsel %vm241_vm1, %v485_v50, -1e+30 }
 0x19f   : > { %520 = vmax.xlane.f32.xlu1 %v2277_v51 }
 0x1a0   : > { %518 = vmax.xlane.f32.xlu0 %v502_v53  ;;  %v1718_v54 = vpop.f32.mrb[4].mxu0 }
 0x1a1   : > { %v490_v55 = vmul.f32 0.17677669, %v1718_v54  ;;  %v437_v56 = vpop.f32.mrb[5].mxu0 }
 0x1a2   : > { %v488_v57 = vmul.f32 0.17677669, %v437_v56  ;;  %v1719_v58 = vpop.f32.mrb[6].mxu0 }
 0x1a3   : > { %v508_v60 = vsel %vm241_vm1, %v490_v55, -1e+30  ;;  %v440_v61 = vpop.f32.mrb[7].mxu0  ;;  %v491_v24 = vmul.f32 0.17677669, %v1719_v58 }
 0x1a4   : > { %524 = vmax.xlane.f32.xlu0 %v505_v59  ;;  %530 = vmax.xlane.f32.xlu1 %v508_v60  ;;  %v2288_v62 = vsel %vm241_vm1, %v488_v57, -1e+30  ;;  %v489_v25 = vmul.f32 0.17677669, %v440_v61 }
 0x1a5   : > { %v509_v41 = vsel %vm241_vm1, %v491_v24, -1e+30 }
 0x1a6   : > { %v2319_v44 = vsel %vm241_vm1, %v489_v25, -1e+30 }
 0x1a8   : > { %526 = vmax.xlane.f32.xlu1 %v2288_v62  ;;  %v1722_v63 = vpop.f32.mrb[8].mxu0 }
 0x1a9   : > { %v494_v0 = vmul.f32 0.17677669, %v1722_v63  ;;  %v453_v10 = vpop.f32.mrb[9].mxu0 }
 0x1aa   : > { %v492_v11 = vmul.f32 0.17677669, %v453_v10  ;;  %v1723_v12 = vpop.f32.mrb[10].mxu0 }
 0x1ab   : > { %v2293_v13 = vsel %vm241_vm1, %v494_v0, -1e+30  ;;  %v456_v14 = vpop.f32.mrb[11].mxu0  ;;  %v495_v43 = vmul.f32 0.17677669, %v1723_v12 }
 0x1ac   : > { %538 = vmax.xlane.f32.xlu1 %v2293_v13  ;;  %v2298_v15 = vsel %vm241_vm1, %v492_v11, -1e+30  ;;  %v493_v45 = vmul.f32 0.17677669, %v456_v14 }
 0x1b0   : > { %534 = vmax.xlane.f32.xlu1 %v2298_v15  ;;  %v1726_v16 = vpop.f32.mrb[12].mxu0 }
 0x1b1   : > { %v498_v17 = vmul.f32 0.17677669, %v1726_v16  ;;  %v469_v18 = vpop.f32.mrb[13].mxu0 }
 0x1b2   : > { %v496_v19 = vmul.f32 0.17677669, %v469_v18  ;;  %v1727_v20 = vpop.f32.mrb[14].mxu0 }
 0x1b3   : > { %v2303_v21 = vsel %vm241_vm1, %v498_v17, -1e+30  ;;  %v472_v22 = vpop.f32.mrb[15].mxu0  ;;  %v499_v46 = vmul.f32 0.17677669, %v1727_v20 }
 0x1b4   : > { %546 = vmax.xlane.f32.xlu1 %v2303_v21  ;;  %v2308_v23 = vsel %vm241_vm1, %v496_v19, -1e+30  ;;  %v497_v48 = vmul.f32 0.17677669, %v472_v22 }
 0x1b5   : > { %v2334_v47 = vsel %vm241_vm1, %v499_v46, -1e+30 }
 0x1b6   : > { %v2339_v50 = vsel %vm241_vm1, %v497_v48, -1e+30 }
 0x1b8   : > { %542 = vmax.xlane.f32.xlu1 %v2308_v23 }
 0x1ba   : > { %817 = vrot.lane.b32.xlu0 %v2140_v2, %s2092_s21  ;;  %v2324_v2 = vsel %vm241_vm1, %v495_v43, -1e+30 }
 0x1c9   : > { %819 = vrot.lane.b32.xlu1 %v2143_v3, %s2092_s21  ;;  %v2329_v3 = vsel %vm241_vm1, %v493_v45, -1e+30 }
 0x1d9   : > { %532 = vmax.xlane.f32.xlu0 %v509_v41 }
 0x1dd   : > { %528 = vmax.xlane.f32.xlu0 %v2319_v44 }
 0x1e1   : > { %540 = vmax.xlane.f32.xlu0 %v2324_v2 }
 0x1e5   : > { %536 = vmax.xlane.f32.xlu0 %v2329_v3 }
 0x1e9   : > { %548 = vmax.xlane.f32.xlu0 %v2334_v47 }
 0x1ed   : > { %544 = vmax.xlane.f32.xlu0 %v2339_v50 }
 0x229   : > { %v523_v52 = vpop.xlane.xlu0 %522 }
 0x22a   : > { %v552_v54 = vsub.f32 %v504_v49, %v523_v52 }
 0x22c   : > { %v570_v55 = vmul.f32 1.442695, %v552_v54  ;;  %v521_v56 = vpop.xlane.xlu1 %520 }
 0x22d   : > { %v519_v57 = vpop.xlane.xlu0 %518  ;;  %v551_v63 = vsub.f32 %v2277_v51, %v521_v56 }
 0x22e   : > { %1939 = vpow2.f32 %v570_v55  ;;  %v550_v58 = vsub.f32 %v502_v53, %v519_v57 }
 0x22f   : > { %v568_v17 = vmul.f32 1.442695, %v551_v63 }
 0x230   : > { %v566_v61 = vmul.f32 1.442695, %v550_v58 }
 0x231   : > { %v525_v0 = vpop.xlane.xlu0 %524  ;;  %v531_v10 = vpop.xlane.xlu1 %530 }
 0x232   : > { %1941 = vpow2.f32 %v566_v61  ;;  %v553_v11 = vsub.f32 %v505_v59, %v525_v0  ;;  %v556_v12 = vsub.f32 %v508_v60, %v531_v10 }
 0x234   : > { %v572_v14 = vmul.f32 1.442695, %v553_v11  ;;  %v578_v16 = vmul.f32 1.442695, %v556_v12 }
 0x235   : > { %v527_v18 = vpop.xlane.xlu1 %526  ;;  %v2368_v22 = vpop.permute.xlu0 %817 }
 0x236   : > { %1943 = vpow2.f32 %v572_v14  ;;  %v554_v49 = vsub.f32 %v2288_v62, %v527_v18 }
 0x237   : > { %1945 = vpow2.f32 %v578_v16 }
 0x238   : > { %v2344_v19 = vpop.eup %1939  ;;  %v574_v20 = vmul.f32 1.442695, %v554_v49  ;;  %1947 = vpow2.f32 %v568_v17 }
 0x239   : > { %602 = vadd.xlane.f32.xlu1 %v2344_v19  ;;  %v539_v45 = vpop.xlane.xlu1 %538 }
 0x23a   : > { %1949 = vpow2.f32 %v574_v20  ;;  %v560_v55 = vsub.f32 %v2293_v13, %v539_v45 }
 0x23c   : > { %v2347_v51 = vpop.eup %1941 }
 0x23d   : > { %598 = vadd.xlane.f32.xlu1 %v2347_v51 }
 0x240   : > { %v2350_v53 = vpop.eup %1943 }
 0x241   : > { %v2352_v59 = vpop.eup %1945  ;;  %604 = vadd.xlane.f32.xlu0 %v2350_v53 }
 0x242   : > { %610 = vadd.xlane.f32.xlu1 %v2352_v59  ;;  %v2356_v60 = vpop.eup %1947 }
 0x244   : > { %v2358_v62 = vpop.eup %1949 }
 0x245   : > { %600 = vadd.xlane.f32.xlu0 %v2356_v60 }
 0x246   : > { %606 = vadd.xlane.f32.xlu1 %v2358_v62 }
 0x257   : > { %821 = vrot.lane.b32.xlu1 %v2149_v4, %s2092_s21  ;;  %v535_v4 = vpop.xlane.xlu1 %534 }
 0x25b   : > { %823 = vrot.lane.b32.xlu0 %v2153_v5, %s2092_s21  ;;  %v558_v5 = vsub.f32 %v2298_v15, %v535_v4  ;;  %v547_v13 = vpop.xlane.xlu1 %546 }
 0x25c   : > { %v564_v12 = vsub.f32 %v2303_v21, %v547_v13 }
 0x25d   : > { %v582_v58 = vmul.f32 1.442695, %v558_v5 }
 0x25e   : > { %v594_v16 = vmul.f32 1.442695, %v564_v12 }
 0x25f   : > { %825 = vrot.lane.b32.xlu0 %v2157_v6, %s2092_s21  ;;  %v586_v6 = vmul.f32 1.442695, %v560_v55 }
 0x266   : > { %v533_v24 = vpop.xlane.xlu0 %532 }
 0x267   : > { %v557_v43 = vsub.f32 %v509_v41, %v533_v24 }
 0x269   : > { %v580_v48 = vmul.f32 1.442695, %v557_v43 }
 0x26a   : > { %v529_v25 = vpop.xlane.xlu0 %528 }
 0x26b   : > { %v555_v52 = vsub.f32 %v2319_v44, %v529_v25  ;;  %1951 = vpow2.f32 %v580_v48 }
 0x26d   : > { %v576_v56 = vmul.f32 1.442695, %v555_v52 }
 0x26e   : > { %v541_v46 = vpop.xlane.xlu0 %540 }
 0x26f   : > { %1953 = vpow2.f32 %v576_v56  ;;  %v561_v41 = vsub.f32 %v2324_v2, %v541_v46 }
 0x270   : > { %1955 = vpow2.f32 %v586_v6 }
 0x271   : > { %1957 = vpow2.f32 %v582_v58  ;;  %v588_v10 = vmul.f32 1.442695, %v561_v41 }
 0x272   : > { %v537_v54 = vpop.xlane.xlu0 %536 }
 0x273   : > { %v559_v15 = vsub.f32 %v2329_v3, %v537_v54 }
 0x275   : > { %v2375_v0 = vpop.eup %1951  ;;  %v584_v2 = vmul.f32 1.442695, %v559_v15 }
 0x276   : > { %v549_v57 = vpop.xlane.xlu0 %548 }
 0x277   : > { %v565_v49 = vsub.f32 %v2334_v47, %v549_v57 }
 0x279   : > { %v2379_v11 = vpop.eup %1953  ;;  %v596_v24 = vmul.f32 1.442695, %v565_v49 }
 0x27a   : > { %v545_v61 = vpop.xlane.xlu0 %544  ;;  %v2383_v14 = vpop.eup %1955 }
 0x27b   : > { %v563_v63 = vsub.f32 %v2339_v50, %v545_v61  ;;  %v543_v50 = vpop.xlane.xlu1 %542  ;;  %v2387_v18 = vpop.eup %1957 }
 0x27c   : > { %v562_v17 = vsub.f32 %v2308_v23, %v543_v50 }
 0x27d   : > { %v592_v44 = vmul.f32 1.442695, %v563_v63 }
 0x27e   : > { %612 = vadd.xlane.f32.xlu0 %v2375_v0  ;;  %v590_v21 = vmul.f32 1.442695, %v562_v17 }
 0x27f   : > { %1959 = vpow2.f32 %v592_v44 }
 0x280   : > { %1961 = vpow2.f32 %v588_v10 }
 0x281   : > { %1963 = vpow2.f32 %v584_v2 }
 0x282   : > { %608 = vadd.xlane.f32.xlu0 %v2379_v11  ;;  %1965 = vpow2.f32 %v594_v16 }
 0x283   : > { %1967 = vpow2.f32 %v590_v21 }
 0x284   : > { %1969 = vpow2.f32 %v596_v24 }
 0x286   : > { %618 = vadd.xlane.f32.xlu0 %v2383_v14 }
 0x289   : > { %v2389_v3 = vpop.eup %1959 }
 0x28a   : > { %614 = vadd.xlane.f32.xlu0 %v2387_v18  ;;  %624 = vadd.xlane.f32.xlu1 %v2389_v3  ;;  %v2394_v20 = vpop.eup %1961 }
 0x28b   : > { %v2397_v23 = vpop.eup %1963 }
 0x28c   : > { %v2400_v25 = vpop.eup %1965 }
 0x28d   : > { %v2403_v43 = vpop.eup %1967 }
 0x28e   : > { %620 = vadd.xlane.f32.xlu0 %v2394_v20  ;;  %v2408_v47 = vpop.eup %1969 }
 0x292   : > { %616 = vadd.xlane.f32.xlu0 %v2397_v23 }
 0x296   : > { %626 = vadd.xlane.f32.xlu0 %v2400_v25 }
 0x29a   : > { %622 = vadd.xlane.f32.xlu0 %v2403_v43 }
 0x29b   : > { %829 = vrot.lane.b32.xlu1 %v2165_v8, %s2092_s21  ;;  %v820_v8 = vpop.permute.xlu1 %819 }
 0x29e   : > { %628 = vadd.xlane.f32.xlu0 %v2408_v47 }
 0x29f   : > { %807 = vrot.lane.b32.xlu1 %v2210_v29, %s2093_s22 }
 0x2a3   : > { %811 = vrot.lane.b32.xlu1 %v2220_v31, %s2093_s22 }
 0x2a7   : > { %1162 = vrot.lane.b32.xlu1 %v2235_v34, %s2093_s22 }
 0x2b4   : > { %827 = vrot.lane.b32.xlu0 %v2161_v7, %s2092_s21 }
 0x2b8   : > { %799 = vrot.lane.b32.xlu0 %v2175_v9, %s2093_s22 }
 0x2bc   : > { %801 = vrot.lane.b32.xlu0 %v2197_v26, %s2093_s22 }
 0x2c0   : > { %803 = vrot.lane.b32.xlu0 %v2200_v27, %s2093_s22 }
 0x2c4   : > { %805 = vrot.lane.b32.xlu0 %v2207_v28, %s2093_s22 }
 0x2c6   : > { %v603_v29 = vpop.xlane.xlu1 %602 }
 0x2c8   : > { %809 = vrot.lane.b32.xlu0 %v2217_v30, %s2093_s22 }
 0x2ca   : > { %v599_v7 = vpop.xlane.xlu1 %598 }
 0x2cc   : > { %813 = vrot.lane.b32.xlu0 %v2227_v32, %s2093_s22 }
 0x2ce   : > { %v605_v31 = vpop.xlane.xlu0 %604 }
 0x2cf   : > { %1971 = vrcp.f32 %v605_v31  ;;  %v611_v54 = vpop.xlane.xlu1 %610 }
 0x2d0   : > { %1160 = vrot.lane.b32.xlu0 %v2137_v1, %s2093_s22  ;;  %1973 = vrcp.f32 %v599_v7  ;;  %v856_v1 = vsel %vm338_vm0, %v2265_v40, 0 }
 0x2d1   : > { %1975 = vrcp.f32 %v603_v29 }
 0x2d2   : > { %v601_v9 = vpop.xlane.xlu0 %600 }
 0x2d3   : > { %1977 = vrcp.f32 %v601_v9 }
 0x2d6   : > { %v824_v55 = vpop.permute.xlu0 %823 }
 0x2d7   : > { %v868_v4 = vsel %vm338_vm0, %v824_v55, 0 }
 0x2d9   : > { %v1972_v26 = vpop.eup %1971 }
 0x2da   : > { %v1974_v27 = vpop.eup %1973  ;;  %v649_v45 = vmul.f32 %v1972_v26, %v2350_v53  ;;  %v859_v53 = vsel %vm338_vm0, %v2368_v22, 0  ;;  %v826_v56 = vpop.permute.xlu0 %825 }
 0x2db   : > { %v1976_v28 = vpop.eup %1975  ;;  %v646_v30 = vmul.f32 %v1974_v27, %v2347_v51  ;;  %v607_v51 = vpop.xlane.xlu1 %606 }
 0x2dc   : > { %v648_v46 = vmul.f32 %v1976_v28, %v2344_v19  ;;  %v862_v19 = vsel %vm338_vm0, %v820_v8, 0 }
 0x2dd   : > { %v1978_v34 = vpop.eup %1977 }
 0x2de   : > { %v647_v32 = vmul.f32 %v1978_v34, %v2356_v60  ;;  %v663_v52 = vpack.c.bf16 %v649_v45, %v648_v46 }
 0x2df   : > { %v822_v60 = vpop.permute.xlu1 %821 }
 0x2e0   : > { %v662_v48 = vpack.c.bf16 %v647_v32, %v646_v30  ;;  %v865_v40 = vsel %vm338_vm0, %v822_v60, 0 }
 0x2e2   : > { %1744 = vmatprep.mubr.bf16.mxu1 %v662_v48 }
 0x2e3   : > { %1745 = vmatmul.mubr.bf16.vlgmr.msra.gmra.mrb[0].mxu1 %v663_v52 }
 0x2e4   : > { %1761 = vmatpush3.bf16.xpose.msra.mxu1 %v856_v1 }
 0x2e5   : > { %1833 = vmatprep.subr.msk.bf16.mxu1 %vm338_vm0, %v2368_v22  ;;  %v871_v22 = vsel %vm338_vm0, %v826_v56, 0 }
 0x2ec   : > { %1763 = vmatpush3.bf16.xpose.msra.mxu1 %v859_v53 }
 0x2ed   : > { %1834 = vmatprep.subr.msk.bf16.mxu1 %vm338_vm0, %v820_v8 }
 0x2f4   : > { %1765 = vmatpush3.bf16.xpose.msra.mxu1 %v862_v19 }
 0x2f5   : > { %1835 = vmatprep.subr.msk.bf16.mxu1 %vm338_vm0, %v822_v60 }
 0x2fc   : > { %1767 = vmatpush3.bf16.xpose.msra.mxu1 %v865_v40 }
 0x2fd   : > { %1836 = vmatprep.subr.msk.bf16.mxu1 %vm338_vm0, %v824_v55 }
 0x304   : > { %1769 = vmatpush3.bf16.xpose.msra.mxu1 %v868_v4 }
 0x305   : > { %1837 = vmatprep.subr.msk.bf16.mxu1 %vm338_vm0, %v826_v56 }
 0x30b   : > { %v613_v5 = vpop.xlane.xlu0 %612 }
 0x30c   : > { %1771 = vmatpush3.bf16.xpose.msra.mxu1 %v871_v22  ;;  %1979 = vrcp.f32 %v613_v5 }
 0x30d   : > { %1981 = vrcp.f32 %v607_v51 }
 0x30e   : > { %1983 = vrcp.f32 %v611_v54 }
 0x30f   : > { %v609_v57 = vpop.xlane.xlu0 %608 }
 0x310   : > { %1985 = vrcp.f32 %v609_v57 }
 0x313   : > { %v619_v6 = vpop.xlane.xlu0 %618 }
 0x316   : > { %v1980_v58 = vpop.eup %1979 }
 0x317   : > { %v615_v61 = vpop.xlane.xlu0 %614  ;;  %v1982_v41 = vpop.eup %1981  ;;  %v653_v13 = vmul.f32 %v1980_v58, %v2375_v0 }
 0x318   : > { %v1984_v63 = vpop.eup %1983  ;;  %v650_v15 = vmul.f32 %v1982_v41, %v2358_v62  ;;  %v625_v21 = vpop.xlane.xlu1 %624 }
 0x319   : > { %v652_v2 = vmul.f32 %v1984_v63, %v2352_v59 }
 0x31a   : > { %v1986_v44 = vpop.eup %1985 }
 0x31b   : > { %v621_v10 = vpop.xlane.xlu0 %620  ;;  %v651_v12 = vmul.f32 %v1986_v44, %v2379_v11  ;;  %v665_v16 = vpack.c.bf16 %v653_v13, %v652_v2 }
 0x31c   : > { %1987 = vrcp.f32 %v621_v10  ;;  %v830_v34 = vpop.permute.xlu1 %829 }
 0x31d   : > { %v664_v50 = vpack.c.bf16 %v651_v12, %v650_v15  ;;  %1989 = vrcp.f32 %v615_v61  ;;  %v877_v52 = vsel %vm338_vm0, %v830_v34, 0 }
 0x31e   : > { %1991 = vrcp.f32 %v619_v6 }
 0x31f   : > { %1748 = vmatprep.mubr.bf16.mxu1 %v664_v50  ;;  %v617_v17 = vpop.xlane.xlu0 %616 }
 0x320   : > { %1993 = vrcp.f32 %v617_v17  ;;  %1749 = vmatmul.mubr.bf16.gmra.mrb[4].mxu1 %v665_v16  ;;  %v808_v19 = vpop.permute.xlu1 %807 }
 0x321   : > { %1995 = vrcp.f32 %v625_v21 }
 0x323   : > { %v627_v49 = vpop.xlane.xlu0 %626 }
 0x324   : > { %v812_v60 = vpop.permute.xlu1 %811 }
 0x326   : > { %v1988_v0 = vpop.eup %1987 }
 0x327   : > { %v623_v24 = vpop.xlane.xlu0 %622  ;;  %v1990_v8 = vpop.eup %1989  ;;  %v657_v59 = vmul.f32 %v1988_v0, %v2394_v20 }
 0x328   : > { %1997 = vrcp.f32 %v623_v24  ;;  %v1992_v62 = vpop.eup %1991  ;;  %v654_v7 = vmul.f32 %v1990_v8, %v2387_v18  ;;  %v1163_v5 = vpop.permute.xlu1 %1162 }
 0x329   : > { %1999 = vrcp.f32 %v627_v49  ;;  %v656_v9 = vmul.f32 %v1992_v62, %v2383_v14 }
 0x32a   : > { %v1994_v11 = vpop.eup %1993 }
 0x32b   : > { %v629_v29 = vpop.xlane.xlu0 %628  ;;  %v655_v31 = vmul.f32 %v1994_v11, %v2397_v23  ;;  %v667_v27 = vpack.c.bf16 %v657_v59, %v656_v9  ;;  %v1996_v45 = vpop.eup %1995 }
 0x32c   : > { %2001 = vrcp.f32 %v629_v29  ;;  %v659_v23 = vmul.f32 %v1996_v45, %v2389_v3 }
 0x32d   : > { %v666_v26 = vpack.c.bf16 %v655_v31, %v654_v7 }
 0x32f   : > { %1752 = vmatprep.mubr.bf16.mxu1 %v666_v26  ;;  %v828_v28 = vpop.permute.xlu0 %827 }
 0x330   : > { %1753 = vmatmul.mubr.bf16.gmra.mrb[8].mxu1 %v667_v27  ;;  %v874_v30 = vsel %vm338_vm0, %v828_v28, 0  ;;  %1838 = vmatprep.subr.msk.bf16.mxu1 %vm338_vm0, %v828_v28 }
 0x331   : > { %1773 = vmatpush3.bf16.xpose.msra.mxu1 %v874_v30 }
 0x332   : > { %v1998_v20 = vpop.eup %1997  ;;  %1839 = vmatprep.subr.msk.bf16.mxu1 %vm338_vm0, %v830_v34 }
 0x333   : > { %v658_v18 = vmul.f32 %v1998_v20, %v2403_v43  ;;  %v2000_v14 = vpop.eup %1999  ;;  %v800_v46 = vpop.permute.xlu0 %799 }
 0x334   : > { %v660_v1 = vmul.f32 %v2000_v14, %v2400_v25 }
 0x335   : > { %v668_v32 = vpack.c.bf16 %v659_v23, %v658_v18 }
 0x336   : > { %v2002_v48 = vpop.eup %2001 }
 0x337   : > { %1756 = vmatprep.mubr.bf16.mxu1 %v668_v32  ;;  %v661_v54 = vmul.f32 %v2002_v48, %v2408_v47  ;;  %v802_v51 = vpop.permute.xlu0 %801 }
 0x339   : > { %v669_v53 = vpack.c.bf16 %v661_v54, %v660_v1  ;;  %1775 = vmatpush3.bf16.xpose.msra.mxu1 %v877_v52 }
 0x33b   : > { %1757 = vmatmul.mubr.bf16.gmra.mrb[12].mxu1 %v669_v53  ;;  %v804_v43 = vpop.permute.xlu0 %803 }
 0x33c   : > { %1776 = vmatprep.mubr.msk.bf16.mxu1 %vm338_vm0, %v800_v46 }
 0x33f   : > { %v806_v3 = vpop.permute.xlu0 %805 }
 0x343   : > { %1777 = vmatmul.mubr.msk.bf16.vlgmr.msra.gmra.mrb[16].mxu1 %vm338_vm0, %v802_v51  ;;  %v810_v25 = vpop.permute.xlu0 %809 }
 0x344   : > { %1780 = vmatprep.mubr.msk.bf16.mxu1 %vm338_vm0, %v804_v43 }
 0x347   : > { %v814_v47 = vpop.permute.xlu0 %813 }
 0x34b   : > { %1781 = vmatmul.mubr.msk.bf16.gmra.mrb[20].mxu1 %vm338_vm0, %v806_v3  ;;  %v1161_v22 = vpop.permute.xlu0 %1160 }
 0x34c   : > { %1784 = vmatprep.mubr.msk.bf16.mxu1 %vm338_vm0, %v808_v19  ;;  %1792 = vmatprep.subr.bf16.mxu0 %v1161_v22 }
 0x34d   : > { %1793 = vmatpush3.bf16.msra.mxu0 %v1161_v22 }
 0x34e   : > { %1794 = vmatprep.subr.bf16.mxu0 %v1163_v5 }
 0x351   : > { %1795 = vmatpush3.bf16.msra.mxu0 %v1163_v5 }
 0x353   : > { %1785 = vmatmul.mubr.msk.bf16.gmra.mrb[24].mxu1 %vm338_vm0, %v810_v25 }
 0x354   : > { %1788 = vmatprep.mubr.msk.bf16.mxu1 %vm338_vm0, %v812_v60 }
 0x35b   : > { %1789 = vmatmul.mubr.msk.bf16.gmra.mrb[28].mxu1 %vm338_vm0, %v814_v47 }
 0x3b6   : > { %v2475_v40 = vpop.f32.mrb[0].mxu1 }
 0x3b7   : > { %v2477_v55 = vpop.f32.mrb[1].mxu1 }
 0x3b8   : > { %v2479_v4 = vpop.f32.mrb[2].mxu1 }
 0x3b9   : > { %v2481_v56 = vpop.f32.mrb[3].mxu1 }
 0x3f3   : > { %v2483_v57 = vpop.f32.mrb[4].mxu1 }
 0x3f4   : > { %v2485_v6 = vpop.f32.mrb[5].mxu1 }
 0x3f5   : > { %v2487_v58 = vpop.f32.mrb[6].mxu1 }
 0x3f6   : > { %v2489_v61 = vpop.f32.mrb[7].mxu1 }
 0x403   : > { %v2491_v41 = vpop.f32.mrb[8].mxu1 }
 0x404   : > { %v2493_v63 = vpop.f32.mrb[9].mxu1 }
 0x405   : > { %v2495_v44 = vpop.f32.mrb[10].mxu1 }
 0x406   : > { %v2497_v13 = vpop.f32.mrb[11].mxu1 }
 0x40e   : > { %v2499_v10 = vpop.f32.mrb[12].mxu1 }
 0x40f   : > { %v2501_v15 = vpop.f32.mrb[13].mxu1 }
 0x410   : > { %v2503_v12 = vpop.f32.mrb[14].mxu1 }
 0x411   : > { %v2505_v2 = vpop.f32.mrb[15].mxu1 }
 0x416   : > { %v1778_v50 = vpop.f32.mrb[16].mxu1 }
 0x417   : > { %v978_v16 = vmul.f32 0.17677669, %v1778_v50  ;;  %v913_v17 = vpop.f32.mrb[17].mxu1 }
 0x418   : > { %v976_v21 = vmul.f32 0.17677669, %v913_v17  ;;  %v1779_v49 = vpop.f32.mrb[18].mxu1 }
 0x419   : > { %v916_v0 = vpop.f32.mrb[19].mxu1  ;;  %v2509_v24 = vsel %vm241_vm1, %v978_v16, -1e+30  ;;  %v979_v8 = vmul.f32 0.17677669, %v1779_v49 }
 0x41a   : > { %v977_v62 = vmul.f32 0.17677669, %v916_v0  ;;  %1012 = vmax.xlane.f32.xlu0 %v2509_v24  ;;  %v2514_v11 = vsel %vm241_vm1, %v976_v21, -1e+30 }
 0x41b   : > { %1008 = vmax.xlane.f32.xlu1 %v2514_v11  ;;  %v2524_v7 = vsel %vm241_vm1, %v979_v8, -1e+30 }
 0x41c   : > { %v2519_v59 = vsel %vm241_vm1, %v977_v62, -1e+30 }
 0x41e   : > { %1010 = vmax.xlane.f32.xlu0 %v2519_v59  ;;  %v1782_v29 = vpop.f32.mrb[20].mxu1 }
 0x41f   : > { %v982_v31 = vmul.f32 0.17677669, %v1782_v29  ;;  %1014 = vmax.xlane.f32.xlu1 %v2524_v7  ;;  %v929_v9 = vpop.f32.mrb[21].mxu1 }
 0x420   : > { %v980_v26 = vmul.f32 0.17677669, %v929_v9  ;;  %v1783_v27 = vpop.f32.mrb[22].mxu1 }
 0x421   : > { %v983_v28 = vmul.f32 0.17677669, %v1783_v27  ;;  %v932_v34 = vpop.f32.mrb[23].mxu1  ;;  %v998_v45 = vsel %vm241_vm1, %v982_v31, -1e+30 }
 0x422   : > { %1020 = vmax.xlane.f32.xlu0 %v998_v45  ;;  %v981_v30 = vmul.f32 0.17677669, %v932_v34  ;;  %v2536_v18 = vsel %vm241_vm1, %v980_v26, -1e+30 }
 0x423   : > { %v2531_v20 = vsel %vm241_vm1, %v983_v28, -1e+30 }
 0x424   : > { %1022 = vmax.xlane.f32.xlu1 %v2531_v20  ;;  %v2541_v46 = vsel %vm241_vm1, %v981_v30, -1e+30 }
 0x426   : > { %1016 = vmax.xlane.f32.xlu0 %v2536_v18  ;;  %v1786_v23 = vpop.f32.mrb[24].mxu1 }
 0x427   : > { %v986_v14 = vmul.f32 0.17677669, %v1786_v23  ;;  %v945_v32 = vpop.f32.mrb[25].mxu1 }
 0x428   : > { %v984_v48 = vmul.f32 0.17677669, %v945_v32  ;;  %1018 = vmax.xlane.f32.xlu1 %v2541_v46  ;;  %v1787_v52 = vpop.f32.mrb[26].mxu1 }
 0x429   : > { %v987_v1 = vmul.f32 0.17677669, %v1787_v52  ;;  %v948_v54 = vpop.f32.mrb[27].mxu1  ;;  %v2546_v53 = vsel %vm241_vm1, %v986_v14, -1e+30 }
 0x42a   : > { %1028 = vmax.xlane.f32.xlu0 %v2546_v53  ;;  %v985_v51 = vmul.f32 0.17677669, %v948_v54  ;;  %v2556_v3 = vsel %vm241_vm1, %v984_v48, -1e+30 }
 0x42b   : > { %v2551_v43 = vsel %vm241_vm1, %v987_v1, -1e+30 }
 0x42c   : > { %1030 = vmax.xlane.f32.xlu1 %v2551_v43  ;;  %v2561_v60 = vsel %vm241_vm1, %v985_v51, -1e+30 }
 0x42e   : > { %1024 = vmax.xlane.f32.xlu0 %v2556_v3  ;;  %v1790_v19 = vpop.f32.mrb[28].mxu1 }
 0x42f   : > { %v990_v25 = vmul.f32 0.17677669, %v1790_v19  ;;  %v961_v47 = vpop.f32.mrb[29].mxu1 }
 0x430   : > { %1026 = vmax.xlane.f32.xlu1 %v2561_v60  ;;  %v988_v22 = vmul.f32 0.17677669, %v961_v47  ;;  %v1791_v5 = vpop.f32.mrb[30].mxu1 }
 0x431   : > { %v2566_v50 = vsel %vm241_vm1, %v990_v25, -1e+30  ;;  %v964_v16 = vpop.f32.mrb[31].mxu1  ;;  %v991_v21 = vmul.f32 0.17677669, %v1791_v5 }
 0x432   : > { %1036 = vmax.xlane.f32.xlu0 %v2566_v50  ;;  %v2571_v17 = vsel %vm241_vm1, %v988_v22, -1e+30  ;;  %v989_v49 = vmul.f32 0.17677669, %v964_v16 }
 0x433   : > { %v2584_v0 = vsel %vm241_vm1, %v991_v21, -1e+30 }
 0x436   : > { %1032 = vmax.xlane.f32.xlu0 %v2571_v17 }
 0x441   : > { %1168 = vrot.lane.b32.xlu1 %v2247_v36, %s2093_s22  ;;  %v2589_v36 = vsel %vm241_vm1, %v989_v49, -1e+30 }
 0x44c   : > { %1164 = vrot.lane.b32.xlu0 %v2232_v33, %s2093_s22 }
 0x450   : > { %1166 = vrot.lane.b32.xlu0 %v2242_v35, %s2093_s22 }
 0x454   : > { %1172 = vrot.lane.b32.xlu0 %v2257_v38, %s2093_s22 }
 0x465   : > { %1038 = vmax.xlane.f32.xlu1 %v2584_v0 }
 0x469   : > { %1034 = vmax.xlane.f32.xlu1 %v2589_v36 }
 0x47a   : > { %1170 = vrot.lane.b32.xlu1 %v2252_v37, %s2093_s22 }
 0x4a7   : > { %v1013_v33 = vpop.xlane.xlu0 %1012 }
 0x4a8   : > { %v1042_v35 = vsub.f32 %v2509_v24, %v1013_v33  ;;  %v1009_v38 = vpop.xlane.xlu1 %1008 }
 0x4a9   : > { %v1040_v8 = vsub.f32 %v2514_v11, %v1009_v38 }
 0x4aa   : > { %v1060_v62 = vmul.f32 1.442695, %v1042_v35 }
 0x4ab   : > { %v1011_v29 = vpop.xlane.xlu0 %1010  ;;  %v1056_v31 = vmul.f32 1.442695, %v1040_v8 }
 0x4ac   : > { %2003 = vpow2.f32 %v1060_v62  ;;  %v1015_v9 = vpop.xlane.xlu1 %1014  ;;  %v1041_v26 = vsub.f32 %v2519_v59, %v1011_v29 }
 0x4ad   : > { %v1043_v42 = vsub.f32 %v2524_v7, %v1015_v9  ;;  %2005 = vpow2.f32 %v1056_v31 }
 0x4ae   : > { %v1058_v23 = vmul.f32 1.442695, %v1041_v26 }
 0x4af   : > { %v1062_v27 = vmul.f32 1.442695, %v1043_v42  ;;  %v1021_v28 = vpop.xlane.xlu0 %1020 }
 0x4b0   : > { %v1046_v34 = vsub.f32 %v998_v45, %v1021_v28 }
 0x4b1   : > { %v1023_v37 = vpop.xlane.xlu1 %1022  ;;  %2007 = vpow2.f32 %v1062_v27 }
 0x4b2   : > { %v1068_v30 = vmul.f32 1.442695, %v1046_v34  ;;  %v1047_v24 = vsub.f32 %v2531_v20, %v1023_v37 }
 0x4b3   : > { %v1017_v11 = vpop.xlane.xlu0 %1016 }
 0x4b4   : > { %2009 = vpow2.f32 %v1068_v30  ;;  %v1044_v14 = vsub.f32 %v2536_v18, %v1017_v11  ;;  %v1070_v52 = vmul.f32 1.442695, %v1047_v24 }
 0x4b5   : > { %v1019_v32 = vpop.xlane.xlu1 %1018  ;;  %2011 = vpow2.f32 %v1058_v23 }
 0x4b6   : > { %v2600_v48 = vpop.eup %2003  ;;  %v1064_v7 = vmul.f32 1.442695, %v1044_v14  ;;  %v1045_v59 = vsub.f32 %v2541_v46, %v1019_v32 }
 0x4b7   : > { %1092 = vadd.xlane.f32.xlu1 %v2600_v48  ;;  %v1029_v45 = vpop.xlane.xlu0 %1028  ;;  %v2605_v51 = vpop.eup %2005 }
 0x4b8   : > { %2013 = vpow2.f32 %v1064_v7  ;;  %v1066_v1 = vmul.f32 1.442695, %v1045_v59  ;;  %v1050_v54 = vsub.f32 %v2546_v53, %v1029_v45 }
 0x4b9   : > { %v1031_v20 = vpop.xlane.xlu1 %1030  ;;  %2015 = vpow2.f32 %v1070_v52 }
 0x4ba   : > { %2017 = vpow2.f32 %v1066_v1  ;;  %v1076_v19 = vmul.f32 1.442695, %v1050_v54  ;;  %v1051_v53 = vsub.f32 %v2551_v43, %v1031_v20 }
 0x4bb   : > { %1088 = vadd.xlane.f32.xlu1 %v2605_v51  ;;  %v1025_v18 = vpop.xlane.xlu0 %1024  ;;  %v2609_v25 = vpop.eup %2007 }
 0x4bc   : > { %v1048_v46 = vsub.f32 %v2556_v3, %v1025_v18  ;;  %2019 = vpow2.f32 %v1076_v19 }
 0x4bd   : > { %v1027_v47 = vpop.xlane.xlu1 %1026 }
 0x4be   : > { %v2611_v22 = vpop.eup %2009  ;;  %v1049_v5 = vsub.f32 %v2561_v60, %v1027_v47  ;;  %v1072_v21 = vmul.f32 1.442695, %v1048_v46  ;;  %v1078_v60 = vmul.f32 1.442695, %v1051_v53 }
 0x4bf   : > { %1094 = vadd.xlane.f32.xlu1 %v2609_v25  ;;  %1100 = vadd.xlane.f32.xlu0 %v2611_v22  ;;  %v1037_v16 = vpop.xlane.xlu0 %1036  ;;  %v2618_v3 = vpop.eup %2011 }
 0x4c0   : > { %v1074_v49 = vmul.f32 1.442695, %v1049_v5  ;;  %v1054_v33 = vsub.f32 %v2566_v50, %v1037_v16 }
 0x4c1   : > { %v1169_v26 = vpop.permute.xlu1 %1168 }
 0x4c2   : > { %v2620_v35 = vpop.eup %2013  ;;  %2021 = vpow2.f32 %v1074_v49  ;;  %v1084_v38 = vmul.f32 1.442695, %v1054_v33 }
 0x4c3   : > { %1090 = vadd.xlane.f32.xlu1 %v2618_v3  ;;  %1096 = vadd.xlane.f32.xlu0 %v2620_v35  ;;  %v1033_v43 = vpop.xlane.xlu0 %1032  ;;  %2023 = vpow2.f32 %v1072_v21  ;;  %v2625_v62 = vpop.eup %2015 }
 0x4c4   : > { %v1052_v8 = vsub.f32 %v2571_v17, %v1033_v43  ;;  %v2627_v29 = vpop.eup %2017  ;;  %2025 = vpow2.f32 %v1084_v38 }
 0x4c5   : > { %2027 = vpow2.f32 %v1078_v60 }
 0x4c6   : > { %v1080_v50 = vmul.f32 1.442695, %v1052_v8  ;;  %v2631_v9 = vpop.eup %2019 }
 0x4c7   : > { %1098 = vadd.xlane.f32.xlu1 %v2627_v29  ;;  %1102 = vadd.xlane.f32.xlu0 %v2625_v62  ;;  %v1165_v31 = vpop.permute.xlu0 %1164 }
 0x4c8   : > { %1796 = vmatprep.subr.bf16.mxu0 %v1165_v31  ;;  %2029 = vpow2.f32 %v1080_v50 }
 0x4c9   : > { %1797 = vmatpush3.bf16.msra.mxu0 %v1165_v31 }
 0x4cb   : > { %1108 = vadd.xlane.f32.xlu0 %v2631_v9  ;;  %v1167_v17 = vpop.permute.xlu0 %1166 }
 0x4cc   : > { %v2634_v42 = vpop.eup %2021  ;;  %1798 = vmatprep.subr.bf16.mxu0 %v1167_v17 }
 0x4cd   : > { %1106 = vadd.xlane.f32.xlu1 %v2634_v42  ;;  %1799 = vmatpush3.bf16.msra.mxu0 %v1167_v17  ;;  %v2637_v27 = vpop.eup %2023 }
 0x4ce   : > { %1800 = vmatprep.subr.bf16.mxu0 %v1169_v26  ;;  %v2640_v28 = vpop.eup %2025 }
 0x4cf   : > { %1104 = vadd.xlane.f32.xlu0 %v2637_v27  ;;  %v2643_v34 = vpop.eup %2027  ;;  %v1173_v7 = vpop.permute.xlu0 %1172 }
 0x4d1   : > { %1116 = vadd.xlane.f32.xlu1 %v2640_v28  ;;  %1801 = vmatpush3.bf16.msra.mxu0 %v1169_v26 }
 0x4d2   : > { %v2646_v37 = vpop.eup %2029 }
 0x4d3   : > { %1110 = vadd.xlane.f32.xlu0 %v2643_v34 }
 0x4d5   : > { %1112 = vadd.xlane.f32.xlu1 %v2646_v37 }
 0x4e6   : > { %1174 = vrot.lane.b32.xlu1 %v2260_v39, %s2093_s22 }
 0x4f2   : > { %v1039_v30 = vpop.xlane.xlu1 %1038 }
 0x4f3   : > { %v1055_v24 = vsub.f32 %v2584_v0, %v1039_v30 }
 0x4f5   : > { %v1086_v59 = vmul.f32 1.442695, %v1055_v24 }
 0x4f6   : > { %v1035_v23 = vpop.xlane.xlu1 %1034 }
 0x4f7   : > { %v1053_v11 = vsub.f32 %v2589_v36, %v1035_v23 }
 0x4f9   : > { %v1082_v14 = vmul.f32 1.442695, %v1053_v11 }
 0x4fa   : > { %v1171_v32 = vpop.permute.xlu1 %1170 }
 0x4fb   : > { %2031 = vpow2.f32 %v1082_v14  ;;  %1802 = vmatprep.subr.bf16.mxu0 %v1171_v32 }
 0x4fc   : > { %1803 = vmatpush3.bf16.msra.mxu0 %v1171_v32  ;;  %2033 = vpow2.f32 %v1086_v59 }
 0x4fd   : > { %1804 = vmatprep.subr.bf16.mxu0 %v1173_v7 }
 0x500   : > { %1805 = vmatpush3.bf16.msra.mxu0 %v1173_v7 }
 0x505   : > { %v2653_v52 = vpop.eup %2031 }
 0x506   : > { %1114 = vadd.xlane.f32.xlu0 %v2653_v52  ;;  %v2656_v39 = vpop.eup %2033 }
 0x50a   : > { %1118 = vadd.xlane.f32.xlu0 %v2656_v39 }
 0x544   : > { %v1093_v0 = vpop.xlane.xlu1 %1092 }
 0x548   : > { %v1089_v36 = vpop.xlane.xlu1 %1088 }
 0x549   : > { %2035 = vrcp.f32 %v1089_v36 }
 0x54c   : > { %v1095_v45 = vpop.xlane.xlu1 %1094  ;;  %v1101_v1 = vpop.xlane.xlu0 %1100 }
 0x550   : > { %v1091_v54 = vpop.xlane.xlu1 %1090  ;;  %v1097_v20 = vpop.xlane.xlu0 %1096 }
 0x551   : > { %2037 = vrcp.f32 %v1091_v54 }
 0x552   : > { %2039 = vrcp.f32 %v1095_v45 }
 0x553   : > { %v2036_v47 = vpop.eup %2035 }
 0x554   : > { %v1103_v18 = vpop.xlane.xlu0 %1102  ;;  %v1099_v19 = vpop.xlane.xlu1 %1098  ;;  %v1136_v16 = vmul.f32 %v2036_v47, %v2605_v51 }
 0x555   : > { %2041 = vrcp.f32 %v1099_v19 }
 0x556   : > { %2043 = vrcp.f32 %v1093_v0 }
 0x557   : > { %2045 = vrcp.f32 %v1097_v20 }
 0x558   : > { %v1109_v46 = vpop.xlane.xlu0 %1108  ;;  %2047 = vrcp.f32 %v1103_v18 }
 0x55a   : > { %v1107_v5 = vpop.xlane.xlu1 %1106 }
 0x55b   : > { %v2038_v53 = vpop.eup %2037 }
 0x55c   : > { %v1137_v21 = vmul.f32 %v2038_v53, %v2618_v3  ;;  %v1105_v49 = vpop.xlane.xlu0 %1104  ;;  %v2040_v43 = vpop.eup %2039 }
 0x55d   : > { %2049 = vrcp.f32 %v1105_v49  ;;  %v1139_v17 = vmul.f32 %v2040_v43, %v2609_v25 }
 0x55e   : > { %v1117_v33 = vpop.xlane.xlu1 %1116  ;;  %v1152_v38 = vpack.c.bf16 %v1137_v21, %v1136_v16  ;;  %2051 = vrcp.f32 %v1101_v1 }
 0x55f   : > { %v2042_v8 = vpop.eup %2041  ;;  %2053 = vrcp.f32 %v1107_v5 }
 0x560   : > { %1808 = vmatprep.mubr.bf16.mxu0 %v1152_v38  ;;  %v2044_v50 = vpop.eup %2043  ;;  %v1111_v26 = vpop.xlane.xlu0 %1110  ;;  %v1141_v51 = vmul.f32 %v2042_v8, %v2627_v29 }
 0x561   : > { %v2046_v31 = vpop.eup %2045  ;;  %v1138_v3 = vmul.f32 %v2044_v50, %v2600_v48  ;;  %2055 = vrcp.f32 %v1111_v26 }
 0x562   : > { %v1113_v60 = vpop.xlane.xlu1 %1112  ;;  %v1140_v23 = vmul.f32 %v2046_v31, %v2620_v35  ;;  %v2048_v11 = vpop.eup %2047  ;;  %2057 = vrcp.f32 %v1109_v46 }
 0x563   : > { %v1153_v24 = vpack.c.bf16 %v1139_v17, %v1138_v3  ;;  %v1143_v59 = vmul.f32 %v2048_v11, %v2625_v62  ;;  %2059 = vrcp.f32 %v1113_v60 }
 0x564   : > { %v1154_v14 = vpack.c.bf16 %v1141_v51, %v1140_v23 }
 0x566   : > { %v1175_v30 = vpop.permute.xlu1 %1174 }
 0x567   : > { %1806 = vmatprep.subr.bf16.mxu0 %v1175_v30  ;;  %v2050_v32 = vpop.eup %2049 }
 0x568   : > { %1807 = vmatpush3.bf16.msra.mxu0 %v1175_v30  ;;  %v2052_v7 = vpop.eup %2051  ;;  %v1144_v29 = vmul.f32 %v2050_v32, %v2637_v27 }
 0x569   : > { %v2054_v25 = vpop.eup %2053  ;;  %v1142_v48 = vmul.f32 %v2052_v7, %v2611_v22 }
 0x56a   : > { %v1145_v0 = vmul.f32 %v2054_v25, %v2634_v42 }
 0x56b   : > { %1809 = vmatmul.mubr.bf16.vlgmr.msra.gmra.mrb[16].mxu0 %v1153_v24  ;;  %v1155_v36 = vpack.c.bf16 %v1143_v59, %v1142_v48  ;;  %v2056_v45 = vpop.eup %2055 }
 0x56c   : > { %1812 = vmatprep.mubr.bf16.mxu0 %v1154_v14  ;;  %v1156_v35 = vpack.c.bf16 %v1145_v0, %v1144_v29  ;;  %v2058_v1 = vpop.eup %2057  ;;  %v1147_v54 = vmul.f32 %v2056_v45, %v2643_v34 }
 0x56d   : > { %v1146_v20 = vmul.f32 %v2058_v1, %v2631_v9  ;;  %v2060_v22 = vpop.eup %2059 }
 0x56e   : > { %v1148_v19 = vmul.f32 %v2060_v22, %v2646_v37 }
 0x56f   : > { %v1157_v18 = vpack.c.bf16 %v1147_v54, %v1146_v20 }
 0x573   : > { %1813 = vmatmul.mubr.bf16.gmra.mrb[20].mxu0 %v1155_v36 }
 0x574   : > { %1816 = vmatprep.mubr.bf16.mxu0 %v1156_v35 }
 0x57b   : > { %1817 = vmatmul.mubr.bf16.gmra.mrb[24].mxu0 %v1157_v18 }
 0x593   : > { %v1115_v62 = vpop.xlane.xlu0 %1114 }
 0x594   : > { %2061 = vrcp.f32 %v1115_v62 }
 0x595   : > { %2063 = vrcp.f32 %v1117_v33 }
 0x597   : > { %v1119_v27 = vpop.xlane.xlu0 %1118 }
 0x598   : > { %2065 = vrcp.f32 %v1119_v27 }
 0x59e   : > { %v2062_v42 = vpop.eup %2061 }
 0x59f   : > { %v1149_v46 = vmul.f32 %v2062_v42, %v2653_v52  ;;  %v2064_v47 = vpop.eup %2063 }
 0x5a0   : > { %v1150_v9 = vmul.f32 %v2064_v47, %v2640_v28 }
 0x5a1   : > { %v1158_v5 = vpack.c.bf16 %v1149_v46, %v1148_v19 }
 0x5a2   : > { %v2066_v53 = vpop.eup %2065 }
 0x5a3   : > { %1820 = vmatprep.mubr.bf16.mxu0 %v1158_v5  ;;  %v1151_v34 = vmul.f32 %v2066_v53, %v2656_v39 }
 0x5a5   : > { %v1159_v16 = vpack.c.bf16 %v1151_v34, %v1150_v9 }
 0x5a7   : > { %1821 = vmatmul.mubr.bf16.gmra.mrb[28].mxu0 %v1159_v16 }
 0x63e   : > { %v1810_v21 = vpop.f32.mrb[16].mxu0 }
 0x63f   : > { %v1218_v49 = vpop.f32.mrb[17].mxu0 }
 0x640   : > { %v1811_v33 = vpop.f32.mrb[18].mxu0 }
 0x641   : > { %v1867_v38 = vpack.i.bf16 %v1811_v33, %v1810_v21  ;;  %v1221_v43 = vpop.f32.mrb[19].mxu0 }
 0x642   : > { %v1872_v60 = vpack.i.bf16 %v1221_v43, %v1218_v49 }
 0x643   : > { %1868 = vrot.lane.b32.xlu1 %v1867_v38, %s2092_s21 }
 0x644   : > { %1873 = vrot.lane.b32.xlu0 %v1872_v60, %s2092_s21 }
 0x646   : > { %v1814_v37 = vpop.f32.mrb[20].mxu0 }
 0x647   : > { %v1234_v52 = vpop.f32.mrb[21].mxu0 }
 0x648   : > { %v1815_v8 = vpop.f32.mrb[22].mxu0 }
 0x649   : > { %v1877_v50 = vpack.i.bf16 %v1815_v8, %v1814_v37  ;;  %v1237_v31 = vpop.f32.mrb[23].mxu0 }
 0x64a   : > { %v1882_v28 = vpack.i.bf16 %v1237_v31, %v1234_v52 }
 0x64b   : > { %1878 = vrot.lane.b32.xlu0 %v1877_v50, %s2092_s21 }
 0x64c   : > { %1883 = vrot.lane.b32.xlu1 %v1882_v28, %s2092_s21 }
 0x64e   : > { %v1818_v39 = vpop.f32.mrb[24].mxu0 }
 0x64f   : > { %v1250_v17 = vpop.f32.mrb[25].mxu0 }
 0x650   : > { %v1819_v26 = vpop.f32.mrb[26].mxu0 }
 0x651   : > { %v1887_v30 = vpack.i.bf16 %v1819_v26, %v1818_v39  ;;  %v1253_v51 = vpop.f32.mrb[27].mxu0 }
 0x652   : > { %v1892_v3 = vpack.i.bf16 %v1253_v51, %v1250_v17 }
 0x653   : > { %1888 = vrot.lane.b32.xlu0 %v1887_v30, %s2092_s21 }
 0x654   : > { %1893 = vrot.lane.b32.xlu1 %v1892_v3, %s2092_s21 }
 0x67a   : > { %v1822_v23 = vpop.f32.mrb[28].mxu0 }
 0x67b   : > { %v1266_v24 = vpop.f32.mrb[29].mxu0 }
 0x67c   : > { %v1823_v11 = vpop.f32.mrb[30].mxu0 }
 0x67d   : > { %v1902_v14 = vpack.i.bf16 %v1823_v11, %v1822_v23  ;;  %v1269_v32 = vpop.f32.mrb[31].mxu0 }
 0x67e   : > { %v1897_v7 = vpack.i.bf16 %v1269_v32, %v1266_v24 }
 0x67f   : > { %1903 = vrot.lane.b32.xlu0 %v1902_v14, %s2092_s21 }
 0x680   : > { %1898 = vrot.lane.b32.xlu1 %v1897_v7, %s2092_s21 }
 0x6b5   : > { %v1869_v25 = vpop.permute.xlu1 %1868 }
 0x6b6   : > { %v1871_v59 = vunpack.i.h.bf16 %v1869_v25  ;;  %v1870_v29 = vunpack.i.l.bf16 %v1869_v25  ;;  %v1874_v48 = vpop.permute.xlu0 %1873 }
 0x6b7   : > { %v1876_v0 = vunpack.i.h.bf16 %v1874_v48  ;;  %v1875_v36 = vunpack.i.l.bf16 %v1874_v48 }
 0x6b8   : > { %v1348_v45 = vsel %vm338_vm0, %v2479_v4, %v1871_v59  ;;  %v1347_v35 = vsel %vm338_vm0, %v2475_v40, %v1870_v29 }
 0x6b9   : > { %v1619_v1 = vpack.c.bf16 %v1348_v45, %v1348_v45  ;;  %v1618_v54 = vpack.c.bf16 %v1347_v35, %v1347_v35  ;;  %v1346_v20 = vsel %vm338_vm0, %v2481_v56, %v1876_v0  ;;  %v1345_v18 = vsel %vm338_vm0, %v2477_v55, %v1875_v36 }
 0x6ba   : > { %v1617_v62 = vpack.c.bf16 %v1346_v20, %v1346_v20  ;;  %v1616_v27 = vpack.c.bf16 %v1345_v18, %v1345_v18 }
 0x6bb   : > { %1429 = vst.msk [vmem:[%s2687_s26 + $0xc] sm:$0xf] %vm1425_vm2, %v1619_v1  ;;  %1428 = vst.msk [vmem:[%s2687_s26 + $0x8] sm:$0xf] %vm1425_vm2, %v1618_v54 }
 0x6bc   : > { %1427 = vst.msk [vmem:[%s2687_s26 + $0x4] sm:$0xf] %vm1425_vm2, %v1617_v62  ;;  %1426 = vst.msk [vmem:[%s2687_s26] sm:$0xf] %vm1425_vm2, %v1616_v27 }
 0x6bd   : > { %v1879_v40 = vpop.permute.xlu0 %1878 }
 0x6be   : > { %v1881_v4 = vunpack.i.h.bf16 %v1879_v40  ;;  %v1880_v56 = vunpack.i.l.bf16 %v1879_v40  ;;  %v1884_v22 = vpop.permute.xlu1 %1883 }
 0x6bf   : > { %v1886_v42 = vunpack.i.h.bf16 %v1884_v22  ;;  %v1885_v55 = vunpack.i.l.bf16 %v1884_v22 }
 0x6c0   : > { %v1352_v19 = vsel %vm338_vm0, %v2487_v58, %v1881_v4  ;;  %v1351_v46 = vsel %vm338_vm0, %v2483_v57, %v1880_v56 }
 0x6c1   : > { %v1623_v47 = vpack.c.bf16 %v1352_v19, %v1352_v19  ;;  %v1622_v5 = vpack.c.bf16 %v1351_v46, %v1351_v46  ;;  %v1350_v53 = vsel %vm338_vm0, %v2489_v61, %v1886_v42  ;;  %v1349_v9 = vsel %vm338_vm0, %v2485_v6, %v1885_v55 }
 0x6c2   : > { %v1621_v34 = vpack.c.bf16 %v1350_v53, %v1350_v53  ;;  %v1620_v16 = vpack.c.bf16 %v1349_v9, %v1349_v9 }
 0x6c3   : > { %1433 = vst.msk [vmem:[%s2687_s26 + $0x1c] sm:$0xf] %vm1425_vm2, %v1623_v47  ;;  %1432 = vst.msk [vmem:[%s2687_s26 + $0x18] sm:$0xf] %vm1425_vm2, %v1622_v5 }
 0x6c4   : > { %1431 = vst.msk [vmem:[%s2687_s26 + $0x14] sm:$0xf] %vm1425_vm2, %v1621_v34  ;;  %1430 = vst.msk [vmem:[%s2687_s26 + $0x10] sm:$0xf] %vm1425_vm2, %v1620_v16 }
 0x6c5   : > { %v1889_v57 = vpop.permute.xlu0 %1888 }
 0x6c6   : > { %v1891_v58 = vunpack.i.h.bf16 %v1889_v57  ;;  %v1890_v61 = vunpack.i.l.bf16 %v1889_v57  ;;  %v1894_v21 = vpop.permute.xlu1 %1893 }
 0x6c7   : > { %v1896_v49 = vunpack.i.h.bf16 %v1894_v21  ;;  %v1895_v6 = vunpack.i.l.bf16 %v1894_v21 }
 0x6c8   : > { %v1356_v33 = vsel %vm338_vm0, %v2495_v44, %v1891_v58  ;;  %v1355_v38 = vsel %vm338_vm0, %v2491_v41, %v1890_v61 }
 0x6c9   : > { %v1627_v43 = vpack.c.bf16 %v1356_v33, %v1356_v33  ;;  %v1626_v60 = vpack.c.bf16 %v1355_v38, %v1355_v38  ;;  %v1354_v37 = vsel %vm338_vm0, %v2497_v13, %v1896_v49  ;;  %v1353_v52 = vsel %vm338_vm0, %v2493_v63, %v1895_v6 }
 0x6ca   : > { %v1625_v8 = vpack.c.bf16 %v1354_v37, %v1354_v37  ;;  %v1624_v50 = vpack.c.bf16 %v1353_v52, %v1353_v52 }
 0x6cb   : > { %1437 = vst.msk [vmem:[%s2687_s26 + $0x2c] sm:$0xf] %vm1425_vm2, %v1627_v43  ;;  %1436 = vst.msk [vmem:[%s2687_s26 + $0x28] sm:$0xf] %vm1425_vm2, %v1626_v60 }
 0x6cc   : > { %1435 = vst.msk [vmem:[%s2687_s26 + $0x24] sm:$0xf] %vm1425_vm2, %v1625_v8  ;;  %1434 = vst.msk [vmem:[%s2687_s26 + $0x20] sm:$0xf] %vm1425_vm2, %v1624_v50 }
 0x6f1   : > { %v1904_v41 = vpop.permute.xlu0 %1903 }
 0x6f2   : > { %v1906_v44 = vunpack.i.h.bf16 %v1904_v41  ;;  %v1905_v13 = vunpack.i.l.bf16 %v1904_v41  ;;  %v1899_v31 = vpop.permute.xlu1 %1898 }
 0x6f3   : > { %v1901_v28 = vunpack.i.h.bf16 %v1899_v31  ;;  %v1900_v63 = vunpack.i.l.bf16 %v1899_v31 }
 0x6f4   : > { %v1360_v39 = vsel %vm338_vm0, %v2503_v12, %v1906_v44  ;;  %v1359_v17 = vsel %vm338_vm0, %v2499_v10, %v1905_v13 }
 0x6f5   : > { %v1631_v26 = vpack.c.bf16 %v1360_v39, %v1360_v39  ;;  %v1630_v30 = vpack.c.bf16 %v1359_v17, %v1359_v17  ;;  %v1358_v51 = vsel %vm338_vm0, %v2505_v2, %v1901_v28  ;;  %v1357_v3 = vsel %vm338_vm0, %v2501_v15, %v1900_v63 }
 0x6f6   : > { %v1629_v23 = vpack.c.bf16 %v1358_v51, %v1358_v51  ;;  %v1628_v24 = vpack.c.bf16 %v1357_v3, %v1357_v3 }
 0x6f7   : > { %1441 = vst.msk [vmem:[%s2687_s26 + $0x3c] sm:$0xf] %vm1425_vm2, %v1631_v26  ;;  %1440 = vst.msk [vmem:[%s2687_s26 + $0x38] sm:$0xf] %vm1425_vm2, %v1630_v30 }
 0x6f8   : > { %1439 = vst.msk [vmem:[%s2687_s26 + $0x34] sm:$0xf] %vm1425_vm2, %v1629_v23  ;;  %1438 = vst.msk [vmem:[%s2687_s26 + $0x30] sm:$0xf] %vm1425_vm2, %v1628_v24 }
 0x6f9 PF: > { %s12_s11 = sadd.s32 1, %s2089_s11   ;;  %s2765_s9 = smov %s2085_s10 }
 0x6fa   : > { %p9_p5 = scmp.ge.s32.totalorder %s12_s11, 4   ;;  %s2766_s10 = smov %s2768_s12 }
 0x6fc   :  { %11 = sbr.rel (!%p9_p5) target bundleno = 2 (0x2), region = 61 }

// kernel: closed_call.18
= control target key start
LH: loop header
LB: loop body
LE: loop exit
PB: predicated region body
PF: predicated region fallthrough
CT: control target
= control target key end

     0   :  { %vm22_vm0 = vcmask 523264   ;;  %v805_v1 = vmov 0.0   ;;  %s1232_s1 = inlined_call_operand.vmem [shape: bf16[64,64], index: 1, kind: input, shape index: {}]   ;;  %s1233_s0 = inlined_call_operand.vmem [shape: bf16[256,64], index: 0, kind: input, shape index: {}]   ;;  %s1234_s2 = inlined_call_operand.vmem [shape: f32[1,64], index: 2, kind: input, shape index: {}]   ;;  %s1235_s3 = inlined_call_operand.vmem [shape: f32[256,64], index: 3, kind: input, shape index: {}]   ;;  %s1236_s4 = inlined_call_operand.vmem [shape: f32[256,64], index: 4, kind: output, shape index: {}]  }
   0x1   :  { %v785_v0 = vld [vmem:[%s1232_s1] sm:$0xff]   ;;  %25 = vst.msk [vmem:[#allocation2 + $0x10] sm:$0xff] %vm22_vm0, %v805_v1  ;;  %23 = vst.msk [vmem:[#allocation2] sm:$0xff] %vm22_vm0, %v805_v1  ;;  %v786_v2 = vld [vmem:[%s1232_s1 + $0x8] sm:$0xff]  }
   0x2   :  { %24 = vst.msk [vmem:[#allocation2 + $0x8] sm:$0xff] %vm22_vm0, %v805_v1  ;;  %26 = vst.msk [vmem:[#allocation2 + $0x18] sm:$0xff] %vm22_vm0, %v805_v1  ;;  %736 = vmatprep.subr.bf16.mxu0 %v785_v0  ;;  %776 = vmatprep.subr.bf16.mxu1 %v785_v0  ;;  %v787_v3 = vld [vmem:[%s1232_s1 + $0x10] sm:$0xff]   ;;  %v789_v4 = vld [vmem:[%s1233_s0] sm:$0xff]  }
   0x3   :  { %27 = vst.msk [vmem:[#allocation2 + $0x20] sm:$0xff] %vm22_vm0, %v805_v1  ;;  %28 = vst.msk [vmem:[#allocation2 + $0x28] sm:$0xff] %vm22_vm0, %v805_v1  ;;  %737 = vmatpush3.bf16.msra.mxu0 %v785_v0  ;;  %780 = vmatpush3.bf16.msra.mxu1 %v785_v0  ;;  %v790_v5 = vld [vmem:[%s1233_s0 + $0x40] sm:$0xff]   ;;  %v788_v6 = vld [vmem:[%s1232_s1 + $0x18] sm:$0xff]  }
   0x4   :  { %29 = vst.msk [vmem:[#allocation2 + $0x30] sm:$0xff] %vm22_vm0, %v805_v1  ;;  %30 = vst.msk [vmem:[#allocation2 + $0x38] sm:$0xff] %vm22_vm0, %v805_v1  ;;  %738 = vmatprep.subr.bf16.mxu0 %v786_v2  ;;  %777 = vmatprep.subr.bf16.mxu1 %v786_v2  ;;  %v791_v7 = vld [vmem:[%s1233_s0 + $0x8] sm:$0xff]   ;;  %v793_v9 = vld [vmem:[%s1233_s0 + $0x10] sm:$0xff]  }
   0x5   :  { %31 = vst.msk [vmem:[#allocation2 + $0x40] sm:$0xff] %vm22_vm0, %v805_v1  ;;  %32 = vst.msk [vmem:[#allocation2 + $0x48] sm:$0xff] %vm22_vm0, %v805_v1  ;;  %744 = vmatprep.mubr.msk.bf16.mxu0 %vm22_vm0, %v789_v4  ;;  %760 = vmatprep.mubr.msk.bf16.mxu1 %vm22_vm0, %v790_v5  ;;  %v792_v8 = vld [vmem:[%s1233_s0 + $0x48] sm:$0xff]   ;;  %v794_v10 = vld [vmem:[%s1233_s0 + $0x50] sm:$0xff]  }
   0x6   :  { %33 = vst.msk [vmem:[#allocation2 + $0x50] sm:$0xff] %vm22_vm0, %v805_v1  ;;  %34 = vst.msk [vmem:[#allocation2 + $0x58] sm:$0xff] %vm22_vm0, %v805_v1  ;;  %v795_v11 = vld [vmem:[%s1233_s0 + $0x18] sm:$0xff]   ;;  %v797_v13 = vld [vmem:[%s1233_s0 + $0x20] sm:$0xff]  }
   0x7   :  { %35 = vst.msk [vmem:[#allocation2 + $0x60] sm:$0xff] %vm22_vm0, %v805_v1  ;;  %36 = vst.msk [vmem:[#allocation2 + $0x68] sm:$0xff] %vm22_vm0, %v805_v1  ;;  %739 = vmatpush3.bf16.msra.mxu0 %v786_v2  ;;  %781 = vmatpush3.bf16.msra.mxu1 %v786_v2  ;;  %v796_v12 = vld [vmem:[%s1233_s0 + $0x58] sm:$0xff]   ;;  %v798_v14 = vld [vmem:[%s1233_s0 + $0x60] sm:$0xff]  }
   0x8   :  { %37 = vst.msk [vmem:[#allocation2 + $0x70] sm:$0xff] %vm22_vm0, %v805_v1  ;;  %38 = vst.msk [vmem:[#allocation2 + $0x78] sm:$0xff] %vm22_vm0, %v805_v1  ;;  %740 = vmatprep.subr.bf16.mxu0 %v787_v3  ;;  %778 = vmatprep.subr.bf16.mxu1 %v787_v3  ;;  %v799_v15 = vld [vmem:[%s1233_s0 + $0x28] sm:$0xff]   ;;  %v801_v17 = vld [vmem:[%s1233_s0 + $0x30] sm:$0xff]  }
   0x9   :  { %39 = vst.msk [vmem:[#allocation2 + $0x80] sm:$0xff] %vm22_vm0, %v805_v1  ;;  %40 = vst.msk [vmem:[#allocation2 + $0x88] sm:$0xff] %vm22_vm0, %v805_v1  ;;  %v800_v16 = vld [vmem:[%s1233_s0 + $0x68] sm:$0xff]   ;;  %v802_v18 = vld [vmem:[%s1233_s0 + $0x70] sm:$0xff]  }
   0xa   :  { %41 = vst.msk [vmem:[#allocation2 + $0x90] sm:$0xff] %vm22_vm0, %v805_v1  ;;  %42 = vst.msk [vmem:[#allocation2 + $0x98] sm:$0xff] %vm22_vm0, %v805_v1  ;;  %v803_v19 = vld [vmem:[%s1233_s0 + $0x38] sm:$0xff]   ;;  %v57_v21 = vld [vmem:[#allocation2 + $0x10] sm:$0xff] }
   0xb   :  { %43 = vst.msk [vmem:[#allocation2 + $0xa0] sm:$0xff] %vm22_vm0, %v805_v1  ;;  %44 = vst.msk [vmem:[#allocation2 + $0xa8] sm:$0xff] %vm22_vm0, %v805_v1  ;;  %741 = vmatpush3.bf16.msra.mxu0 %v787_v3  ;;  %782 = vmatpush3.bf16.msra.mxu1 %v787_v3  ;;  %v804_v20 = vld [vmem:[%s1233_s0 + $0x78] sm:$0xff]   ;;  %v55_v23 = vld [vmem:[#allocation2] sm:$0xff] }
   0xc   :  { %45 = vst.msk [vmem:[#allocation2 + $0xb0] sm:$0xff] %vm22_vm0, %v805_v1  ;;  %46 = vst.msk [vmem:[#allocation2 + $0xb8] sm:$0xff] %vm22_vm0, %v805_v1  ;;  %742 = vmatprep.subr.bf16.mxu0 %v788_v6  ;;  %779 = vmatprep.subr.bf16.mxu1 %v788_v6  ;;  %v58_v27 = vld [vmem:[#allocation2 + $0x18] sm:$0xff]  ;;  %v56_v33 = vld [vmem:[#allocation2 + $0x8] sm:$0xff] }
   0xd   :  { %47 = vst.msk [vmem:[#allocation2 + $0xc0] sm:$0xff] %vm22_vm0, %v805_v1  ;;  %48 = vst.msk [vmem:[#allocation2 + $0xc8] sm:$0xff] %vm22_vm0, %v805_v1  ;;  %v61_v45 = vld [vmem:[#allocation2 + $0x30] sm:$0xff]  ;;  %v59_v47 = vld [vmem:[#allocation2 + $0x20] sm:$0xff] }
   0xe   :  { %49 = vst.msk [vmem:[#allocation2 + $0xd0] sm:$0xff] %vm22_vm0, %v805_v1  ;;  %50 = vst.msk [vmem:[#allocation2 + $0xd8] sm:$0xff] %vm22_vm0, %v805_v1  ;;  %v950_v49 = vld [vmem:[%s1234_s2] ss:$0 sm:$0xff]  ;;  %v62_v50 = vld [vmem:[#allocation2 + $0x38] sm:$0xff] }
   0xf   :  { %51 = vst.msk [vmem:[#allocation2 + $0xe0] sm:$0xff] %vm22_vm0, %v805_v1  ;;  %52 = vst.msk [vmem:[#allocation2 + $0xe8] sm:$0xff] %vm22_vm0, %v805_v1  ;;  %743 = vmatpush3.bf16.msra.mxu0 %v788_v6  ;;  %783 = vmatpush3.bf16.msra.mxu1 %v788_v6  ;;  %v581_v52 = vld [vmem:[%s1235_s3 + $0x10] sm:$0xff]  ;;  %v60_v55 = vld [vmem:[#allocation2 + $0x28] sm:$0xff] }
  0x10   :  { %53 = vst.msk [vmem:[#allocation2 + $0xf0] sm:$0xff] %vm22_vm0, %v805_v1  ;;  %54 = vst.msk [vmem:[#allocation2 + $0xf8] sm:$0xff] %vm22_vm0, %v805_v1  ;;  %v71_v24 = vld [vmem:[#allocation2 + $0x80] sm:$0xff]  ;;  %v72_v34 = vld [vmem:[#allocation2 + $0x88] sm:$0xff] }
  0x11   :  { %v73_v22 = vld [vmem:[#allocation2 + $0x90] sm:$0xff]  ;;  %v74_v28 = vld [vmem:[#allocation2 + $0x98] sm:$0xff]  ;;  %v579_v58 = vld [vmem:[%s1235_s3] sm:$0xff] }
  0x12   :  { %745 = vmatmul.mubr.msk.bf16.vlgmr.msra.gmra.mrb[0].mxu0 %vm22_vm0, %v791_v7  ;;  %761 = vmatmul.mubr.msk.bf16.vlgmr.msra.gmra.mrb[0].mxu1 %vm22_vm0, %v792_v8  ;;  %v75_v48 = vld [vmem:[#allocation2 + $0xa0] sm:$0xff]  ;;  %v76_v56 = vld [vmem:[#allocation2 + $0xa8] sm:$0xff]  ;;  %v597_v57 = vld [vmem:[%s1235_s3 + $0x90] sm:$0xff] }
  0x13   :  { %748 = vmatprep.mubr.msk.bf16.mxu0 %vm22_vm0, %v793_v9  ;;  %764 = vmatprep.mubr.msk.bf16.mxu1 %vm22_vm0, %v794_v10  ;;  %v77_v46 = vld [vmem:[#allocation2 + $0xb0] sm:$0xff]  ;;  %v78_v51 = vld [vmem:[#allocation2 + $0xb8] sm:$0xff]  ;;  %v595_v59 = vld [vmem:[%s1235_s3 + $0x80] sm:$0xff] }
  0x14   :  { %v582_v2 = vld [vmem:[%s1235_s3 + $0x18] sm:$0xff] }
  0x1a   :  { %749 = vmatmul.mubr.msk.bf16.gmra.mrb[4].mxu0 %vm22_vm0, %v795_v11  ;;  %765 = vmatmul.mubr.msk.bf16.gmra.mrb[4].mxu1 %vm22_vm0, %v796_v12  ;;  %v598_v11 = vld [vmem:[%s1235_s3 + $0x98] sm:$0xff] }
  0x1b   :  { %752 = vmatprep.mubr.msk.bf16.mxu0 %vm22_vm0, %v797_v13  ;;  %768 = vmatprep.mubr.msk.bf16.mxu1 %vm22_vm0, %v798_v14 }
  0x22   :  { %753 = vmatmul.mubr.msk.bf16.gmra.mrb[8].mxu0 %vm22_vm0, %v799_v15  ;;  %769 = vmatmul.mubr.msk.bf16.gmra.mrb[8].mxu1 %vm22_vm0, %v800_v16 }
  0x23   :  { %756 = vmatprep.mubr.msk.bf16.mxu0 %vm22_vm0, %v801_v17  ;;  %772 = vmatprep.mubr.msk.bf16.mxu1 %vm22_vm0, %v802_v18 }
  0x2a   :  { %757 = vmatmul.mubr.msk.bf16.gmra.mrb[12].mxu0 %vm22_vm0, %v803_v19  ;;  %773 = vmatmul.mubr.msk.bf16.gmra.mrb[12].mxu1 %vm22_vm0, %v804_v20  ;;  %v580_v20 = vld [vmem:[%s1235_s3 + $0x8] sm:$0xff] }
  0xe5   :  { %v746_v25 = vpop.f32.mrb[0].mxu0  ;;  %v762_v26 = vpop.f32.mrb[0].mxu1 }
  0xe6   :  { %v443_v29 = vadd.f32 %v746_v25, %v57_v21  ;;  %v459_v30 = vadd.f32 %v762_v26, %v73_v22  ;;  %v314_v31 = vpop.f32.mrb[1].mxu0  ;;  %v378_v32 = vpop.f32.mrb[1].mxu1 }
  0xe7   :  { %v441_v35 = vadd.f32 %v314_v31, %v55_v23  ;;  %v457_v36 = vadd.f32 %v378_v32, %v71_v24  ;;  %v747_v37 = vpop.f32.mrb[2].mxu0  ;;  %v763_v38 = vpop.f32.mrb[2].mxu1 }
  0xe8   :  { %475 = vst.msk [vmem:[#allocation2 + $0x10] sm:$0xff] %vm22_vm0, %v443_v29  ;;  %491 = vst.msk [vmem:[#allocation2 + $0x90] sm:$0xff] %vm22_vm0, %v459_v30  ;;  %v444_v39 = vadd.f32 %v747_v37, %v58_v27  ;;  %v460_v40 = vadd.f32 %v763_v38, %v74_v28  ;;  %v317_v41 = vpop.f32.mrb[3].mxu0  ;;  %v381_v42 = vpop.f32.mrb[3].mxu1  ;;  %v596_v29 = vld [vmem:[%s1235_s3 + $0x88] sm:$0xff] }
  0xe9   :  { %473 = vst.msk [vmem:[#allocation2] sm:$0xff] %vm22_vm0, %v441_v35  ;;  %489 = vst.msk [vmem:[#allocation2 + $0x80] sm:$0xff] %vm22_vm0, %v457_v36  ;;  %v442_v43 = vadd.f32 %v317_v41, %v56_v33  ;;  %v458_v44 = vadd.f32 %v381_v42, %v72_v34  ;;  %v65_v34 = vld [vmem:[#allocation2 + $0x50] sm:$0xff]  ;;  %v63_v36 = vld [vmem:[#allocation2 + $0x40] sm:$0xff] }
  0xea   :  { %476 = vst.msk [vmem:[#allocation2 + $0x18] sm:$0xff] %vm22_vm0, %v444_v39  ;;  %492 = vst.msk [vmem:[#allocation2 + $0x98] sm:$0xff] %vm22_vm0, %v460_v40  ;;  %v81_v35 = vld [vmem:[#allocation2 + $0xd0] sm:$0xff]  ;;  %v79_v39 = vld [vmem:[#allocation2 + $0xc0] sm:$0xff] }
  0xeb   :  { %474 = vst.msk [vmem:[#allocation2 + $0x8] sm:$0xff] %vm22_vm0, %v442_v43  ;;  %490 = vst.msk [vmem:[#allocation2 + $0x88] sm:$0xff] %vm22_vm0, %v458_v44  ;;  %v66_v40 = vld [vmem:[#allocation2 + $0x58] sm:$0xff]  ;;  %v585_v44 = vld [vmem:[%s1235_s3 + $0x30] sm:$0xff] }
  0xec   :  { %v82_v41 = vld [vmem:[#allocation2 + $0xd8] sm:$0xff] }
  0xed   :  { %v750_v53 = vpop.f32.mrb[4].mxu0  ;;  %v766_v54 = vpop.f32.mrb[4].mxu1 }
  0xee   :  { %v447_v60 = vadd.f32 %v750_v53, %v61_v45  ;;  %v463_v61 = vadd.f32 %v766_v54, %v77_v46  ;;  %v330_v62 = vpop.f32.mrb[5].mxu0  ;;  %v394_v63 = vpop.f32.mrb[5].mxu1 }
  0xef   :  { %v510_v0 = vld [vmem:[#allocation2 + $0x10] sm:$0xff]  ;;  %v445_v3 = vadd.f32 %v330_v62, %v59_v47  ;;  %v461_v4 = vadd.f32 %v394_v63, %v75_v48  ;;  %v751_v5 = vpop.f32.mrb[6].mxu0  ;;  %v767_v6 = vpop.f32.mrb[6].mxu1  ;;  %v64_v47 = vld [vmem:[#allocation2 + $0x48] sm:$0xff] }
  0xf0   :  { %v526_v1 = vld [vmem:[#allocation2 + $0x90] sm:$0xff]  ;;  %v549_v7 = vadd.f32 %v950_v49, %v510_v0  ;;  %v508_v9 = vld [vmem:[#allocation2] sm:$0xff]  ;;  %479 = vst.msk [vmem:[#allocation2 + $0x30] sm:$0xff] %vm22_vm0, %v447_v60  ;;  %495 = vst.msk [vmem:[#allocation2 + $0xb0] sm:$0xff] %vm22_vm0, %v463_v61  ;;  %v448_v12 = vadd.f32 %v751_v5, %v62_v50  ;;  %v464_v13 = vadd.f32 %v767_v6, %v78_v51  ;;  %v333_v14 = vpop.f32.mrb[7].mxu0  ;;  %v397_v15 = vpop.f32.mrb[7].mxu1 }
  0xf1   :  { %v565_v8 = vadd.f32 %v950_v49, %v526_v1  ;;  %v524_v10 = vld [vmem:[#allocation2 + $0x80] sm:$0xff]  ;;  %v547_v16 = vadd.f32 %v950_v49, %v508_v9  ;;  %v511_v18 = vld [vmem:[#allocation2 + $0x18] sm:$0xff]  ;;  %477 = vst.msk [vmem:[#allocation2 + $0x20] sm:$0xff] %vm22_vm0, %v445_v3  ;;  %493 = vst.msk [vmem:[#allocation2 + $0xa0] sm:$0xff] %vm22_vm0, %v461_v4  ;;  %v446_v21 = vadd.f32 %v333_v14, %v60_v55 }
  0xf2   :  { %v563_v17 = vadd.f32 %v950_v49, %v524_v10  ;;  %v527_v19 = vld [vmem:[#allocation2 + $0x98] sm:$0xff]  ;;  %v462_v22 = vadd.f32 %v397_v15, %v76_v56  ;;  %v613_v23 = vadd.f32 %v581_v52, %v549_v7  ;;  %v550_v25 = vadd.f32 %v950_v49, %v511_v18  ;;  %v509_v27 = vld [vmem:[#allocation2 + $0x8] sm:$0xff]  ;;  %480 = vst.msk [vmem:[#allocation2 + $0x38] sm:$0xff] %vm22_vm0, %v448_v12  ;;  %v601_v50 = vld [vmem:[%s1235_s3 + $0xb0] sm:$0xff] }
  0xf3   :  { %v629_v24 = vadd.f32 %v597_v57, %v565_v8  ;;  %v566_v26 = vadd.f32 %v950_v49, %v527_v19  ;;  %v525_v28 = vld [vmem:[#allocation2 + $0x88] sm:$0xff]  ;;  %496 = vst.msk [vmem:[#allocation2 + $0xb8] sm:$0xff] %vm22_vm0, %v464_v13  ;;  %v611_v30 = vadd.f32 %v579_v58, %v547_v16  ;;  %v548_v32 = vadd.f32 %v950_v49, %v509_v27  ;;  %v583_v51 = vld [vmem:[%s1235_s3 + $0x20] sm:$0xff]  ;;  %v602_v4 = vld [vmem:[%s1235_s3 + $0xb8] sm:$0xff] }
  0xf4   :  { %v627_v31 = vadd.f32 %v595_v59, %v563_v17  ;;  %v564_v33 = vadd.f32 %v950_v49, %v525_v28  ;;  %478 = vst.msk [vmem:[#allocation2 + $0x28] sm:$0xff] %vm22_vm0, %v446_v21  ;;  %494 = vst.msk [vmem:[#allocation2 + $0xa8] sm:$0xff] %vm22_vm0, %v462_v22  ;;  %v614_v37 = vadd.f32 %v582_v2, %v550_v25  ;;  %v80_v48 = vld [vmem:[#allocation2 + $0xc8] sm:$0xff]  ;;  %v599_v52 = vld [vmem:[%s1235_s3 + $0xa0] sm:$0xff] }
  0xf5   :  { %645 = vst.msk [vmem:[%s1236_s4 + $0x10] sm:$0xff] %vm22_vm0, %v613_v23  ;;  %661 = vst.msk [vmem:[%s1236_s4 + $0x90] sm:$0xff] %vm22_vm0, %v629_v24  ;;  %v630_v38 = vadd.f32 %v598_v11, %v566_v26  ;;  %v612_v42 = vadd.f32 %v580_v20, %v548_v32  ;;  %v754_v45 = vpop.f32.mrb[8].mxu0  ;;  %v770_v46 = vpop.f32.mrb[8].mxu1  ;;  %v586_v59 = vld [vmem:[%s1235_s3 + $0x38] sm:$0xff]  ;;  %v584_v13 = vld [vmem:[%s1235_s3 + $0x28] sm:$0xff] }
  0xf6   :  { %643 = vst.msk [vmem:[%s1236_s4] sm:$0xff] %vm22_vm0, %v611_v30  ;;  %659 = vst.msk [vmem:[%s1236_s4 + $0x80] sm:$0xff] %vm22_vm0, %v627_v31  ;;  %v628_v43 = vadd.f32 %v596_v29, %v564_v33  ;;  %v451_v53 = vadd.f32 %v754_v45, %v65_v34  ;;  %v467_v54 = vadd.f32 %v770_v46, %v81_v35  ;;  %v346_v55 = vpop.f32.mrb[9].mxu0  ;;  %v410_v56 = vpop.f32.mrb[9].mxu1  ;;  %v600_v22 = vld [vmem:[%s1235_s3 + $0xa8] sm:$0xff]  ;;  %v69_v27 = vld [vmem:[#allocation2 + $0x70] sm:$0xff] }
  0xf7   :  { %646 = vst.msk [vmem:[%s1236_s4 + $0x18] sm:$0xff] %vm22_vm0, %v614_v37  ;;  %662 = vst.msk [vmem:[%s1236_s4 + $0x98] sm:$0xff] %vm22_vm0, %v630_v38  ;;  %v514_v57 = vld [vmem:[#allocation2 + $0x30] sm:$0xff]  ;;  %v449_v60 = vadd.f32 %v346_v55, %v63_v36  ;;  %v465_v61 = vadd.f32 %v410_v56, %v79_v39  ;;  %v755_v62 = vpop.f32.mrb[10].mxu0  ;;  %v771_v63 = vpop.f32.mrb[10].mxu1  ;;  %v67_v29 = vld [vmem:[#allocation2 + $0x60] sm:$0xff] }
  0xf8   :  { %644 = vst.msk [vmem:[%s1236_s4 + $0x8] sm:$0xff] %vm22_vm0, %v612_v42  ;;  %660 = vst.msk [vmem:[%s1236_s4 + $0x88] sm:$0xff] %vm22_vm0, %v628_v43  ;;  %v530_v58 = vld [vmem:[#allocation2 + $0xb0] sm:$0xff]  ;;  %v553_v0 = vadd.f32 %v950_v49, %v514_v57  ;;  %v512_v2 = vld [vmem:[#allocation2 + $0x20] sm:$0xff]  ;;  %v452_v5 = vadd.f32 %v755_v62, %v66_v40  ;;  %v468_v6 = vadd.f32 %v771_v63, %v82_v41  ;;  %v349_v7 = vpop.f32.mrb[11].mxu0  ;;  %v413_v8 = vpop.f32.mrb[11].mxu1 }
  0xf9   :  { %v569_v1 = vadd.f32 %v950_v49, %v530_v58  ;;  %v528_v3 = vld [vmem:[#allocation2 + $0xa0] sm:$0xff]  ;;  %483 = vst.msk [vmem:[#allocation2 + $0x50] sm:$0xff] %vm22_vm0, %v451_v53  ;;  %499 = vst.msk [vmem:[#allocation2 + $0xd0] sm:$0xff] %vm22_vm0, %v467_v54  ;;  %v551_v9 = vadd.f32 %v950_v49, %v512_v2  ;;  %v515_v11 = vld [vmem:[#allocation2 + $0x38] sm:$0xff]  ;;  %v450_v14 = vadd.f32 %v349_v7, %v64_v47 }
  0xfa   :  { %v567_v10 = vadd.f32 %v950_v49, %v528_v3  ;;  %v531_v12 = vld [vmem:[#allocation2 + $0xb8] sm:$0xff]  ;;  %481 = vst.msk [vmem:[#allocation2 + $0x40] sm:$0xff] %vm22_vm0, %v449_v60  ;;  %497 = vst.msk [vmem:[#allocation2 + $0xc0] sm:$0xff] %vm22_vm0, %v465_v61  ;;  %v466_v15 = vadd.f32 %v413_v8, %v80_v48  ;;  %v617_v16 = vadd.f32 %v585_v44, %v553_v0  ;;  %v85_v28 = vld [vmem:[#allocation2 + $0xf0] sm:$0xff] }
  0xfb   :  { %v633_v17 = vadd.f32 %v601_v50, %v569_v1  ;;  %v554_v18 = vadd.f32 %v950_v49, %v515_v11  ;;  %v570_v19 = vadd.f32 %v950_v49, %v531_v12  ;;  %v513_v20 = vld [vmem:[#allocation2 + $0x28] sm:$0xff]  ;;  %484 = vst.msk [vmem:[#allocation2 + $0x58] sm:$0xff] %vm22_vm0, %v452_v5  ;;  %500 = vst.msk [vmem:[#allocation2 + $0xd8] sm:$0xff] %vm22_vm0, %v468_v6  ;;  %v83_v32 = vld [vmem:[#allocation2 + $0xe0] sm:$0xff] }
  0xfc   :  { %v529_v21 = vld [vmem:[#allocation2 + $0xa8] sm:$0xff]  ;;  %v615_v23 = vadd.f32 %v583_v51, %v551_v9  ;;  %v631_v24 = vadd.f32 %v599_v52, %v567_v10  ;;  %v552_v25 = vadd.f32 %v950_v49, %v513_v20  ;;  %482 = vst.msk [vmem:[#allocation2 + $0x48] sm:$0xff] %vm22_vm0, %v450_v14  ;;  %498 = vst.msk [vmem:[#allocation2 + $0xc8] sm:$0xff] %vm22_vm0, %v466_v15  ;;  %v70_v33 = vld [vmem:[#allocation2 + $0x78] sm:$0xff] }
  0xfd   :  { %v568_v26 = vadd.f32 %v950_v49, %v529_v21  ;;  %649 = vst.msk [vmem:[%s1236_s4 + $0x30] sm:$0xff] %vm22_vm0, %v617_v16  ;;  %665 = vst.msk [vmem:[%s1236_s4 + $0xb0] sm:$0xff] %vm22_vm0, %v633_v17  ;;  %v618_v30 = vadd.f32 %v586_v59, %v554_v18  ;;  %v634_v31 = vadd.f32 %v602_v4, %v570_v19  ;;  %v86_v34 = vld [vmem:[#allocation2 + $0xf8] sm:$0xff]  ;;  %v589_v37 = vld [vmem:[%s1235_s3 + $0x50] sm:$0xff]  ;;  %v758_v38 = vpop.f32.mrb[12].mxu0  ;;  %v774_v39 = vpop.f32.mrb[12].mxu1 }
  0xfe   :  { %647 = vst.msk [vmem:[%s1236_s4 + $0x20] sm:$0xff] %vm22_vm0, %v615_v23  ;;  %663 = vst.msk [vmem:[%s1236_s4 + $0xa0] sm:$0xff] %vm22_vm0, %v631_v24  ;;  %v616_v35 = vadd.f32 %v584_v13, %v552_v25  ;;  %v68_v40 = vld [vmem:[#allocation2 + $0x68] sm:$0xff]  ;;  %v605_v42 = vld [vmem:[%s1235_s3 + $0xd0] sm:$0xff]  ;;  %v455_v45 = vadd.f32 %v758_v38, %v69_v27  ;;  %v471_v46 = vadd.f32 %v774_v39, %v85_v28  ;;  %v362_v47 = vpop.f32.mrb[13].mxu0  ;;  %v426_v48 = vpop.f32.mrb[13].mxu1 }
  0xff   :  { %v632_v36 = vadd.f32 %v600_v22, %v568_v26  ;;  %v84_v41 = vld [vmem:[#allocation2 + $0xe8] sm:$0xff]  ;;  %650 = vst.msk [vmem:[%s1236_s4 + $0x38] sm:$0xff] %vm22_vm0, %v618_v30  ;;  %666 = vst.msk [vmem:[%s1236_s4 + $0xb8] sm:$0xff] %vm22_vm0, %v634_v31  ;;  %v587_v43 = vld [vmem:[%s1235_s3 + $0x40] sm:$0xff]  ;;  %v453_v53 = vadd.f32 %v362_v47, %v67_v29  ;;  %v469_v54 = vadd.f32 %v426_v48, %v83_v32  ;;  %v759_v55 = vpop.f32.mrb[14].mxu0  ;;  %v775_v56 = vpop.f32.mrb[14].mxu1 }
 0x100   :  { %v603_v44 = vld [vmem:[%s1235_s3 + $0xc0] sm:$0xff]  ;;  %648 = vst.msk [vmem:[%s1236_s4 + $0x28] sm:$0xff] %vm22_vm0, %v616_v35  ;;  %v518_v50 = vld [vmem:[#allocation2 + $0x50] sm:$0xff]  ;;  %v590_v52 = vld [vmem:[%s1235_s3 + $0x58] sm:$0xff]  ;;  %v456_v62 = vadd.f32 %v759_v55, %v70_v33  ;;  %v472_v63 = vadd.f32 %v775_v56, %v86_v34  ;;  %v365_v0 = vpop.f32.mrb[15].mxu0  ;;  %v429_v1 = vpop.f32.mrb[15].mxu1 }
 0x101   :  { %664 = vst.msk [vmem:[%s1236_s4 + $0xa8] sm:$0xff] %vm22_vm0, %v632_v36  ;;  %v534_v51 = vld [vmem:[#allocation2 + $0xd0] sm:$0xff]  ;;  %v557_v57 = vadd.f32 %v950_v49, %v518_v50  ;;  %v516_v59 = vld [vmem:[#allocation2 + $0x40] sm:$0xff]  ;;  %v606_v61 = vld [vmem:[%s1235_s3 + $0xd8] sm:$0xff]  ;;  %v454_v7 = vadd.f32 %v365_v0, %v68_v40  ;;  %v470_v8 = vadd.f32 %v429_v1, %v84_v41 }
 0x102   :  { %v573_v58 = vadd.f32 %v950_v49, %v534_v51  ;;  %v532_v60 = vld [vmem:[#allocation2 + $0xc0] sm:$0xff]  ;;  %487 = vst.msk [vmem:[#allocation2 + $0x70] sm:$0xff] %vm22_vm0, %v455_v45  ;;  %503 = vst.msk [vmem:[#allocation2 + $0xf0] sm:$0xff] %vm22_vm0, %v471_v46  ;;  %v555_v2 = vadd.f32 %v950_v49, %v516_v59  ;;  %v519_v4 = vld [vmem:[#allocation2 + $0x58] sm:$0xff] }
 0x103   :  { %v571_v3 = vadd.f32 %v950_v49, %v532_v60  ;;  %v535_v5 = vld [vmem:[#allocation2 + $0xd8] sm:$0xff]  ;;  %v588_v6 = vld [vmem:[%s1235_s3 + $0x48] sm:$0xff]  ;;  %485 = vst.msk [vmem:[#allocation2 + $0x60] sm:$0xff] %vm22_vm0, %v453_v53  ;;  %501 = vst.msk [vmem:[#allocation2 + $0xe0] sm:$0xff] %vm22_vm0, %v469_v54  ;;  %v621_v9 = vadd.f32 %v589_v37, %v557_v57  ;;  %v558_v11 = vadd.f32 %v950_v49, %v519_v4 }
 0x104   :  { %v637_v10 = vadd.f32 %v605_v42, %v573_v58  ;;  %v574_v12 = vadd.f32 %v950_v49, %v535_v5  ;;  %v517_v13 = vld [vmem:[#allocation2 + $0x48] sm:$0xff]  ;;  %488 = vst.msk [vmem:[#allocation2 + $0x78] sm:$0xff] %vm22_vm0, %v456_v62  ;;  %504 = vst.msk [vmem:[#allocation2 + $0xf8] sm:$0xff] %vm22_vm0, %v472_v63  ;;  %v619_v16 = vadd.f32 %v587_v43, %v555_v2  ;;  %v593_v24 = vld [vmem:[%s1235_s3 + $0x70] sm:$0xff] }
 0x105   :  { %v533_v14 = vld [vmem:[#allocation2 + $0xc8] sm:$0xff]  ;;  %v635_v17 = vadd.f32 %v603_v44, %v571_v3  ;;  %v556_v18 = vadd.f32 %v950_v49, %v517_v13  ;;  %486 = vst.msk [vmem:[#allocation2 + $0x68] sm:$0xff] %vm22_vm0, %v454_v7  ;;  %502 = vst.msk [vmem:[#allocation2 + $0xe8] sm:$0xff] %vm22_vm0, %v470_v8  ;;  %v622_v20 = vadd.f32 %v590_v52, %v558_v11  ;;  %v609_v25 = vld [vmem:[%s1235_s3 + $0xf0] sm:$0xff] }
 0x106   :  { %v604_v15 = vld [vmem:[%s1235_s3 + $0xc8] sm:$0xff]  ;;  %v572_v19 = vadd.f32 %v950_v49, %v533_v14  ;;  %653 = vst.msk [vmem:[%s1236_s4 + $0x50] sm:$0xff] %vm22_vm0, %v621_v9  ;;  %669 = vst.msk [vmem:[%s1236_s4 + $0xd0] sm:$0xff] %vm22_vm0, %v637_v10  ;;  %v638_v21 = vadd.f32 %v606_v61, %v574_v12  ;;  %v591_v26 = vld [vmem:[%s1235_s3 + $0x60] sm:$0xff] }
 0x107   :  { %651 = vst.msk [vmem:[%s1236_s4 + $0x40] sm:$0xff] %vm22_vm0, %v619_v16  ;;  %667 = vst.msk [vmem:[%s1236_s4 + $0xc0] sm:$0xff] %vm22_vm0, %v635_v17  ;;  %v620_v22 = vadd.f32 %v588_v6, %v556_v18  ;;  %v607_v27 = vld [vmem:[%s1235_s3 + $0xe0] sm:$0xff]  ;;  %v594_v30 = vld [vmem:[%s1235_s3 + $0x78] sm:$0xff] }
 0x108   :  { %v636_v23 = vadd.f32 %v604_v15, %v572_v19  ;;  %654 = vst.msk [vmem:[%s1236_s4 + $0x58] sm:$0xff] %vm22_vm0, %v622_v20  ;;  %670 = vst.msk [vmem:[%s1236_s4 + $0xd8] sm:$0xff] %vm22_vm0, %v638_v21  ;;  %v610_v35 = vld [vmem:[%s1235_s3 + $0xf8] sm:$0xff]  ;;  %v592_v40 = vld [vmem:[%s1235_s3 + $0x68] sm:$0xff] }
 0x109   :  { %652 = vst.msk [vmem:[%s1236_s4 + $0x48] sm:$0xff] %vm22_vm0, %v620_v22  ;;  %v522_v28 = vld [vmem:[#allocation2 + $0x70] sm:$0xff]  ;;  %v608_v47 = vld [vmem:[%s1235_s3 + $0xe8] sm:$0xff] }
 0x10a   :  { %668 = vst.msk [vmem:[%s1236_s4 + $0xc8] sm:$0xff] %vm22_vm0, %v636_v23  ;;  %v538_v29 = vld [vmem:[#allocation2 + $0xf0] sm:$0xff]  ;;  %v561_v31 = vadd.f32 %v950_v49, %v522_v28  ;;  %v520_v33 = vld [vmem:[#allocation2 + $0x60] sm:$0xff] }
 0x10b   :  { %v577_v32 = vadd.f32 %v950_v49, %v538_v29  ;;  %v536_v34 = vld [vmem:[#allocation2 + $0xe0] sm:$0xff]  ;;  %v559_v36 = vadd.f32 %v950_v49, %v520_v33  ;;  %v523_v38 = vld [vmem:[#allocation2 + $0x78] sm:$0xff] }
 0x10c   :  { %v575_v37 = vadd.f32 %v950_v49, %v536_v34  ;;  %v539_v39 = vld [vmem:[#allocation2 + $0xf8] sm:$0xff]  ;;  %v625_v41 = vadd.f32 %v593_v24, %v561_v31  ;;  %v562_v43 = vadd.f32 %v950_v49, %v523_v38  ;;  %v521_v45 = vld [vmem:[#allocation2 + $0x68] sm:$0xff] }
 0x10d   :  { %v641_v42 = vadd.f32 %v609_v25, %v577_v32  ;;  %v578_v44 = vadd.f32 %v950_v49, %v539_v39  ;;  %v537_v46 = vld [vmem:[#allocation2 + $0xe8] sm:$0xff]  ;;  %v623_v48 = vadd.f32 %v591_v26, %v559_v36  ;;  %v560_v51 = vadd.f32 %v950_v49, %v521_v45 }
 0x10e   :  { %v639_v50 = vadd.f32 %v607_v27, %v575_v37  ;;  %v576_v52 = vadd.f32 %v950_v49, %v537_v46  ;;  %657 = vst.msk [vmem:[%s1236_s4 + $0x70] sm:$0xff] %vm22_vm0, %v625_v41  ;;  %v626_v53 = vadd.f32 %v594_v30, %v562_v43 }
 0x10f   :  { %673 = vst.msk [vmem:[%s1236_s4 + $0xf0] sm:$0xff] %vm22_vm0, %v641_v42  ;;  %v642_v54 = vadd.f32 %v610_v35, %v578_v44  ;;  %655 = vst.msk [vmem:[%s1236_s4 + $0x60] sm:$0xff] %vm22_vm0, %v623_v48  ;;  %v624_v49 = vadd.f32 %v592_v40, %v560_v51 }
 0x110   :  { %671 = vst.msk [vmem:[%s1236_s4 + $0xe0] sm:$0xff] %vm22_vm0, %v639_v50  ;;  %v640_v55 = vadd.f32 %v608_v47, %v576_v52  ;;  %658 = vst.msk [vmem:[%s1236_s4 + $0x78] sm:$0xff] %vm22_vm0, %v626_v53 }
 0x111   :  { %674 = vst.msk [vmem:[%s1236_s4 + $0xf8] sm:$0xff] %vm22_vm0, %v642_v54  ;;  %656 = vst.msk [vmem:[%s1236_s4 + $0x68] sm:$0xff] %vm22_vm0, %v624_v49 }
 0x112   :  { %672 = vst.msk [vmem:[%s1236_s4 + $0xe8] sm:$0xff] %vm22_vm0, %v640_v55 }

// kernel: vision_transformer_forward.5
= control target key start
LH: loop header
LB: loop body
LE: loop exit
PB: predicated region body
PF: predicated region fallthrough
CT: control target
= control target key end

     0   :  { %vm24_vm0 = vcmask 517120   ;;  %s269_s0 = inlined_call_operand.vmem [shape: f32[2,64], index: 0, kind: input, shape index: {}]   ;;  %s270_s1 = inlined_call_operand.vmem [shape: f32[1,64], index: 1, kind: input, shape index: {}]   ;;  %s271_s2 = inlined_call_operand.vmem [shape: f32[1,64], index: 2, kind: input, shape index: {}]   ;;  %s272_s3 = inlined_call_operand.vmem [shape: bf16[64,32], index: 3, kind: input, shape index: {}]   ;;  %s273_s4 = inlined_call_operand.hbm [shape: f32[2,32], index: 4, kind: output, shape index: {}]  }
   0x1   :  { %v23_v0 = vld [vmem:[%s269_s0] sm:$0x3] }
   0x2   :  { %v25_v1 = vsel %vm24_vm0, %v23_v0, 0.0 }
   0x3   :  { %26 = vadd.xlane.f32.xlu0 %v25_v1 }
   0x4   :  { %9 = vsyncpa [#allocation4], 0  ;;  %v178_v7 = vld [vmem:[%s272_s3] sm:$0xff]   ;;  %v208_v8 = vmov 0.0   ;;  %v179_v9 = vld [vmem:[%s272_s3 + $0x8] sm:$0xff]   ;;  %vm209_vm1 = vmmov 0  }
   0x5   :  { %163 = vmatprep.subr.bf16.mxu0 %v208_v8  ;;  %v180_v10 = vld [vmem:[%s272_s3 + $0x10] sm:$0xff]   ;;  %v181_v11 = vld [vmem:[%s272_s3 + $0x18] sm:$0xff]   ;;  %171 = vmatprep.mubr.msk.bf16.mxu0 %vm209_vm1, %v208_v8  ;;  %v151_v16 = vld [vmem:[%s270_s1] ss:$0 sm:$0xff]  ;;  %vm56_vm2 = vcmask 516096   ;;  %vm91_vm3 = vcmask 523264  }
   0x6   :  { %164 = vmatpush3.bf16.msra.mxu0 %v178_v7  ;;  %v152_v18 = vld [vmem:[%s271_s2] ss:$0 sm:$0xff]  ;;  %s210_s3 = smov [#allocation3]   ;;  %vm135_vm4 = vcmask 254976  }
   0x7   :  { %165 = vmatprep.subr.bf16.mxu0 %v208_v8  ;;  %s143_s28 = sshll.u32 %s210_s3, 4  ;;  %s144_s28 = int_to_ptr.vmem [resolvable:$true] %s143_s28 }
   0x8   :  { %s184_s1 = scalar_lea.vmem %s144_s28, 32  ;;  %p189_p1 = scmp.lt.s32.totalorder %s144_s28, %s144_s28 }
   0x9   :  { %p185_p0 = scmp.ne.s32.totalorder %s144_s28, %s184_s1  ;;  %p190_p2 = scmp.lt.s32.totalorder %s184_s1, %s184_s1 }
   0xa   :  { %166 = vmatpush3.bf16.msra.mxu0 %v179_v9 }
   0xb   :  { %167 = vmatprep.subr.bf16.mxu0 %v208_v8  ;;  %p191_p3 = por %p190_p2, %p189_p1 }
   0xd   :  { %p192_p4 = pnand %p191_p3, %p185_p0 }
   0xe   :  { %168 = vmatpush3.bf16.msra.mxu0 %v180_v10 }
   0xf   :  { %169 = vmatprep.subr.bf16.mxu0 %v208_v8 }
  0x12   :  { %170 = vmatpush3.bf16.msra.mxu0 %v181_v11 }
  0x90   :  { %v27_v2 = vpop.xlane.xlu0 %26 }
  0x91   :  { %v29_v3 = vmul.f32 0.015625, %v27_v2 }
  0x93   :  { %v30_v4 = vsub.f32 %v23_v0, %v29_v3 }
  0x95   :  { %v31_v5 = vmul.f32 %v30_v4, %v30_v4 }
  0x97   :  { %v32_v6 = vsel %vm24_vm0, %v31_v5, 0.0 }
  0x98   :  { %33 = vadd.xlane.f32.xlu0 %v32_v6 }
 0x125   :  { %v34_v12 = vpop.xlane.xlu0 %33 }
 0x126   :  { %v35_v13 = vmul.f32 0.015625, %v34_v12 }
 0x128   :  { %v36_v14 = vadd.f32 1e-05, %v35_v13 }
 0x12a   :  { %182 = vrsqrt.f32 %v36_v14 }
 0x134   :  { %v183_v15 = vpop.eup %182 }
 0x135   :  { %v38_v17 = vmul.f32 %v183_v15, %v30_v4 }
 0x137   :  { %v46_v19 = vmul.f32 %v151_v16, %v38_v17 }
 0x139   :  { %v54_v20 = vadd.f32 %v152_v18, %v46_v19 }
 0x13b   :  { %v55_v21 = vpack.c.bf16 %v54_v20, %v54_v20 }
 0x13d   :  { %57 = vst.msk [vmem:[#allocation2] sm:$0x1] %vm56_vm2, %v55_v21 }
 0x144   :  { %v58_v22 = vld [vmem:[#allocation2] sm:$0x1] }
 0x145   :  { %172 = vmatmul.mubr.msk.bf16.vlgmr.msra.gmra.mrb[0].mxu0 %vm91_vm3, %v58_v22 }
 0x218   :  { %v129_v23 = vpop.f32.mrb[0].mxu0 }
 0x219   :  { %136 = vst.msk [vmem:[#allocation3] sm:$0x3] %vm135_vm4, %v129_v23  ;;  %v173_v24 = vpop.f32.mrb[1].mxu0 }
 0x21a   :  { %v132_v25 = vpop.f32.mrb[2].mxu0 }
 0x21b   :  { %195 = shalt.err (!%p192_p4)
}
 0x21c   :  { %s196_s30 = scalar_lea.hbm %s273_s4, 32 }
 0x21d   :  { %p197_p5 = scmp.ne.s32.totalorder %s273_s4, %s196_s30  ;;  %p200_p6 = scmp.lt.u32.totalorder %s196_s30, %s273_s4 }
 0x21f   :  { %p202_p7 = pnand %p200_p6, %p197_p5 }
 0x221   :  { %205 = shalt.err (!%p202_p7)
}
 0x222   :  { %146 = dma.vmem_to_hbm [thread:$0]  %s144_s28, 32, %s273_s4, [#allocation4]   ;;  %v174_v26 = vpop.f32.mrb[3].mxu0 }
 0x223   :  { %206 = dma.done.wait [#allocation4], 32  }
 0x224   :  { %207 = vsyncadd [#allocation4], 4294967264 }
 0x225   :  { %150 = vsyncpa [#allocation4], 1 }

// kernel: closed_call.20
= control target key start
LH: loop header
LB: loop body
LE: loop exit
PB: predicated region body
PF: predicated region fallthrough
CT: control target
= control target key end

     0   :  { %vm22_vm0 = vcmask 523264   ;;  %v1049_v48 = vmov 0.0   ;;  %s1544_s1 = inlined_call_operand.vmem [shape: bf16[256,64], index: 1, kind: input, shape index: {}]   ;;  %s1545_s0 = inlined_call_operand.vmem [shape: bf16[256,256], index: 0, kind: input, shape index: {}]   ;;  %s1546_s2 = inlined_call_operand.vmem [shape: f32[1,64], index: 2, kind: input, shape index: {}]   ;;  %s1547_s3 = inlined_call_operand.vmem [shape: f32[256,64], index: 3, kind: input, shape index: {}]   ;;  %s1548_s4 = inlined_call_operand.vmem [shape: f32[256,64], index: 4, kind: output, shape index: {}]  }
   0x1   :  { %v985_v0 = vld [vmem:[%s1544_s1 + $0x40] sm:$0xff]   ;;  %v987_v2 = vld [vmem:[%s1544_s1 + $0x48] sm:$0xff]   ;;  %v989_v4 = vld [vmem:[%s1544_s1 + $0x50] sm:$0xff]   ;;  %23 = vst.msk [vmem:[#allocation2] sm:$0xff] %vm22_vm0, %v1049_v48 }
   0x2   :  { %v986_v1 = vld [vmem:[%s1544_s1] sm:$0xff]   ;;  %856 = vmatprep.subr.bf16.mxu0 %v985_v0  ;;  %968 = vmatprep.subr.bf16.mxu1 %v985_v0  ;;  %v988_v3 = vld [vmem:[%s1544_s1 + $0x8] sm:$0xff]   ;;  %v990_v5 = vld [vmem:[%s1544_s1 + $0x10] sm:$0xff]   ;;  %24 = vst.msk [vmem:[#allocation2 + $0x8] sm:$0xff] %vm22_vm0, %v1049_v48 }
   0x3   :  { %857 = vmatpush3.bf16.msra.mxu0 %v986_v1  ;;  %976 = vmatpush3.bf16.msra.mxu1 %v986_v1  ;;  %v991_v6 = vld [vmem:[%s1544_s1 + $0x58] sm:$0xff]   ;;  %v993_v8 = vld [vmem:[%s1544_s1 + $0x60] sm:$0xff]   ;;  %v995_v10 = vld [vmem:[%s1544_s1 + $0x68] sm:$0xff]   ;;  %25 = vst.msk [vmem:[#allocation2 + $0x10] sm:$0xff] %vm22_vm0, %v1049_v48 }
   0x4   :  { %858 = vmatprep.subr.bf16.mxu0 %v987_v2  ;;  %969 = vmatprep.subr.bf16.mxu1 %v987_v2  ;;  %v992_v7 = vld [vmem:[%s1544_s1 + $0x18] sm:$0xff]   ;;  %v994_v9 = vld [vmem:[%s1544_s1 + $0x20] sm:$0xff]   ;;  %v996_v13 = vld [vmem:[%s1544_s1 + $0x28] sm:$0xff]   ;;  %26 = vst.msk [vmem:[#allocation2 + $0x18] sm:$0xff] %vm22_vm0, %v1049_v48 }
   0x5   :  { %v1003_v11 = vld [vmem:[%s1545_s0 + $0x4] ss:$8 sps:$4 sm:$0xff]   ;;  %v997_v14 = vld [vmem:[%s1544_s1 + $0x70] sm:$0xff]   ;;  %v999_v16 = vld [vmem:[%s1544_s1 + $0x78] sm:$0xff]   ;;  %27 = vst.msk [vmem:[#allocation2 + $0x20] sm:$0xff] %vm22_vm0, %v1049_v48 }
   0x6   :  { %v1006_v12 = vld [vmem:[%s1545_s0 + $0x84] ss:$8 sps:$4 sm:$0xff]   ;;  %439 = vmatprep.mubr.bf16.mxu0 %v1003_v11  ;;  %v998_v15 = vld [vmem:[%s1544_s1 + $0x30] sm:$0xff]   ;;  %v1000_v17 = vld [vmem:[%s1544_s1 + $0x38] sm:$0xff]   ;;  %28 = vst.msk [vmem:[#allocation2 + $0x28] sm:$0xff] %vm22_vm0, %v1049_v48 }
   0x7   :  { %859 = vmatpush3.bf16.msra.mxu0 %v988_v3  ;;  %977 = vmatpush3.bf16.msra.mxu1 %v988_v3  ;;  %v1001_v18 = vld [vmem:[%s1545_s0] ss:$8 sps:$4 sm:$0xff]   ;;  %v1007_v20 = vld [vmem:[%s1545_s0 + $0x14] ss:$8 sps:$4 sm:$0xff]   ;;  %v1011_v22 = vld [vmem:[%s1545_s0 + $0x10] ss:$8 sps:$4 sm:$0xff]  }
   0x8   :  { %860 = vmatprep.subr.bf16.mxu0 %v989_v4  ;;  %970 = vmatprep.subr.bf16.mxu1 %v989_v4  ;;  %v1004_v19 = vld [vmem:[%s1545_s0 + $0x80] ss:$8 sps:$4 sm:$0xff]   ;;  %v1009_v21 = vld [vmem:[%s1545_s0 + $0x94] ss:$8 sps:$4 sm:$0xff]   ;;  %v1012_v23 = vld [vmem:[%s1545_s0 + $0x90] ss:$8 sps:$4 sm:$0xff]  }
   0x9   :  { %503 = vmatprep.mubr.bf16.mxu1 %v1006_v12  ;;  %v1013_v24 = vld [vmem:[%s1545_s0 + $0x24] ss:$8 sps:$4 sm:$0xff]   ;;  %v1017_v26 = vld [vmem:[%s1545_s0 + $0x20] ss:$8 sps:$4 sm:$0xff]   ;;  %v1019_v28 = vld [vmem:[%s1545_s0 + $0x34] ss:$8 sps:$4 sm:$0xff]  }
   0xa   :  { %v1015_v25 = vld [vmem:[%s1545_s0 + $0xa4] ss:$8 sps:$4 sm:$0xff]   ;;  %v1018_v27 = vld [vmem:[%s1545_s0 + $0xa0] ss:$8 sps:$4 sm:$0xff]   ;;  %v1021_v29 = vld [vmem:[%s1545_s0 + $0xb4] ss:$8 sps:$4 sm:$0xff]  }
   0xb   :  { %861 = vmatpush3.bf16.msra.mxu0 %v990_v5  ;;  %978 = vmatpush3.bf16.msra.mxu1 %v990_v5  ;;  %v1023_v30 = vld [vmem:[%s1545_s0 + $0x30] ss:$8 sps:$4 sm:$0xff]   ;;  %v1025_v32 = vld [vmem:[%s1545_s0 + $0x44] ss:$8 sps:$4 sm:$0xff]   ;;  %v1029_v34 = vld [vmem:[%s1545_s0 + $0x40] ss:$8 sps:$4 sm:$0xff]  }
   0xc   :  { %862 = vmatprep.subr.bf16.mxu0 %v991_v6  ;;  %971 = vmatprep.subr.bf16.mxu1 %v991_v6  ;;  %v1024_v31 = vld [vmem:[%s1545_s0 + $0xb0] ss:$8 sps:$4 sm:$0xff]   ;;  %v1027_v33 = vld [vmem:[%s1545_s0 + $0xc4] ss:$8 sps:$4 sm:$0xff]   ;;  %v1030_v35 = vld [vmem:[%s1545_s0 + $0xc0] ss:$8 sps:$4 sm:$0xff]  }
   0xd   :  { %v1031_v36 = vld [vmem:[%s1545_s0 + $0x54] ss:$8 sps:$4 sm:$0xff]   ;;  %v1035_v38 = vld [vmem:[%s1545_s0 + $0x50] ss:$8 sps:$4 sm:$0xff]   ;;  %v1037_v40 = vld [vmem:[%s1545_s0 + $0x64] ss:$8 sps:$4 sm:$0xff]  }
   0xe   :  { %v1033_v37 = vld [vmem:[%s1545_s0 + $0xd4] ss:$8 sps:$4 sm:$0xff]   ;;  %v1036_v39 = vld [vmem:[%s1545_s0 + $0xd0] ss:$8 sps:$4 sm:$0xff]   ;;  %v1039_v41 = vld [vmem:[%s1545_s0 + $0xe4] ss:$8 sps:$4 sm:$0xff]  }
   0xf   :  { %863 = vmatpush3.bf16.msra.mxu0 %v992_v7  ;;  %979 = vmatpush3.bf16.msra.mxu1 %v992_v7  ;;  %v1041_v42 = vld [vmem:[%s1545_s0 + $0x60] ss:$8 sps:$4 sm:$0xff]   ;;  %v1043_v44 = vld [vmem:[%s1545_s0 + $0x74] ss:$8 sps:$4 sm:$0xff]   ;;  %v1047_v46 = vld [vmem:[%s1545_s0 + $0x70] ss:$8 sps:$4 sm:$0xff]  }
  0x10   :  { %864 = vmatprep.subr.bf16.mxu0 %v993_v8  ;;  %972 = vmatprep.subr.bf16.mxu1 %v993_v8  ;;  %v1042_v43 = vld [vmem:[%s1545_s0 + $0xe0] ss:$8 sps:$4 sm:$0xff]   ;;  %v1045_v45 = vld [vmem:[%s1545_s0 + $0xf4] ss:$8 sps:$4 sm:$0xff]   ;;  %v1048_v47 = vld [vmem:[%s1545_s0 + $0xf0] ss:$8 sps:$4 sm:$0xff]  }
  0x11   :  { %29 = vst.msk [vmem:[#allocation2 + $0x30] sm:$0xff] %vm22_vm0, %v1049_v48  ;;  %30 = vst.msk [vmem:[#allocation2 + $0x38] sm:$0xff] %vm22_vm0, %v1049_v48  ;;  %v55_v51 = vld [vmem:[#allocation2] sm:$0xff]  ;;  %v56_v59 = vld [vmem:[#allocation2 + $0x8] sm:$0xff] }
  0x12   :  { %31 = vst.msk [vmem:[#allocation2 + $0x40] sm:$0xff] %vm22_vm0, %v1049_v48  ;;  %32 = vst.msk [vmem:[#allocation2 + $0x48] sm:$0xff] %vm22_vm0, %v1049_v48  ;;  %v57_v7 = vld [vmem:[#allocation2 + $0x10] sm:$0xff] }
  0x13   :  { %865 = vmatpush3.bf16.msra.mxu0 %v994_v9  ;;  %980 = vmatpush3.bf16.msra.mxu1 %v994_v9  ;;  %33 = vst.msk [vmem:[#allocation2 + $0x50] sm:$0xff] %vm22_vm0, %v1049_v48  ;;  %34 = vst.msk [vmem:[#allocation2 + $0x58] sm:$0xff] %vm22_vm0, %v1049_v48 }
  0x14   :  { %866 = vmatprep.subr.bf16.mxu0 %v995_v10  ;;  %973 = vmatprep.subr.bf16.mxu1 %v995_v10  ;;  %35 = vst.msk [vmem:[#allocation2 + $0x60] sm:$0xff] %vm22_vm0, %v1049_v48  ;;  %36 = vst.msk [vmem:[#allocation2 + $0x68] sm:$0xff] %vm22_vm0, %v1049_v48 }
  0x15   :  { %37 = vst.msk [vmem:[#allocation2 + $0x70] sm:$0xff] %vm22_vm0, %v1049_v48  ;;  %38 = vst.msk [vmem:[#allocation2 + $0x78] sm:$0xff] %vm22_vm0, %v1049_v48 }
  0x16   :  { %39 = vst.msk [vmem:[#allocation2 + $0x80] sm:$0xff] %vm22_vm0, %v1049_v48  ;;  %40 = vst.msk [vmem:[#allocation2 + $0x88] sm:$0xff] %vm22_vm0, %v1049_v48 }
  0x17   :  { %867 = vmatpush3.bf16.msra.mxu0 %v996_v13  ;;  %981 = vmatpush3.bf16.msra.mxu1 %v996_v13  ;;  %41 = vst.msk [vmem:[#allocation2 + $0x90] sm:$0xff] %vm22_vm0, %v1049_v48  ;;  %42 = vst.msk [vmem:[#allocation2 + $0x98] sm:$0xff] %vm22_vm0, %v1049_v48 }
  0x18   :  { %868 = vmatprep.subr.bf16.mxu0 %v997_v14  ;;  %974 = vmatprep.subr.bf16.mxu1 %v997_v14  ;;  %43 = vst.msk [vmem:[#allocation2 + $0xa0] sm:$0xff] %vm22_vm0, %v1049_v48  ;;  %44 = vst.msk [vmem:[#allocation2 + $0xa8] sm:$0xff] %vm22_vm0, %v1049_v48 }
  0x19   :  { %45 = vst.msk [vmem:[#allocation2 + $0xb0] sm:$0xff] %vm22_vm0, %v1049_v48  ;;  %46 = vst.msk [vmem:[#allocation2 + $0xb8] sm:$0xff] %vm22_vm0, %v1049_v48 }
  0x1a   :  { %47 = vst.msk [vmem:[#allocation2 + $0xc0] sm:$0xff] %vm22_vm0, %v1049_v48  ;;  %48 = vst.msk [vmem:[#allocation2 + $0xc8] sm:$0xff] %vm22_vm0, %v1049_v48 }
  0x1b   :  { %869 = vmatpush3.bf16.msra.mxu0 %v998_v15  ;;  %982 = vmatpush3.bf16.msra.mxu1 %v998_v15  ;;  %49 = vst.msk [vmem:[#allocation2 + $0xd0] sm:$0xff] %vm22_vm0, %v1049_v48  ;;  %50 = vst.msk [vmem:[#allocation2 + $0xd8] sm:$0xff] %vm22_vm0, %v1049_v48  ;;  %v1258_v15 = vld [vmem:[%s1546_s2] ss:$0 sm:$0xff] }
  0x1c   :  { %870 = vmatprep.subr.bf16.mxu0 %v999_v16  ;;  %975 = vmatprep.subr.bf16.mxu1 %v999_v16  ;;  %51 = vst.msk [vmem:[#allocation2 + $0xe0] sm:$0xff] %vm22_vm0, %v1049_v48  ;;  %52 = vst.msk [vmem:[#allocation2 + $0xe8] sm:$0xff] %vm22_vm0, %v1049_v48  ;;  %v58_v16 = vld [vmem:[#allocation2 + $0x18] sm:$0xff] }
  0x1d   :  { %53 = vst.msk [vmem:[#allocation2 + $0xf0] sm:$0xff] %vm22_vm0, %v1049_v48  ;;  %54 = vst.msk [vmem:[#allocation2 + $0xf8] sm:$0xff] %vm22_vm0, %v1049_v48  ;;  %v71_v53 = vld [vmem:[#allocation2 + $0x80] sm:$0xff]  ;;  %v72_v61 = vld [vmem:[#allocation2 + $0x88] sm:$0xff] }
  0x1e   :  { %v73_v9 = vld [vmem:[#allocation2 + $0x90] sm:$0xff] }
  0x1f   :  { %871 = vmatpush3.bf16.msra.mxu0 %v1000_v17  ;;  %983 = vmatpush3.bf16.msra.mxu1 %v1000_v17 }
  0x22   :  { %440 = vmatmul.mubr.bf16.vlgmr.msra.gmra.mrb[0].mxu0 %v1001_v18  ;;  %504 = vmatmul.mubr.bf16.vlgmr.msra.gmra.mrb[0].mxu1 %v1004_v19  ;;  %v74_v18 = vld [vmem:[#allocation2 + $0x98] sm:$0xff] }
  0x23   :  { %447 = vmatprep.mubr.bf16.mxu0 %v1007_v20  ;;  %511 = vmatprep.mubr.bf16.mxu1 %v1009_v21  ;;  %v707_v20 = vld [vmem:[%s1547_s3] sm:$0xff] }
  0x2a   :  { %448 = vmatmul.mubr.bf16.gmra.mrb[4].mxu0 %v1011_v22  ;;  %512 = vmatmul.mubr.bf16.gmra.mrb[4].mxu1 %v1012_v23 }
  0x2b   :  { %455 = vmatprep.mubr.bf16.mxu0 %v1013_v24  ;;  %519 = vmatprep.mubr.bf16.mxu1 %v1015_v25 }
  0x32   :  { %456 = vmatmul.mubr.bf16.gmra.mrb[8].mxu0 %v1017_v26  ;;  %520 = vmatmul.mubr.bf16.gmra.mrb[8].mxu1 %v1018_v27  ;;  %v723_v27 = vld [vmem:[%s1547_s3 + $0x80] sm:$0xff] }
  0x33   :  { %463 = vmatprep.mubr.bf16.mxu0 %v1019_v28  ;;  %527 = vmatprep.mubr.bf16.mxu1 %v1021_v29 }
  0x3a   :  { %464 = vmatmul.mubr.bf16.gmra.mrb[12].mxu0 %v1023_v30  ;;  %528 = vmatmul.mubr.bf16.gmra.mrb[12].mxu1 %v1024_v31  ;;  %v708_v30 = vld [vmem:[%s1547_s3 + $0x8] sm:$0xff] }
  0x3b   :  { %471 = vmatprep.mubr.bf16.mxu0 %v1025_v32  ;;  %535 = vmatprep.mubr.bf16.mxu1 %v1027_v33 }
  0x42   :  { %472 = vmatmul.mubr.bf16.gmra.mrb[16].mxu0 %v1029_v34  ;;  %536 = vmatmul.mubr.bf16.gmra.mrb[16].mxu1 %v1030_v35  ;;  %v724_v35 = vld [vmem:[%s1547_s3 + $0x88] sm:$0xff] }
  0x43   :  { %479 = vmatprep.mubr.bf16.mxu0 %v1031_v36  ;;  %543 = vmatprep.mubr.bf16.mxu1 %v1033_v37 }
  0x4a   :  { %480 = vmatmul.mubr.bf16.gmra.mrb[20].mxu0 %v1035_v38  ;;  %544 = vmatmul.mubr.bf16.gmra.mrb[20].mxu1 %v1036_v39 }
  0x4b   :  { %487 = vmatprep.mubr.bf16.mxu0 %v1037_v40  ;;  %551 = vmatprep.mubr.bf16.mxu1 %v1039_v41 }
  0x52   :  { %488 = vmatmul.mubr.bf16.gmra.mrb[24].mxu0 %v1041_v42  ;;  %552 = vmatmul.mubr.bf16.gmra.mrb[24].mxu1 %v1042_v43  ;;  %v59_v42 = vld [vmem:[#allocation2 + $0x20] sm:$0xff] }
  0x53   :  { %495 = vmatprep.mubr.bf16.mxu0 %v1043_v44  ;;  %559 = vmatprep.mubr.bf16.mxu1 %v1045_v45  ;;  %v75_v44 = vld [vmem:[#allocation2 + $0xa0] sm:$0xff] }
  0x5a   :  { %496 = vmatmul.mubr.bf16.gmra.mrb[28].mxu0 %v1047_v46  ;;  %560 = vmatmul.mubr.bf16.gmra.mrb[28].mxu1 %v1048_v47 }
  0xf5   :  { %v872_v49 = vpop.f32.mrb[0].mxu0  ;;  %v920_v50 = vpop.f32.mrb[0].mxu1 }
  0xf6   :  { %v873_v52 = vpop.f32.mrb[1].mxu0  ;;  %v921_v54 = vpop.f32.mrb[1].mxu1 }
  0xf7   :  { %v874_v55 = vadd.f32 %v873_v52, %v872_v49  ;;  %v922_v56 = vadd.f32 %v921_v54, %v920_v50  ;;  %v875_v57 = vpop.f32.mrb[2].mxu0  ;;  %v923_v58 = vpop.f32.mrb[2].mxu1  ;;  %v60_v52 = vld [vmem:[#allocation2 + $0x28] sm:$0xff] }
  0xf8   :  { %v876_v60 = vpop.f32.mrb[3].mxu0  ;;  %v924_v62 = vpop.f32.mrb[3].mxu1  ;;  %v76_v54 = vld [vmem:[#allocation2 + $0xa8] sm:$0xff] }
  0xf9   :  { %v568_v63 = vadd.f32 %v874_v55, %v55_v51  ;;  %v584_v0 = vadd.f32 %v922_v56, %v71_v53  ;;  %v877_v1 = vadd.f32 %v876_v60, %v875_v57  ;;  %v925_v2 = vadd.f32 %v924_v62, %v923_v58  ;;  %v709_v56 = vld [vmem:[%s1547_s3 + $0x10] sm:$0xff] }
  0xfb   :  { %601 = vst.msk [vmem:[#allocation2] sm:$0xff] %vm22_vm0, %v568_v63  ;;  %617 = vst.msk [vmem:[#allocation2 + $0x80] sm:$0xff] %vm22_vm0, %v584_v0  ;;  %v569_v3 = vadd.f32 %v877_v1, %v56_v59  ;;  %v585_v4 = vadd.f32 %v925_v2, %v72_v61  ;;  %v725_v63 = vld [vmem:[%s1547_s3 + $0x90] sm:$0xff]  ;;  %v710_v2 = vld [vmem:[%s1547_s3 + $0x18] sm:$0xff] }
  0xfd   :  { %602 = vst.msk [vmem:[#allocation2 + $0x8] sm:$0xff] %vm22_vm0, %v569_v3  ;;  %618 = vst.msk [vmem:[#allocation2 + $0x88] sm:$0xff] %vm22_vm0, %v585_v4  ;;  %v878_v5 = vpop.f32.mrb[4].mxu0  ;;  %v926_v6 = vpop.f32.mrb[4].mxu1 }
  0xfe   :  { %v879_v8 = vpop.f32.mrb[5].mxu0  ;;  %v927_v10 = vpop.f32.mrb[5].mxu1 }
  0xff   :  { %v880_v11 = vadd.f32 %v879_v8, %v878_v5  ;;  %v928_v12 = vadd.f32 %v927_v10, %v926_v6  ;;  %v881_v13 = vpop.f32.mrb[6].mxu0  ;;  %v929_v14 = vpop.f32.mrb[6].mxu1 }
 0x100   :  { %v882_v17 = vpop.f32.mrb[7].mxu0  ;;  %v930_v19 = vpop.f32.mrb[7].mxu1 }
 0x101   :  { %v570_v21 = vadd.f32 %v880_v11, %v57_v7  ;;  %v586_v22 = vadd.f32 %v928_v12, %v73_v9  ;;  %v883_v23 = vadd.f32 %v882_v17, %v881_v13  ;;  %v931_v24 = vadd.f32 %v930_v19, %v929_v14  ;;  %v726_v7 = vld [vmem:[%s1547_s3 + $0x98] sm:$0xff]  ;;  %v61_v14 = vld [vmem:[#allocation2 + $0x30] sm:$0xff] }
 0x102   :  { %v636_v25 = vld [vmem:[#allocation2] sm:$0xff]  ;;  %v77_v17 = vld [vmem:[#allocation2 + $0xb0] sm:$0xff] }
 0x103   :  { %v652_v26 = vld [vmem:[#allocation2 + $0x80] sm:$0xff]  ;;  %v675_v28 = vadd.f32 %v1258_v15, %v636_v25  ;;  %603 = vst.msk [vmem:[#allocation2 + $0x10] sm:$0xff] %vm22_vm0, %v570_v21  ;;  %619 = vst.msk [vmem:[#allocation2 + $0x90] sm:$0xff] %vm22_vm0, %v586_v22  ;;  %v571_v31 = vadd.f32 %v883_v23, %v58_v16  ;;  %v587_v32 = vadd.f32 %v931_v24, %v74_v18  ;;  %v62_v25 = vld [vmem:[#allocation2 + $0x38] sm:$0xff] }
 0x104   :  { %v691_v29 = vadd.f32 %v1258_v15, %v652_v26  ;;  %v637_v33 = vld [vmem:[#allocation2 + $0x8] sm:$0xff] }
 0x105   :  { %v653_v34 = vld [vmem:[#allocation2 + $0x88] sm:$0xff]  ;;  %v739_v36 = vadd.f32 %v707_v20, %v675_v28  ;;  %v676_v38 = vadd.f32 %v1258_v15, %v637_v33  ;;  %604 = vst.msk [vmem:[#allocation2 + $0x18] sm:$0xff] %vm22_vm0, %v571_v31  ;;  %620 = vst.msk [vmem:[#allocation2 + $0x98] sm:$0xff] %vm22_vm0, %v587_v32  ;;  %v884_v40 = vpop.f32.mrb[8].mxu0  ;;  %v932_v41 = vpop.f32.mrb[8].mxu1 }
 0x106   :  { %v755_v37 = vadd.f32 %v723_v27, %v691_v29  ;;  %v692_v39 = vadd.f32 %v1258_v15, %v653_v34  ;;  %v885_v43 = vpop.f32.mrb[9].mxu0  ;;  %v933_v45 = vpop.f32.mrb[9].mxu1  ;;  %v78_v27 = vld [vmem:[#allocation2 + $0xb8] sm:$0xff]  ;;  %v711_v29 = vld [vmem:[%s1547_s3 + $0x20] sm:$0xff] }
 0x107   :  { %771 = vst.msk [vmem:[%s1548_s4] sm:$0xff] %vm22_vm0, %v739_v36  ;;  %v740_v46 = vadd.f32 %v708_v30, %v676_v38  ;;  %v886_v48 = vadd.f32 %v885_v43, %v884_v40  ;;  %v934_v49 = vadd.f32 %v933_v45, %v932_v41  ;;  %v887_v50 = vpop.f32.mrb[10].mxu0  ;;  %v935_v51 = vpop.f32.mrb[10].mxu1  ;;  %v727_v36 = vld [vmem:[%s1547_s3 + $0xa0] sm:$0xff] }
 0x108   :  { %787 = vst.msk [vmem:[%s1548_s4 + $0x80] sm:$0xff] %vm22_vm0, %v755_v37  ;;  %v756_v47 = vadd.f32 %v724_v35, %v692_v39  ;;  %v888_v53 = vpop.f32.mrb[11].mxu0  ;;  %v936_v55 = vpop.f32.mrb[11].mxu1  ;;  %v712_v39 = vld [vmem:[%s1547_s3 + $0x28] sm:$0xff] }
 0x109   :  { %772 = vst.msk [vmem:[%s1548_s4 + $0x8] sm:$0xff] %vm22_vm0, %v740_v46  ;;  %v572_v57 = vadd.f32 %v886_v48, %v59_v42  ;;  %v588_v58 = vadd.f32 %v934_v49, %v75_v44  ;;  %v889_v59 = vadd.f32 %v888_v53, %v887_v50  ;;  %v937_v60 = vadd.f32 %v936_v55, %v935_v51  ;;  %v728_v44 = vld [vmem:[%s1547_s3 + $0xa8] sm:$0xff]  ;;  %v63_v51 = vld [vmem:[#allocation2 + $0x40] sm:$0xff] }
 0x10a   :  { %788 = vst.msk [vmem:[%s1548_s4 + $0x88] sm:$0xff] %vm22_vm0, %v756_v47  ;;  %v638_v61 = vld [vmem:[#allocation2 + $0x10] sm:$0xff]  ;;  %v79_v53 = vld [vmem:[#allocation2 + $0xc0] sm:$0xff] }
 0x10b   :  { %v654_v62 = vld [vmem:[#allocation2 + $0x90] sm:$0xff]  ;;  %v677_v0 = vadd.f32 %v1258_v15, %v638_v61  ;;  %605 = vst.msk [vmem:[#allocation2 + $0x20] sm:$0xff] %vm22_vm0, %v572_v57  ;;  %621 = vst.msk [vmem:[#allocation2 + $0xa0] sm:$0xff] %vm22_vm0, %v588_v58  ;;  %v573_v3 = vadd.f32 %v889_v59, %v60_v52  ;;  %v589_v4 = vadd.f32 %v937_v60, %v76_v54  ;;  %v64_v61 = vld [vmem:[#allocation2 + $0x48] sm:$0xff] }
 0x10c   :  { %v693_v1 = vadd.f32 %v1258_v15, %v654_v62  ;;  %v639_v5 = vld [vmem:[#allocation2 + $0x18] sm:$0xff] }
 0x10d   :  { %v655_v6 = vld [vmem:[#allocation2 + $0x98] sm:$0xff]  ;;  %v741_v8 = vadd.f32 %v709_v56, %v677_v0  ;;  %v678_v10 = vadd.f32 %v1258_v15, %v639_v5  ;;  %606 = vst.msk [vmem:[#allocation2 + $0x28] sm:$0xff] %vm22_vm0, %v573_v3  ;;  %622 = vst.msk [vmem:[#allocation2 + $0xa8] sm:$0xff] %vm22_vm0, %v589_v4  ;;  %v890_v12 = vpop.f32.mrb[12].mxu0  ;;  %v938_v13 = vpop.f32.mrb[12].mxu1 }
 0x10e   :  { %v757_v9 = vadd.f32 %v725_v63, %v693_v1  ;;  %v694_v11 = vadd.f32 %v1258_v15, %v655_v6  ;;  %v891_v16 = vpop.f32.mrb[13].mxu0  ;;  %v939_v18 = vpop.f32.mrb[13].mxu1  ;;  %v80_v63 = vld [vmem:[#allocation2 + $0xc8] sm:$0xff]  ;;  %v713_v1 = vld [vmem:[%s1547_s3 + $0x30] sm:$0xff] }
 0x10f   :  { %773 = vst.msk [vmem:[%s1548_s4 + $0x10] sm:$0xff] %vm22_vm0, %v741_v8  ;;  %v742_v19 = vadd.f32 %v710_v2, %v678_v10  ;;  %v892_v21 = vadd.f32 %v891_v16, %v890_v12  ;;  %v940_v22 = vadd.f32 %v939_v18, %v938_v13  ;;  %v893_v23 = vpop.f32.mrb[14].mxu0  ;;  %v941_v24 = vpop.f32.mrb[14].mxu1  ;;  %v729_v8 = vld [vmem:[%s1547_s3 + $0xb0] sm:$0xff] }
 0x110   :  { %789 = vst.msk [vmem:[%s1548_s4 + $0x90] sm:$0xff] %vm22_vm0, %v757_v9  ;;  %v758_v20 = vadd.f32 %v726_v7, %v694_v11  ;;  %v894_v26 = vpop.f32.mrb[15].mxu0  ;;  %v942_v28 = vpop.f32.mrb[15].mxu1  ;;  %v714_v11 = vld [vmem:[%s1547_s3 + $0x38] sm:$0xff] }
 0x111   :  { %774 = vst.msk [vmem:[%s1548_s4 + $0x18] sm:$0xff] %vm22_vm0, %v742_v19  ;;  %v574_v30 = vadd.f32 %v892_v21, %v61_v14  ;;  %v590_v31 = vadd.f32 %v940_v22, %v77_v17  ;;  %v895_v32 = vadd.f32 %v894_v26, %v893_v23  ;;  %v943_v33 = vadd.f32 %v942_v28, %v941_v24  ;;  %v730_v17 = vld [vmem:[%s1547_s3 + $0xb8] sm:$0xff]  ;;  %v65_v24 = vld [vmem:[#allocation2 + $0x50] sm:$0xff] }
 0x112   :  { %790 = vst.msk [vmem:[%s1548_s4 + $0x98] sm:$0xff] %vm22_vm0, %v758_v20  ;;  %v640_v34 = vld [vmem:[#allocation2 + $0x20] sm:$0xff]  ;;  %v81_v26 = vld [vmem:[#allocation2 + $0xd0] sm:$0xff] }
 0x113   :  { %v656_v35 = vld [vmem:[#allocation2 + $0xa0] sm:$0xff]  ;;  %v679_v37 = vadd.f32 %v1258_v15, %v640_v34  ;;  %607 = vst.msk [vmem:[#allocation2 + $0x30] sm:$0xff] %vm22_vm0, %v574_v30  ;;  %623 = vst.msk [vmem:[#allocation2 + $0xb0] sm:$0xff] %vm22_vm0, %v590_v31  ;;  %v575_v40 = vadd.f32 %v895_v32, %v62_v25  ;;  %v591_v41 = vadd.f32 %v943_v33, %v78_v27  ;;  %v66_v34 = vld [vmem:[#allocation2 + $0x58] sm:$0xff] }
 0x114   :  { %v695_v38 = vadd.f32 %v1258_v15, %v656_v35  ;;  %v641_v42 = vld [vmem:[#allocation2 + $0x28] sm:$0xff] }
 0x115   :  { %v657_v43 = vld [vmem:[#allocation2 + $0xa8] sm:$0xff]  ;;  %v743_v45 = vadd.f32 %v711_v29, %v679_v37  ;;  %v680_v47 = vadd.f32 %v1258_v15, %v641_v42  ;;  %608 = vst.msk [vmem:[#allocation2 + $0x38] sm:$0xff] %vm22_vm0, %v575_v40  ;;  %624 = vst.msk [vmem:[#allocation2 + $0xb8] sm:$0xff] %vm22_vm0, %v591_v41  ;;  %v896_v49 = vpop.f32.mrb[16].mxu0  ;;  %v944_v50 = vpop.f32.mrb[16].mxu1 }
 0x116   :  { %v759_v46 = vadd.f32 %v727_v36, %v695_v38  ;;  %v696_v48 = vadd.f32 %v1258_v15, %v657_v43  ;;  %v897_v52 = vpop.f32.mrb[17].mxu0  ;;  %v945_v54 = vpop.f32.mrb[17].mxu1  ;;  %v82_v36 = vld [vmem:[#allocation2 + $0xd8] sm:$0xff]  ;;  %v715_v38 = vld [vmem:[%s1547_s3 + $0x40] sm:$0xff] }
 0x117   :  { %775 = vst.msk [vmem:[%s1548_s4 + $0x20] sm:$0xff] %vm22_vm0, %v743_v45  ;;  %v744_v55 = vadd.f32 %v712_v39, %v680_v47  ;;  %v898_v57 = vadd.f32 %v897_v52, %v896_v49  ;;  %v946_v58 = vadd.f32 %v945_v54, %v944_v50  ;;  %v899_v59 = vpop.f32.mrb[18].mxu0  ;;  %v947_v60 = vpop.f32.mrb[18].mxu1  ;;  %v731_v45 = vld [vmem:[%s1547_s3 + $0xc0] sm:$0xff] }
 0x118   :  { %791 = vst.msk [vmem:[%s1548_s4 + $0xa0] sm:$0xff] %vm22_vm0, %v759_v46  ;;  %v760_v56 = vadd.f32 %v728_v44, %v696_v48  ;;  %v900_v62 = vpop.f32.mrb[19].mxu0  ;;  %v948_v0 = vpop.f32.mrb[19].mxu1  ;;  %v716_v48 = vld [vmem:[%s1547_s3 + $0x48] sm:$0xff] }
 0x119   :  { %776 = vst.msk [vmem:[%s1548_s4 + $0x28] sm:$0xff] %vm22_vm0, %v744_v55  ;;  %v576_v2 = vadd.f32 %v898_v57, %v63_v51  ;;  %v592_v3 = vadd.f32 %v946_v58, %v79_v53  ;;  %v901_v4 = vadd.f32 %v900_v62, %v899_v59  ;;  %v949_v5 = vadd.f32 %v948_v0, %v947_v60  ;;  %v732_v53 = vld [vmem:[%s1547_s3 + $0xc8] sm:$0xff]  ;;  %v67_v60 = vld [vmem:[#allocation2 + $0x60] sm:$0xff] }
 0x11a   :  { %792 = vst.msk [vmem:[%s1548_s4 + $0xa8] sm:$0xff] %vm22_vm0, %v760_v56  ;;  %v642_v6 = vld [vmem:[#allocation2 + $0x30] sm:$0xff]  ;;  %v83_v62 = vld [vmem:[#allocation2 + $0xe0] sm:$0xff] }
 0x11b   :  { %v658_v7 = vld [vmem:[#allocation2 + $0xb0] sm:$0xff]  ;;  %v681_v9 = vadd.f32 %v1258_v15, %v642_v6  ;;  %609 = vst.msk [vmem:[#allocation2 + $0x40] sm:$0xff] %vm22_vm0, %v576_v2  ;;  %625 = vst.msk [vmem:[#allocation2 + $0xc0] sm:$0xff] %vm22_vm0, %v592_v3  ;;  %v577_v12 = vadd.f32 %v901_v4, %v64_v61  ;;  %v593_v13 = vadd.f32 %v949_v5, %v80_v63  ;;  %v68_v6 = vld [vmem:[#allocation2 + $0x68] sm:$0xff] }
 0x11c   :  { %v697_v10 = vadd.f32 %v1258_v15, %v658_v7  ;;  %v643_v14 = vld [vmem:[#allocation2 + $0x38] sm:$0xff] }
 0x11d   :  { %v659_v16 = vld [vmem:[#allocation2 + $0xb8] sm:$0xff]  ;;  %v745_v18 = vadd.f32 %v713_v1, %v681_v9  ;;  %v682_v20 = vadd.f32 %v1258_v15, %v643_v14  ;;  %610 = vst.msk [vmem:[#allocation2 + $0x48] sm:$0xff] %vm22_vm0, %v577_v12  ;;  %626 = vst.msk [vmem:[#allocation2 + $0xc8] sm:$0xff] %vm22_vm0, %v593_v13  ;;  %v902_v22 = vpop.f32.mrb[20].mxu0  ;;  %v950_v23 = vpop.f32.mrb[20].mxu1 }
 0x11e   :  { %v761_v19 = vadd.f32 %v729_v8, %v697_v10  ;;  %v698_v21 = vadd.f32 %v1258_v15, %v659_v16  ;;  %v903_v25 = vpop.f32.mrb[21].mxu0  ;;  %v951_v27 = vpop.f32.mrb[21].mxu1  ;;  %v84_v8 = vld [vmem:[#allocation2 + $0xe8] sm:$0xff]  ;;  %v717_v10 = vld [vmem:[%s1547_s3 + $0x50] sm:$0xff] }
 0x11f   :  { %777 = vst.msk [vmem:[%s1548_s4 + $0x30] sm:$0xff] %vm22_vm0, %v745_v18  ;;  %v746_v28 = vadd.f32 %v714_v11, %v682_v20  ;;  %v904_v30 = vadd.f32 %v903_v25, %v902_v22  ;;  %v952_v31 = vadd.f32 %v951_v27, %v950_v23  ;;  %v905_v32 = vpop.f32.mrb[22].mxu0  ;;  %v953_v33 = vpop.f32.mrb[22].mxu1  ;;  %v733_v18 = vld [vmem:[%s1547_s3 + $0xd0] sm:$0xff] }
 0x120   :  { %793 = vst.msk [vmem:[%s1548_s4 + $0xb0] sm:$0xff] %vm22_vm0, %v761_v19  ;;  %v762_v29 = vadd.f32 %v730_v17, %v698_v21  ;;  %v906_v35 = vpop.f32.mrb[23].mxu0  ;;  %v954_v37 = vpop.f32.mrb[23].mxu1  ;;  %v718_v21 = vld [vmem:[%s1547_s3 + $0x58] sm:$0xff] }
 0x121   :  { %778 = vst.msk [vmem:[%s1548_s4 + $0x38] sm:$0xff] %vm22_vm0, %v746_v28  ;;  %v578_v39 = vadd.f32 %v904_v30, %v65_v24  ;;  %v594_v40 = vadd.f32 %v952_v31, %v81_v26  ;;  %v907_v41 = vadd.f32 %v906_v35, %v905_v32  ;;  %v955_v42 = vadd.f32 %v954_v37, %v953_v33  ;;  %v734_v26 = vld [vmem:[%s1547_s3 + $0xd8] sm:$0xff]  ;;  %v69_v33 = vld [vmem:[#allocation2 + $0x70] sm:$0xff] }
 0x122   :  { %794 = vst.msk [vmem:[%s1548_s4 + $0xb8] sm:$0xff] %vm22_vm0, %v762_v29  ;;  %v644_v43 = vld [vmem:[#allocation2 + $0x40] sm:$0xff]  ;;  %v85_v35 = vld [vmem:[#allocation2 + $0xf0] sm:$0xff] }
 0x123   :  { %v660_v44 = vld [vmem:[#allocation2 + $0xc0] sm:$0xff]  ;;  %v683_v46 = vadd.f32 %v1258_v15, %v644_v43  ;;  %611 = vst.msk [vmem:[#allocation2 + $0x50] sm:$0xff] %vm22_vm0, %v578_v39  ;;  %627 = vst.msk [vmem:[#allocation2 + $0xd0] sm:$0xff] %vm22_vm0, %v594_v40  ;;  %v579_v49 = vadd.f32 %v907_v41, %v66_v34  ;;  %v595_v50 = vadd.f32 %v955_v42, %v82_v36  ;;  %v70_v43 = vld [vmem:[#allocation2 + $0x78] sm:$0xff] }
 0x124   :  { %v699_v47 = vadd.f32 %v1258_v15, %v660_v44  ;;  %v645_v51 = vld [vmem:[#allocation2 + $0x48] sm:$0xff] }
 0x125   :  { %v661_v52 = vld [vmem:[#allocation2 + $0xc8] sm:$0xff]  ;;  %v747_v54 = vadd.f32 %v715_v38, %v683_v46  ;;  %v684_v56 = vadd.f32 %v1258_v15, %v645_v51  ;;  %612 = vst.msk [vmem:[#allocation2 + $0x58] sm:$0xff] %vm22_vm0, %v579_v49  ;;  %628 = vst.msk [vmem:[#allocation2 + $0xd8] sm:$0xff] %vm22_vm0, %v595_v50  ;;  %v908_v58 = vpop.f32.mrb[24].mxu0  ;;  %v956_v59 = vpop.f32.mrb[24].mxu1 }
 0x126   :  { %v763_v55 = vadd.f32 %v731_v45, %v699_v47  ;;  %v700_v57 = vadd.f32 %v1258_v15, %v661_v52  ;;  %v909_v61 = vpop.f32.mrb[25].mxu0  ;;  %v957_v63 = vpop.f32.mrb[25].mxu1  ;;  %v86_v45 = vld [vmem:[#allocation2 + $0xf8] sm:$0xff]  ;;  %v719_v47 = vld [vmem:[%s1547_s3 + $0x60] sm:$0xff] }
 0x127   :  { %779 = vst.msk [vmem:[%s1548_s4 + $0x40] sm:$0xff] %vm22_vm0, %v747_v54  ;;  %v748_v0 = vadd.f32 %v716_v48, %v684_v56  ;;  %v910_v2 = vadd.f32 %v909_v61, %v908_v58  ;;  %v958_v3 = vadd.f32 %v957_v63, %v956_v59  ;;  %v911_v4 = vpop.f32.mrb[26].mxu0  ;;  %v959_v5 = vpop.f32.mrb[26].mxu1  ;;  %v735_v54 = vld [vmem:[%s1547_s3 + $0xe0] sm:$0xff] }
 0x128   :  { %795 = vst.msk [vmem:[%s1548_s4 + $0xc0] sm:$0xff] %vm22_vm0, %v763_v55  ;;  %v764_v1 = vadd.f32 %v732_v53, %v700_v57  ;;  %v912_v7 = vpop.f32.mrb[27].mxu0  ;;  %v960_v9 = vpop.f32.mrb[27].mxu1  ;;  %v720_v57 = vld [vmem:[%s1547_s3 + $0x68] sm:$0xff] }
 0x129   :  { %780 = vst.msk [vmem:[%s1548_s4 + $0x48] sm:$0xff] %vm22_vm0, %v748_v0  ;;  %v580_v11 = vadd.f32 %v910_v2, %v67_v60  ;;  %v596_v12 = vadd.f32 %v958_v3, %v83_v62  ;;  %v913_v13 = vadd.f32 %v912_v7, %v911_v4  ;;  %v961_v14 = vadd.f32 %v960_v9, %v959_v5  ;;  %v736_v62 = vld [vmem:[%s1547_s3 + $0xe8] sm:$0xff]  ;;  %v721_v5 = vld [vmem:[%s1547_s3 + $0x70] sm:$0xff] }
 0x12a   :  { %796 = vst.msk [vmem:[%s1548_s4 + $0xc8] sm:$0xff] %vm22_vm0, %v764_v1  ;;  %v646_v16 = vld [vmem:[#allocation2 + $0x50] sm:$0xff] }
 0x12b   :  { %v662_v17 = vld [vmem:[#allocation2 + $0xd0] sm:$0xff]  ;;  %v685_v19 = vadd.f32 %v1258_v15, %v646_v16  ;;  %613 = vst.msk [vmem:[#allocation2 + $0x60] sm:$0xff] %vm22_vm0, %v580_v11  ;;  %629 = vst.msk [vmem:[#allocation2 + $0xe0] sm:$0xff] %vm22_vm0, %v596_v12  ;;  %v581_v22 = vadd.f32 %v913_v13, %v68_v6  ;;  %v597_v23 = vadd.f32 %v961_v14, %v84_v8  ;;  %v722_v11 = vld [vmem:[%s1547_s3 + $0x78] sm:$0xff] }
 0x12c   :  { %v701_v20 = vadd.f32 %v1258_v15, %v662_v17  ;;  %v647_v24 = vld [vmem:[#allocation2 + $0x58] sm:$0xff]  ;;  %v737_v8 = vld [vmem:[%s1547_s3 + $0xf0] sm:$0xff] }
 0x12d   :  { %v663_v25 = vld [vmem:[#allocation2 + $0xd8] sm:$0xff]  ;;  %v749_v27 = vadd.f32 %v717_v10, %v685_v19  ;;  %v686_v29 = vadd.f32 %v1258_v15, %v647_v24  ;;  %614 = vst.msk [vmem:[#allocation2 + $0x68] sm:$0xff] %vm22_vm0, %v581_v22  ;;  %630 = vst.msk [vmem:[#allocation2 + $0xe8] sm:$0xff] %vm22_vm0, %v597_v23  ;;  %v914_v31 = vpop.f32.mrb[28].mxu0  ;;  %v962_v32 = vpop.f32.mrb[28].mxu1 }
 0x12e   :  { %v765_v28 = vadd.f32 %v733_v18, %v701_v20  ;;  %v702_v30 = vadd.f32 %v1258_v15, %v663_v25  ;;  %v915_v34 = vpop.f32.mrb[29].mxu0  ;;  %v963_v36 = vpop.f32.mrb[29].mxu1  ;;  %v738_v14 = vld [vmem:[%s1547_s3 + $0xf8] sm:$0xff] }
 0x12f   :  { %781 = vst.msk [vmem:[%s1548_s4 + $0x50] sm:$0xff] %vm22_vm0, %v749_v27  ;;  %v750_v37 = vadd.f32 %v718_v21, %v686_v29  ;;  %v916_v39 = vadd.f32 %v915_v34, %v914_v31  ;;  %v964_v40 = vadd.f32 %v963_v36, %v962_v32  ;;  %v917_v41 = vpop.f32.mrb[30].mxu0  ;;  %v965_v42 = vpop.f32.mrb[30].mxu1 }
 0x130   :  { %797 = vst.msk [vmem:[%s1548_s4 + $0xd0] sm:$0xff] %vm22_vm0, %v765_v28  ;;  %v766_v38 = vadd.f32 %v734_v26, %v702_v30  ;;  %v918_v44 = vpop.f32.mrb[31].mxu0  ;;  %v966_v46 = vpop.f32.mrb[31].mxu1 }
 0x131   :  { %782 = vst.msk [vmem:[%s1548_s4 + $0x58] sm:$0xff] %vm22_vm0, %v750_v37  ;;  %v582_v48 = vadd.f32 %v916_v39, %v69_v33  ;;  %v598_v49 = vadd.f32 %v964_v40, %v85_v35  ;;  %v919_v50 = vadd.f32 %v918_v44, %v917_v41  ;;  %v967_v51 = vadd.f32 %v966_v46, %v965_v42 }
 0x132   :  { %798 = vst.msk [vmem:[%s1548_s4 + $0xd8] sm:$0xff] %vm22_vm0, %v766_v38  ;;  %v648_v52 = vld [vmem:[#allocation2 + $0x60] sm:$0xff] }
 0x133   :  { %v664_v53 = vld [vmem:[#allocation2 + $0xe0] sm:$0xff]  ;;  %v687_v55 = vadd.f32 %v1258_v15, %v648_v52  ;;  %615 = vst.msk [vmem:[#allocation2 + $0x70] sm:$0xff] %vm22_vm0, %v582_v48  ;;  %631 = vst.msk [vmem:[#allocation2 + $0xf0] sm:$0xff] %vm22_vm0, %v598_v49  ;;  %v583_v58 = vadd.f32 %v919_v50, %v70_v43  ;;  %v599_v59 = vadd.f32 %v967_v51, %v86_v45 }
 0x134   :  { %v703_v56 = vadd.f32 %v1258_v15, %v664_v53  ;;  %v649_v60 = vld [vmem:[#allocation2 + $0x68] sm:$0xff] }
 0x135   :  { %v665_v61 = vld [vmem:[#allocation2 + $0xe8] sm:$0xff]  ;;  %v751_v63 = vadd.f32 %v719_v47, %v687_v55  ;;  %v688_v1 = vadd.f32 %v1258_v15, %v649_v60  ;;  %616 = vst.msk [vmem:[#allocation2 + $0x78] sm:$0xff] %vm22_vm0, %v583_v58  ;;  %632 = vst.msk [vmem:[#allocation2 + $0xf8] sm:$0xff] %vm22_vm0, %v599_v59 }
 0x136   :  { %v767_v0 = vadd.f32 %v735_v54, %v703_v56  ;;  %v704_v2 = vadd.f32 %v1258_v15, %v665_v61 }
 0x137   :  { %783 = vst.msk [vmem:[%s1548_s4 + $0x60] sm:$0xff] %vm22_vm0, %v751_v63  ;;  %v752_v3 = vadd.f32 %v720_v57, %v688_v1 }
 0x138   :  { %799 = vst.msk [vmem:[%s1548_s4 + $0xe0] sm:$0xff] %vm22_vm0, %v767_v0  ;;  %v768_v4 = vadd.f32 %v736_v62, %v704_v2 }
 0x139   :  { %784 = vst.msk [vmem:[%s1548_s4 + $0x68] sm:$0xff] %vm22_vm0, %v752_v3 }
 0x13a   :  { %800 = vst.msk [vmem:[%s1548_s4 + $0xe8] sm:$0xff] %vm22_vm0, %v768_v4  ;;  %v650_v6 = vld [vmem:[#allocation2 + $0x70] sm:$0xff] }
 0x13b   :  { %v666_v7 = vld [vmem:[#allocation2 + $0xf0] sm:$0xff]  ;;  %v689_v9 = vadd.f32 %v1258_v15, %v650_v6 }
 0x13c   :  { %v705_v10 = vadd.f32 %v1258_v15, %v666_v7  ;;  %v651_v12 = vld [vmem:[#allocation2 + $0x78] sm:$0xff] }
 0x13d   :  { %v667_v13 = vld [vmem:[#allocation2 + $0xf8] sm:$0xff]  ;;  %v753_v16 = vadd.f32 %v721_v5, %v689_v9  ;;  %v690_v18 = vadd.f32 %v1258_v15, %v651_v12 }
 0x13e   :  { %v769_v17 = vadd.f32 %v737_v8, %v705_v10  ;;  %v706_v19 = vadd.f32 %v1258_v15, %v667_v13 }
 0x13f   :  { %785 = vst.msk [vmem:[%s1548_s4 + $0x70] sm:$0xff] %vm22_vm0, %v753_v16  ;;  %v754_v20 = vadd.f32 %v722_v11, %v690_v18 }
 0x140   :  { %801 = vst.msk [vmem:[%s1548_s4 + $0xf0] sm:$0xff] %vm22_vm0, %v769_v17  ;;  %v770_v21 = vadd.f32 %v738_v14, %v706_v19 }
 0x141   :  { %786 = vst.msk [vmem:[%s1548_s4 + $0x78] sm:$0xff] %vm22_vm0, %v754_v20 }
 0x142   :  { %802 = vst.msk [vmem:[%s1548_s4 + $0xf8] sm:$0xff] %vm22_vm0, %v770_v21 }

// kernel: closed_call.19
= control target key start
LH: loop header
LB: loop body
LE: loop exit
PB: predicated region body
PF: predicated region fallthrough
CT: control target
= control target key end

     0   :  { %vm57_vm0 = vcmask 523264   ;;  %s3314_s0 = inlined_call_operand.vmem [shape: f32[256,64], index: 0, kind: input, shape index: {}]   ;;  %s3315_s3 = inlined_call_operand.vmem [shape: bf16[64,256], index: 3, kind: input, shape index: {}]   ;;  %s3316_s1 = inlined_call_operand.vmem [shape: f32[1,64], index: 1, kind: input, shape index: {}]   ;;  %s3317_s2 = inlined_call_operand.vmem [shape: f32[1,64], index: 2, kind: input, shape index: {}]   ;;  %s3318_s4 = inlined_call_operand.vmem [shape: f32[1,256], index: 4, kind: input, shape index: {}]   ;;  %s3319_s5 = inlined_call_operand.vmem [shape: bf16[256,256], index: 5, kind: output, shape index: {}]  }
   0x1   :  { %v2168_v0 = vld [vmem:[%s3314_s0] sm:$0xff]  ;;  %v2178_v2 = vld [vmem:[%s3314_s0 + $0x8] sm:$0xff]  ;;  %v2196_v8 = vld [vmem:[%s3314_s0 + $0x10] sm:$0xff] }
   0x2   :  { %v2173_v1 = vld [vmem:[%s3314_s0 + $0x80] sm:$0xff]  ;;  %v58_v3 = vsel %vm57_vm0, %v2168_v0, 0.0  ;;  %v2187_v5 = vld [vmem:[%s3314_s0 + $0x88] sm:$0xff]  ;;  %v61_v6 = vsel %vm57_vm0, %v2178_v2, 0.0  ;;  %v2201_v9 = vld [vmem:[%s3314_s0 + $0x18] sm:$0xff]  ;;  %v64_v10 = vsel %vm57_vm0, %v2196_v8, 0.0 }
   0x3   :  { %v106_v4 = vsel %vm57_vm0, %v2173_v1, 0.0  ;;  %59 = vadd.xlane.f32.xlu0 %v58_v3  ;;  %v109_v7 = vsel %vm57_vm0, %v2187_v5, 0.0  ;;  %v67_v11 = vsel %vm57_vm0, %v2201_v9, 0.0  ;;  %v2210_v12 = vld [vmem:[%s3314_s0 + $0x90] sm:$0xff]  ;;  %v2215_v13 = vld [vmem:[%s3314_s0 + $0x98] sm:$0xff]  ;;  %v2224_v16 = vld [vmem:[%s3314_s0 + $0x20] sm:$0xff] }
   0x4   :  { %107 = vadd.xlane.f32.xlu1 %v106_v4  ;;  %v112_v14 = vsel %vm57_vm0, %v2210_v12, 0.0  ;;  %v115_v15 = vsel %vm57_vm0, %v2215_v13, 0.0  ;;  %v2229_v17 = vld [vmem:[%s3314_s0 + $0x28] sm:$0xff]  ;;  %v70_v18 = vsel %vm57_vm0, %v2224_v16, 0.0  ;;  %v2238_v20 = vld [vmem:[%s3314_s0 + $0xa0] sm:$0xff]  ;;  %v2252_v24 = vld [vmem:[%s3314_s0 + $0x30] sm:$0xff] }
   0x5   :  { %v73_v19 = vsel %vm57_vm0, %v2229_v17, 0.0  ;;  %v2243_v21 = vld [vmem:[%s3314_s0 + $0xa8] sm:$0xff]  ;;  %v118_v22 = vsel %vm57_vm0, %v2238_v20, 0.0  ;;  %v2257_v25 = vld [vmem:[%s3314_s0 + $0x38] sm:$0xff]  ;;  %v76_v26 = vsel %vm57_vm0, %v2252_v24, 0.0  ;;  %v2266_v28 = vld [vmem:[%s3314_s0 + $0xb0] sm:$0xff] }
   0x6   :  { %v121_v23 = vsel %vm57_vm0, %v2243_v21, 0.0  ;;  %v79_v27 = vsel %vm57_vm0, %v2257_v25, 0.0  ;;  %v2271_v29 = vld [vmem:[%s3314_s0 + $0xb8] sm:$0xff]  ;;  %v124_v30 = vsel %vm57_vm0, %v2266_v28, 0.0  ;;  %v2280_v32 = vld [vmem:[%s3314_s0 + $0x40] sm:$0xff]  ;;  %v2285_v33 = vld [vmem:[%s3314_s0 + $0x48] sm:$0xff] }
   0x7   :  { %62 = vadd.xlane.f32.xlu0 %v61_v6  ;;  %v127_v31 = vsel %vm57_vm0, %v2271_v29, 0.0  ;;  %v82_v34 = vsel %vm57_vm0, %v2280_v32, 0.0  ;;  %v85_v35 = vsel %vm57_vm0, %v2285_v33, 0.0  ;;  %v2294_v36 = vld [vmem:[%s3314_s0 + $0xc0] sm:$0xff]  ;;  %v2299_v37 = vld [vmem:[%s3314_s0 + $0xc8] sm:$0xff]  ;;  %v2308_v40 = vld [vmem:[%s3314_s0 + $0x50] sm:$0xff] }
   0x8   :  { %110 = vadd.xlane.f32.xlu1 %v109_v7  ;;  %v130_v38 = vsel %vm57_vm0, %v2294_v36, 0.0  ;;  %v133_v39 = vsel %vm57_vm0, %v2299_v37, 0.0  ;;  %v2313_v41 = vld [vmem:[%s3314_s0 + $0x58] sm:$0xff]  ;;  %v88_v42 = vsel %vm57_vm0, %v2308_v40, 0.0  ;;  %v2322_v44 = vld [vmem:[%s3314_s0 + $0xd0] sm:$0xff]  ;;  %v2336_v48 = vld [vmem:[%s3314_s0 + $0x60] sm:$0xff] }
   0x9   :  { %v91_v43 = vsel %vm57_vm0, %v2313_v41, 0.0  ;;  %v2327_v45 = vld [vmem:[%s3314_s0 + $0xd8] sm:$0xff]  ;;  %v136_v46 = vsel %vm57_vm0, %v2322_v44, 0.0  ;;  %v2341_v49 = vld [vmem:[%s3314_s0 + $0x68] sm:$0xff]  ;;  %v94_v50 = vsel %vm57_vm0, %v2336_v48, 0.0  ;;  %v2350_v52 = vld [vmem:[%s3314_s0 + $0xe0] sm:$0xff] }
   0xa   :  { %v139_v47 = vsel %vm57_vm0, %v2327_v45, 0.0  ;;  %v97_v51 = vsel %vm57_vm0, %v2341_v49, 0.0  ;;  %v2355_v53 = vld [vmem:[%s3314_s0 + $0xe8] sm:$0xff]  ;;  %v142_v54 = vsel %vm57_vm0, %v2350_v52, 0.0  ;;  %v2364_v56 = vld [vmem:[%s3314_s0 + $0x70] sm:$0xff]  ;;  %v2369_v57 = vld [vmem:[%s3314_s0 + $0x78] sm:$0xff] }
   0xb   :  { %65 = vadd.xlane.f32.xlu0 %v64_v10  ;;  %v145_v55 = vsel %vm57_vm0, %v2355_v53, 0.0  ;;  %v100_v58 = vsel %vm57_vm0, %v2364_v56, 0.0  ;;  %v103_v59 = vsel %vm57_vm0, %v2369_v57, 0.0  ;;  %v2378_v60 = vld [vmem:[%s3314_s0 + $0xf0] sm:$0xff]  ;;  %v2383_v61 = vld [vmem:[%s3314_s0 + $0xf8] sm:$0xff] }
   0xc   :  { %68 = vadd.xlane.f32.xlu1 %v67_v11  ;;  %v148_v62 = vsel %vm57_vm0, %v2378_v60, 0.0  ;;  %v151_v63 = vsel %vm57_vm0, %v2383_v61, 0.0 }
   0xf   :  { %113 = vadd.xlane.f32.xlu0 %v112_v14 }
  0x10   :  { %116 = vadd.xlane.f32.xlu1 %v115_v15 }
  0x13   :  { %71 = vadd.xlane.f32.xlu0 %v70_v18 }
  0x14   :  { %74 = vadd.xlane.f32.xlu1 %v73_v19 }
  0x17   :  { %119 = vadd.xlane.f32.xlu0 %v118_v22 }
  0x18   :  { %122 = vadd.xlane.f32.xlu1 %v121_v23 }
  0x1b   :  { %77 = vadd.xlane.f32.xlu0 %v76_v26 }
  0x1c   :  { %80 = vadd.xlane.f32.xlu1 %v79_v27 }
  0x1f   :  { %125 = vadd.xlane.f32.xlu0 %v124_v30 }
  0x20   :  { %128 = vadd.xlane.f32.xlu1 %v127_v31 }
  0x23   :  { %83 = vadd.xlane.f32.xlu0 %v82_v34 }
  0x24   :  { %86 = vadd.xlane.f32.xlu1 %v85_v35 }
  0x27   :  { %131 = vadd.xlane.f32.xlu0 %v130_v38 }
  0x28   :  { %134 = vadd.xlane.f32.xlu1 %v133_v39 }
  0x2b   :  { %89 = vadd.xlane.f32.xlu0 %v88_v42 }
  0x2c   :  { %92 = vadd.xlane.f32.xlu1 %v91_v43 }
  0x2f   :  { %137 = vadd.xlane.f32.xlu0 %v136_v46 }
  0x30   :  { %140 = vadd.xlane.f32.xlu1 %v139_v47 }
  0x33   :  { %95 = vadd.xlane.f32.xlu0 %v94_v50 }
  0x34   :  { %98 = vadd.xlane.f32.xlu1 %v97_v51 }
  0x37   :  { %143 = vadd.xlane.f32.xlu0 %v142_v54 }
  0x38   :  { %146 = vadd.xlane.f32.xlu1 %v145_v55 }
  0x3b   :  { %101 = vadd.xlane.f32.xlu0 %v100_v58 }
  0x3c   :  { %104 = vadd.xlane.f32.xlu1 %v103_v59 }
  0x3f   :  { %149 = vadd.xlane.f32.xlu0 %v148_v62 }
  0x40   :  { %152 = vadd.xlane.f32.xlu1 %v151_v63 }
  0x90   :  { %v60_v3 = vpop.xlane.xlu0 %59 }
  0x91   :  { %v108_v4 = vpop.xlane.xlu1 %107  ;;  %v155_v6 = vmul.f32 0.015625, %v60_v3 }
  0x92   :  { %v171_v7 = vmul.f32 0.015625, %v108_v4 }
  0x93   :  { %v2390_v10 = vsub.f32 %v2168_v0, %v155_v6 }
  0x94   :  { %v2393_v11 = vsub.f32 %v2173_v1, %v171_v7  ;;  %v63_v14 = vpop.xlane.xlu0 %62 }
  0x95   :  { %v111_v15 = vpop.xlane.xlu1 %110  ;;  %v156_v18 = vmul.f32 0.015625, %v63_v14  ;;  %v219_v22 = vmul.f32 %v2390_v10, %v2390_v10 }
  0x96   :  { %v172_v19 = vmul.f32 0.015625, %v111_v15  ;;  %v235_v23 = vmul.f32 %v2393_v11, %v2393_v11 }
  0x97   :  { %v2400_v26 = vsub.f32 %v2178_v2, %v156_v18  ;;  %v251_v0 = vsel %vm57_vm0, %v219_v22, 0.0 }
  0x98   :  { %v2403_v27 = vsub.f32 %v2187_v5, %v172_v19  ;;  %252 = vadd.xlane.f32.xlu0 %v251_v0  ;;  %v66_v1 = vpop.xlane.xlu0 %65  ;;  %v299_v31 = vsel %vm57_vm0, %v235_v23, 0.0 }
  0x99   :  { %v69_v30 = vpop.xlane.xlu1 %68  ;;  %v157_v34 = vmul.f32 0.015625, %v66_v1  ;;  %v220_v38 = vmul.f32 %v2400_v26, %v2400_v26 }
  0x9a   :  { %v158_v35 = vmul.f32 0.015625, %v69_v30  ;;  %v236_v39 = vmul.f32 %v2403_v27, %v2403_v27 }
  0x9b   :  { %v2412_v2 = vsub.f32 %v2196_v8, %v157_v34  ;;  %v254_v42 = vsel %vm57_vm0, %v220_v38, 0.0 }
  0x9c   :  { %v2415_v5 = vsub.f32 %v2201_v9, %v158_v35  ;;  %300 = vadd.xlane.f32.xlu0 %v299_v31  ;;  %255 = vadd.xlane.f32.xlu1 %v254_v42  ;;  %v114_v43 = vpop.xlane.xlu0 %113  ;;  %v302_v47 = vsel %vm57_vm0, %v236_v39, 0.0 }
  0x9d   :  { %v117_v46 = vpop.xlane.xlu1 %116  ;;  %v173_v50 = vmul.f32 0.015625, %v114_v43  ;;  %v221_v54 = vmul.f32 %v2412_v2, %v2412_v2 }
  0x9e   :  { %v174_v51 = vmul.f32 0.015625, %v117_v46  ;;  %v222_v8 = vmul.f32 %v2415_v5, %v2415_v5 }
  0x9f   :  { %v2424_v55 = vsub.f32 %v2210_v12, %v173_v50  ;;  %v257_v58 = vsel %vm57_vm0, %v221_v54, 0.0 }
  0xa0   :  { %v2427_v9 = vsub.f32 %v2215_v13, %v174_v51  ;;  %303 = vadd.xlane.f32.xlu1 %v302_v47  ;;  %258 = vadd.xlane.f32.xlu0 %v257_v58  ;;  %v72_v59 = vpop.xlane.xlu0 %71  ;;  %v260_v63 = vsel %vm57_vm0, %v222_v8, 0.0 }
  0xa1   :  { %v75_v62 = vpop.xlane.xlu1 %74  ;;  %v159_v3 = vmul.f32 0.015625, %v72_v59  ;;  %v237_v6 = vmul.f32 %v2424_v55, %v2424_v55 }
  0xa2   :  { %v160_v4 = vmul.f32 0.015625, %v75_v62  ;;  %v238_v12 = vmul.f32 %v2427_v9, %v2427_v9 }
  0xa3   :  { %v2436_v7 = vsub.f32 %v2224_v16, %v159_v3  ;;  %v305_v14 = vsel %vm57_vm0, %v237_v6, 0.0 }
  0xa4   :  { %v2439_v13 = vsub.f32 %v2229_v17, %v160_v4  ;;  %261 = vadd.xlane.f32.xlu1 %v260_v63  ;;  %306 = vadd.xlane.f32.xlu0 %v305_v14  ;;  %v120_v15 = vpop.xlane.xlu0 %119  ;;  %v308_v19 = vsel %vm57_vm0, %v238_v12, 0.0 }
  0xa5   :  { %v123_v18 = vpop.xlane.xlu1 %122  ;;  %v175_v22 = vmul.f32 0.015625, %v120_v15  ;;  %v223_v0 = vmul.f32 %v2436_v7, %v2436_v7 }
  0xa6   :  { %v176_v23 = vmul.f32 0.015625, %v123_v18  ;;  %v224_v16 = vmul.f32 %v2439_v13, %v2439_v13 }
  0xa7   :  { %v2448_v1 = vsub.f32 %v2238_v20, %v175_v22  ;;  %v263_v30 = vsel %vm57_vm0, %v223_v0, 0.0 }
  0xa8   :  { %v2451_v17 = vsub.f32 %v2243_v21, %v176_v23  ;;  %309 = vadd.xlane.f32.xlu1 %v308_v19  ;;  %264 = vadd.xlane.f32.xlu0 %v263_v30  ;;  %v78_v31 = vpop.xlane.xlu0 %77  ;;  %v266_v35 = vsel %vm57_vm0, %v224_v16, 0.0 }
  0xa9   :  { %v81_v34 = vpop.xlane.xlu1 %80  ;;  %v161_v38 = vmul.f32 0.015625, %v78_v31  ;;  %v239_v42 = vmul.f32 %v2448_v1, %v2448_v1 }
  0xaa   :  { %v162_v39 = vmul.f32 0.015625, %v81_v34  ;;  %v240_v20 = vmul.f32 %v2451_v17, %v2451_v17 }
  0xab   :  { %v2460_v43 = vsub.f32 %v2252_v24, %v161_v38  ;;  %v311_v46 = vsel %vm57_vm0, %v239_v42, 0.0  ;;  %v601_v42 = vld [vmem:[%s3315_s3] sm:$0xff] }
  0xac   :  { %v2463_v21 = vsub.f32 %v2257_v25, %v162_v39  ;;  %267 = vadd.xlane.f32.xlu1 %v266_v35  ;;  %312 = vadd.xlane.f32.xlu0 %v311_v46  ;;  %v126_v47 = vpop.xlane.xlu0 %125  ;;  %v314_v51 = vsel %vm57_vm0, %v240_v20, 0.0 }
  0xad   :  { %v129_v50 = vpop.xlane.xlu1 %128  ;;  %v177_v54 = vmul.f32 0.015625, %v126_v47  ;;  %v225_v58 = vmul.f32 %v2460_v43, %v2460_v43 }
  0xae   :  { %v178_v8 = vmul.f32 0.015625, %v129_v50  ;;  %v226_v24 = vmul.f32 %v2463_v21, %v2463_v21 }
  0xaf   :  { %v2472_v59 = vsub.f32 %v2266_v28, %v177_v54  ;;  %v269_v62 = vsel %vm57_vm0, %v225_v58, 0.0 }
  0xb0   :  { %v2475_v25 = vsub.f32 %v2271_v29, %v178_v8  ;;  %315 = vadd.xlane.f32.xlu1 %v314_v51  ;;  %270 = vadd.xlane.f32.xlu0 %v269_v62  ;;  %v84_v63 = vpop.xlane.xlu0 %83  ;;  %v272_v4 = vsel %vm57_vm0, %v226_v24, 0.0 }
  0xb1   :  { %v87_v3 = vpop.xlane.xlu1 %86  ;;  %v163_v6 = vmul.f32 0.015625, %v84_v63  ;;  %v241_v14 = vmul.f32 %v2472_v59, %v2472_v59 }
  0xb2   :  { %v164_v12 = vmul.f32 0.015625, %v87_v3  ;;  %v242_v28 = vmul.f32 %v2475_v25, %v2475_v25  ;;  %v603_v3 = vld [vmem:[%s3315_s3 + $0x10] sm:$0xff] }
  0xb3   :  { %v2484_v15 = vsub.f32 %v2280_v32, %v163_v6  ;;  %v317_v18 = vsel %vm57_vm0, %v241_v14, 0.0 }
  0xb4   :  { %v2487_v29 = vsub.f32 %v2285_v33, %v164_v12  ;;  %273 = vadd.xlane.f32.xlu1 %v272_v4  ;;  %318 = vadd.xlane.f32.xlu0 %v317_v18  ;;  %v132_v19 = vpop.xlane.xlu0 %131  ;;  %v320_v23 = vsel %vm57_vm0, %v242_v28, 0.0 }
  0xb5   :  { %v135_v22 = vpop.xlane.xlu1 %134  ;;  %v179_v0 = vmul.f32 0.015625, %v132_v19  ;;  %v227_v30 = vmul.f32 %v2484_v15, %v2484_v15 }
  0xb6   :  { %v180_v16 = vmul.f32 0.015625, %v135_v22  ;;  %v228_v32 = vmul.f32 %v2487_v29, %v2487_v29 }
  0xb7   :  { %v2496_v31 = vsub.f32 %v2294_v36, %v179_v0  ;;  %v275_v34 = vsel %vm57_vm0, %v227_v30, 0.0  ;;  %v602_v36 = vld [vmem:[%s3315_s3 + $0x8] sm:$0xff]  ;;  %v605_v30 = vld [vmem:[%s3315_s3 + $0x20] sm:$0xff] }
  0xb8   :  { %v2499_v33 = vsub.f32 %v2299_v37, %v180_v16  ;;  %321 = vadd.xlane.f32.xlu1 %v320_v23  ;;  %276 = vadd.xlane.f32.xlu0 %v275_v34  ;;  %v90_v35 = vpop.xlane.xlu0 %89  ;;  %v278_v39 = vsel %vm57_vm0, %v228_v32, 0.0  ;;  %v1806_v37 = vld [vmem:[%s3315_s3 + $0x4] ss:$8 sps:$4 sm:$0xff]   ;;  %v1645_v51 = vcombine.low %v601_v42, %v602_v36 }
  0xb9   :  { %v93_v38 = vpop.xlane.xlu1 %92  ;;  %v165_v20 = vmul.f32 0.015625, %v90_v35  ;;  %v243_v47 = vmul.f32 %v2496_v31, %v2496_v31  ;;  %710 = vmatprep.subr.bf16.mxu0 %v1806_v37  ;;  %1797 = vmatprep.subr.bf16.mxu1 %v1806_v37 }
  0xba   :  { %v166_v46 = vmul.f32 0.015625, %v93_v38  ;;  %v244_v50 = vmul.f32 %v2499_v33, %v2499_v33  ;;  %711 = vmatpush1.bf16.msra.mxu0 %v1645_v51  ;;  %1801 = vmatpush1.bf16.msra.mxu1 %v1645_v51 }
  0xbb   :  { %v2517_v54 = vsub.f32 %v2308_v40, %v165_v20  ;;  %v323_v58 = vsel %vm57_vm0, %v243_v47, 0.0  ;;  %v604_v40 = vld [vmem:[%s3315_s3 + $0x18] sm:$0xff] }
  0xbc   :  { %v2520_v8 = vsub.f32 %v2313_v41, %v166_v46  ;;  %279 = vadd.xlane.f32.xlu1 %v278_v39  ;;  %324 = vadd.xlane.f32.xlu0 %v323_v58  ;;  %v138_v24 = vpop.xlane.xlu0 %137  ;;  %v326_v63 = vsel %vm57_vm0, %v244_v50, 0.0  ;;  %v1808_v41 = vld [vmem:[%s3315_s3 + $0x14] ss:$8 sps:$4 sm:$0xff]   ;;  %v1647_v28 = vcombine.low %v603_v3, %v604_v40 }
  0xbd   :  { %v141_v62 = vpop.xlane.xlu1 %140  ;;  %v181_v4 = vmul.f32 0.015625, %v138_v24  ;;  %v229_v12 = vmul.f32 %v2517_v54, %v2517_v54  ;;  %712 = vmatprep.subr.bf16.mxu0 %v1808_v41  ;;  %1798 = vmatprep.subr.bf16.mxu1 %v1808_v41  ;;  %v607_v50 = vld [vmem:[%s3315_s3 + $0x30] sm:$0xff] }
  0xbe   :  { %v182_v6 = vmul.f32 0.015625, %v141_v62  ;;  %v230_v14 = vmul.f32 %v2520_v8, %v2520_v8  ;;  %713 = vmatpush1.bf16.msra.mxu0 %v1647_v28  ;;  %1802 = vmatpush1.bf16.msra.mxu1 %v1647_v28 }
  0xbf   :  { %v2538_v18 = vsub.f32 %v2322_v44, %v181_v4  ;;  %v281_v22 = vsel %vm57_vm0, %v229_v12, 0.0  ;;  %v606_v44 = vld [vmem:[%s3315_s3 + $0x28] sm:$0xff] }
  0xc0   :  { %v2541_v19 = vsub.f32 %v2327_v45, %v182_v6  ;;  %327 = vadd.xlane.f32.xlu1 %v326_v63  ;;  %282 = vadd.xlane.f32.xlu0 %v281_v22  ;;  %v96_v23 = vpop.xlane.xlu0 %95  ;;  %v284_v16 = vsel %vm57_vm0, %v230_v14, 0.0  ;;  %v1810_v45 = vld [vmem:[%s3315_s3 + $0x24] ss:$8 sps:$4 sm:$0xff]   ;;  %v1649_v39 = vcombine.low %v605_v30, %v606_v44 }
  0xc1   :  { %v99_v0 = vpop.xlane.xlu1 %98  ;;  %v167_v32 = vmul.f32 0.015625, %v96_v23  ;;  %v245_v35 = vmul.f32 %v2538_v18, %v2538_v18  ;;  %714 = vmatprep.subr.bf16.mxu0 %v1810_v45  ;;  %1799 = vmatprep.subr.bf16.mxu1 %v1810_v45  ;;  %v2134_v23 = vmov 0  }
  0xc2   :  { %v168_v34 = vmul.f32 0.015625, %v99_v0  ;;  %v246_v38 = vmul.f32 %v2541_v19, %v2541_v19  ;;  %715 = vmatpush1.bf16.msra.mxu0 %v1649_v39  ;;  %1803 = vmatpush1.bf16.msra.mxu1 %v1649_v39 }
  0xc3   :  { %v2559_v42 = vsub.f32 %v2336_v48, %v167_v32  ;;  %v329_v37 = vsel %vm57_vm0, %v245_v35, 0.0  ;;  %v608_v48 = vld [vmem:[%s3315_s3 + $0x38] sm:$0xff]  ;;  %742 = vmatprep.mubr.bf16.mxu0 %v2134_v23  ;;  %822 = vmatprep.mubr.bf16.mxu1 %v2134_v23 }
  0xc4   :  { %v2562_v36 = vsub.f32 %v2341_v49, %v168_v34  ;;  %285 = vadd.xlane.f32.xlu1 %v284_v16  ;;  %330 = vadd.xlane.f32.xlu0 %v329_v37  ;;  %v144_v20 = vpop.xlane.xlu0 %143  ;;  %v332_v47 = vsel %vm57_vm0, %v246_v38, 0.0  ;;  %v1812_v49 = vld [vmem:[%s3315_s3 + $0x34] ss:$8 sps:$4 sm:$0xff]   ;;  %v1651_v63 = vcombine.low %v607_v50, %v608_v48 }
  0xc5   :  { %v147_v46 = vpop.xlane.xlu1 %146  ;;  %v183_v51 = vmul.f32 0.015625, %v144_v20  ;;  %v231_v24 = vmul.f32 %v2559_v42, %v2559_v42  ;;  %716 = vmatprep.subr.bf16.mxu0 %v1812_v49  ;;  %1800 = vmatprep.subr.bf16.mxu1 %v1812_v49 }
  0xc6   :  { %v184_v58 = vmul.f32 0.015625, %v147_v46  ;;  %v232_v62 = vmul.f32 %v2562_v36, %v2562_v36  ;;  %717 = vmatpush1.bf16.msra.mxu0 %v1651_v63  ;;  %1804 = vmatpush1.bf16.msra.mxu1 %v1651_v63 }
  0xc7   :  { %v2580_v3 = vsub.f32 %v2350_v52, %v183_v51  ;;  %v287_v41 = vsel %vm57_vm0, %v231_v24, 0.0 }
  0xc8   :  { %v2583_v40 = vsub.f32 %v2355_v53, %v184_v58  ;;  %333 = vadd.xlane.f32.xlu1 %v332_v47  ;;  %288 = vadd.xlane.f32.xlu0 %v287_v41  ;;  %v102_v4 = vpop.xlane.xlu0 %101  ;;  %v290_v12 = vsel %vm57_vm0, %v232_v62, 0.0 }
  0xc9   :  { %v105_v6 = vpop.xlane.xlu1 %104  ;;  %v169_v14 = vmul.f32 0.015625, %v102_v4  ;;  %v247_v22 = vmul.f32 %v2580_v3, %v2580_v3 }
  0xca   :  { %v170_v28 = vmul.f32 0.015625, %v105_v6  ;;  %v248_v52 = vmul.f32 %v2583_v40, %v2583_v40 }
  0xcb   :  { %v2594_v53 = vsub.f32 %v2364_v56, %v169_v14  ;;  %v335_v16 = vsel %vm57_vm0, %v247_v22, 0.0 }
  0xcc   :  { %v2597_v0 = vsub.f32 %v2369_v57, %v170_v28  ;;  %291 = vadd.xlane.f32.xlu1 %v290_v12  ;;  %336 = vadd.xlane.f32.xlu0 %v335_v16  ;;  %v150_v30 = vpop.xlane.xlu0 %149  ;;  %v338_v45 = vsel %vm57_vm0, %v248_v52, 0.0 }
  0xcd   :  { %v153_v44 = vpop.xlane.xlu1 %152  ;;  %v185_v32 = vmul.f32 0.015625, %v150_v30  ;;  %v233_v35 = vmul.f32 %v2594_v53, %v2594_v53 }
  0xce   :  { %v186_v34 = vmul.f32 0.015625, %v153_v44  ;;  %v234_v56 = vmul.f32 %v2597_v0, %v2597_v0 }
  0xcf   :  { %v2606_v38 = vsub.f32 %v2378_v60, %v185_v32  ;;  %v293_v39 = vsel %vm57_vm0, %v233_v35, 0.0 }
  0xd0   :  { %v2609_v57 = vsub.f32 %v2383_v61, %v186_v34  ;;  %339 = vadd.xlane.f32.xlu1 %v338_v45  ;;  %294 = vadd.xlane.f32.xlu0 %v293_v39  ;;  %v296_v37 = vsel %vm57_vm0, %v234_v56, 0.0  ;;  %v2623_v39 = vld [vmem:[%s3316_s1] ss:$0 sm:$0xff] }
  0xd1   :  { %v249_v20 = vmul.f32 %v2606_v38, %v2606_v38 }
  0xd2   :  { %v250_v46 = vmul.f32 %v2609_v57, %v2609_v57 }
  0xd3   :  { %v341_v47 = vsel %vm57_vm0, %v249_v20, 0.0 }
  0xd4   :  { %297 = vadd.xlane.f32.xlu1 %v296_v37  ;;  %342 = vadd.xlane.f32.xlu0 %v341_v47  ;;  %v344_v60 = vsel %vm57_vm0, %v250_v46, 0.0 }
  0xd8   :  { %345 = vadd.xlane.f32.xlu1 %v344_v60 }
 0x125   :  { %v253_v61 = vpop.xlane.xlu0 %252 }
 0x126   :  { %v347_v50 = vmul.f32 0.015625, %v253_v61 }
 0x128   :  { %v379_v48 = vadd.f32 1e-05, %v347_v50 }
 0x129   :  { %v256_v49 = vpop.xlane.xlu1 %255  ;;  %v301_v51 = vpop.xlane.xlu0 %300 }
 0x12a   :  { %1814 = vrsqrt.f32 %v379_v48  ;;  %v348_v58 = vmul.f32 0.015625, %v256_v49  ;;  %v363_v24 = vmul.f32 0.015625, %v301_v51  ;;  %v2630_v51 = vld [vmem:[%s3317_s2] ss:$0 sm:$0xff] }
 0x12c   :  { %v380_v62 = vadd.f32 1e-05, %v348_v58  ;;  %v395_v63 = vadd.f32 1e-05, %v363_v24 }
 0x12d   :  { %v304_v41 = vpop.xlane.xlu1 %303  ;;  %v259_v4 = vpop.xlane.xlu0 %258 }
 0x12e   :  { %1816 = vrsqrt.f32 %v380_v62  ;;  %v364_v6 = vmul.f32 0.015625, %v304_v41  ;;  %v349_v12 = vmul.f32 0.015625, %v259_v4 }
 0x12f   :  { %1818 = vrsqrt.f32 %v395_v63 }
 0x130   :  { %v396_v14 = vadd.f32 1e-05, %v364_v6  ;;  %v381_v28 = vadd.f32 1e-05, %v349_v12 }
 0x131   :  { %v262_v22 = vpop.xlane.xlu1 %261  ;;  %v307_v52 = vpop.xlane.xlu0 %306 }
 0x132   :  { %1820 = vrsqrt.f32 %v396_v14  ;;  %v350_v16 = vmul.f32 0.015625, %v262_v22  ;;  %v365_v30 = vmul.f32 0.015625, %v307_v52 }
 0x133   :  { %1822 = vrsqrt.f32 %v381_v28 }
 0x134   :  { %v1815_v44 = vpop.eup %1814  ;;  %v382_v45 = vadd.f32 1e-05, %v350_v16  ;;  %v397_v32 = vadd.f32 1e-05, %v365_v30 }
 0x135   :  { %v443_v34 = vmul.f32 %v1815_v44, %v2390_v10  ;;  %v310_v35 = vpop.xlane.xlu1 %309  ;;  %v265_v56 = vpop.xlane.xlu0 %264 }
 0x136   :  { %1824 = vrsqrt.f32 %v382_v45  ;;  %v366_v37 = vmul.f32 0.015625, %v310_v35  ;;  %v351_v20 = vmul.f32 0.015625, %v265_v56 }
 0x137   :  { %1826 = vrsqrt.f32 %v397_v32  ;;  %v482_v50 = vmul.f32 %v2623_v39, %v443_v34 }
 0x138   :  { %v1817_v46 = vpop.eup %1816  ;;  %v398_v47 = vadd.f32 1e-05, %v366_v37  ;;  %v383_v60 = vadd.f32 1e-05, %v351_v20 }
 0x139   :  { %v1819_v61 = vpop.eup %1818  ;;  %v444_v48 = vmul.f32 %v1817_v46, %v2400_v26  ;;  %v268_v10 = vpop.xlane.xlu1 %267  ;;  %v521_v26 = vadd.f32 %v2630_v51, %v482_v50 }
 0x13a   :  { %v313_v49 = vpop.xlane.xlu0 %312  ;;  %v459_v58 = vmul.f32 %v1819_v61, %v2393_v11  ;;  %1828 = vrsqrt.f32 %v398_v47  ;;  %v352_v24 = vmul.f32 0.015625, %v268_v10 }
 0x13b   :  { %v367_v62 = vmul.f32 0.015625, %v313_v49  ;;  %v483_v63 = vmul.f32 %v2623_v39, %v444_v48  ;;  %1830 = vrsqrt.f32 %v383_v60 }
 0x13c   :  { %v1821_v41 = vpop.eup %1820  ;;  %v384_v4 = vadd.f32 1e-05, %v352_v24  ;;  %v498_v28 = vmul.f32 %v2623_v39, %v459_v58 }
 0x13d   :  { %v399_v6 = vadd.f32 1e-05, %v367_v62  ;;  %v1823_v12 = vpop.eup %1822  ;;  %v522_v14 = vadd.f32 %v2630_v51, %v483_v63  ;;  %v460_v22 = vmul.f32 %v1821_v41, %v2403_v27  ;;  %v316_v52 = vpop.xlane.xlu1 %315 }
 0x13e   :  { %v271_v11 = vpop.xlane.xlu0 %270  ;;  %v445_v16 = vmul.f32 %v1823_v12, %v2412_v2  ;;  %1832 = vrsqrt.f32 %v384_v4  ;;  %v368_v30 = vmul.f32 0.015625, %v316_v52  ;;  %v537_v27 = vadd.f32 %v2630_v51, %v498_v28 }
 0x13f   :  { %v553_v44 = vpack.c.bf16 %v522_v14, %v521_v26  ;;  %v499_v45 = vmul.f32 %v2623_v39, %v460_v22  ;;  %1834 = vrsqrt.f32 %v399_v6  ;;  %v353_v32 = vmul.f32 0.015625, %v271_v11 }
 0x140   :  { %v1825_v34 = vpop.eup %1824  ;;  %v484_v35 = vmul.f32 %v2623_v39, %v445_v16  ;;  %v400_v56 = vadd.f32 1e-05, %v368_v30 }
 0x141   :  { %v1827_v37 = vpop.eup %1826  ;;  %569 = vst.msk [vmem:[#allocation2] sm:$0xff] %vm57_vm0, %v553_v44  ;;  %v538_v20 = vadd.f32 %v2630_v51, %v499_v45  ;;  %v446_v2 = vmul.f32 %v1825_v34, %v2415_v5  ;;  %v385_v46 = vadd.f32 1e-05, %v353_v32  ;;  %v274_v47 = vpop.xlane.xlu1 %273 }
 0x142   :  { %v319_v60 = vpop.xlane.xlu0 %318  ;;  %v461_v61 = vmul.f32 %v1827_v37, %v2424_v55  ;;  %1836 = vrsqrt.f32 %v400_v56  ;;  %v354_v50 = vmul.f32 0.015625, %v274_v47  ;;  %v523_v24 = vadd.f32 %v2630_v51, %v484_v35 }
 0x143   :  { %v561_v48 = vpack.c.bf16 %v538_v20, %v537_v27  ;;  %v485_v10 = vmul.f32 %v2623_v39, %v446_v2  ;;  %1838 = vrsqrt.f32 %v385_v46  ;;  %v369_v49 = vmul.f32 0.015625, %v319_v60 }
 0x144   :  { %v1829_v58 = vpop.eup %1828  ;;  %v386_v62 = vadd.f32 1e-05, %v354_v50  ;;  %v500_v41 = vmul.f32 %v2623_v39, %v461_v61 }
 0x145   :  { %v1831_v63 = vpop.eup %1830  ;;  %577 = vst.msk [vmem:[#allocation2 + $0x40] sm:$0xff] %vm57_vm0, %v561_v48  ;;  %v524_v5 = vadd.f32 %v2630_v51, %v485_v10  ;;  %v462_v55 = vmul.f32 %v1829_v58, %v2427_v9  ;;  %v401_v4 = vadd.f32 1e-05, %v369_v49  ;;  %v322_v6 = vpop.xlane.xlu1 %321 }
 0x146   :  { %v277_v12 = vpop.xlane.xlu0 %276  ;;  %v447_v26 = vmul.f32 %v1831_v63, %v2436_v7  ;;  %1840 = vrsqrt.f32 %v386_v62  ;;  %v370_v14 = vmul.f32 0.015625, %v322_v6  ;;  %v539_v9 = vadd.f32 %v2630_v51, %v500_v41 }
 0x147   :  { %v554_v28 = vpack.c.bf16 %v524_v5, %v523_v24  ;;  %v501_v22 = vmul.f32 %v2623_v39, %v462_v55  ;;  %1842 = vrsqrt.f32 %v401_v4  ;;  %v355_v52 = vmul.f32 0.015625, %v277_v12 }
 0x148   :  { %v1833_v11 = vpop.eup %1832  ;;  %v486_v16 = vmul.f32 %v2623_v39, %v447_v26  ;;  %v402_v30 = vadd.f32 1e-05, %v370_v14  ;;  %v585_v44 = vld [vmem:[#allocation2] sm:$0xff] }
 0x149   :  { %v1835_v45 = vpop.eup %1834  ;;  %570 = vst.msk [vmem:[#allocation2 + $0x8] sm:$0xff] %vm57_vm0, %v554_v28  ;;  %v540_v32 = vadd.f32 %v2630_v51, %v501_v22  ;;  %v448_v7 = vmul.f32 %v1833_v11, %v2439_v13  ;;  %v387_v34 = vadd.f32 1e-05, %v355_v52  ;;  %v280_v35 = vpop.xlane.xlu1 %279  ;;  %1653 = vmatmul.mubr.msk.bf16.vlgmr.msra.gmra.mrb[0].mxu0 %vm57_vm0, %v585_v44 }
 0x14a   :  { %v325_v56 = vpop.xlane.xlu0 %324  ;;  %v463_v37 = vmul.f32 %v1835_v45, %v2448_v1  ;;  %1844 = vrsqrt.f32 %v402_v30  ;;  %v356_v27 = vmul.f32 0.015625, %v280_v35  ;;  %752 = vmatprep.mubr.bf16.mxu0 %v2134_v23  ;;  %v525_v60 = vadd.f32 %v2630_v51, %v486_v16 }
 0x14b   :  { %v562_v20 = vpack.c.bf16 %v540_v32, %v539_v9  ;;  %v487_v2 = vmul.f32 %v2623_v39, %v448_v7  ;;  %1846 = vrsqrt.f32 %v387_v34  ;;  %v371_v46 = vmul.f32 0.015625, %v325_v56 }
 0x14c   :  { %v1837_v47 = vpop.eup %1836  ;;  %v388_v13 = vadd.f32 1e-05, %v356_v27  ;;  %v593_v61 = vld [vmem:[#allocation2 + $0x40] sm:$0xff]  ;;  %v502_v1 = vmul.f32 %v2623_v39, %v463_v37 }
 0x14d   :  { %v1839_v50 = vpop.eup %1838  ;;  %578 = vst.msk [vmem:[#allocation2 + $0x48] sm:$0xff] %vm57_vm0, %v562_v20  ;;  %v526_v48 = vadd.f32 %v2630_v51, %v487_v2  ;;  %v464_v10 = vmul.f32 %v1837_v47, %v2451_v17  ;;  %v403_v49 = vadd.f32 1e-05, %v371_v46  ;;  %v328_v58 = vpop.xlane.xlu1 %327  ;;  %1661 = vmatmul.mubr.msk.bf16.vlgmr.msra.gmra.mrb[0].mxu1 %vm57_vm0, %v593_v61 }
 0x14e   :  { %v283_v24 = vpop.xlane.xlu0 %282  ;;  %v449_v62 = vmul.f32 %v1839_v50, %v2460_v43  ;;  %1848 = vrsqrt.f32 %v388_v13  ;;  %v372_v63 = vmul.f32 0.015625, %v328_v58  ;;  %832 = vmatprep.mubr.bf16.mxu1 %v2134_v23  ;;  %v541_v14 = vadd.f32 %v2630_v51, %v502_v1 }
 0x14f   :  { %v555_v5 = vpack.c.bf16 %v526_v48, %v525_v60  ;;  %v503_v41 = vmul.f32 %v2623_v39, %v464_v10  ;;  %1850 = vrsqrt.f32 %v403_v49  ;;  %v357_v55 = vmul.f32 0.015625, %v283_v24 }
 0x150   :  { %v1841_v4 = vpop.eup %1840  ;;  %v488_v6 = vmul.f32 %v2623_v39, %v449_v62  ;;  %v404_v17 = vadd.f32 1e-05, %v372_v63  ;;  %v586_v12 = vld [vmem:[#allocation2 + $0x8] sm:$0xff] }
 0x151   :  { %v1843_v26 = vpop.eup %1842  ;;  %571 = vst.msk [vmem:[#allocation2 + $0x10] sm:$0xff] %vm57_vm0, %v555_v5  ;;  %v542_v43 = vadd.f32 %v2630_v51, %v503_v41  ;;  %v450_v28 = vmul.f32 %v1841_v4, %v2463_v21  ;;  %v389_v22 = vadd.f32 1e-05, %v357_v55  ;;  %v286_v52 = vpop.xlane.xlu1 %285  ;;  %1654 = vmatmul.mubr.msk.bf16.gmra.mrb[4].mxu0 %vm57_vm0, %v586_v12 }
 0x152   :  { %v331_v11 = vpop.xlane.xlu0 %330  ;;  %v465_v16 = vmul.f32 %v1843_v26, %v2472_v59  ;;  %1852 = vrsqrt.f32 %v404_v17  ;;  %v358_v30 = vmul.f32 0.015625, %v286_v52  ;;  %762 = vmatprep.mubr.bf16.mxu0 %v2134_v23  ;;  %v527_v7 = vadd.f32 %v2630_v51, %v488_v6 }
 0x153   :  { %v563_v44 = vpack.c.bf16 %v542_v43, %v541_v14  ;;  %v489_v45 = vmul.f32 %v2623_v39, %v450_v28  ;;  %1854 = vrsqrt.f32 %v389_v22  ;;  %v373_v9 = vmul.f32 0.015625, %v331_v11 }
 0x154   :  { %v1845_v32 = vpop.eup %1844  ;;  %v390_v21 = vadd.f32 1e-05, %v358_v30  ;;  %v594_v34 = vld [vmem:[#allocation2 + $0x48] sm:$0xff]  ;;  %v504_v59 = vmul.f32 %v2623_v39, %v465_v16 }
 0x155   :  { %v1847_v35 = vpop.eup %1846  ;;  %579 = vst.msk [vmem:[#allocation2 + $0x50] sm:$0xff] %vm57_vm0, %v563_v44  ;;  %v528_v56 = vadd.f32 %v2630_v51, %v489_v45  ;;  %v466_v37 = vmul.f32 %v1845_v32, %v2475_v25  ;;  %v405_v27 = vadd.f32 1e-05, %v373_v9  ;;  %v334_v20 = vpop.xlane.xlu1 %333  ;;  %1662 = vmatmul.mubr.msk.bf16.gmra.mrb[4].mxu1 %vm57_vm0, %v594_v34 }
 0x156   :  { %v289_v2 = vpop.xlane.xlu0 %288  ;;  %v451_v46 = vmul.f32 %v1847_v35, %v2484_v15  ;;  %1856 = vrsqrt.f32 %v390_v21  ;;  %v374_v47 = vmul.f32 0.015625, %v334_v20  ;;  %842 = vmatprep.mubr.bf16.mxu1 %v2134_v23  ;;  %v543_v49 = vadd.f32 %v2630_v51, %v504_v59 }
 0x157   :  { %v556_v60 = vpack.c.bf16 %v528_v56, %v527_v7  ;;  %v505_v13 = vmul.f32 %v2623_v39, %v466_v37  ;;  %1858 = vrsqrt.f32 %v405_v27  ;;  %v359_v61 = vmul.f32 0.015625, %v289_v2 }
 0x158   :  { %v1849_v50 = vpop.eup %1848  ;;  %v490_v48 = vmul.f32 %v2623_v39, %v451_v46  ;;  %v406_v25 = vadd.f32 1e-05, %v374_v47  ;;  %v587_v1 = vld [vmem:[#allocation2 + $0x10] sm:$0xff] }
 0x159   :  { %v1851_v10 = vpop.eup %1850  ;;  %572 = vst.msk [vmem:[#allocation2 + $0x18] sm:$0xff] %vm57_vm0, %v556_v60  ;;  %v544_v15 = vadd.f32 %v2630_v51, %v505_v13  ;;  %v452_v58 = vmul.f32 %v1849_v50, %v2487_v29  ;;  %v391_v24 = vadd.f32 1e-05, %v359_v61  ;;  %v292_v62 = vpop.xlane.xlu1 %291  ;;  %1655 = vmatmul.mubr.msk.bf16.gmra.mrb[8].mxu0 %vm57_vm0, %v587_v1 }
 0x15a   :  { %v337_v63 = vpop.xlane.xlu0 %336  ;;  %v467_v5 = vmul.f32 %v1851_v10, %v2496_v31  ;;  %1860 = vrsqrt.f32 %v406_v25  ;;  %v360_v41 = vmul.f32 0.015625, %v292_v62  ;;  %772 = vmatprep.mubr.bf16.mxu0 %v2134_v23  ;;  %v529_v12 = vadd.f32 %v2630_v51, %v490_v48 }
 0x15b   :  { %v564_v55 = vpack.c.bf16 %v544_v15, %v543_v49  ;;  %v491_v4 = vmul.f32 %v2623_v39, %v452_v58  ;;  %1862 = vrsqrt.f32 %v391_v24  ;;  %v375_v6 = vmul.f32 0.015625, %v337_v63 }
 0x15c   :  { %v1853_v17 = vpop.eup %1852  ;;  %v392_v29 = vadd.f32 1e-05, %v360_v41  ;;  %v595_v26 = vld [vmem:[#allocation2 + $0x50] sm:$0xff]  ;;  %v506_v31 = vmul.f32 %v2623_v39, %v467_v5 }
 0x15d   :  { %v1855_v14 = vpop.eup %1854  ;;  %580 = vst.msk [vmem:[#allocation2 + $0x58] sm:$0xff] %vm57_vm0, %v564_v55  ;;  %v530_v43 = vadd.f32 %v2630_v51, %v491_v4  ;;  %v468_v28 = vmul.f32 %v1853_v17, %v2499_v33  ;;  %v407_v22 = vadd.f32 1e-05, %v375_v6  ;;  %v340_v52 = vpop.xlane.xlu1 %339  ;;  %1663 = vmatmul.mubr.msk.bf16.gmra.mrb[8].mxu1 %vm57_vm0, %v595_v26 }
 0x15e   :  { %v295_v11 = vpop.xlane.xlu0 %294  ;;  %v453_v16 = vmul.f32 %v1855_v14, %v2517_v54  ;;  %1864 = vrsqrt.f32 %v392_v29  ;;  %v376_v30 = vmul.f32 0.015625, %v340_v52  ;;  %852 = vmatprep.mubr.bf16.mxu1 %v2134_v23  ;;  %v545_v35 = vadd.f32 %v2630_v51, %v506_v31 }
 0x15f   :  { %v557_v44 = vpack.c.bf16 %v530_v43, %v529_v12  ;;  %v507_v45 = vmul.f32 %v2623_v39, %v468_v28  ;;  %1866 = vrsqrt.f32 %v407_v22  ;;  %v361_v9 = vmul.f32 0.015625, %v295_v11 }
 0x160   :  { %v1857_v32 = vpop.eup %1856  ;;  %v492_v7 = vmul.f32 %v2623_v39, %v453_v16  ;;  %v408_v33 = vadd.f32 1e-05, %v376_v30  ;;  %v588_v21 = vld [vmem:[#allocation2 + $0x18] sm:$0xff] }
 0x161   :  { %v1859_v34 = vpop.eup %1858  ;;  %573 = vst.msk [vmem:[#allocation2 + $0x20] sm:$0xff] %vm57_vm0, %v557_v44  ;;  %v546_v54 = vadd.f32 %v2630_v51, %v507_v45  ;;  %v454_v56 = vmul.f32 %v1857_v32, %v2520_v8  ;;  %v393_v59 = vadd.f32 1e-05, %v361_v9  ;;  %v298_v37 = vpop.xlane.xlu1 %297  ;;  %1656 = vmatmul.mubr.msk.bf16.gmra.mrb[12].mxu0 %vm57_vm0, %v588_v21 }
 0x162   :  { %v343_v27 = vpop.xlane.xlu0 %342  ;;  %v469_v20 = vmul.f32 %v1859_v34, %v2538_v18  ;;  %1868 = vrsqrt.f32 %v408_v33  ;;  %v362_v2 = vmul.f32 0.015625, %v298_v37  ;;  %782 = vmatprep.mubr.bf16.mxu0 %v2134_v23  ;;  %v531_v61 = vadd.f32 %v2630_v51, %v492_v7 }
 0x163   :  { %v565_v46 = vpack.c.bf16 %v546_v54, %v545_v35  ;;  %v493_v47 = vmul.f32 %v2623_v39, %v454_v56  ;;  %1870 = vrsqrt.f32 %v393_v59  ;;  %v377_v60 = vmul.f32 0.015625, %v343_v27 }
 0x164   :  { %v1861_v13 = vpop.eup %1860  ;;  %v394_v8 = vadd.f32 1e-05, %v362_v2  ;;  %v596_v50 = vld [vmem:[#allocation2 + $0x58] sm:$0xff]  ;;  %v508_v18 = vmul.f32 %v2623_v39, %v469_v20 }
 0x165   :  { %v1863_v48 = vpop.eup %1862  ;;  %581 = vst.msk [vmem:[#allocation2 + $0x60] sm:$0xff] %vm57_vm0, %v565_v46  ;;  %v532_v25 = vadd.f32 %v2630_v51, %v493_v47  ;;  %v470_v1 = vmul.f32 %v1861_v13, %v2541_v19  ;;  %v409_v10 = vadd.f32 1e-05, %v377_v60  ;;  %v346_v49 = vpop.xlane.xlu1 %345  ;;  %1664 = vmatmul.mubr.msk.bf16.gmra.mrb[12].mxu1 %vm57_vm0, %v596_v50  ;;  %v611_v47 = vlaneseq  ;;  %v609_v13 = vld [vmem:[%s3318_s4] sm:$0x3] }
 0x166   :  { %v455_v15 = vmul.f32 %v1863_v48, %v2559_v42  ;;  %1872 = vrsqrt.f32 %v394_v8  ;;  %v378_v58 = vmul.f32 0.015625, %v346_v49  ;;  %862 = vmatprep.mubr.bf16.mxu1 %v2134_v23  ;;  %v547_v19 = vadd.f32 %v2630_v51, %v508_v18 }
 0x167   :  { %v558_v24 = vpack.c.bf16 %v532_v25, %v531_v61  ;;  %v509_v62 = vmul.f32 %v2623_v39, %v470_v1  ;;  %1874 = vrsqrt.f32 %v409_v10 }
 0x168   :  { %v1865_v63 = vpop.eup %1864  ;;  %v410_v5 = vadd.f32 1e-05, %v378_v58  ;;  %v589_v41 = vld [vmem:[#allocation2 + $0x20] sm:$0xff]  ;;  %v494_v42 = vmul.f32 %v2623_v39, %v455_v15 }
 0x169   :  { %v1867_v55 = vpop.eup %1866  ;;  %574 = vst.msk [vmem:[#allocation2 + $0x28] sm:$0xff] %vm57_vm0, %v558_v24  ;;  %v548_v4 = vadd.f32 %v2630_v51, %v509_v62  ;;  %v456_v6 = vmul.f32 %v1865_v63, %v2562_v36  ;;  %1657 = vmatmul.mubr.msk.bf16.gmra.mrb[16].mxu0 %vm57_vm0, %v589_v41 }
 0x16a   :  { %v471_v17 = vmul.f32 %v1867_v55, %v2580_v3  ;;  %1876 = vrsqrt.f32 %v410_v5  ;;  %792 = vmatprep.mubr.bf16.mxu0 %v2134_v23  ;;  %v533_v31 = vadd.f32 %v2630_v51, %v494_v42 }
 0x16b   :  { %v566_v12 = vpack.c.bf16 %v548_v4, %v547_v19  ;;  %v495_v29 = vmul.f32 %v2623_v39, %v456_v6 }
 0x16c   :  { %v1869_v26 = vpop.eup %1868  ;;  %v597_v14 = vld [vmem:[#allocation2 + $0x60] sm:$0xff]  ;;  %v510_v36 = vmul.f32 %v2623_v39, %v471_v17 }
 0x16d   :  { %v1871_v43 = vpop.eup %1870  ;;  %582 = vst.msk [vmem:[#allocation2 + $0x68] sm:$0xff] %vm57_vm0, %v566_v12  ;;  %v534_v28 = vadd.f32 %v2630_v51, %v495_v29  ;;  %v472_v22 = vmul.f32 %v1869_v26, %v2583_v40  ;;  %1665 = vmatmul.mubr.msk.bf16.gmra.mrb[16].mxu1 %vm57_vm0, %v597_v14 }
 0x16e   :  { %v457_v3 = vmul.f32 %v1871_v43, %v2594_v53  ;;  %872 = vmatprep.mubr.bf16.mxu1 %v2134_v23  ;;  %v549_v45 = vadd.f32 %v2630_v51, %v510_v36 }
 0x16f   :  { %v559_v52 = vpack.c.bf16 %v534_v28, %v533_v31  ;;  %v511_v11 = vmul.f32 %v2623_v39, %v472_v22 }
 0x170   :  { %v1873_v16 = vpop.eup %1872  ;;  %v590_v30 = vld [vmem:[#allocation2 + $0x28] sm:$0xff]  ;;  %v496_v40 = vmul.f32 %v2623_v39, %v457_v3 }
 0x171   :  { %v1875_v44 = vpop.eup %1874  ;;  %575 = vst.msk [vmem:[#allocation2 + $0x30] sm:$0xff] %vm57_vm0, %v559_v52  ;;  %v550_v9 = vadd.f32 %v2630_v51, %v511_v11  ;;  %v458_v32 = vmul.f32 %v1873_v16, %v2597_v0  ;;  %1658 = vmatmul.mubr.msk.bf16.gmra.mrb[20].mxu0 %vm57_vm0, %v590_v30 }
 0x172   :  { %v473_v53 = vmul.f32 %v1875_v44, %v2606_v38  ;;  %802 = vmatprep.mubr.bf16.mxu0 %v2134_v23  ;;  %v535_v35 = vadd.f32 %v2630_v51, %v496_v40 }
 0x173   :  { %v567_v7 = vpack.c.bf16 %v550_v9, %v549_v45  ;;  %v497_v33 = vmul.f32 %v2623_v39, %v458_v32 }
 0x174   :  { %v1877_v21 = vpop.eup %1876  ;;  %v598_v34 = vld [vmem:[#allocation2 + $0x68] sm:$0xff]  ;;  %v512_v56 = vmul.f32 %v2623_v39, %v473_v53 }
 0x175   :  { %583 = vst.msk [vmem:[#allocation2 + $0x70] sm:$0xff] %vm57_vm0, %v567_v7  ;;  %v536_v54 = vadd.f32 %v2630_v51, %v497_v33  ;;  %v474_v0 = vmul.f32 %v1877_v21, %v2609_v57  ;;  %1666 = vmatmul.mubr.msk.bf16.gmra.mrb[20].mxu1 %vm57_vm0, %v598_v34 }
 0x176   :  { %882 = vmatprep.mubr.bf16.mxu1 %v2134_v23  ;;  %v551_v27 = vadd.f32 %v2630_v51, %v512_v56 }
 0x177   :  { %v560_v38 = vpack.c.bf16 %v536_v54, %v535_v35  ;;  %v513_v59 = vmul.f32 %v2623_v39, %v474_v0 }
 0x178   :  { %v591_v37 = vld [vmem:[#allocation2 + $0x30] sm:$0xff] }
 0x179   :  { %576 = vst.msk [vmem:[#allocation2 + $0x38] sm:$0xff] %vm57_vm0, %v560_v38  ;;  %v552_v20 = vadd.f32 %v2630_v51, %v513_v59  ;;  %1659 = vmatmul.mubr.msk.bf16.gmra.mrb[24].mxu0 %vm57_vm0, %v591_v37  ;;  %v612_v51 = vshrl.u32 %v611_v47, 7 }
 0x17a   :  { %812 = vmatprep.mubr.bf16.mxu0 %v2134_v23 }
 0x17b   :  { %v568_v2 = vpack.c.bf16 %v552_v20, %v551_v27  ;;  %v613_v60 = vsub.s32 0, %v612_v51  ;;  %v617_v61 = vsub.s32 1, %v612_v51 }
 0x17c   :  { %v599_v57 = vld [vmem:[#allocation2 + $0x70] sm:$0xff] }
 0x17d   :  { %584 = vst.msk [vmem:[#allocation2 + $0x78] sm:$0xff] %vm57_vm0, %v568_v2  ;;  %1667 = vmatmul.mubr.msk.bf16.gmra.mrb[24].mxu1 %vm57_vm0, %v599_v57  ;;  %v2774_v8 = vrot.slane %v609_v13, %v613_v60  ;;  %v2776_v50 = vrot.slane %v609_v13, %v617_v61 }
 0x17e   :  { %892 = vmatprep.mubr.bf16.mxu1 %v2134_v23 }
 0x180   :  { %v592_v39 = vld [vmem:[#allocation2 + $0x38] sm:$0xff] }
 0x181   :  { %1660 = vmatmul.mubr.msk.bf16.gmra.mrb[28].mxu0 %vm57_vm0, %v592_v39 }
 0x184   :  { %v600_v46 = vld [vmem:[#allocation2 + $0x78] sm:$0xff] }
 0x185   :  { %1668 = vmatmul.mubr.msk.bf16.gmra.mrb[28].mxu1 %vm57_vm0, %v600_v46 }
 0x21c   :  { %v744_v48 = vpop.f32.mrb[0].mxu0 }
 0x21d   :  { %v2779_v23 = vadd.f32 %v744_v48, %v2774_v8  ;;  %v746_v25 = vpop.f32.mrb[1].mxu0 }
 0x21e   :  { %v2782_v18 = vadd.f32 %v746_v25, %v2776_v50  ;;  %v748_v1 = vpop.f32.mrb[2].mxu0 }
 0x21f   :  { %v1669_v10 = vmul.f32 -1.702, %v2779_v23  ;;  %v2786_v49 = vadd.f32 %v748_v1, %v2774_v8  ;;  %v750_v15 = vpop.f32.mrb[3].mxu0 }
 0x220   :  { %v1670_v58 = vmul.f32 -1.702, %v2782_v18  ;;  %v2790_v24 = vadd.f32 %v750_v15, %v2776_v50  ;;  %v824_v62 = vpop.f32.mrb[0].mxu1 }
 0x221   :  { %v1031_v63 = vmul.f32 1.442695, %v1669_v10  ;;  %v1671_v5 = vmul.f32 -1.702, %v2786_v49  ;;  %v2794_v41 = vadd.f32 %v824_v62, %v2774_v8  ;;  %v826_v55 = vpop.f32.mrb[1].mxu1 }
 0x222   :  { %v1033_v19 = vmul.f32 1.442695, %v1670_v58  ;;  %v1672_v4 = vmul.f32 -1.702, %v2790_v24  ;;  %v2798_v42 = vadd.f32 %v826_v55, %v2776_v50  ;;  %v828_v6 = vpop.f32.mrb[2].mxu1 }
 0x223   :  { %1878 = vpow2.f32 %v1031_v63  ;;  %v1035_v17 = vmul.f32 1.442695, %v1671_v5  ;;  %v1701_v12 = vmul.f32 -1.702, %v2794_v41  ;;  %v2802_v29 = vadd.f32 %v828_v6, %v2774_v8  ;;  %v830_v26 = vpop.f32.mrb[3].mxu1 }
 0x224   :  { %1880 = vpow2.f32 %v1033_v19  ;;  %v1037_v14 = vmul.f32 1.442695, %v1672_v4  ;;  %v1702_v43 = vmul.f32 -1.702, %v2798_v42  ;;  %v2806_v31 = vadd.f32 %v830_v26, %v2776_v50  ;;  %v754_v28 = vpop.f32.mrb[4].mxu0 }
 0x225   :  { %1882 = vpow2.f32 %v1035_v17  ;;  %v1095_v36 = vmul.f32 1.442695, %v1701_v12  ;;  %v1703_v22 = vmul.f32 -1.702, %v2802_v29  ;;  %v2810_v3 = vadd.f32 %v754_v28, %v2774_v8  ;;  %v756_v52 = vpop.f32.mrb[5].mxu0 }
 0x226   :  { %1884 = vpow2.f32 %v1037_v14  ;;  %v1097_v11 = vmul.f32 1.442695, %v1702_v43  ;;  %v1704_v16 = vmul.f32 -1.702, %v2806_v31  ;;  %v2814_v30 = vadd.f32 %v756_v52, %v2776_v50  ;;  %v758_v44 = vpop.f32.mrb[6].mxu0 }
 0x227   :  { %1886 = vpow2.f32 %v1095_v36  ;;  %v1099_v45 = vmul.f32 1.442695, %v1703_v22  ;;  %v1673_v9 = vmul.f32 -1.702, %v2810_v3  ;;  %v2818_v40 = vadd.f32 %v758_v44, %v2774_v8  ;;  %v760_v32 = vpop.f32.mrb[7].mxu0 }
 0x228   :  { %1888 = vpow2.f32 %v1097_v11  ;;  %v1101_v53 = vmul.f32 1.442695, %v1704_v16  ;;  %v1674_v7 = vmul.f32 -1.702, %v2814_v30  ;;  %v2822_v33 = vadd.f32 %v760_v32, %v2776_v50  ;;  %v834_v21 = vpop.f32.mrb[4].mxu1 }
 0x229   :  { %1890 = vpow2.f32 %v1099_v45  ;;  %v1039_v34 = vmul.f32 1.442695, %v1673_v9  ;;  %v1675_v35 = vmul.f32 -1.702, %v2818_v40  ;;  %v2826_v54 = vadd.f32 %v834_v21, %v2774_v8  ;;  %v836_v56 = vpop.f32.mrb[5].mxu1 }
 0x22a   :  { %1892 = vpow2.f32 %v1101_v53  ;;  %v1041_v0 = vmul.f32 1.442695, %v1674_v7  ;;  %v1676_v38 = vmul.f32 -1.702, %v2822_v33  ;;  %v838_v59 = vpop.f32.mrb[6].mxu1  ;;  %v2831_v47 = vadd.f32 %v836_v56, %v2776_v50 }
 0x22b   :  { %1894 = vpow2.f32 %v1039_v34  ;;  %v1043_v37 = vmul.f32 1.442695, %v1675_v35  ;;  %v1705_v27 = vmul.f32 -1.702, %v2826_v54  ;;  %v840_v20 = vpop.f32.mrb[7].mxu1  ;;  %v2834_v61 = vadd.f32 %v838_v59, %v2774_v8 }
 0x22c   :  { %1896 = vpow2.f32 %v1041_v0  ;;  %v1045_v2 = vmul.f32 1.442695, %v1676_v38  ;;  %v764_v57 = vpop.f32.mrb[8].mxu0  ;;  %v2837_v10 = vadd.f32 %v840_v20, %v2776_v50  ;;  %v1706_v4 = vmul.f32 -1.702, %v2831_v47 }
 0x22d   :  { %v1879_v39 = vpop.eup %1878  ;;  %1898 = vpow2.f32 %v1043_v37  ;;  %v1103_v46 = vmul.f32 1.442695, %v1705_v27  ;;  %v766_v51 = vpop.f32.mrb[9].mxu0  ;;  %v2840_v63 = vadd.f32 %v764_v57, %v2774_v8  ;;  %v1707_v14 = vmul.f32 -1.702, %v2834_v61 }
 0x22e   :  { %v1881_v60 = vpop.eup %1880  ;;  %v1159_v13 = vadd.f32 1.0, %v1879_v39  ;;  %1900 = vpow2.f32 %v1045_v2  ;;  %v768_v48 = vpop.f32.mrb[10].mxu0  ;;  %v2844_v6 = vadd.f32 %v766_v51, %v2776_v50  ;;  %v1708_v52 = vmul.f32 -1.702, %v2837_v10 }
 0x22f   :  { %v1883_v25 = vpop.eup %1882  ;;  %v1160_v1 = vadd.f32 1.0, %v1881_v60  ;;  %1902 = vpow2.f32 %v1103_v46  ;;  %v770_v15 = vpop.f32.mrb[11].mxu0  ;;  %v2848_v43 = vadd.f32 %v768_v48, %v2774_v8  ;;  %v1677_v45 = vmul.f32 -1.702, %v2840_v63 }
 0x230   :  { %v1885_v58 = vpop.eup %1884  ;;  %1904 = vrcp.f32 %v1159_v13  ;;  %v1161_v62 = vadd.f32 1.0, %v1883_v25  ;;  %v844_v5 = vpop.f32.mrb[8].mxu1  ;;  %v2853_v9 = vadd.f32 %v770_v15, %v2776_v50  ;;  %v1105_v21 = vmul.f32 1.442695, %v1706_v4 }
 0x231   :  { %v1887_v55 = vpop.eup %1886  ;;  %1906 = vrcp.f32 %v1160_v1  ;;  %v1162_v19 = vadd.f32 1.0, %v1885_v58  ;;  %v846_v17 = vpop.f32.mrb[9].mxu1  ;;  %v1678_v34 = vmul.f32 -1.702, %v2844_v6  ;;  %v1107_v38 = vmul.f32 1.442695, %v1707_v14 }
 0x232   :  { %v1889_v12 = vpop.eup %1888  ;;  %1908 = vrcp.f32 %v1161_v62  ;;  %v1191_v26 = vadd.f32 1.0, %v1887_v55  ;;  %v848_v28 = vpop.f32.mrb[10].mxu1  ;;  %v1679_v59 = vmul.f32 -1.702, %v2848_v43  ;;  %v1109_v2 = vmul.f32 1.442695, %v1708_v52 }
 0x233   :  { %v1891_v36 = vpop.eup %1890  ;;  %1910 = vrcp.f32 %v1162_v19  ;;  %v1192_v22 = vadd.f32 1.0, %v1889_v12  ;;  %v850_v11 = vpop.f32.mrb[11].mxu1  ;;  %v2860_v57 = vadd.f32 %v844_v5, %v2774_v8  ;;  %v1047_v60 = vmul.f32 1.442695, %v1677_v45 }
 0x234   :  { %v1893_v16 = vpop.eup %1892  ;;  %1912 = vrcp.f32 %v1191_v26  ;;  %v1193_v44 = vadd.f32 1.0, %v1891_v36  ;;  %v774_v32 = vpop.f32.mrb[12].mxu0  ;;  %v1680_v13 = vmul.f32 -1.702, %v2853_v9  ;;  %v1049_v15 = vmul.f32 1.442695, %v1678_v34 }
 0x235   :  { %v1895_v53 = vpop.eup %1894  ;;  %1914 = vrcp.f32 %v1192_v22  ;;  %v1194_v7 = vadd.f32 1.0, %v1893_v16  ;;  %v776_v35 = vpop.f32.mrb[13].mxu0  ;;  %v2868_v58 = vadd.f32 %v846_v17, %v2776_v50  ;;  %v1051_v19 = vmul.f32 1.442695, %v1679_v59 }
 0x236   :  { %v1897_v56 = vpop.eup %1896  ;;  %1916 = vrcp.f32 %v1193_v44  ;;  %v1163_v0 = vadd.f32 1.0, %v1895_v53  ;;  %v2857_v37 = vpop.f32.mrb[14].mxu0  ;;  %v2873_v4 = vadd.f32 %v848_v28, %v2774_v8  ;;  %v1709_v36 = vmul.f32 -1.702, %v2860_v57 }
 0x237   :  { %v1899_v27 = vpop.eup %1898  ;;  %1918 = vrcp.f32 %v1194_v7  ;;  %v1164_v20 = vadd.f32 1.0, %v1897_v56  ;;  %v2862_v39 = vpop.f32.mrb[15].mxu0  ;;  %v2880_v17 = vadd.f32 %v850_v11, %v2776_v50  ;;  %v1053_v44 = vmul.f32 1.442695, %v1680_v13 }
 0x238   :  { %v1901_v46 = vpop.eup %1900  ;;  %1920 = vrcp.f32 %v1163_v0  ;;  %v1165_v51 = vadd.f32 1.0, %v1899_v27  ;;  %v2865_v48 = vpop.f32.mrb[12].mxu1  ;;  %v2886_v28 = vadd.f32 %v774_v32, %v2774_v8  ;;  %v1710_v7 = vmul.f32 -1.702, %v2868_v58 }
 0x239   :  { %v1903_v25 = vpop.eup %1902  ;;  %1922 = vrcp.f32 %v1164_v20  ;;  %v1166_v1 = vadd.f32 1.0, %v1901_v46  ;;  %v2870_v62 = vpop.f32.mrb[13].mxu1  ;;  %v2893_v11 = vadd.f32 %v776_v35, %v2776_v50  ;;  %v1711_v32 = vmul.f32 -1.702, %v2873_v4 }
 0x23a   :  { %v1905_v5 = vpop.eup %1904  ;;  %1924 = vrcp.f32 %v1165_v51  ;;  %v1195_v55 = vadd.f32 1.0, %v1903_v25  ;;  %v2875_v12 = vpop.f32.mrb[14].mxu1  ;;  %v1712_v20 = vmul.f32 -1.702, %v2880_v17  ;;  %v1681_v51 = vmul.f32 -1.702, %v2886_v28 }
 0x23b   :  { %v1907_v26 = vpop.eup %1906  ;;  %v1351_v14 = vmul.f32 %v1905_v5, %v2779_v23  ;;  %1926 = vrcp.f32 %v1166_v1  ;;  %v2882_v22 = vpop.f32.mrb[15].mxu1  ;;  %v1113_v25 = vmul.f32 1.442695, %v1710_v7  ;;  %v1682_v1 = vmul.f32 -1.702, %v2893_v11 }
 0x23c   :  { %v1909_v52 = vpop.eup %1908  ;;  %v1352_v16 = vmul.f32 %v1907_v26, %v2782_v18  ;;  %1928 = vrcp.f32 %v1195_v55  ;;  %v2888_v45 = vpop.f32.mrb[16].mxu0  ;;  %v1115_v26 = vmul.f32 1.442695, %v1711_v32 }
 0x23d   :  { %v1911_v53 = vpop.eup %1910  ;;  %v1353_v23 = vmul.f32 %v1909_v52, %v2786_v49  ;;  %1930 = vpow2.f32 %v1105_v21  ;;  %v2895_v34 = vpop.f32.mrb[17].mxu0  ;;  %v1111_v21 = vmul.f32 1.442695, %v1709_v36 }
 0x23e   :  { %v1913_v56 = vpop.eup %1912  ;;  %v1765_v18 = vpack.c.bf16 %v1352_v16, %v1351_v14  ;;  %v1354_v0 = vmul.f32 %v1911_v53, %v2790_v24  ;;  %1932 = vpow2.f32 %v1107_v38  ;;  %v2899_v59 = vpop.f32.mrb[18].mxu0 }
 0x23f   :  { %v1915_v27 = vpop.eup %1914  ;;  %v1383_v49 = vmul.f32 %v1913_v56, %v2794_v41  ;;  %1934 = vpow2.f32 %v1109_v2  ;;  %v2903_v35 = vpop.f32.mrb[19].mxu0 }
 0x240   :  { %v1917_v46 = vpop.eup %1916  ;;  %1607 = vst [vmem:[%s3319_s5] sm:$0xff] %v1765_v18  ;;  %v1766_v24 = vpack.c.bf16 %v1354_v0, %v1353_v23  ;;  %v1384_v38 = vmul.f32 %v1915_v27, %v2798_v42  ;;  %1936 = vpow2.f32 %v1047_v60  ;;  %v2910_v13 = vpop.f32.mrb[16].mxu1 }
 0x241   :  { %v1919_v41 = vpop.eup %1918  ;;  %v1385_v2 = vmul.f32 %v1917_v46, %v2802_v29  ;;  %1938 = vpow2.f32 %v1049_v15  ;;  %v2914_v5 = vpop.f32.mrb[17].mxu1  ;;  %v1117_v15 = vmul.f32 1.442695, %v1712_v20 }
 0x242   :  { %v1921_v55 = vpop.eup %1920  ;;  %1608 = vst [vmem:[%s3319_s5 + $0x8] sm:$0xff] %v1766_v24  ;;  %v1781_v42 = vpack.c.bf16 %v1384_v38, %v1383_v49  ;;  %v1386_v60 = vmul.f32 %v1919_v41, %v2806_v31  ;;  %1940 = vpow2.f32 %v1051_v19  ;;  %v2920_v14 = vpop.f32.mrb[18].mxu1  ;;  %v1055_v31 = vmul.f32 1.442695, %v1681_v51 }
 0x243   :  { %v1923_v36 = vpop.eup %1922  ;;  %v1355_v29 = vmul.f32 %v1921_v55, %v2810_v3  ;;  %1942 = vpow2.f32 %v1053_v44  ;;  %v2923_v52 = vpop.f32.mrb[19].mxu1  ;;  %v1057_v3 = vmul.f32 1.442695, %v1682_v1  ;;  %v2934_v44 = vadd.f32 %v2857_v37, %v2774_v8 }
 0x244   :  { %v1925_v16 = vpop.eup %1924  ;;  %1623 = vst [vmem:[%s3319_s5 + $0x80] sm:$0xff] %v1781_v42  ;;  %v1782_v53 = vpack.c.bf16 %v1386_v60, %v1385_v2  ;;  %v1356_v23 = vmul.f32 %v1923_v36, %v2814_v30  ;;  %1944 = vpow2.f32 %v1111_v21  ;;  %v2929_v19 = vpop.f32.mrb[20].mxu0  ;;  %v2980_v36 = vadd.f32 %v2882_v22, %v2776_v50 }
 0x245   :  { %v1927_v7 = vpop.eup %1926  ;;  %v1357_v56 = vmul.f32 %v1925_v16, %v2818_v40  ;;  %1946 = vpow2.f32 %v1113_v25  ;;  %v2936_v18 = vpop.f32.mrb[21].mxu0  ;;  %v2946_v40 = vadd.f32 %v2862_v39, %v2776_v50  ;;  %v1683_v51 = vmul.f32 -1.702, %v2934_v44 }
 0x246   :  { %v2938_v0 = vpop.eup %1928  ;;  %1624 = vst [vmem:[%s3319_s5 + $0x88] sm:$0xff] %v1782_v53  ;;  %v1767_v30 = vpack.c.bf16 %v1356_v23, %v1355_v29  ;;  %v1358_v32 = vmul.f32 %v1927_v7, %v2822_v33  ;;  %1948 = vpow2.f32 %v1115_v26  ;;  %v2948_v27 = vpop.f32.mrb[22].mxu0  ;;  %v2957_v33 = vadd.f32 %v2865_v48, %v2774_v8 }
 0x247   :  { %v1931_v37 = vpop.eup %1930  ;;  %1950 = vpow2.f32 %v1117_v15  ;;  %v2950_v49 = vpop.f32.mrb[23].mxu0  ;;  %v1684_v1 = vmul.f32 -1.702, %v2946_v40  ;;  %v2970_v48 = vadd.f32 %v2870_v62, %v2776_v50  ;;  %v2976_v26 = vadd.f32 %v2875_v12, %v2774_v8 }
 0x248   :  { %v1933_v21 = vpop.eup %1932  ;;  %1609 = vst [vmem:[%s3319_s5 + $0x10] sm:$0xff] %v1767_v30  ;;  %v1768_v20 = vpack.c.bf16 %v1358_v32, %v1357_v56  ;;  %v1196_v46 = vadd.f32 1.0, %v1931_v37  ;;  %1952 = vpow2.f32 %v1055_v31  ;;  %v2959_v39 = vpop.f32.mrb[20].mxu1  ;;  %v1713_v62 = vmul.f32 -1.702, %v2957_v33 }
 0x249   :  { %v1935_v24 = vpop.eup %1934  ;;  %v1197_v38 = vadd.f32 1.0, %v1933_v21  ;;  %1954 = vpow2.f32 %v1057_v3  ;;  %v2962_v41 = vpop.f32.mrb[21].mxu1  ;;  %v1059_v7 = vmul.f32 1.442695, %v1683_v51  ;;  %v2989_v12 = vadd.f32 %v2888_v45, %v2774_v8 }
 0x24a   :  { %v1937_v2 = vpop.eup %1936  ;;  %1610 = vst [vmem:[%s3319_s5 + $0x18] sm:$0xff] %v1768_v20  ;;  %1956 = vrcp.f32 %v1196_v46  ;;  %v1198_v25 = vadd.f32 1.0, %v1935_v24  ;;  %v2972_v55 = vpop.f32.mrb[22].mxu1  ;;  %v1061_v30 = vmul.f32 1.442695, %v1684_v1 }
 0x24b   :  { %v1939_v42 = vpop.eup %1938  ;;  %1958 = vrcp.f32 %v1197_v38  ;;  %v1167_v60 = vadd.f32 1.0, %v1937_v2  ;;  %v2982_v29 = vpop.f32.mrb[23].mxu1  ;;  %v1714_v32 = vmul.f32 -1.702, %v2970_v48  ;;  %v1715_v46 = vmul.f32 -1.702, %v2976_v26 }
 0x24c   :  { %v1941_v15 = vpop.eup %1940  ;;  %1960 = vrcp.f32 %v1198_v25  ;;  %v1168_v16 = vadd.f32 1.0, %v1939_v42  ;;  %v2985_v53 = vpop.f32.mrb[24].mxu0  ;;  %v1716_v24 = vmul.f32 -1.702, %v2980_v36  ;;  %v1119_v2 = vmul.f32 1.442695, %v1713_v62 }
 0x24d   :  { %v1943_v23 = vpop.eup %1942  ;;  %1962 = vrcp.f32 %v1167_v60  ;;  %v1169_v31 = vadd.f32 1.0, %v1941_v15  ;;  %v2991_v56 = vpop.f32.mrb[25].mxu0  ;;  %v3002_v25 = vadd.f32 %v2895_v34, %v2776_v50  ;;  %v1387_v60 = vmul.f32 %v2938_v0, %v2826_v54 }
 0x24e   :  { %v1945_v22 = vpop.eup %1944  ;;  %1964 = vrcp.f32 %v1168_v16  ;;  %v1170_v3 = vadd.f32 1.0, %v1943_v23  ;;  %v2994_v37 = vpop.f32.mrb[26].mxu0  ;;  %v1685_v16 = vmul.f32 -1.702, %v2989_v12  ;;  %v1121_v62 = vmul.f32 1.442695, %v1714_v32 }
 0x24f   :  { %v1947_v21 = vpop.eup %1946  ;;  %1966 = vrcp.f32 %v1169_v31  ;;  %v1199_v20 = vadd.f32 1.0, %v1945_v22  ;;  %v2998_v38 = vpop.f32.mrb[27].mxu0  ;;  %v3013_v34 = vadd.f32 %v2899_v59, %v2774_v8  ;;  %v1123_v54 = vmul.f32 1.442695, %v1715_v46 }
 0x250   :  { %v1949_v45 = vpop.eup %1948  ;;  %1968 = vrcp.f32 %v1170_v3  ;;  %v1200_v51 = vadd.f32 1.0, %v1947_v21  ;;  %v3004_v1 = vpop.f32.mrb[24].mxu1  ;;  %v1125_v0 = vmul.f32 1.442695, %v1716_v24  ;;  %v3022_v32 = vadd.f32 %v2903_v35, %v2776_v50 }
 0x251   :  { %3320 = vst [vmem:[#allocation3_spill] sm:$0xff] %v3004_v1  ;;  %v1951_v42 = vpop.eup %1950  ;;  %1970 = vrcp.f32 %v1199_v20  ;;  %v1201_v15 = vadd.f32 1.0, %v1949_v45  ;;  %v3009_v23 = vpop.f32.mrb[25].mxu1  ;;  %v3029_v46 = vadd.f32 %v2910_v13, %v2774_v8  ;;  %v1687_v35 = vmul.f32 -1.702, %v3013_v34 }
 0x252   :  { %3321 = vst [vmem:[#allocation4_spill] sm:$0xff] %v3009_v23  ;;  %v1953_v31 = vpop.eup %1952  ;;  %1972 = vrcp.f32 %v1200_v51  ;;  %v1202_v22 = vadd.f32 1.0, %v1951_v42  ;;  %v3015_v3 = vpop.f32.mrb[26].mxu1  ;;  %v1686_v51 = vmul.f32 -1.702, %v3002_v25  ;;  %v3044_v13 = vadd.f32 %v2920_v14, %v2774_v8 }
 0x253   :  { %3322 = vst [vmem:[#allocation5_spill] sm:$0xff] %v3015_v3  ;;  %v1955_v21 = vpop.eup %1954  ;;  %1974 = vrcp.f32 %v1201_v15  ;;  %v1171_v1 = vadd.f32 1.0, %v1953_v31  ;;  %v3017_v20 = vpop.f32.mrb[27].mxu1  ;;  %v1063_v15 = vmul.f32 1.442695, %v1685_v16 }
 0x254   :  { %v1957_v45 = vpop.eup %1956  ;;  %1976 = vrcp.f32 %v1202_v22  ;;  %v1172_v23 = vadd.f32 1.0, %v1955_v21  ;;  %v3024_v59 = vpop.f32.mrb[28].mxu0  ;;  %v3037_v21 = vadd.f32 %v2914_v5, %v2776_v50  ;;  %v1688_v5 = vmul.f32 -1.702, %v3022_v32 }
 0x255   :  { %3323 = vst [vmem:[#allocation6_spill] sm:$0xff] %v3024_v59  ;;  %v1959_v42 = vpop.eup %1958  ;;  %v1388_v3 = vmul.f32 %v1957_v45, %v2831_v47  ;;  %1978 = vrcp.f32 %v1171_v1  ;;  %v3031_v24 = vpop.f32.mrb[29].mxu0 }
 0x256   :  { %3324 = vst [vmem:[#allocation7_spill] sm:$0xff] %v3031_v24  ;;  %v1961_v31 = vpop.eup %1960  ;;  %v1389_v22 = vmul.f32 %v1959_v42, %v2834_v61  ;;  %1980 = vrcp.f32 %v1172_v23  ;;  %v3039_v59 = vpop.f32.mrb[30].mxu0  ;;  %v1065_v42 = vmul.f32 1.442695, %v1686_v51  ;;  %v1718_v51 = vmul.f32 -1.702, %v3037_v21 }
 0x257   :  { %3325 = vst [vmem:[#allocation8_spill] sm:$0xff] %v3039_v59  ;;  %v1963_v47 = vpop.eup %1962  ;;  %v1783_v1 = vpack.c.bf16 %v1388_v3, %v1387_v60  ;;  %v1390_v16 = vmul.f32 %v1961_v31, %v2837_v10  ;;  %1982 = vpow2.f32 %v1059_v7  ;;  %v3046_v45 = vpop.f32.mrb[31].mxu0  ;;  %v1717_v7 = vmul.f32 -1.702, %v3029_v46 }
 0x258   :  { %v1965_v61 = vpop.eup %1964  ;;  %v1359_v23 = vmul.f32 %v1963_v47, %v2840_v63  ;;  %1984 = vpow2.f32 %v1061_v30  ;;  %v3050_v24 = vpop.f32.mrb[28].mxu1  ;;  %v1067_v3 = vmul.f32 1.442695, %v1687_v35 }
 0x259   :  { %v1967_v59 = vpop.eup %1966  ;;  %1625 = vst [vmem:[%s3319_s5 + $0x90] sm:$0xff] %v1783_v1  ;;  %v1784_v10 = vpack.c.bf16 %v1390_v16, %v1389_v22  ;;  %v1360_v14 = vmul.f32 %v1965_v61, %v2844_v6  ;;  %1986 = vpow2.f32 %v1119_v2  ;;  %v3057_v60 = vpop.f32.mrb[29].mxu1  ;;  %v1719_v22 = vmul.f32 -1.702, %v3044_v13 }
 0x25a   :  { %v1969_v63 = vpop.eup %1968  ;;  %v1361_v30 = vmul.f32 %v1967_v59, %v2848_v43  ;;  %1988 = vpow2.f32 %v1121_v62  ;;  %v3061_v31 = vpop.f32.mrb[30].mxu1  ;;  %v1069_v59 = vmul.f32 1.442695, %v1688_v5 }
 0x25b   :  { %v1971_v47 = vpop.eup %1970  ;;  %1626 = vst [vmem:[%s3319_s5 + $0x98] sm:$0xff] %v1784_v10  ;;  %v1769_v6 = vpack.c.bf16 %v1360_v14, %v1359_v23  ;;  %v1362_v2 = vmul.f32 %v1969_v63, %v2853_v9  ;;  %1990 = vpow2.f32 %v1123_v54  ;;  %v3068_v1 = vpop.f32.mrb[31].mxu1  ;;  %v1127_v9 = vmul.f32 1.442695, %v1717_v7 }
 0x25c   :  { %v1973_v43 = vpop.eup %1972  ;;  %v1391_v62 = vmul.f32 %v1971_v47, %v2860_v57  ;;  %1992 = vpow2.f32 %v1125_v0  ;;  %v1129_v10 = vmul.f32 1.442695, %v1718_v51  ;;  %v1131_v5 = vmul.f32 1.442695, %v1719_v22 }
 0x25d   :  { %v1975_v35 = vpop.eup %1974  ;;  %1611 = vst [vmem:[%s3319_s5 + $0x20] sm:$0xff] %v1769_v6  ;;  %v1770_v16 = vpack.c.bf16 %v1362_v2, %v1361_v30  ;;  %v1392_v61 = vmul.f32 %v1973_v43, %v2868_v58  ;;  %1994 = vpow2.f32 %v1063_v15  ;;  %v3087_v7 = vadd.f32 %v2923_v52, %v2776_v50 }
 0x25e   :  { %v1977_v54 = vpop.eup %1976  ;;  %v1393_v23 = vmul.f32 %v1975_v35, %v2873_v4  ;;  %1996 = vpow2.f32 %v1065_v42  ;;  %v3102_v2 = vadd.f32 %v2948_v27, %v2774_v8  ;;  %v3115_v27 = vadd.f32 %v2959_v39, %v2774_v8 }
 0x25f   :  { %v1979_v14 = vpop.eup %1978  ;;  %1612 = vst [vmem:[%s3319_s5 + $0x28] sm:$0xff] %v1770_v16  ;;  %v1785_v57 = vpack.c.bf16 %v1392_v61, %v1391_v62  ;;  %v1394_v0 = vmul.f32 %v1977_v54, %v2880_v17  ;;  %1998 = vpow2.f32 %v1067_v3  ;;  %v1720_v43 = vmul.f32 -1.702, %v3087_v7 }
 0x260   :  { %v1981_v63 = vpop.eup %1980  ;;  %v1363_v58 = vmul.f32 %v1979_v14, %v2886_v28  ;;  %2000 = vpow2.f32 %v1069_v59  ;;  %v3091_v28 = vadd.f32 %v2929_v19, %v2774_v8 }
 0x261   :  { %v1983_v15 = vpop.eup %1982  ;;  %1627 = vst [vmem:[%s3319_s5 + $0xa0] sm:$0xff] %v1785_v57  ;;  %v1786_v4 = vpack.c.bf16 %v1394_v0, %v1393_v23  ;;  %v1364_v42 = vmul.f32 %v1981_v63, %v2893_v11  ;;  %2002 = vpow2.f32 %v1127_v9  ;;  %v3098_v11 = vadd.f32 %v2936_v18, %v2776_v50 }
 0x262   :  { %v1985_v17 = vpop.eup %1984  ;;  %v1173_v30 = vadd.f32 1.0, %v1983_v15  ;;  %2004 = vpow2.f32 %v1129_v10  ;;  %v3110_v18 = vadd.f32 %v2950_v49, %v2776_v50  ;;  %v1689_v35 = vmul.f32 -1.702, %v3091_v28 }
 0x263   :  { %v1987_v3 = vpop.eup %1986  ;;  %1628 = vst [vmem:[%s3319_s5 + $0xa8] sm:$0xff] %v1786_v4  ;;  %v1771_v51 = vpack.c.bf16 %v1364_v42, %v1363_v58  ;;  %v1174_v47 = vadd.f32 1.0, %v1985_v17  ;;  %2006 = vpow2.f32 %v1131_v5  ;;  %v1690_v9 = vmul.f32 -1.702, %v3098_v11 }
 0x264   :  { %v1989_v52 = vpop.eup %1988  ;;  %2008 = vrcp.f32 %v1173_v30  ;;  %v1203_v6 = vadd.f32 1.0, %v1987_v3  ;;  %v1691_v49 = vmul.f32 -1.702, %v3102_v2  ;;  %v3121_v10 = vadd.f32 %v2962_v41, %v2776_v50 }
 0x265   :  { %v1991_v19 = vpop.eup %1990  ;;  %1613 = vst [vmem:[%s3319_s5 + $0x30] sm:$0xff] %v1771_v51  ;;  %2010 = vrcp.f32 %v1174_v47  ;;  %v1204_v22 = vadd.f32 1.0, %v1989_v52  ;;  %v1133_v0 = vmul.f32 1.442695, %v1720_v43  ;;  %v1692_v39 = vmul.f32 -1.702, %v3110_v18 }
 0x266   :  { %v1993_v62 = vpop.eup %1992  ;;  %2012 = vrcp.f32 %v1203_v6  ;;  %v1205_v59 = vadd.f32 1.0, %v1991_v19  ;;  %v1071_v58 = vmul.f32 1.442695, %v1689_v35  ;;  %v1721_v15 = vmul.f32 -1.702, %v3115_v27 }
 0x267   :  { %v1995_v16 = vpop.eup %1994  ;;  %2014 = vrcp.f32 %v1204_v22  ;;  %v1206_v61 = vadd.f32 1.0, %v1993_v62  ;;  %v1073_v17 = vmul.f32 1.442695, %v1690_v9  ;;  %v3127_v41 = vadd.f32 %v2972_v55, %v2774_v8 }
 0x268   :  { %v1997_v54 = vpop.eup %1996  ;;  %2016 = vrcp.f32 %v1205_v59  ;;  %v1175_v23 = vadd.f32 1.0, %v1995_v16  ;;  %v1075_v51 = vmul.f32 1.442695, %v1691_v49  ;;  %v1722_v47 = vmul.f32 -1.702, %v3121_v10 }
 0x269   :  { %v1999_v14 = vpop.eup %1998  ;;  %2018 = vrcp.f32 %v1206_v61  ;;  %v1176_v57 = vadd.f32 1.0, %v1997_v54  ;;  %v1077_v19 = vmul.f32 1.442695, %v1692_v39  ;;  %v3132_v22 = vadd.f32 %v2982_v29, %v2776_v50 }
 0x26a   :  { %v2001_v5 = vpop.eup %2000  ;;  %2020 = vrcp.f32 %v1175_v23  ;;  %v1177_v63 = vadd.f32 1.0, %v1999_v14  ;;  %v1135_v59 = vmul.f32 1.442695, %v1721_v15  ;;  %v3136_v55 = vadd.f32 %v2985_v53, %v2774_v8 }
 0x26b   :  { %v2003_v4 = vpop.eup %2002  ;;  %2022 = vrcp.f32 %v1176_v57  ;;  %v1178_v42 = vadd.f32 1.0, %v2001_v5  ;;  %v1723_v61 = vmul.f32 -1.702, %v3127_v41  ;;  %v3142_v9 = vadd.f32 %v2991_v56, %v2776_v50 }
 0x26c   :  { %v2005_v30 = vpop.eup %2004  ;;  %2024 = vrcp.f32 %v1177_v63  ;;  %v1207_v3 = vadd.f32 1.0, %v2003_v4  ;;  %v1137_v23 = vmul.f32 1.442695, %v1722_v47  ;;  %v3147_v49 = vadd.f32 %v2994_v37, %v2774_v8 }
 0x26d   :  { %v2007_v52 = vpop.eup %2006  ;;  %2026 = vrcp.f32 %v1178_v42  ;;  %v1208_v6 = vadd.f32 1.0, %v2005_v30  ;;  %v3153_v57 = vadd.f32 %v2998_v38, %v2776_v50  ;;  %v1693_v5 = vmul.f32 -1.702, %v3136_v55 }
 0x26e   :  { %v2009_v43 = vpop.eup %2008  ;;  %2028 = vrcp.f32 %v1207_v3  ;;  %v1209_v62 = vadd.f32 1.0, %v2007_v52  ;;  %v1139_v15 = vmul.f32 1.442695, %v1723_v61 }
 0x26f   :  { %v2011_v35 = vpop.eup %2010  ;;  %v1365_v16 = vmul.f32 %v2009_v43, %v2934_v44  ;;  %2030 = vrcp.f32 %v1208_v6  ;;  %v1724_v44 = vmul.f32 -1.702, %v3132_v22 }
 0x270   :  { %v2013_v29 = vpop.eup %2012  ;;  %v1366_v54 = vmul.f32 %v2011_v35, %v2946_v40  ;;  %2032 = vrcp.f32 %v1209_v62 }
 0x271   :  { %v2015_v53 = vpop.eup %2014  ;;  %v1395_v14 = vmul.f32 %v2013_v29, %v2957_v33  ;;  %2034 = vpow2.f32 %v1133_v0  ;;  %v1694_v33 = vmul.f32 -1.702, %v3142_v9 }
 0x272   :  { %v2017_v56 = vpop.eup %2016  ;;  %v1772_v39 = vpack.c.bf16 %v1366_v54, %v1365_v16  ;;  %v1396_v40 = vmul.f32 %v2015_v53, %v2970_v48  ;;  %2036 = vpow2.f32 %v1071_v58  ;;  %v1695_v48 = vmul.f32 -1.702, %v3147_v49 }
 0x273   :  { %v2019_v63 = vpop.eup %2018  ;;  %v1397_v37 = vmul.f32 %v2017_v56, %v2976_v26  ;;  %2038 = vpow2.f32 %v1073_v17  ;;  %v1141_v26 = vmul.f32 1.442695, %v1724_v44  ;;  %v1696_v17 = vmul.f32 -1.702, %v3153_v57 }
 0x274   :  { %v2021_v0 = vpop.eup %2020  ;;  %1614 = vst [vmem:[%s3319_s5 + $0x38] sm:$0xff] %v1772_v39  ;;  %v1787_v38 = vpack.c.bf16 %v1396_v40, %v1395_v14  ;;  %v1398_v4 = vmul.f32 %v2019_v63, %v2980_v36  ;;  %2040 = vpow2.f32 %v1075_v51  ;;  %v1079_v36 = vmul.f32 1.442695, %v1693_v5 }
 0x275   :  { %v2023_v58 = vpop.eup %2022  ;;  %v1367_v42 = vmul.f32 %v2021_v0, %v2989_v12  ;;  %2042 = vpow2.f32 %v1077_v19  ;;  %v1081_v6 = vmul.f32 1.442695, %v1694_v33  ;;  %v1083_v62 = vmul.f32 1.442695, %v1695_v48 }
 0x276   :  { %v2025_v30 = vpop.eup %2024  ;;  %1629 = vst [vmem:[%s3319_s5 + $0xb0] sm:$0xff] %v1787_v38  ;;  %v1788_v3 = vpack.c.bf16 %v1398_v4, %v1397_v37  ;;  %v1368_v47 = vmul.f32 %v2023_v58, %v3002_v25  ;;  %2044 = vpow2.f32 %v1135_v59  ;;  %v1085_v59 = vmul.f32 1.442695, %v1696_v17 }
 0x277   :  { %v2027_v51 = vpop.eup %2026  ;;  %v1369_v52 = vmul.f32 %v2025_v30, %v3013_v34  ;;  %2046 = vpow2.f32 %v1137_v23  ;;  %v3199_v5 = vadd.f32 %v3017_v20, %v2776_v50 }
 0x278   :  { %v2029_v12 = vpop.eup %2028  ;;  %1630 = vst [vmem:[%s3319_s5 + $0xb8] sm:$0xff] %v1788_v3  ;;  %v1773_v19 = vpack.c.bf16 %v1368_v47, %v1367_v42  ;;  %v1370_v43 = vmul.f32 %v2027_v51, %v3022_v32  ;;  %2048 = vpow2.f32 %v1139_v15  ;;  %v3326_v32 = vld [vmem:[#allocation3_spill] sm:$0xff]  ;;  %v3329_v15 = vld [vmem:[#allocation6_spill] sm:$0xff] }
 0x279   :  { %v2031_v35 = vpop.eup %2030  ;;  %v1399_v25 = vmul.f32 %v2029_v12, %v3029_v46  ;;  %2050 = vpow2.f32 %v1141_v26  ;;  %v3184_v54 = vadd.f32 %v3326_v32, %v2774_v8  ;;  %v3327_v46 = vld [vmem:[#allocation4_spill] sm:$0xff]  ;;  %v3206_v33 = vadd.f32 %v3329_v15, %v2774_v8  ;;  %v3330_v3 = vld [vmem:[#allocation7_spill] sm:$0xff] }
 0x27a   :  { %v3176_v16 = vpop.eup %2032  ;;  %1615 = vst [vmem:[%s3319_s5 + $0x40] sm:$0xff] %v1773_v19  ;;  %v1774_v34 = vpack.c.bf16 %v1370_v43, %v1369_v52  ;;  %v1400_v61 = vmul.f32 %v2031_v35, %v3037_v21  ;;  %2052 = vpow2.f32 %v1079_v36  ;;  %v3188_v23 = vadd.f32 %v3327_v46, %v2776_v50  ;;  %v3328_v21 = vld [vmem:[#allocation5_spill] sm:$0xff] }
 0x27b   :  { %v2035_v29 = vpop.eup %2034  ;;  %2054 = vpow2.f32 %v1081_v6  ;;  %v3195_v56 = vadd.f32 %v3328_v21, %v2774_v8  ;;  %v1725_v4 = vmul.f32 -1.702, %v3184_v54  ;;  %v1728_v30 = vmul.f32 -1.702, %v3199_v5 }
 0x27c   :  { %v2037_v53 = vpop.eup %2036  ;;  %1616 = vst [vmem:[%s3319_s5 + $0x48] sm:$0xff] %v1774_v34  ;;  %v1789_v14 = vpack.c.bf16 %v1400_v61, %v1399_v25  ;;  %v1210_v44 = vadd.f32 1.0, %v2035_v29  ;;  %2056 = vpow2.f32 %v1083_v62  ;;  %v1726_v48 = vmul.f32 -1.702, %v3188_v23 }
 0x27d   :  { %v2039_v39 = vpop.eup %2038  ;;  %v1179_v40 = vadd.f32 1.0, %v2037_v53  ;;  %2058 = vpow2.f32 %v1085_v59  ;;  %v1727_v42 = vmul.f32 -1.702, %v3195_v56  ;;  %v3214_v47 = vadd.f32 %v3330_v3, %v2776_v50  ;;  %v3331_v59 = vld [vmem:[#allocation8_spill] sm:$0xff] }
 0x27e   :  { %v2041_v63 = vpop.eup %2040  ;;  %1631 = vst [vmem:[%s3319_s5 + $0xc0] sm:$0xff] %v1789_v14  ;;  %2060 = vrcp.f32 %v1210_v44  ;;  %v1180_v37 = vadd.f32 1.0, %v2039_v39  ;;  %v1697_v52 = vmul.f32 -1.702, %v3206_v33  ;;  %v1143_v19 = vmul.f32 1.442695, %v1725_v4 }
 0x27f   :  { %v2043_v0 = vpop.eup %2042  ;;  %2062 = vrcp.f32 %v1179_v40  ;;  %v1181_v38 = vadd.f32 1.0, %v2041_v63  ;;  %v1145_v43 = vmul.f32 1.442695, %v1726_v48  ;;  %v1147_v25 = vmul.f32 1.442695, %v1727_v42 }
 0x280   :  { %v2045_v20 = vpop.eup %2044  ;;  %2064 = vrcp.f32 %v1180_v37  ;;  %v1182_v58 = vadd.f32 1.0, %v2043_v0  ;;  %v3219_v34 = vadd.f32 %v3331_v59, %v2774_v8  ;;  %v1149_v32 = vmul.f32 1.442695, %v1728_v30 }
 0x281   :  { %v2047_v26 = vpop.eup %2046  ;;  %2066 = vrcp.f32 %v1181_v38  ;;  %v1211_v17 = vadd.f32 1.0, %v2045_v20  ;;  %v1698_v46 = vmul.f32 -1.702, %v3214_v47  ;;  %v1087_v44 = vmul.f32 1.442695, %v1697_v52 }
 0x282   :  { %v2049_v36 = vpop.eup %2048  ;;  %2068 = vrcp.f32 %v1182_v58  ;;  %v1212_v51 = vadd.f32 1.0, %v2047_v26  ;;  %v3224_v21 = vadd.f32 %v3046_v45, %v2776_v50  ;;  %v1401_v40 = vmul.f32 %v3176_v16, %v3044_v13 }
 0x283   :  { %v2051_v6 = vpop.eup %2050  ;;  %2070 = vrcp.f32 %v1211_v17  ;;  %v1213_v12 = vadd.f32 1.0, %v2049_v36  ;;  %v3230_v37 = vadd.f32 %v3050_v24, %v2774_v8  ;;  %v1699_v38 = vmul.f32 -1.702, %v3219_v34 }
 0x284   :  { %v2053_v62 = vpop.eup %2052  ;;  %2072 = vrcp.f32 %v1212_v51  ;;  %v1214_v35 = vadd.f32 1.0, %v2051_v6  ;;  %v3235_v4 = vadd.f32 %v3057_v60, %v2776_v50  ;;  %v1089_v13 = vmul.f32 1.442695, %v1698_v46 }
 0x285   :  { %v2055_v61 = vpop.eup %2054  ;;  %2074 = vrcp.f32 %v1213_v12  ;;  %v1183_v29 = vadd.f32 1.0, %v2053_v62  ;;  %v3240_v16 = vadd.f32 %v3061_v31, %v2774_v8  ;;  %v1700_v58 = vmul.f32 -1.702, %v3224_v21 }
 0x286   :  { %v2057_v53 = vpop.eup %2056  ;;  %2076 = vrcp.f32 %v1214_v35  ;;  %v1184_v14 = vadd.f32 1.0, %v2055_v61  ;;  %v3246_v42 = vadd.f32 %v3068_v1, %v2776_v50  ;;  %v1729_v17 = vmul.f32 -1.702, %v3230_v37 }
 0x287   :  { %v2059_v39 = vpop.eup %2058  ;;  %2078 = vrcp.f32 %v1183_v29  ;;  %v1185_v63 = vadd.f32 1.0, %v2057_v53  ;;  %v1091_v31 = vmul.f32 1.442695, %v1699_v38 }
 0x288   :  { %v2061_v15 = vpop.eup %2060  ;;  %2080 = vrcp.f32 %v1184_v14  ;;  %v1186_v0 = vadd.f32 1.0, %v2059_v39  ;;  %v1732_v52 = vmul.f32 -1.702, %v3246_v42 }
 0x289   :  { %v2063_v45 = vpop.eup %2062  ;;  %v1402_v48 = vmul.f32 %v2061_v15, %v3087_v7  ;;  %2082 = vrcp.f32 %v1185_v63 }
 0x28a   :  { %v2065_v24 = vpop.eup %2064  ;;  %v1371_v20 = vmul.f32 %v2063_v45, %v3091_v28  ;;  %2084 = vrcp.f32 %v1186_v0  ;;  %v1730_v28 = vmul.f32 -1.702, %v3235_v4 }
 0x28b   :  { %v2067_v60 = vpop.eup %2066  ;;  %v1790_v26 = vpack.c.bf16 %v1402_v48, %v1401_v40  ;;  %v1372_v7 = vmul.f32 %v2065_v24, %v3098_v11  ;;  %2086 = vpow2.f32 %v1143_v19  ;;  %v1731_v11 = vmul.f32 -1.702, %v3240_v16 }
 0x28c   :  { %v2069_v30 = vpop.eup %2068  ;;  %v1373_v8 = vmul.f32 %v2067_v60, %v3102_v2  ;;  %2088 = vpow2.f32 %v1145_v43  ;;  %v1093_v2 = vmul.f32 1.442695, %v1700_v58  ;;  %v1153_v35 = vmul.f32 1.442695, %v1730_v28 }
 0x28d   :  { %v2071_v3 = vpop.eup %2070  ;;  %1632 = vst [vmem:[%s3319_s5 + $0xc8] sm:$0xff] %v1790_v26  ;;  %v1775_v50 = vpack.c.bf16 %v1372_v7, %v1371_v20  ;;  %v1374_v1 = vmul.f32 %v2069_v30, %v3110_v18  ;;  %2090 = vpow2.f32 %v1147_v25  ;;  %v1151_v18 = vmul.f32 1.442695, %v1729_v17 }
 0x28e   :  { %v2073_v36 = vpop.eup %2072  ;;  %v1403_v51 = vmul.f32 %v2071_v3, %v3115_v27  ;;  %2092 = vpow2.f32 %v1149_v32  ;;  %v1155_v61 = vmul.f32 1.442695, %v1731_v11  ;;  %v1157_v32 = vmul.f32 1.442695, %v1732_v52 }
 0x28f   :  { %v2075_v6 = vpop.eup %2074  ;;  %1617 = vst [vmem:[%s3319_s5 + $0x50] sm:$0xff] %v1775_v50  ;;  %v1776_v12 = vpack.c.bf16 %v1374_v1, %v1373_v8  ;;  %v1404_v19 = vmul.f32 %v2073_v36, %v3121_v10  ;;  %2094 = vpow2.f32 %v1087_v44 }
 0x290   :  { %v2077_v43 = vpop.eup %2076  ;;  %v1405_v62 = vmul.f32 %v2075_v6, %v3127_v41  ;;  %2096 = vpow2.f32 %v1089_v13 }
 0x291   :  { %v2079_v27 = vpop.eup %2078  ;;  %1618 = vst [vmem:[%s3319_s5 + $0x58] sm:$0xff] %v1776_v12  ;;  %v1791_v25 = vpack.c.bf16 %v1404_v19, %v1403_v51  ;;  %v1406_v59 = vmul.f32 %v2077_v43, %v3132_v22  ;;  %2098 = vpow2.f32 %v1091_v31 }
 0x292   :  { %v2081_v29 = vpop.eup %2080  ;;  %v1375_v10 = vmul.f32 %v2079_v27, %v3136_v55  ;;  %2100 = vpow2.f32 %v1093_v2 }
 0x293   :  { %v2083_v46 = vpop.eup %2082  ;;  %1633 = vst [vmem:[%s3319_s5 + $0xd0] sm:$0xff] %v1791_v25  ;;  %v1792_v41 = vpack.c.bf16 %v1406_v59, %v1405_v62  ;;  %v1376_v53 = vmul.f32 %v2081_v29, %v3142_v9  ;;  %2102 = vpow2.f32 %v1151_v18 }
 0x294   :  { %v2085_v14 = vpop.eup %2084  ;;  %v1377_v44 = vmul.f32 %v2083_v46, %v3147_v49  ;;  %2104 = vpow2.f32 %v1153_v35 }
 0x295   :  { %v2087_v22 = vpop.eup %2086  ;;  %1634 = vst [vmem:[%s3319_s5 + $0xd8] sm:$0xff] %v1792_v41  ;;  %v1777_v55 = vpack.c.bf16 %v1376_v53, %v1375_v10  ;;  %v1378_v39 = vmul.f32 %v2085_v14, %v3153_v57  ;;  %2106 = vpow2.f32 %v1155_v61 }
 0x296   :  { %v2089_v40 = vpop.eup %2088  ;;  %v1215_v63 = vadd.f32 1.0, %v2087_v22  ;;  %2108 = vpow2.f32 %v1157_v32 }
 0x297   :  { %v2091_v15 = vpop.eup %2090  ;;  %1619 = vst [vmem:[%s3319_s5 + $0x60] sm:$0xff] %v1777_v55  ;;  %v1778_v9 = vpack.c.bf16 %v1378_v39, %v1377_v44  ;;  %v1216_v49 = vadd.f32 1.0, %v2089_v40 }
 0x298   :  { %v2093_v0 = vpop.eup %2092  ;;  %2110 = vrcp.f32 %v1215_v63  ;;  %v1217_v38 = vadd.f32 1.0, %v2091_v15 }
 0x299   :  { %v2095_v45 = vpop.eup %2094  ;;  %1620 = vst [vmem:[%s3319_s5 + $0x68] sm:$0xff] %v1778_v9  ;;  %2112 = vrcp.f32 %v1216_v49  ;;  %v1218_v57 = vadd.f32 1.0, %v2093_v0 }
 0x29a   :  { %v2097_v48 = vpop.eup %2096  ;;  %2114 = vrcp.f32 %v1217_v38  ;;  %v1187_v13 = vadd.f32 1.0, %v2095_v45 }
 0x29b   :  { %v2099_v24 = vpop.eup %2098  ;;  %2116 = vrcp.f32 %v1218_v57  ;;  %v1188_v20 = vadd.f32 1.0, %v2097_v48 }
 0x29c   :  { %v2101_v58 = vpop.eup %2100  ;;  %2118 = vrcp.f32 %v1187_v13  ;;  %v1189_v60 = vadd.f32 1.0, %v2099_v24 }
 0x29d   :  { %v2103_v26 = vpop.eup %2102  ;;  %2120 = vrcp.f32 %v1188_v20  ;;  %v1190_v7 = vadd.f32 1.0, %v2101_v58 }
 0x29e   :  { %v2105_v17 = vpop.eup %2104  ;;  %2122 = vrcp.f32 %v1189_v60  ;;  %v1219_v30 = vadd.f32 1.0, %v2103_v26 }
 0x29f   :  { %v2107_v8 = vpop.eup %2106  ;;  %2124 = vrcp.f32 %v1190_v7  ;;  %v1220_v31 = vadd.f32 1.0, %v2105_v17 }
 0x2a0   :  { %v2109_v28 = vpop.eup %2108  ;;  %2126 = vrcp.f32 %v1219_v30  ;;  %v1221_v3 = vadd.f32 1.0, %v2107_v8 }
 0x2a1   :  { %2128 = vrcp.f32 %v1220_v31  ;;  %v1222_v50 = vadd.f32 1.0, %v2109_v28 }
 0x2a2   :  { %v2111_v1 = vpop.eup %2110  ;;  %2130 = vrcp.f32 %v1221_v3 }
 0x2a3   :  { %v2113_v11 = vpop.eup %2112  ;;  %v1407_v36 = vmul.f32 %v2111_v1, %v3184_v54  ;;  %2132 = vrcp.f32 %v1222_v50 }
 0x2a4   :  { %v2115_v51 = vpop.eup %2114  ;;  %v1408_v2 = vmul.f32 %v2113_v11, %v3188_v23 }
 0x2a5   :  { %v2117_v52 = vpop.eup %2116  ;;  %v1409_v6 = vmul.f32 %v2115_v51, %v3195_v56 }
 0x2a6   :  { %v2119_v12 = vpop.eup %2118  ;;  %v1793_v19 = vpack.c.bf16 %v1408_v2, %v1407_v36  ;;  %v1410_v18 = vmul.f32 %v2117_v52, %v3199_v5 }
 0x2a7   :  { %v2121_v43 = vpop.eup %2120  ;;  %v1379_v62 = vmul.f32 %v2119_v12, %v3206_v33 }
 0x2a8   :  { %v2123_v35 = vpop.eup %2122  ;;  %1635 = vst [vmem:[%s3319_s5 + $0xe0] sm:$0xff] %v1793_v19  ;;  %v1794_v54 = vpack.c.bf16 %v1410_v18, %v1409_v6  ;;  %v1380_v27 = vmul.f32 %v2121_v43, %v3214_v47 }
 0x2a9   :  { %v2125_v25 = vpop.eup %2124  ;;  %v1381_v23 = vmul.f32 %v2123_v35, %v3219_v34 }
 0x2aa   :  { %v2127_v59 = vpop.eup %2126  ;;  %1636 = vst [vmem:[%s3319_s5 + $0xe8] sm:$0xff] %v1794_v54  ;;  %v1779_v56 = vpack.c.bf16 %v1380_v27, %v1379_v62  ;;  %v1382_v5 = vmul.f32 %v2125_v25, %v3224_v21 }
 0x2ab   :  { %v2129_v33 = vpop.eup %2128  ;;  %v1411_v61 = vmul.f32 %v2127_v59, %v3230_v37 }
 0x2ac   :  { %v2131_v29 = vpop.eup %2130  ;;  %1621 = vst [vmem:[%s3319_s5 + $0x70] sm:$0xff] %v1779_v56  ;;  %v1780_v47 = vpack.c.bf16 %v1382_v5, %v1381_v23  ;;  %v1412_v10 = vmul.f32 %v2129_v33, %v3235_v4 }
 0x2ad   :  { %v2133_v34 = vpop.eup %2132  ;;  %v1413_v32 = vmul.f32 %v2131_v29, %v3240_v16 }
 0x2ae   :  { %1622 = vst [vmem:[%s3319_s5 + $0x78] sm:$0xff] %v1780_v47  ;;  %v1795_v46 = vpack.c.bf16 %v1412_v10, %v1411_v61  ;;  %v1414_v21 = vmul.f32 %v2133_v34, %v3246_v42 }
 0x2b0   :  { %1637 = vst [vmem:[%s3319_s5 + $0xf0] sm:$0xff] %v1795_v46  ;;  %v1796_v37 = vpack.c.bf16 %v1414_v21, %v1413_v32 }
 0x2b2   :  { %1638 = vst [vmem:[%s3319_s5 + $0xf8] sm:$0xff] %v1796_v37 }

</bundles_post_ra>
